<compile_context>
chip_gen: v6e
topology: v6e:2x2x1
jax: 0.10.0
libtpu: 0.0.40
codegen_flags: <defaults>
</compile_context>

<pallas_src>
import functools

import jax
import jax.numpy as jnp
from jax import lax
from jax.experimental import pallas as pl
from jax.experimental.pallas import tpu as pltpu


def _convx_layer_kernel(x_ref, w_ref, b_ref, mask_ref, o_ref, act_ref, *,
                        n_layers, K, Wp, HWp, M, Cpad, row_block, shift0):
    """One (image n, layer l) grid step of the fused stacked conv+ReLU head.

    x_ref   : (1, Mext, Cpad)       bf16 flat padded input (zero halo / margins / chan pad)
    w_ref   : (1, K, K, Cpad, Cpad) bf16 weights of layer l (streamed per grid step)
    b_ref   : (1, 1, Cpad)          f32 bias of layer l
    mask_ref: (HWp, 1)              f32; 1.0 at interior flat positions, 0.0 on pad ring
    o_ref   : (1, HWp, Cpad)        flat padded-grid output (written only at l == L-1)
    act_ref : (2, Mext, Cpad)       bf16 VMEM ping-pong activations (persist across l)
    """
    l = pl.program_id(1)
    adt = act_ref.dtype

    # Stage the input and zero the flat-shift margins once per image. Gating on
    # the layer axis is safe (it is "arbitrary" => never split across TensorCores);
    # gating on program_id(0) would NOT be safe under "parallel" megacore sharding.
    @pl.when(l == 0)
    def _stage():
        act_ref[0, :M, :] = jnp.zeros((M, Cpad), adt)
        act_ref[0, M + HWp:, :] = jnp.zeros((M, Cpad), adt)
        # x already carries zero margins from the wrapper, so slot 1's margins
        # become zero via this full copy. Even layers read slot 1, odd read slot 0.
        act_ref[1, :, :] = x_ref[0, :, :].astype(adt)

    is_last = l == n_layers - 1
    bias = b_ref[0]  # (1, Cpad) f32, hoisted out of the chunk loop

    def run_layer(read_slot):  # read_slot is a Python int -> fully static indexing
        write_slot = 1 - read_slot
        for c0 in range(0, HWp, row_block):
            csz = min(row_block, HWp - c0)
            # "same" conv = K*K shifted contiguous row-slices, each one MXU matmul,
            # value-accumulated in f32 and stored once per chunk.
            acc = jnp.zeros((csz, Cpad), jnp.float32)
            for dy in range(K):
                for dx in range(K):
                    off = shift0 + dy * Wp + dx + c0   # static per-tap flat shift
                    src = act_ref[read_slot, off:off + csz, :]
                    acc = acc + jnp.dot(src, w_ref[0, dy, dx],
                                        preferred_element_type=jnp.float32)
            out = jnp.maximum(acc + bias, 0.0)

            @pl.when(is_last)
            def _store_out():
                # Pad-ring rows hold row-wrapped garbage but the wrapper slices
                # them off, so no mask multiply is needed on the last layer.
                o_ref[0, c0:c0 + csz, :] = out.astype(o_ref.dtype)

            @pl.when(jnp.logical_not(is_last))
            def _store_act():
                # Mask zeroes the pad-ring rows so the next layer's halo is exact.
                masked = out * mask_ref[c0:c0 + csz, :]
                act_ref[write_slot, M + c0:M + c0 + csz, :] = masked.astype(adt)

    # Static ping-pong dispatch on layer parity (keeps all ref indices static).
    @pl.when(l % 2 == 0)
    def _even():
        run_layer(read_slot=1)

    @pl.when(l % 2 == 1)
    def _odd():
        run_layer(read_slot=0)


def _vmem_limit_bytes():
    """Per-generation VMEM cap instead of a hardcoded 32 MiB."""
    try:
        cap = int(pltpu.get_tpu_info().vmem_capacity_bytes)
    except Exception:
        cap = 128 * 1024 * 1024
    headroom = 16 * 1024 * 1024  # Mosaic-internal scratch / pipeline slack
    return int(max(32 * 1024 * 1024, min(cap - headroom, 100 * 1024 * 1024)))


def densepose_v1convx_forward(x_nchw, weights, biases):
    """Equivalent of DensePoseV1ConvXHead.forward (NCHW in, NCHW out).

    weights[i]: (K, K, Cin_i, Cout) HWIO ; biases[i]: (Cout,)
    """
    N, Cin, H, W = x_nchw.shape
    L = len(weights)
    K = weights[0].shape[0]
    assert K % 2 == 1, "pad = K//2 matches PyTorch 'same' only for odd kernels"
    Cout = weights[-1].shape[-1]

    pad = K // 2
    Hp, Wp = H + 2 * pad, W + 2 * pad
    HWp = Hp * Wp
    M0 = pad * Wp + pad                  # minimal flat-shift margin
    M = ((M0 + 15) // 16) * 16           # round up -> sublane-aligned bf16 act stores
    shift0 = M - M0
    Mext = HWp + 2 * M
    cmax = max([Cin] + [w.shape[-1] for w in weights])
    Cpad = 128 * pl.cdiv(cmax, 128)      # lane-dense channel padding
    # Row chunk size: keep the f32 value-accumulator around <=16 vregs, multiple of 16.
    row_block = int(max(16, min(HWp, (16384 // Cpad) // 16 * 16)))

    act_dtype = jnp.bfloat16             # bf16 MXU operands, f32 accumulate

    # ---- one-time layout prep (HBM passes) ----------------------------------
    # TODO(synk): accept NHWC in/out from the surrounding model to drop these
    # full-tensor transpose/pad passes.
    x = jnp.transpose(x_nchw, (0, 2, 3, 1))                              # NHWC
    x = jnp.pad(x, ((0, 0), (pad, pad), (pad, pad), (0, Cpad - Cin)))    # halo + chan pad
    x = x.reshape(N, HWp, Cpad)
    x = jnp.pad(x, ((0, 0), (M, M), (0, 0))).astype(act_dtype)           # flat-shift margins

    w_stack = jnp.stack([
        jnp.pad(w, ((0, 0), (0, 0),
                    (0, Cpad - w.shape[2]), (0, Cpad - w.shape[3])))
        for w in weights]).astype(act_dtype)                             # (L,K,K,Cpad,Cpad) bf16
    b_stack = jnp.stack([
        jnp.pad(b, (0, Cpad - b.shape[0])).reshape(1, Cpad)
        for b in biases]).astype(jnp.float32)                            # (L,1,Cpad) f32

    row = jnp.arange(Hp)
    col = jnp.arange(Wp)
    m2d = (((row >= pad) & (row < pad + H))[:, None]
           & ((col >= pad) & (col < pad + W))[None, :])
    mask = m2d.astype(jnp.float32).reshape(HWp, 1)                       # (HWp,1)

    kernel = functools.partial(
        _convx_layer_kernel, n_layers=L, K=K, Wp=Wp, HWp=HWp, M=M,
        Cpad=Cpad, row_block=row_block, shift0=shift0)

    out_flat = pl.pallas_call(
        kernel,
        out_shape=jax.ShapeDtypeStruct((N, HWp, Cpad), x_nchw.dtype),
        grid_spec=pltpu.PrefetchScalarGridSpec(
            num_scalar_prefetch=0,
            grid=(N, L),                                   # layer axis innermost
            in_specs=[
                pl.BlockSpec((1, Mext, Cpad), lambda n, l: (n, 0, 0)),
                pl.BlockSpec((1, K, K, Cpad, Cpad),
                             lambda n, l: (l, 0, 0, 0, 0)),  # stream weights per layer
                pl.BlockSpec((1, 1, Cpad), lambda n, l: (l, 0, 0)),
                pl.BlockSpec((HWp, 1), lambda n, l: (0, 0)),
            ],
            out_specs=pl.BlockSpec((1, HWp, Cpad), lambda n, l: (n, 0, 0)),
            scratch_shapes=[
                pltpu.VMEM((2, Mext, Cpad), act_dtype),      # ping-pong activations
            ],
        ),
        compiler_params=pltpu.CompilerParams(
            # TODO(synk): when N==1 on v7x, add a second "parallel" axis over HWp
            # row blocks (with an L*pad-row halo) so both TensorCores get work.
            # TODO(synk): for the tiny 32-channel head, block several images per
            # grid step to amortize per-step overhead.
            dimension_semantics=("parallel", "arbitrary"),
            vmem_limit_bytes=_vmem_limit_bytes(),
        ),
    )(x, w_stack, b_stack, mask)

    out = out_flat.reshape(N, Hp, Wp, Cpad)[:, pad:pad + H, pad:pad + W, :Cout]
    return jnp.transpose(out, (0, 3, 1, 2))                              # NHWC -> NCHW


def densepose_v1convx_reference(x_nchw, weights, biases):
    """Pure-JAX f32 reference (lax conv) for correctness checking."""
    x = jnp.transpose(x_nchw, (0, 2, 3, 1))
    for w, b in zip(weights, biases):
        x = lax.conv_general_dilated(
            x, w, window_strides=(1, 1), padding="SAME",
            dimension_numbers=("NHWC", "HWIO", "NHWC"),
            precision=lax.Precision.HIGHEST)
        x = jnp.maximum(x + b[None, None, None, :], 0.0)
    return jnp.transpose(x, (0, 3, 1, 2))


if __name__ == "__main__":
    # Small config consistent with the module:
    #   input_channels=4, CONV_HEAD_DIM=32, CONV_HEAD_KERNEL=3, NUM_STACKED_CONVS=2
    N, Cin, H, W = 2, 4, 16, 16
    hidden_dim, kernel_size, n_stacked_convs = 32, 3, 2

    key = jax.random.PRNGKey(0)
    keys = jax.random.split(key, 1 + 2 * n_stacked_convs)
    x_nchw = jax.random.normal(keys[0], (N, Cin, H, W), jnp.float32)

    # Deterministic synthetic parameters (module's __init__ defines the shapes).
    weights, biases = [], []
    c = Cin
    for i in range(n_stacked_convs):
        w = 0.1 * jax.random.normal(
            keys[1 + 2 * i], (kernel_size, kernel_size, c, hidden_dim),
            jnp.float32)
        b = 0.01 * jax.random.normal(
            keys[2 + 2 * i], (hidden_dim,), jnp.float32)
        weights.append(w)
        biases.append(b)
        c = hidden_dim

    fwd = jax.jit(densepose_v1convx_forward)
    out = fwd(x_nchw, weights, biases)
    out = jax.block_until_ready(out)

    ref = densepose_v1convx_reference(x_nchw, weights, biases)
    assert out.shape == (N, hidden_dim, H, W)
    # bf16 weights/activations (f32 accumulate) -> looser tolerance vs the
    # HIGHEST-precision f32 reference, as flagged in the perf review.
    assert jnp.allclose(out, ref, atol=5e-2, rtol=5e-2), "mismatch vs reference"
    print("KERNEL_OK")
</pallas_src>

<mosaic_0001>
module attributes {stable_mosaic.version = 11 : i64} {
  func.func @_convx_layer_kernel(%arg0: i32, %arg1: i32, %arg2: memref<1x388x128xbf16, #tpu.memory_space<vmem>>, %arg3: memref<1x3x3x128x128xbf16, #tpu.memory_space<vmem>>, %arg4: memref<1x1x128xf32, #tpu.memory_space<vmem>>, %arg5: memref<324x1xf32, #tpu.memory_space<vmem>>, %arg6: memref<1x324x128xf32, #tpu.memory_space<vmem>>, %arg7: memref<2x388x128xbf16, #tpu.memory_space<vmem>>) attributes {dimension_semantics = [#tpu.dimension_semantics<parallel>, #tpu.dimension_semantics<arbitrary>], iteration_bounds = array<i64: 2, 2>, scalar_prefetch = 0 : i64, scratch_operands = 1 : i64, tpu.core_type = #tpu.core_type<tc>, window_params = [{transform_indices = @transform_0, window_bounds = array<i64: 1, 388, 128>}, {transform_indices = @transform_1, window_bounds = array<i64: 1, 3, 3, 128, 128>}, {transform_indices = @transform_2, window_bounds = array<i64: 1, 1, 128>}, {pipeline_mode = #tpu.pipeline_mode<synchronous>, transform_indices = @transform_3, window_bounds = array<i64: 324, 1>}, {transform_indices = @transform_4, window_bounds = array<i64: 1, 324, 128>}]} {
    %c0_i32 = arith.constant 0 : i32
    %0 = arith.cmpi eq, %arg1, %c0_i32 : i32
    %1 = arith.extui %0 : i1 to i32
    %c0_i32_0 = arith.constant 0 : i32
    %2 = arith.cmpi ne, %1, %c0_i32_0 : i32
    scf.if %2 {
      %cst = arith.constant 0.000000e+00 : bf16
      %32 = vector.broadcast %cst : bf16 to vector<32x128xbf16>
      %c0_18 = arith.constant 0 : index
      %c0_19 = arith.constant 0 : index
      %c0_20 = arith.constant 0 : index
      %33 = vector.load %arg7[%c0_18, %c0_19, %c0_20] : memref<2x388x128xbf16, #tpu.memory_space<vmem>>, vector<1x32x128xbf16>
      %34 = vector.shape_cast %33 : vector<1x32x128xbf16> to vector<32x128xbf16>
      %35 = vector.shape_cast %32 : vector<32x128xbf16> to vector<1x32x128xbf16>
      tpu.vector_store %arg7[%c0_18, %c0_19, %c0_20], %35 {strides = array<i32>} : memref<2x388x128xbf16, #tpu.memory_space<vmem>>, vector<1x32x128xbf16>,
      %cst_21 = arith.constant 0.000000e+00 : bf16
      %36 = vector.broadcast %cst_21 : bf16 to vector<32x128xbf16>
      %c0_22 = arith.constant 0 : index
      %c356 = arith.constant 356 : index
      %c0_23 = arith.constant 0 : index
      %37 = vector.load %arg7[%c0_22, %c356, %c0_23] : memref<2x388x128xbf16, #tpu.memory_space<vmem>>, vector<1x32x128xbf16>
      %38 = vector.shape_cast %37 : vector<1x32x128xbf16> to vector<32x128xbf16>
      %39 = vector.shape_cast %36 : vector<32x128xbf16> to vector<1x32x128xbf16>
      tpu.vector_store %arg7[%c0_22, %c356, %c0_23], %39 {strides = array<i32>} : memref<2x388x128xbf16, #tpu.memory_space<vmem>>, vector<1x32x128xbf16>,
      %c0_24 = arith.constant 0 : index
      %c0_25 = arith.constant 0 : index
      %c0_26 = arith.constant 0 : index
      %40 = vector.load %arg2[%c0_24, %c0_25, %c0_26] : memref<1x388x128xbf16, #tpu.memory_space<vmem>>, vector<1x388x128xbf16>
      %41 = vector.shape_cast %40 : vector<1x388x128xbf16> to vector<388x128xbf16>
      %c1 = arith.constant 1 : index
      %c0_27 = arith.constant 0 : index
      %c0_28 = arith.constant 0 : index
      %42 = vector.load %arg7[%c1, %c0_27, %c0_28] : memref<2x388x128xbf16, #tpu.memory_space<vmem>>, vector<1x388x128xbf16>
      %43 = vector.shape_cast %42 : vector<1x388x128xbf16> to vector<388x128xbf16>
      %44 = vector.shape_cast %41 : vector<388x128xbf16> to vector<1x388x128xbf16>
      tpu.vector_store %arg7[%c1, %c0_27, %c0_28], %44 {strides = array<i32>} : memref<2x388x128xbf16, #tpu.memory_space<vmem>>, vector<1x388x128xbf16>,
    } else {
    }
    %c1_i32 = arith.constant 1 : i32
    %3 = arith.cmpi eq, %arg1, %c1_i32 : i32
    %c0 = arith.constant 0 : index
    %c0_1 = arith.constant 0 : index
    %c0_2 = arith.constant 0 : index
    %4 = vector.load %arg4[%c0, %c0_1, %c0_2] : memref<1x1x128xf32, #tpu.memory_space<vmem>>, vector<1x1x128xf32>
    %5 = vector.shape_cast %4 : vector<1x1x128xf32> to vector<1x128xf32>
    %c2_i32 = arith.constant 2 : i32
    %c0_i32_3 = arith.constant 0 : i32
    %6 = arith.cmpi eq, %c2_i32, %c0_i32_3 : i32
    %c1_i32_4 = arith.constant 1 : i32
    %7 = arith.select %6, %c1_i32_4, %c2_i32 : i32
    %8 = arith.remsi %arg1, %7 : i32
    %c0_i32_5 = arith.constant 0 : i32
    %9 = arith.cmpi ne, %8, %c0_i32_5 : i32
    %c0_i32_6 = arith.constant 0 : i32
    %10 = arith.cmpi slt, %8, %c0_i32_6 : i32
    %c0_i32_7 = arith.constant 0 : i32
    %11 = arith.cmpi slt, %7, %c0_i32_7 : i32
    %12 = arith.xori %10, %11 : i1
    %13 = arith.andi %12, %9 : i1
    %14 = arith.addi %8, %7 : i32
    %15 = arith.select %13, %14, %8 : i32
    %c0_i32_8 = arith.constant 0 : i32
    %16 = arith.cmpi eq, %15, %c0_i32_8 : i32
    %17 = arith.extui %16 : i1 to i32
    %c0_i32_9 = arith.constant 0 : i32
    %18 = arith.cmpi ne, %17, %c0_i32_9 : i32
    scf.if %18 {
      %cst = arith.constant 0.000000e+00 : f32
      %32 = vector.broadcast %cst : f32 to vector<128x128xf32>
      %c1 = arith.constant 1 : index
      %c13 = arith.constant 13 : index
      %c0_18 = arith.constant 0 : index
      %33 = vector.load %arg7[%c1, %c13, %c0_18] : memref<2x388x128xbf16, #tpu.memory_space<vmem>>, vector<1x128x128xbf16>
      %34 = vector.shape_cast %33 : vector<1x128x128xbf16> to vector<128x128xbf16>
      %c0_19 = arith.constant 0 : index
      %c0_20 = arith.constant 0 : index
      %c0_21 = arith.constant 0 : index
      %c0_22 = arith.constant 0 : index
      %c0_23 = arith.constant 0 : index
      %35 = vector.load %arg3[%c0_19, %c0_20, %c0_21, %c0_22, %c0_23] : memref<1x3x3x128x128xbf16, #tpu.memory_space<vmem>>, vector<1x1x1x128x128xbf16>
      %36 = vector.shape_cast %35 : vector<1x1x1x128x128xbf16> to vector<128x128xbf16>
      %cst_24 = arith.constant dense<0.000000e+00> : vector<128x128xf32>
      %37 = tpu.matmul %34, %36, %cst_24 {dimension_numbers = #tpu.dot_dimension_numbers<[1], [0], [0], [1], [0, 0, 1, 1], [], []>} : vector<128x128xbf16>, vector<128x128xbf16>, vector<128x128xf32> -> vector<128x128xf32>
      %38 = arith.addf %32, %37 : vector<128x128xf32>
      %c1_25 = arith.constant 1 : index
      %c14 = arith.constant 14 : index
      %c0_26 = arith.constant 0 : index
      %39 = vector.load %arg7[%c1_25, %c14, %c0_26] : memref<2x388x128xbf16, #tpu.memory_space<vmem>>, vector<1x128x128xbf16>
      %40 = vector.shape_cast %39 : vector<1x128x128xbf16> to vector<128x128xbf16>
      %c0_27 = arith.constant 0 : index
      %c0_28 = arith.constant 0 : index
      %c1_29 = arith.constant 1 : index
      %c0_30 = arith.constant 0 : index
      %c0_31 = arith.constant 0 : index
      %41 = vector.load %arg3[%c0_27, %c0_28, %c1_29, %c0_30, %c0_31] : memref<1x3x3x128x128xbf16, #tpu.memory_space<vmem>>, vector<1x1x1x128x128xbf16>
      %42 = vector.shape_cast %41 : vector<1x1x1x128x128xbf16> to vector<128x128xbf16>
      %cst_32 = arith.constant dense<0.000000e+00> : vector<128x128xf32>
      %43 = tpu.matmul %40, %42, %cst_32 {dimension_numbers = #tpu.dot_dimension_numbers<[1], [0], [0], [1], [0, 0, 1, 1], [], []>} : vector<128x128xbf16>, vector<128x128xbf16>, vector<128x128xf32> -> vector<128x128xf32>
      %44 = arith.addf %38, %43 : vector<128x128xf32>
      %c1_33 = arith.constant 1 : index
      %c15 = arith.constant 15 : index
      %c0_34 = arith.constant 0 : index
      %45 = vector.load %arg7[%c1_33, %c15, %c0_34] : memref<2x388x128xbf16, #tpu.memory_space<vmem>>, vector<1x128x128xbf16>
      %46 = vector.shape_cast %45 : vector<1x128x128xbf16> to vector<128x128xbf16>
      %c0_35 = arith.constant 0 : index
      %c0_36 = arith.constant 0 : index
      %c2 = arith.constant 2 : index
      %c0_37 = arith.constant 0 : index
      %c0_38 = arith.constant 0 : index
      %47 = vector.load %arg3[%c0_35, %c0_36, %c2, %c0_37, %c0_38] : memref<1x3x3x128x128xbf16, #tpu.memory_space<vmem>>, vector<1x1x1x128x128xbf16>
      %48 = vector.shape_cast %47 : vector<1x1x1x128x128xbf16> to vector<128x128xbf16>
      %cst_39 = arith.constant dense<0.000000e+00> : vector<128x128xf32>
      %49 = tpu.matmul %46, %48, %cst_39 {dimension_numbers = #tpu.dot_dimension_numbers<[1], [0], [0], [1], [0, 0, 1, 1], [], []>} : vector<128x128xbf16>, vector<128x128xbf16>, vector<128x128xf32> -> vector<128x128xf32>
      %50 = arith.addf %44, %49 : vector<128x128xf32>
      %c1_40 = arith.constant 1 : index
      %c31 = arith.constant 31 : index
      %c0_41 = arith.constant 0 : index
      %51 = vector.load %arg7[%c1_40, %c31, %c0_41] : memref<2x388x128xbf16, #tpu.memory_space<vmem>>, vector<1x128x128xbf16>
      %52 = vector.shape_cast %51 : vector<1x128x128xbf16> to vector<128x128xbf16>
      %c0_42 = arith.constant 0 : index
      %c1_43 = arith.constant 1 : index
      %c0_44 = arith.constant 0 : index
      %c0_45 = arith.constant 0 : index
      %c0_46 = arith.constant 0 : index
      %53 = vector.load %arg3[%c0_42, %c1_43, %c0_44, %c0_45, %c0_46] : memref<1x3x3x128x128xbf16, #tpu.memory_space<vmem>>, vector<1x1x1x128x128xbf16>
      %54 = vector.shape_cast %53 : vector<1x1x1x128x128xbf16> to vector<128x128xbf16>
      %cst_47 = arith.constant dense<0.000000e+00> : vector<128x128xf32>
      %55 = tpu.matmul %52, %54, %cst_47 {dimension_numbers = #tpu.dot_dimension_numbers<[1], [0], [0], [1], [0, 0, 1, 1], [], []>} : vector<128x128xbf16>, vector<128x128xbf16>, vector<128x128xf32> -> vector<128x128xf32>
      %56 = arith.addf %50, %55 : vector<128x128xf32>
      %c1_48 = arith.constant 1 : index
      %c32 = arith.constant 32 : index
      %c0_49 = arith.constant 0 : index
      %57 = vector.load %arg7[%c1_48, %c32, %c0_49] : memref<2x388x128xbf16, #tpu.memory_space<vmem>>, vector<1x128x128xbf16>
      %58 = vector.shape_cast %57 : vector<1x128x128xbf16> to vector<128x128xbf16>
      %c0_50 = arith.constant 0 : index
      %c1_51 = arith.constant 1 : index
      %c1_52 = arith.constant 1 : index
      %c0_53 = arith.constant 0 : index
      %c0_54 = arith.constant 0 : index
      %59 = vector.load %arg3[%c0_50, %c1_51, %c1_52, %c0_53, %c0_54] : memref<1x3x3x128x128xbf16, #tpu.memory_space<vmem>>, vector<1x1x1x128x128xbf16>
      %60 = vector.shape_cast %59 : vector<1x1x1x128x128xbf16> to vector<128x128xbf16>
      %cst_55 = arith.constant dense<0.000000e+00> : vector<128x128xf32>
      %61 = tpu.matmul %58, %60, %cst_55 {dimension_numbers = #tpu.dot_dimension_numbers<[1], [0], [0], [1], [0, 0, 1, 1], [], []>} : vector<128x128xbf16>, vector<128x128xbf16>, vector<128x128xf32> -> vector<128x128xf32>
      %62 = arith.addf %56, %61 : vector<128x128xf32>
      %c1_56 = arith.constant 1 : index
      %c33 = arith.constant 33 : index
      %c0_57 = arith.constant 0 : index
      %63 = vector.load %arg7[%c1_56, %c33, %c0_57] : memref<2x388x128xbf16, #tpu.memory_space<vmem>>, vector<1x128x128xbf16>
      %64 = vector.shape_cast %63 : vector<1x128x128xbf16> to vector<128x128xbf16>
      %c0_58 = arith.constant 0 : index
      %c1_59 = arith.constant 1 : index
      %c2_60 = arith.constant 2 : index
      %c0_61 = arith.constant 0 : index
      %c0_62 = arith.constant 0 : index
      %65 = vector.load %arg3[%c0_58, %c1_59, %c2_60, %c0_61, %c0_62] : memref<1x3x3x128x128xbf16, #tpu.memory_space<vmem>>, vector<1x1x1x128x128xbf16>
      %66 = vector.shape_cast %65 : vector<1x1x1x128x128xbf16> to vector<128x128xbf16>
      %cst_63 = arith.constant dense<0.000000e+00> : vector<128x128xf32>
      %67 = tpu.matmul %64, %66, %cst_63 {dimension_numbers = #tpu.dot_dimension_numbers<[1], [0], [0], [1], [0, 0, 1, 1], [], []>} : vector<128x128xbf16>, vector<128x128xbf16>, vector<128x128xf32> -> vector<128x128xf32>
      %68 = arith.addf %62, %67 : vector<128x128xf32>
      %c1_64 = arith.constant 1 : index
      %c49 = arith.constant 49 : index
      %c0_65 = arith.constant 0 : index
      %69 = vector.load %arg7[%c1_64, %c49, %c0_65] : memref<2x388x128xbf16, #tpu.memory_space<vmem>>, vector<1x128x128xbf16>
      %70 = vector.shape_cast %69 : vector<1x128x128xbf16> to vector<128x128xbf16>
      %c0_66 = arith.constant 0 : index
      %c2_67 = arith.constant 2 : index
      %c0_68 = arith.constant 0 : index
      %c0_69 = arith.constant 0 : index
      %c0_70 = arith.constant 0 : index
      %71 = vector.load %arg3[%c0_66, %c2_67, %c0_68, %c0_69, %c0_70] : memref<1x3x3x128x128xbf16, #tpu.memory_space<vmem>>, vector<1x1x1x128x128xbf16>
      %72 = vector.shape_cast %71 : vector<1x1x1x128x128xbf16> to vector<128x128xbf16>
      %cst_71 = arith.constant dense<0.000000e+00> : vector<128x128xf32>
      %73 = tpu.matmul %70, %72, %cst_71 {dimension_numbers = #tpu.dot_dimension_numbers<[1], [0], [0], [1], [0, 0, 1, 1], [], []>} : vector<128x128xbf16>, vector<128x128xbf16>, vector<128x128xf32> -> vector<128x128xf32>
      %74 = arith.addf %68, %73 : vector<128x128xf32>
      %c1_72 = arith.constant 1 : index
      %c50 = arith.constant 50 : index
      %c0_73 = arith.constant 0 : index
      %75 = vector.load %arg7[%c1_72, %c50, %c0_73] : memref<2x388x128xbf16, #tpu.memory_space<vmem>>, vector<1x128x128xbf16>
      %76 = vector.shape_cast %75 : vector<1x128x128xbf16> to vector<128x128xbf16>
      %c0_74 = arith.constant 0 : index
      %c2_75 = arith.constant 2 : index
      %c1_76 = arith.constant 1 : index
      %c0_77 = arith.constant 0 : index
      %c0_78 = arith.constant 0 : index
      %77 = vector.load %arg3[%c0_74, %c2_75, %c1_76, %c0_77, %c0_78] : memref<1x3x3x128x128xbf16, #tpu.memory_space<vmem>>, vector<1x1x1x128x128xbf16>
      %78 = vector.shape_cast %77 : vector<1x1x1x128x128xbf16> to vector<128x128xbf16>
      %cst_79 = arith.constant dense<0.000000e+00> : vector<128x128xf32>
      %79 = tpu.matmul %76, %78, %cst_79 {dimension_numbers = #tpu.dot_dimension_numbers<[1], [0], [0], [1], [0, 0, 1, 1], [], []>} : vector<128x128xbf16>, vector<128x128xbf16>, vector<128x128xf32> -> vector<128x128xf32>
      %80 = arith.addf %74, %79 : vector<128x128xf32>
      %c1_80 = arith.constant 1 : index
      %c51 = arith.constant 51 : index
      %c0_81 = arith.constant 0 : index
      %81 = vector.load %arg7[%c1_80, %c51, %c0_81] : memref<2x388x128xbf16, #tpu.memory_space<vmem>>, vector<1x128x128xbf16>
      %82 = vector.shape_cast %81 : vector<1x128x128xbf16> to vector<128x128xbf16>
      %c0_82 = arith.constant 0 : index
      %c2_83 = arith.constant 2 : index
      %c2_84 = arith.constant 2 : index
      %c0_85 = arith.constant 0 : index
      %c0_86 = arith.constant 0 : index
      %83 = vector.load %arg3[%c0_82, %c2_83, %c2_84, %c0_85, %c0_86] : memref<1x3x3x128x128xbf16, #tpu.memory_space<vmem>>, vector<1x1x1x128x128xbf16>
      %84 = vector.shape_cast %83 : vector<1x1x1x128x128xbf16> to vector<128x128xbf16>
      %cst_87 = arith.constant dense<0.000000e+00> : vector<128x128xf32>
      %85 = tpu.matmul %82, %84, %cst_87 {dimension_numbers = #tpu.dot_dimension_numbers<[1], [0], [0], [1], [0, 0, 1, 1], [], []>} : vector<128x128xbf16>, vector<128x128xbf16>, vector<128x128xf32> -> vector<128x128xf32>
      %86 = arith.addf %80, %85 : vector<128x128xf32>
      %87 = vector.broadcast %5 : vector<1x128xf32> to vector<128x128xf32>
      %88 = arith.addf %86, %87 : vector<128x128xf32>
      %cst_88 = arith.constant 0.000000e+00 : f32
      %89 = vector.broadcast %cst_88 : f32 to vector<128x128xf32>
      %90 = arith.maximumf %88, %89 : vector<128x128xf32>
      %91 = arith.extui %3 : i1 to i32
      %c0_i32_89 = arith.constant 0 : i32
      %92 = arith.cmpi ne, %91, %c0_i32_89 : i32
      scf.if %92 {
        %c0_245 = arith.constant 0 : index
        %c0_246 = arith.constant 0 : index
        %c0_247 = arith.constant 0 : index
        %224 = vector.load %arg6[%c0_245, %c0_246, %c0_247] : memref<1x324x128xf32, #tpu.memory_space<vmem>>, vector<1x128x128xf32>
        %225 = vector.shape_cast %224 : vector<1x128x128xf32> to vector<128x128xf32>
        %226 = vector.shape_cast %90 : vector<128x128xf32> to vector<1x128x128xf32>
        tpu.vector_store %arg6[%c0_245, %c0_246, %c0_247], %226 {strides = array<i32>} : memref<1x324x128xf32, #tpu.memory_space<vmem>>, vector<1x128x128xf32>,
      } else {
      }
      %true = arith.constant true
      %93 = arith.xori %3, %true : i1
      %94 = arith.extui %93 : i1 to i32
      %c0_i32_90 = arith.constant 0 : i32
      %95 = arith.cmpi ne, %94, %c0_i32_90 : i32
      scf.if %95 {
        %c0_245 = arith.constant 0 : index
        %c0_246 = arith.constant 0 : index
        %224 = vector.load %arg5[%c0_245, %c0_246] : memref<324x1xf32, #tpu.memory_space<vmem>>, vector<128x1xf32>
        %225 = vector.broadcast %224 : vector<128x1xf32> to vector<128x128xf32>
        %226 = arith.mulf %90, %225 : vector<128x128xf32>
        %227 = arith.truncf %226 : vector<128x128xf32> to vector<128x128xbf16>
        %c0_247 = arith.constant 0 : index
        %c32_248 = arith.constant 32 : index
        %c0_249 = arith.constant 0 : index
        %228 = vector.load %arg7[%c0_247, %c32_248, %c0_249] : memref<2x388x128xbf16, #tpu.memory_space<vmem>>, vector<1x128x128xbf16>
        %229 = vector.shape_cast %228 : vector<1x128x128xbf16> to vector<128x128xbf16>
        %230 = vector.shape_cast %227 : vector<128x128xbf16> to vector<1x128x128xbf16>
        tpu.vector_store %arg7[%c0_247, %c32_248, %c0_249], %230 {strides = array<i32>} : memref<2x388x128xbf16, #tpu.memory_space<vmem>>, vector<1x128x128xbf16>,
      } else {
      }
      %cst_91 = arith.constant 0.000000e+00 : f32
      %96 = vector.broadcast %cst_91 : f32 to vector<128x128xf32>
      %c1_92 = arith.constant 1 : index
      %c141 = arith.constant 141 : index
      %c0_93 = arith.constant 0 : index
      %97 = vector.load %arg7[%c1_92, %c141, %c0_93] : memref<2x388x128xbf16, #tpu.memory_space<vmem>>, vector<1x128x128xbf16>
      %98 = vector.shape_cast %97 : vector<1x128x128xbf16> to vector<128x128xbf16>
      %c0_94 = arith.constant 0 : index
      %c0_95 = arith.constant 0 : index
      %c0_96 = arith.constant 0 : index
      %c0_97 = arith.constant 0 : index
      %c0_98 = arith.constant 0 : index
      %99 = vector.load %arg3[%c0_94, %c0_95, %c0_96, %c0_97, %c0_98] : memref<1x3x3x128x128xbf16, #tpu.memory_space<vmem>>, vector<1x1x1x128x128xbf16>
      %100 = vector.shape_cast %99 : vector<1x1x1x128x128xbf16> to vector<128x128xbf16>
      %cst_99 = arith.constant dense<0.000000e+00> : vector<128x128xf32>
      %101 = tpu.matmul %98, %100, %cst_99 {dimension_numbers = #tpu.dot_dimension_numbers<[1], [0], [0], [1], [0, 0, 1, 1], [], []>} : vector<128x128xbf16>, vector<128x128xbf16>, vector<128x128xf32> -> vector<128x128xf32>
      %102 = arith.addf %96, %101 : vector<128x128xf32>
      %c1_100 = arith.constant 1 : index
      %c142 = arith.constant 142 : index
      %c0_101 = arith.constant 0 : index
      %103 = vector.load %arg7[%c1_100, %c142, %c0_101] : memref<2x388x128xbf16, #tpu.memory_space<vmem>>, vector<1x128x128xbf16>
      %104 = vector.shape_cast %103 : vector<1x128x128xbf16> to vector<128x128xbf16>
      %c0_102 = arith.constant 0 : index
      %c0_103 = arith.constant 0 : index
      %c1_104 = arith.constant 1 : index
      %c0_105 = arith.constant 0 : index
      %c0_106 = arith.constant 0 : index
      %105 = vector.load %arg3[%c0_102, %c0_103, %c1_104, %c0_105, %c0_106] : memref<1x3x3x128x128xbf16, #tpu.memory_space<vmem>>, vector<1x1x1x128x128xbf16>
      %106 = vector.shape_cast %105 : vector<1x1x1x128x128xbf16> to vector<128x128xbf16>
      %cst_107 = arith.constant dense<0.000000e+00> : vector<128x128xf32>
      %107 = tpu.matmul %104, %106, %cst_107 {dimension_numbers = #tpu.dot_dimension_numbers<[1], [0], [0], [1], [0, 0, 1, 1], [], []>} : vector<128x128xbf16>, vector<128x128xbf16>, vector<128x128xf32> -> vector<128x128xf32>
      %108 = arith.addf %102, %107 : vector<128x128xf32>
      %c1_108 = arith.constant 1 : index
      %c143 = arith.constant 143 : index
      %c0_109 = arith.constant 0 : index
      %109 = vector.load %arg7[%c1_108, %c143, %c0_109] : memref<2x388x128xbf16, #tpu.memory_space<vmem>>, vector<1x128x128xbf16>
      %110 = vector.shape_cast %109 : vector<1x128x128xbf16> to vector<128x128xbf16>
      %c0_110 = arith.constant 0 : index
      %c0_111 = arith.constant 0 : index
      %c2_112 = arith.constant 2 : index
      %c0_113 = arith.constant 0 : index
      %c0_114 = arith.constant 0 : index
      %111 = vector.load %arg3[%c0_110, %c0_111, %c2_112, %c0_113, %c0_114] : memref<1x3x3x128x128xbf16, #tpu.memory_space<vmem>>, vector<1x1x1x128x128xbf16>
      %112 = vector.shape_cast %111 : vector<1x1x1x128x128xbf16> to vector<128x128xbf16>
      %cst_115 = arith.constant dense<0.000000e+00> : vector<128x128xf32>
      %113 = tpu.matmul %110, %112, %cst_115 {dimension_numbers = #tpu.dot_dimension_numbers<[1], [0], [0], [1], [0, 0, 1, 1], [], []>} : vector<128x128xbf16>, vector<128x128xbf16>, vector<128x128xf32> -> vector<128x128xf32>
      %114 = arith.addf %108, %113 : vector<128x128xf32>
      %c1_116 = arith.constant 1 : index
      %c159 = arith.constant 159 : index
      %c0_117 = arith.constant 0 : index
      %115 = vector.load %arg7[%c1_116, %c159, %c0_117] : memref<2x388x128xbf16, #tpu.memory_space<vmem>>, vector<1x128x128xbf16>
      %116 = vector.shape_cast %115 : vector<1x128x128xbf16> to vector<128x128xbf16>
      %c0_118 = arith.constant 0 : index
      %c1_119 = arith.constant 1 : index
      %c0_120 = arith.constant 0 : index
      %c0_121 = arith.constant 0 : index
      %c0_122 = arith.constant 0 : index
      %117 = vector.load %arg3[%c0_118, %c1_119, %c0_120, %c0_121, %c0_122] : memref<1x3x3x128x128xbf16, #tpu.memory_space<vmem>>, vector<1x1x1x128x128xbf16>
      %118 = vector.shape_cast %117 : vector<1x1x1x128x128xbf16> to vector<128x128xbf16>
      %cst_123 = arith.constant dense<0.000000e+00> : vector<128x128xf32>
      %119 = tpu.matmul %116, %118, %cst_123 {dimension_numbers = #tpu.dot_dimension_numbers<[1], [0], [0], [1], [0, 0, 1, 1], [], []>} : vector<128x128xbf16>, vector<128x128xbf16>, vector<128x128xf32> -> vector<128x128xf32>
      %120 = arith.addf %114, %119 : vector<128x128xf32>
      %c1_124 = arith.constant 1 : index
      %c160 = arith.constant 160 : index
      %c0_125 = arith.constant 0 : index
      %121 = vector.load %arg7[%c1_124, %c160, %c0_125] : memref<2x388x128xbf16, #tpu.memory_space<vmem>>, vector<1x128x128xbf16>
      %122 = vector.shape_cast %121 : vector<1x128x128xbf16> to vector<128x128xbf16>
      %c0_126 = arith.constant 0 : index
      %c1_127 = arith.constant 1 : index
      %c1_128 = arith.constant 1 : index
      %c0_129 = arith.constant 0 : index
      %c0_130 = arith.constant 0 : index
      %123 = vector.load %arg3[%c0_126, %c1_127, %c1_128, %c0_129, %c0_130] : memref<1x3x3x128x128xbf16, #tpu.memory_space<vmem>>, vector<1x1x1x128x128xbf16>
      %124 = vector.shape_cast %123 : vector<1x1x1x128x128xbf16> to vector<128x128xbf16>
      %cst_131 = arith.constant dense<0.000000e+00> : vector<128x128xf32>
      %125 = tpu.matmul %122, %124, %cst_131 {dimension_numbers = #tpu.dot_dimension_numbers<[1], [0], [0], [1], [0, 0, 1, 1], [], []>} : vector<128x128xbf16>, vector<128x128xbf16>, vector<128x128xf32> -> vector<128x128xf32>
      %126 = arith.addf %120, %125 : vector<128x128xf32>
      %c1_132 = arith.constant 1 : index
      %c161 = arith.constant 161 : index
      %c0_133 = arith.constant 0 : index
      %127 = vector.load %arg7[%c1_132, %c161, %c0_133] : memref<2x388x128xbf16, #tpu.memory_space<vmem>>, vector<1x128x128xbf16>
      %128 = vector.shape_cast %127 : vector<1x128x128xbf16> to vector<128x128xbf16>
      %c0_134 = arith.constant 0 : index
      %c1_135 = arith.constant 1 : index
      %c2_136 = arith.constant 2 : index
      %c0_137 = arith.constant 0 : index
      %c0_138 = arith.constant 0 : index
      %129 = vector.load %arg3[%c0_134, %c1_135, %c2_136, %c0_137, %c0_138] : memref<1x3x3x128x128xbf16, #tpu.memory_space<vmem>>, vector<1x1x1x128x128xbf16>
      %130 = vector.shape_cast %129 : vector<1x1x1x128x128xbf16> to vector<128x128xbf16>
      %cst_139 = arith.constant dense<0.000000e+00> : vector<128x128xf32>
      %131 = tpu.matmul %128, %130, %cst_139 {dimension_numbers = #tpu.dot_dimension_numbers<[1], [0], [0], [1], [0, 0, 1, 1], [], []>} : vector<128x128xbf16>, vector<128x128xbf16>, vector<128x128xf32> -> vector<128x128xf32>
      %132 = arith.addf %126, %131 : vector<128x128xf32>
      %c1_140 = arith.constant 1 : index
      %c177 = arith.constant 177 : index
      %c0_141 = arith.constant 0 : index
      %133 = vector.load %arg7[%c1_140, %c177, %c0_141] : memref<2x388x128xbf16, #tpu.memory_space<vmem>>, vector<1x128x128xbf16>
      %134 = vector.shape_cast %133 : vector<1x128x128xbf16> to vector<128x128xbf16>
      %c0_142 = arith.constant 0 : index
      %c2_143 = arith.constant 2 : index
      %c0_144 = arith.constant 0 : index
      %c0_145 = arith.constant 0 : index
      %c0_146 = arith.constant 0 : index
      %135 = vector.load %arg3[%c0_142, %c2_143, %c0_144, %c0_145, %c0_146] : memref<1x3x3x128x128xbf16, #tpu.memory_space<vmem>>, vector<1x1x1x128x128xbf16>
      %136 = vector.shape_cast %135 : vector<1x1x1x128x128xbf16> to vector<128x128xbf16>
      %cst_147 = arith.constant dense<0.000000e+00> : vector<128x128xf32>
      %137 = tpu.matmul %134, %136, %cst_147 {dimension_numbers = #tpu.dot_dimension_numbers<[1], [0], [0], [1], [0, 0, 1, 1], [], []>} : vector<128x128xbf16>, vector<128x128xbf16>, vector<128x128xf32> -> vector<128x128xf32>
      %138 = arith.addf %132, %137 : vector<128x128xf32>
      %c1_148 = arith.constant 1 : index
      %c178 = arith.constant 178 : index
      %c0_149 = arith.constant 0 : index
      %139 = vector.load %arg7[%c1_148, %c178, %c0_149] : memref<2x388x128xbf16, #tpu.memory_space<vmem>>, vector<1x128x128xbf16>
      %140 = vector.shape_cast %139 : vector<1x128x128xbf16> to vector<128x128xbf16>
      %c0_150 = arith.constant 0 : index
      %c2_151 = arith.constant 2 : index
      %c1_152 = arith.constant 1 : index
      %c0_153 = arith.constant 0 : index
      %c0_154 = arith.constant 0 : index
      %141 = vector.load %arg3[%c0_150, %c2_151, %c1_152, %c0_153, %c0_154] : memref<1x3x3x128x128xbf16, #tpu.memory_space<vmem>>, vector<1x1x1x128x128xbf16>
      %142 = vector.shape_cast %141 : vector<1x1x1x128x128xbf16> to vector<128x128xbf16>
      %cst_155 = arith.constant dense<0.000000e+00> : vector<128x128xf32>
      %143 = tpu.matmul %140, %142, %cst_155 {dimension_numbers = #tpu.dot_dimension_numbers<[1], [0], [0], [1], [0, 0, 1, 1], [], []>} : vector<128x128xbf16>, vector<128x128xbf16>, vector<128x128xf32> -> vector<128x128xf32>
      %144 = arith.addf %138, %143 : vector<128x128xf32>
      %c1_156 = arith.constant 1 : index
      %c179 = arith.constant 179 : index
      %c0_157 = arith.constant 0 : index
      %145 = vector.load %arg7[%c1_156, %c179, %c0_157] : memref<2x388x128xbf16, #tpu.memory_space<vmem>>, vector<1x128x128xbf16>
      %146 = vector.shape_cast %145 : vector<1x128x128xbf16> to vector<128x128xbf16>
      %c0_158 = arith.constant 0 : index
      %c2_159 = arith.constant 2 : index
      %c2_160 = arith.constant 2 : index
      %c0_161 = arith.constant 0 : index
      %c0_162 = arith.constant 0 : index
      %147 = vector.load %arg3[%c0_158, %c2_159, %c2_160, %c0_161, %c0_162] : memref<1x3x3x128x128xbf16, #tpu.memory_space<vmem>>, vector<1x1x1x128x128xbf16>
      %148 = vector.shape_cast %147 : vector<1x1x1x128x128xbf16> to vector<128x128xbf16>
      %cst_163 = arith.constant dense<0.000000e+00> : vector<128x128xf32>
      %149 = tpu.matmul %146, %148, %cst_163 {dimension_numbers = #tpu.dot_dimension_numbers<[1], [0], [0], [1], [0, 0, 1, 1], [], []>} : vector<128x128xbf16>, vector<128x128xbf16>, vector<128x128xf32> -> vector<128x128xf32>
      %150 = arith.addf %144, %149 : vector<128x128xf32>
      %151 = vector.broadcast %5 : vector<1x128xf32> to vector<128x128xf32>
      %152 = arith.addf %150, %151 : vector<128x128xf32>
      %cst_164 = arith.constant 0.000000e+00 : f32
      %153 = vector.broadcast %cst_164 : f32 to vector<128x128xf32>
      %154 = arith.maximumf %152, %153 : vector<128x128xf32>
      %155 = arith.extui %3 : i1 to i32
      %c0_i32_165 = arith.constant 0 : i32
      %156 = arith.cmpi ne, %155, %c0_i32_165 : i32
      scf.if %156 {
        %c0_245 = arith.constant 0 : index
        %c128 = arith.constant 128 : index
        %c0_246 = arith.constant 0 : index
        %224 = vector.load %arg6[%c0_245, %c128, %c0_246] : memref<1x324x128xf32, #tpu.memory_space<vmem>>, vector<1x128x128xf32>
        %225 = vector.shape_cast %224 : vector<1x128x128xf32> to vector<128x128xf32>
        %226 = vector.shape_cast %154 : vector<128x128xf32> to vector<1x128x128xf32>
        tpu.vector_store %arg6[%c0_245, %c128, %c0_246], %226 {strides = array<i32>} : memref<1x324x128xf32, #tpu.memory_space<vmem>>, vector<1x128x128xf32>,
      } else {
      }
      %true_166 = arith.constant true
      %157 = arith.xori %3, %true_166 : i1
      %158 = arith.extui %157 : i1 to i32
      %c0_i32_167 = arith.constant 0 : i32
      %159 = arith.cmpi ne, %158, %c0_i32_167 : i32
      scf.if %159 {
        %c128 = arith.constant 128 : index
        %c0_245 = arith.constant 0 : index
        %224 = vector.load %arg5[%c128, %c0_245] : memref<324x1xf32, #tpu.memory_space<vmem>>, vector<128x1xf32>
        %225 = vector.broadcast %224 : vector<128x1xf32> to vector<128x128xf32>
        %226 = arith.mulf %154, %225 : vector<128x128xf32>
        %227 = arith.truncf %226 : vector<128x128xf32> to vector<128x128xbf16>
        %c0_246 = arith.constant 0 : index
        %c160_247 = arith.constant 160 : index
        %c0_248 = arith.constant 0 : index
        %228 = vector.load %arg7[%c0_246, %c160_247, %c0_248] : memref<2x388x128xbf16, #tpu.memory_space<vmem>>, vector<1x128x128xbf16>
        %229 = vector.shape_cast %228 : vector<1x128x128xbf16> to vector<128x128xbf16>
        %230 = vector.shape_cast %227 : vector<128x128xbf16> to vector<1x128x128xbf16>
        tpu.vector_store %arg7[%c0_246, %c160_247, %c0_248], %230 {strides = array<i32>} : memref<2x388x128xbf16, #tpu.memory_space<vmem>>, vector<1x128x128xbf16>,
      } else {
      }
      %cst_168 = arith.constant 0.000000e+00 : f32
      %160 = vector.broadcast %cst_168 : f32 to vector<68x128xf32>
      %c1_169 = arith.constant 1 : index
      %c269 = arith.constant 269 : index
      %c0_170 = arith.constant 0 : index
      %161 = vector.load %arg7[%c1_169, %c269, %c0_170] : memref<2x388x128xbf16, #tpu.memory_space<vmem>>, vector<1x68x128xbf16>
      %162 = vector.shape_cast %161 : vector<1x68x128xbf16> to vector<68x128xbf16>
      %c0_171 = arith.constant 0 : index
      %c0_172 = arith.constant 0 : index
      %c0_173 = arith.constant 0 : index
      %c0_174 = arith.constant 0 : index
      %c0_175 = arith.constant 0 : index
      %163 = vector.load %arg3[%c0_171, %c0_172, %c0_173, %c0_174, %c0_175] : memref<1x3x3x128x128xbf16, #tpu.memory_space<vmem>>, vector<1x1x1x128x128xbf16>
      %164 = vector.shape_cast %163 : vector<1x1x1x128x128xbf16> to vector<128x128xbf16>
      %cst_176 = arith.constant dense<0.000000e+00> : vector<68x128xf32>
      %165 = tpu.matmul %162, %164, %cst_176 {dimension_numbers = #tpu.dot_dimension_numbers<[1], [0], [0], [1], [0, 0, 1, 1], [], []>} : vector<68x128xbf16>, vector<128x128xbf16>, vector<68x128xf32> -> vector<68x128xf32>
      %166 = arith.addf %160, %165 : vector<68x128xf32>
      %c1_177 = arith.constant 1 : index
      %c270 = arith.constant 270 : index
      %c0_178 = arith.constant 0 : index
      %167 = vector.load %arg7[%c1_177, %c270, %c0_178] : memref<2x388x128xbf16, #tpu.memory_space<vmem>>, vector<1x68x128xbf16>
      %168 = vector.shape_cast %167 : vector<1x68x128xbf16> to vector<68x128xbf16>
      %c0_179 = arith.constant 0 : index
      %c0_180 = arith.constant 0 : index
      %c1_181 = arith.constant 1 : index
      %c0_182 = arith.constant 0 : index
      %c0_183 = arith.constant 0 : index
      %169 = vector.load %arg3[%c0_179, %c0_180, %c1_181, %c0_182, %c0_183] : memref<1x3x3x128x128xbf16, #tpu.memory_space<vmem>>, vector<1x1x1x128x128xbf16>
      %170 = vector.shape_cast %169 : vector<1x1x1x128x128xbf16> to vector<128x128xbf16>
      %cst_184 = arith.constant dense<0.000000e+00> : vector<68x128xf32>
      %171 = tpu.matmul %168, %170, %cst_184 {dimension_numbers = #tpu.dot_dimension_numbers<[1], [0], [0], [1], [0, 0, 1, 1], [], []>} : vector<68x128xbf16>, vector<128x128xbf16>, vector<68x128xf32> -> vector<68x128xf32>
      %172 = arith.addf %166, %171 : vector<68x128xf32>
      %c1_185 = arith.constant 1 : index
      %c271 = arith.constant 271 : index
      %c0_186 = arith.constant 0 : index
      %173 = vector.load %arg7[%c1_185, %c271, %c0_186] : memref<2x388x128xbf16, #tpu.memory_space<vmem>>, vector<1x68x128xbf16>
      %174 = vector.shape_cast %173 : vector<1x68x128xbf16> to vector<68x128xbf16>
      %c0_187 = arith.constant 0 : index
      %c0_188 = arith.constant 0 : index
      %c2_189 = arith.constant 2 : index
      %c0_190 = arith.constant 0 : index
      %c0_191 = arith.constant 0 : index
      %175 = vector.load %arg3[%c0_187, %c0_188, %c2_189, %c0_190, %c0_191] : memref<1x3x3x128x128xbf16, #tpu.memory_space<vmem>>, vector<1x1x1x128x128xbf16>
      %176 = vector.shape_cast %175 : vector<1x1x1x128x128xbf16> to vector<128x128xbf16>
      %cst_192 = arith.constant dense<0.000000e+00> : vector<68x128xf32>
      %177 = tpu.matmul %174, %176, %cst_192 {dimension_numbers = #tpu.dot_dimension_numbers<[1], [0], [0], [1], [0, 0, 1, 1], [], []>} : vector<68x128xbf16>, vector<128x128xbf16>, vector<68x128xf32> -> vector<68x128xf32>
      %178 = arith.addf %172, %177 : vector<68x128xf32>
      %c1_193 = arith.constant 1 : index
      %c287 = arith.constant 287 : index
      %c0_194 = arith.constant 0 : index
      %179 = vector.load %arg7[%c1_193, %c287, %c0_194] : memref<2x388x128xbf16, #tpu.memory_space<vmem>>, vector<1x68x128xbf16>
      %180 = vector.shape_cast %179 : vector<1x68x128xbf16> to vector<68x128xbf16>
      %c0_195 = arith.constant 0 : index
      %c1_196 = arith.constant 1 : index
      %c0_197 = arith.constant 0 : index
      %c0_198 = arith.constant 0 : index
      %c0_199 = arith.constant 0 : index
      %181 = vector.load %arg3[%c0_195, %c1_196, %c0_197, %c0_198, %c0_199] : memref<1x3x3x128x128xbf16, #tpu.memory_space<vmem>>, vector<1x1x1x128x128xbf16>
      %182 = vector.shape_cast %181 : vector<1x1x1x128x128xbf16> to vector<128x128xbf16>
      %cst_200 = arith.constant dense<0.000000e+00> : vector<68x128xf32>
      %183 = tpu.matmul %180, %182, %cst_200 {dimension_numbers = #tpu.dot_dimension_numbers<[1], [0], [0], [1], [0, 0, 1, 1], [], []>} : vector<68x128xbf16>, vector<128x128xbf16>, vector<68x128xf32> -> vector<68x128xf32>
      %184 = arith.addf %178, %183 : vector<68x128xf32>
      %c1_201 = arith.constant 1 : index
      %c288 = arith.constant 288 : index
      %c0_202 = arith.constant 0 : index
      %185 = vector.load %arg7[%c1_201, %c288, %c0_202] : memref<2x388x128xbf16, #tpu.memory_space<vmem>>, vector<1x68x128xbf16>
      %186 = vector.shape_cast %185 : vector<1x68x128xbf16> to vector<68x128xbf16>
      %c0_203 = arith.constant 0 : index
      %c1_204 = arith.constant 1 : index
      %c1_205 = arith.constant 1 : index
      %c0_206 = arith.constant 0 : index
      %c0_207 = arith.constant 0 : index
      %187 = vector.load %arg3[%c0_203, %c1_204, %c1_205, %c0_206, %c0_207] : memref<1x3x3x128x128xbf16, #tpu.memory_space<vmem>>, vector<1x1x1x128x128xbf16>
      %188 = vector.shape_cast %187 : vector<1x1x1x128x128xbf16> to vector<128x128xbf16>
      %cst_208 = arith.constant dense<0.000000e+00> : vector<68x128xf32>
      %189 = tpu.matmul %186, %188, %cst_208 {dimension_numbers = #tpu.dot_dimension_numbers<[1], [0], [0], [1], [0, 0, 1, 1], [], []>} : vector<68x128xbf16>, vector<128x128xbf16>, vector<68x128xf32> -> vector<68x128xf32>
      %190 = arith.addf %184, %189 : vector<68x128xf32>
      %c1_209 = arith.constant 1 : index
      %c289 = arith.constant 289 : index
      %c0_210 = arith.constant 0 : index
      %191 = vector.load %arg7[%c1_209, %c289, %c0_210] : memref<2x388x128xbf16, #tpu.memory_space<vmem>>, vector<1x68x128xbf16>
      %192 = vector.shape_cast %191 : vector<1x68x128xbf16> to vector<68x128xbf16>
      %c0_211 = arith.constant 0 : index
      %c1_212 = arith.constant 1 : index
      %c2_213 = arith.constant 2 : index
      %c0_214 = arith.constant 0 : index
      %c0_215 = arith.constant 0 : index
      %193 = vector.load %arg3[%c0_211, %c1_212, %c2_213, %c0_214, %c0_215] : memref<1x3x3x128x128xbf16, #tpu.memory_space<vmem>>, vector<1x1x1x128x128xbf16>
      %194 = vector.shape_cast %193 : vector<1x1x1x128x128xbf16> to vector<128x128xbf16>
      %cst_216 = arith.constant dense<0.000000e+00> : vector<68x128xf32>
      %195 = tpu.matmul %192, %194, %cst_216 {dimension_numbers = #tpu.dot_dimension_numbers<[1], [0], [0], [1], [0, 0, 1, 1], [], []>} : vector<68x128xbf16>, vector<128x128xbf16>, vector<68x128xf32> -> vector<68x128xf32>
      %196 = arith.addf %190, %195 : vector<68x128xf32>
      %c1_217 = arith.constant 1 : index
      %c305 = arith.constant 305 : index
      %c0_218 = arith.constant 0 : index
      %197 = vector.load %arg7[%c1_217, %c305, %c0_218] : memref<2x388x128xbf16, #tpu.memory_space<vmem>>, vector<1x68x128xbf16>
      %198 = vector.shape_cast %197 : vector<1x68x128xbf16> to vector<68x128xbf16>
      %c0_219 = arith.constant 0 : index
      %c2_220 = arith.constant 2 : index
      %c0_221 = arith.constant 0 : index
      %c0_222 = arith.constant 0 : index
      %c0_223 = arith.constant 0 : index
      %199 = vector.load %arg3[%c0_219, %c2_220, %c0_221, %c0_222, %c0_223] : memref<1x3x3x128x128xbf16, #tpu.memory_space<vmem>>, vector<1x1x1x128x128xbf16>
      %200 = vector.shape_cast %199 : vector<1x1x1x128x128xbf16> to vector<128x128xbf16>
      %cst_224 = arith.constant dense<0.000000e+00> : vector<68x128xf32>
      %201 = tpu.matmul %198, %200, %cst_224 {dimension_numbers = #tpu.dot_dimension_numbers<[1], [0], [0], [1], [0, 0, 1, 1], [], []>} : vector<68x128xbf16>, vector<128x128xbf16>, vector<68x128xf32> -> vector<68x128xf32>
      %202 = arith.addf %196, %201 : vector<68x128xf32>
      %c1_225 = arith.constant 1 : index
      %c306 = arith.constant 306 : index
      %c0_226 = arith.constant 0 : index
      %203 = vector.load %arg7[%c1_225, %c306, %c0_226] : memref<2x388x128xbf16, #tpu.memory_space<vmem>>, vector<1x68x128xbf16>
      %204 = vector.shape_cast %203 : vector<1x68x128xbf16> to vector<68x128xbf16>
      %c0_227 = arith.constant 0 : index
      %c2_228 = arith.constant 2 : index
      %c1_229 = arith.constant 1 : index
      %c0_230 = arith.constant 0 : index
      %c0_231 = arith.constant 0 : index
      %205 = vector.load %arg3[%c0_227, %c2_228, %c1_229, %c0_230, %c0_231] : memref<1x3x3x128x128xbf16, #tpu.memory_space<vmem>>, vector<1x1x1x128x128xbf16>
      %206 = vector.shape_cast %205 : vector<1x1x1x128x128xbf16> to vector<128x128xbf16>
      %cst_232 = arith.constant dense<0.000000e+00> : vector<68x128xf32>
      %207 = tpu.matmul %204, %206, %cst_232 {dimension_numbers = #tpu.dot_dimension_numbers<[1], [0], [0], [1], [0, 0, 1, 1], [], []>} : vector<68x128xbf16>, vector<128x128xbf16>, vector<68x128xf32> -> vector<68x128xf32>
      %208 = arith.addf %202, %207 : vector<68x128xf32>
      %c1_233 = arith.constant 1 : index
      %c307 = arith.constant 307 : index
      %c0_234 = arith.constant 0 : index
      %209 = vector.load %arg7[%c1_233, %c307, %c0_234] : memref<2x388x128xbf16, #tpu.memory_space<vmem>>, vector<1x68x128xbf16>
      %210 = vector.shape_cast %209 : vector<1x68x128xbf16> to vector<68x128xbf16>
      %c0_235 = arith.constant 0 : index
      %c2_236 = arith.constant 2 : index
      %c2_237 = arith.constant 2 : index
      %c0_238 = arith.constant 0 : index
      %c0_239 = arith.constant 0 : index
      %211 = vector.load %arg3[%c0_235, %c2_236, %c2_237, %c0_238, %c0_239] : memref<1x3x3x128x128xbf16, #tpu.memory_space<vmem>>, vector<1x1x1x128x128xbf16>
      %212 = vector.shape_cast %211 : vector<1x1x1x128x128xbf16> to vector<128x128xbf16>
      %cst_240 = arith.constant dense<0.000000e+00> : vector<68x128xf32>
      %213 = tpu.matmul %210, %212, %cst_240 {dimension_numbers = #tpu.dot_dimension_numbers<[1], [0], [0], [1], [0, 0, 1, 1], [], []>} : vector<68x128xbf16>, vector<128x128xbf16>, vector<68x128xf32> -> vector<68x128xf32>
      %214 = arith.addf %208, %213 : vector<68x128xf32>
      %215 = vector.broadcast %5 : vector<1x128xf32> to vector<68x128xf32>
      %216 = arith.addf %214, %215 : vector<68x128xf32>
      %cst_241 = arith.constant 0.000000e+00 : f32
      %217 = vector.broadcast %cst_241 : f32 to vector<68x128xf32>
      %218 = arith.maximumf %216, %217 : vector<68x128xf32>
      %219 = arith.extui %3 : i1 to i32
      %c0_i32_242 = arith.constant 0 : i32
      %220 = arith.cmpi ne, %219, %c0_i32_242 : i32
      scf.if %220 {
        %c0_245 = arith.constant 0 : index
        %c256 = arith.constant 256 : index
        %c0_246 = arith.constant 0 : index
        %224 = vector.load %arg6[%c0_245, %c256, %c0_246] : memref<1x324x128xf32, #tpu.memory_space<vmem>>, vector<1x68x128xf32>
        %225 = vector.shape_cast %224 : vector<1x68x128xf32> to vector<68x128xf32>
        %226 = vector.shape_cast %218 : vector<68x128xf32> to vector<1x68x128xf32>
        tpu.vector_store %arg6[%c0_245, %c256, %c0_246], %226 {strides = array<i32>} : memref<1x324x128xf32, #tpu.memory_space<vmem>>, vector<1x68x128xf32>,
      } else {
      }
      %true_243 = arith.constant true
      %221 = arith.xori %3, %true_243 : i1
      %222 = arith.extui %221 : i1 to i32
      %c0_i32_244 = arith.constant 0 : i32
      %223 = arith.cmpi ne, %222, %c0_i32_244 : i32
      scf.if %223 {
        %c256 = arith.constant 256 : index
        %c0_245 = arith.constant 0 : index
        %224 = vector.load %arg5[%c256, %c0_245] : memref<324x1xf32, #tpu.memory_space<vmem>>, vector<68x1xf32>
        %225 = vector.broadcast %224 : vector<68x1xf32> to vector<68x128xf32>
        %226 = arith.mulf %218, %225 : vector<68x128xf32>
        %227 = arith.truncf %226 : vector<68x128xf32> to vector<68x128xbf16>
        %c0_246 = arith.constant 0 : index
        %c288_247 = arith.constant 288 : index
        %c0_248 = arith.constant 0 : index
        %228 = vector.load %arg7[%c0_246, %c288_247, %c0_248] : memref<2x388x128xbf16, #tpu.memory_space<vmem>>, vector<1x68x128xbf16>
        %229 = vector.shape_cast %228 : vector<1x68x128xbf16> to vector<68x128xbf16>
        %230 = vector.shape_cast %227 : vector<68x128xbf16> to vector<1x68x128xbf16>
        tpu.vector_store %arg7[%c0_246, %c288_247, %c0_248], %230 {strides = array<i32>} : memref<2x388x128xbf16, #tpu.memory_space<vmem>>, vector<1x68x128xbf16>,
      } else {
      }
    } else {
    }
    %c2_i32_10 = arith.constant 2 : i32
    %c0_i32_11 = arith.constant 0 : i32
    %19 = arith.cmpi eq, %c2_i32_10, %c0_i32_11 : i32
    %c1_i32_12 = arith.constant 1 : i32
    %20 = arith.select %19, %c1_i32_12, %c2_i32_10 : i32
    %21 = arith.remsi %arg1, %20 : i32
    %c0_i32_13 = arith.constant 0 : i32
    %22 = arith.cmpi ne, %21, %c0_i32_13 : i32
    %c0_i32_14 = arith.constant 0 : i32
    %23 = arith.cmpi slt, %21, %c0_i32_14 : i32
    %c0_i32_15 = arith.constant 0 : i32
    %24 = arith.cmpi slt, %20, %c0_i32_15 : i32
    %25 = arith.xori %23, %24 : i1
    %26 = arith.andi %25, %22 : i1
    %27 = arith.addi %21, %20 : i32
    %28 = arith.select %26, %27, %21 : i32
    %c1_i32_16 = arith.constant 1 : i32
    %29 = arith.cmpi eq, %28, %c1_i32_16 : i32
    %30 = arith.extui %29 : i1 to i32
    %c0_i32_17 = arith.constant 0 : i32
    %31 = arith.cmpi ne, %30, %c0_i32_17 : i32
    scf.if %31 {
      %cst = arith.constant 0.000000e+00 : f32
      %32 = vector.broadcast %cst : f32 to vector<128x128xf32>
      %c0_18 = arith.constant 0 : index
      %c13 = arith.constant 13 : index
      %c0_19 = arith.constant 0 : index
      %33 = vector.load %arg7[%c0_18, %c13, %c0_19] : memref<2x388x128xbf16, #tpu.memory_space<vmem>>, vector<1x128x128xbf16>
      %34 = vector.shape_cast %33 : vector<1x128x128xbf16> to vector<128x128xbf16>
      %c0_20 = arith.constant 0 : index
      %c0_21 = arith.constant 0 : index
      %c0_22 = arith.constant 0 : index
      %c0_23 = arith.constant 0 : index
      %c0_24 = arith.constant 0 : index
      %35 = vector.load %arg3[%c0_20, %c0_21, %c0_22, %c0_23, %c0_24] : memref<1x3x3x128x128xbf16, #tpu.memory_space<vmem>>, vector<1x1x1x128x128xbf16>
      %36 = vector.shape_cast %35 : vector<1x1x1x128x128xbf16> to vector<128x128xbf16>
      %cst_25 = arith.constant dense<0.000000e+00> : vector<128x128xf32>
      %37 = tpu.matmul %34, %36, %cst_25 {dimension_numbers = #tpu.dot_dimension_numbers<[1], [0], [0], [1], [0, 0, 1, 1], [], []>} : vector<128x128xbf16>, vector<128x128xbf16>, vector<128x128xf32> -> vector<128x128xf32>
      %38 = arith.addf %32, %37 : vector<128x128xf32>
      %c0_26 = arith.constant 0 : index
      %c14 = arith.constant 14 : index
      %c0_27 = arith.constant 0 : index
      %39 = vector.load %arg7[%c0_26, %c14, %c0_27] : memref<2x388x128xbf16, #tpu.memory_space<vmem>>, vector<1x128x128xbf16>
      %40 = vector.shape_cast %39 : vector<1x128x128xbf16> to vector<128x128xbf16>
      %c0_28 = arith.constant 0 : index
      %c0_29 = arith.constant 0 : index
      %c1 = arith.constant 1 : index
      %c0_30 = arith.constant 0 : index
      %c0_31 = arith.constant 0 : index
      %41 = vector.load %arg3[%c0_28, %c0_29, %c1, %c0_30, %c0_31] : memref<1x3x3x128x128xbf16, #tpu.memory_space<vmem>>, vector<1x1x1x128x128xbf16>
      %42 = vector.shape_cast %41 : vector<1x1x1x128x128xbf16> to vector<128x128xbf16>
      %cst_32 = arith.constant dense<0.000000e+00> : vector<128x128xf32>
      %43 = tpu.matmul %40, %42, %cst_32 {dimension_numbers = #tpu.dot_dimension_numbers<[1], [0], [0], [1], [0, 0, 1, 1], [], []>} : vector<128x128xbf16>, vector<128x128xbf16>, vector<128x128xf32> -> vector<128x128xf32>
      %44 = arith.addf %38, %43 : vector<128x128xf32>
      %c0_33 = arith.constant 0 : index
      %c15 = arith.constant 15 : index
      %c0_34 = arith.constant 0 : index
      %45 = vector.load %arg7[%c0_33, %c15, %c0_34] : memref<2x388x128xbf16, #tpu.memory_space<vmem>>, vector<1x128x128xbf16>
      %46 = vector.shape_cast %45 : vector<1x128x128xbf16> to vector<128x128xbf16>
      %c0_35 = arith.constant 0 : index
      %c0_36 = arith.constant 0 : index
      %c2 = arith.constant 2 : index
      %c0_37 = arith.constant 0 : index
      %c0_38 = arith.constant 0 : index
      %47 = vector.load %arg3[%c0_35, %c0_36, %c2, %c0_37, %c0_38] : memref<1x3x3x128x128xbf16, #tpu.memory_space<vmem>>, vector<1x1x1x128x128xbf16>
      %48 = vector.shape_cast %47 : vector<1x1x1x128x128xbf16> to vector<128x128xbf16>
      %cst_39 = arith.constant dense<0.000000e+00> : vector<128x128xf32>
      %49 = tpu.matmul %46, %48, %cst_39 {dimension_numbers = #tpu.dot_dimension_numbers<[1], [0], [0], [1], [0, 0, 1, 1], [], []>} : vector<128x128xbf16>, vector<128x128xbf16>, vector<128x128xf32> -> vector<128x128xf32>
      %50 = arith.addf %44, %49 : vector<128x128xf32>
      %c0_40 = arith.constant 0 : index
      %c31 = arith.constant 31 : index
      %c0_41 = arith.constant 0 : index
      %51 = vector.load %arg7[%c0_40, %c31, %c0_41] : memref<2x388x128xbf16, #tpu.memory_space<vmem>>, vector<1x128x128xbf16>
      %52 = vector.shape_cast %51 : vector<1x128x128xbf16> to vector<128x128xbf16>
      %c0_42 = arith.constant 0 : index
      %c1_43 = arith.constant 1 : index
      %c0_44 = arith.constant 0 : index
      %c0_45 = arith.constant 0 : index
      %c0_46 = arith.constant 0 : index
      %53 = vector.load %arg3[%c0_42, %c1_43, %c0_44, %c0_45, %c0_46] : memref<1x3x3x128x128xbf16, #tpu.memory_space<vmem>>, vector<1x1x1x128x128xbf16>
      %54 = vector.shape_cast %53 : vector<1x1x1x128x128xbf16> to vector<128x128xbf16>
      %cst_47 = arith.constant dense<0.000000e+00> : vector<128x128xf32>
      %55 = tpu.matmul %52, %54, %cst_47 {dimension_numbers = #tpu.dot_dimension_numbers<[1], [0], [0], [1], [0, 0, 1, 1], [], []>} : vector<128x128xbf16>, vector<128x128xbf16>, vector<128x128xf32> -> vector<128x128xf32>
      %56 = arith.addf %50, %55 : vector<128x128xf32>
      %c0_48 = arith.constant 0 : index
      %c32 = arith.constant 32 : index
      %c0_49 = arith.constant 0 : index
      %57 = vector.load %arg7[%c0_48, %c32, %c0_49] : memref<2x388x128xbf16, #tpu.memory_space<vmem>>, vector<1x128x128xbf16>
      %58 = vector.shape_cast %57 : vector<1x128x128xbf16> to vector<128x128xbf16>
      %c0_50 = arith.constant 0 : index
      %c1_51 = arith.constant 1 : index
      %c1_52 = arith.constant 1 : index
      %c0_53 = arith.constant 0 : index
      %c0_54 = arith.constant 0 : index
      %59 = vector.load %arg3[%c0_50, %c1_51, %c1_52, %c0_53, %c0_54] : memref<1x3x3x128x128xbf16, #tpu.memory_space<vmem>>, vector<1x1x1x128x128xbf16>
      %60 = vector.shape_cast %59 : vector<1x1x1x128x128xbf16> to vector<128x128xbf16>
      %cst_55 = arith.constant dense<0.000000e+00> : vector<128x128xf32>
      %61 = tpu.matmul %58, %60, %cst_55 {dimension_numbers = #tpu.dot_dimension_numbers<[1], [0], [0], [1], [0, 0, 1, 1], [], []>} : vector<128x128xbf16>, vector<128x128xbf16>, vector<128x128xf32> -> vector<128x128xf32>
      %62 = arith.addf %56, %61 : vector<128x128xf32>
      %c0_56 = arith.constant 0 : index
      %c33 = arith.constant 33 : index
      %c0_57 = arith.constant 0 : index
      %63 = vector.load %arg7[%c0_56, %c33, %c0_57] : memref<2x388x128xbf16, #tpu.memory_space<vmem>>, vector<1x128x128xbf16>
      %64 = vector.shape_cast %63 : vector<1x128x128xbf16> to vector<128x128xbf16>
      %c0_58 = arith.constant 0 : index
      %c1_59 = arith.constant 1 : index
      %c2_60 = arith.constant 2 : index
      %c0_61 = arith.constant 0 : index
      %c0_62 = arith.constant 0 : index
      %65 = vector.load %arg3[%c0_58, %c1_59, %c2_60, %c0_61, %c0_62] : memref<1x3x3x128x128xbf16, #tpu.memory_space<vmem>>, vector<1x1x1x128x128xbf16>
      %66 = vector.shape_cast %65 : vector<1x1x1x128x128xbf16> to vector<128x128xbf16>
      %cst_63 = arith.constant dense<0.000000e+00> : vector<128x128xf32>
      %67 = tpu.matmul %64, %66, %cst_63 {dimension_numbers = #tpu.dot_dimension_numbers<[1], [0], [0], [1], [0, 0, 1, 1], [], []>} : vector<128x128xbf16>, vector<128x128xbf16>, vector<128x128xf32> -> vector<128x128xf32>
      %68 = arith.addf %62, %67 : vector<128x128xf32>
      %c0_64 = arith.constant 0 : index
      %c49 = arith.constant 49 : index
      %c0_65 = arith.constant 0 : index
      %69 = vector.load %arg7[%c0_64, %c49, %c0_65] : memref<2x388x128xbf16, #tpu.memory_space<vmem>>, vector<1x128x128xbf16>
      %70 = vector.shape_cast %69 : vector<1x128x128xbf16> to vector<128x128xbf16>
      %c0_66 = arith.constant 0 : index
      %c2_67 = arith.constant 2 : index
      %c0_68 = arith.constant 0 : index
      %c0_69 = arith.constant 0 : index
      %c0_70 = arith.constant 0 : index
      %71 = vector.load %arg3[%c0_66, %c2_67, %c0_68, %c0_69, %c0_70] : memref<1x3x3x128x128xbf16, #tpu.memory_space<vmem>>, vector<1x1x1x128x128xbf16>
      %72 = vector.shape_cast %71 : vector<1x1x1x128x128xbf16> to vector<128x128xbf16>
      %cst_71 = arith.constant dense<0.000000e+00> : vector<128x128xf32>
      %73 = tpu.matmul %70, %72, %cst_71 {dimension_numbers = #tpu.dot_dimension_numbers<[1], [0], [0], [1], [0, 0, 1, 1], [], []>} : vector<128x128xbf16>, vector<128x128xbf16>, vector<128x128xf32> -> vector<128x128xf32>
      %74 = arith.addf %68, %73 : vector<128x128xf32>
      %c0_72 = arith.constant 0 : index
      %c50 = arith.constant 50 : index
      %c0_73 = arith.constant 0 : index
      %75 = vector.load %arg7[%c0_72, %c50, %c0_73] : memref<2x388x128xbf16, #tpu.memory_space<vmem>>, vector<1x128x128xbf16>
      %76 = vector.shape_cast %75 : vector<1x128x128xbf16> to vector<128x128xbf16>
      %c0_74 = arith.constant 0 : index
      %c2_75 = arith.constant 2 : index
      %c1_76 = arith.constant 1 : index
      %c0_77 = arith.constant 0 : index
      %c0_78 = arith.constant 0 : index
      %77 = vector.load %arg3[%c0_74, %c2_75, %c1_76, %c0_77, %c0_78] : memref<1x3x3x128x128xbf16, #tpu.memory_space<vmem>>, vector<1x1x1x128x128xbf16>
      %78 = vector.shape_cast %77 : vector<1x1x1x128x128xbf16> to vector<128x128xbf16>
      %cst_79 = arith.constant dense<0.000000e+00> : vector<128x128xf32>
      %79 = tpu.matmul %76, %78, %cst_79 {dimension_numbers = #tpu.dot_dimension_numbers<[1], [0], [0], [1], [0, 0, 1, 1], [], []>} : vector<128x128xbf16>, vector<128x128xbf16>, vector<128x128xf32> -> vector<128x128xf32>
      %80 = arith.addf %74, %79 : vector<128x128xf32>
      %c0_80 = arith.constant 0 : index
      %c51 = arith.constant 51 : index
      %c0_81 = arith.constant 0 : index
      %81 = vector.load %arg7[%c0_80, %c51, %c0_81] : memref<2x388x128xbf16, #tpu.memory_space<vmem>>, vector<1x128x128xbf16>
      %82 = vector.shape_cast %81 : vector<1x128x128xbf16> to vector<128x128xbf16>
      %c0_82 = arith.constant 0 : index
      %c2_83 = arith.constant 2 : index
      %c2_84 = arith.constant 2 : index
      %c0_85 = arith.constant 0 : index
      %c0_86 = arith.constant 0 : index
      %83 = vector.load %arg3[%c0_82, %c2_83, %c2_84, %c0_85, %c0_86] : memref<1x3x3x128x128xbf16, #tpu.memory_space<vmem>>, vector<1x1x1x128x128xbf16>
      %84 = vector.shape_cast %83 : vector<1x1x1x128x128xbf16> to vector<128x128xbf16>
      %cst_87 = arith.constant dense<0.000000e+00> : vector<128x128xf32>
      %85 = tpu.matmul %82, %84, %cst_87 {dimension_numbers = #tpu.dot_dimension_numbers<[1], [0], [0], [1], [0, 0, 1, 1], [], []>} : vector<128x128xbf16>, vector<128x128xbf16>, vector<128x128xf32> -> vector<128x128xf32>
      %86 = arith.addf %80, %85 : vector<128x128xf32>
      %87 = vector.broadcast %5 : vector<1x128xf32> to vector<128x128xf32>
      %88 = arith.addf %86, %87 : vector<128x128xf32>
      %cst_88 = arith.constant 0.000000e+00 : f32
      %89 = vector.broadcast %cst_88 : f32 to vector<128x128xf32>
      %90 = arith.maximumf %88, %89 : vector<128x128xf32>
      %91 = arith.extui %3 : i1 to i32
      %c0_i32_89 = arith.constant 0 : i32
      %92 = arith.cmpi ne, %91, %c0_i32_89 : i32
      scf.if %92 {
        %c0_245 = arith.constant 0 : index
        %c0_246 = arith.constant 0 : index
        %c0_247 = arith.constant 0 : index
        %224 = vector.load %arg6[%c0_245, %c0_246, %c0_247] : memref<1x324x128xf32, #tpu.memory_space<vmem>>, vector<1x128x128xf32>
        %225 = vector.shape_cast %224 : vector<1x128x128xf32> to vector<128x128xf32>
        %226 = vector.shape_cast %90 : vector<128x128xf32> to vector<1x128x128xf32>
        tpu.vector_store %arg6[%c0_245, %c0_246, %c0_247], %226 {strides = array<i32>} : memref<1x324x128xf32, #tpu.memory_space<vmem>>, vector<1x128x128xf32>,
      } else {
      }
      %true = arith.constant true
      %93 = arith.xori %3, %true : i1
      %94 = arith.extui %93 : i1 to i32
      %c0_i32_90 = arith.constant 0 : i32
      %95 = arith.cmpi ne, %94, %c0_i32_90 : i32
      scf.if %95 {
        %c0_245 = arith.constant 0 : index
        %c0_246 = arith.constant 0 : index
        %224 = vector.load %arg5[%c0_245, %c0_246] : memref<324x1xf32, #tpu.memory_space<vmem>>, vector<128x1xf32>
        %225 = vector.broadcast %224 : vector<128x1xf32> to vector<128x128xf32>
        %226 = arith.mulf %90, %225 : vector<128x128xf32>
        %227 = arith.truncf %226 : vector<128x128xf32> to vector<128x128xbf16>
        %c1_247 = arith.constant 1 : index
        %c32_248 = arith.constant 32 : index
        %c0_249 = arith.constant 0 : index
        %228 = vector.load %arg7[%c1_247, %c32_248, %c0_249] : memref<2x388x128xbf16, #tpu.memory_space<vmem>>, vector<1x128x128xbf16>
        %229 = vector.shape_cast %228 : vector<1x128x128xbf16> to vector<128x128xbf16>
        %230 = vector.shape_cast %227 : vector<128x128xbf16> to vector<1x128x128xbf16>
        tpu.vector_store %arg7[%c1_247, %c32_248, %c0_249], %230 {strides = array<i32>} : memref<2x388x128xbf16, #tpu.memory_space<vmem>>, vector<1x128x128xbf16>,
      } else {
      }
      %cst_91 = arith.constant 0.000000e+00 : f32
      %96 = vector.broadcast %cst_91 : f32 to vector<128x128xf32>
      %c0_92 = arith.constant 0 : index
      %c141 = arith.constant 141 : index
      %c0_93 = arith.constant 0 : index
      %97 = vector.load %arg7[%c0_92, %c141, %c0_93] : memref<2x388x128xbf16, #tpu.memory_space<vmem>>, vector<1x128x128xbf16>
      %98 = vector.shape_cast %97 : vector<1x128x128xbf16> to vector<128x128xbf16>
      %c0_94 = arith.constant 0 : index
      %c0_95 = arith.constant 0 : index
      %c0_96 = arith.constant 0 : index
      %c0_97 = arith.constant 0 : index
      %c0_98 = arith.constant 0 : index
      %99 = vector.load %arg3[%c0_94, %c0_95, %c0_96, %c0_97, %c0_98] : memref<1x3x3x128x128xbf16, #tpu.memory_space<vmem>>, vector<1x1x1x128x128xbf16>
      %100 = vector.shape_cast %99 : vector<1x1x1x128x128xbf16> to vector<128x128xbf16>
      %cst_99 = arith.constant dense<0.000000e+00> : vector<128x128xf32>
      %101 = tpu.matmul %98, %100, %cst_99 {dimension_numbers = #tpu.dot_dimension_numbers<[1], [0], [0], [1], [0, 0, 1, 1], [], []>} : vector<128x128xbf16>, vector<128x128xbf16>, vector<128x128xf32> -> vector<128x128xf32>
      %102 = arith.addf %96, %101 : vector<128x128xf32>
      %c0_100 = arith.constant 0 : index
      %c142 = arith.constant 142 : index
      %c0_101 = arith.constant 0 : index
      %103 = vector.load %arg7[%c0_100, %c142, %c0_101] : memref<2x388x128xbf16, #tpu.memory_space<vmem>>, vector<1x128x128xbf16>
      %104 = vector.shape_cast %103 : vector<1x128x128xbf16> to vector<128x128xbf16>
      %c0_102 = arith.constant 0 : index
      %c0_103 = arith.constant 0 : index
      %c1_104 = arith.constant 1 : index
      %c0_105 = arith.constant 0 : index
      %c0_106 = arith.constant 0 : index
      %105 = vector.load %arg3[%c0_102, %c0_103, %c1_104, %c0_105, %c0_106] : memref<1x3x3x128x128xbf16, #tpu.memory_space<vmem>>, vector<1x1x1x128x128xbf16>
      %106 = vector.shape_cast %105 : vector<1x1x1x128x128xbf16> to vector<128x128xbf16>
      %cst_107 = arith.constant dense<0.000000e+00> : vector<128x128xf32>
      %107 = tpu.matmul %104, %106, %cst_107 {dimension_numbers = #tpu.dot_dimension_numbers<[1], [0], [0], [1], [0, 0, 1, 1], [], []>} : vector<128x128xbf16>, vector<128x128xbf16>, vector<128x128xf32> -> vector<128x128xf32>
      %108 = arith.addf %102, %107 : vector<128x128xf32>
      %c0_108 = arith.constant 0 : index
      %c143 = arith.constant 143 : index
      %c0_109 = arith.constant 0 : index
      %109 = vector.load %arg7[%c0_108, %c143, %c0_109] : memref<2x388x128xbf16, #tpu.memory_space<vmem>>, vector<1x128x128xbf16>
      %110 = vector.shape_cast %109 : vector<1x128x128xbf16> to vector<128x128xbf16>
      %c0_110 = arith.constant 0 : index
      %c0_111 = arith.constant 0 : index
      %c2_112 = arith.constant 2 : index
      %c0_113 = arith.constant 0 : index
      %c0_114 = arith.constant 0 : index
      %111 = vector.load %arg3[%c0_110, %c0_111, %c2_112, %c0_113, %c0_114] : memref<1x3x3x128x128xbf16, #tpu.memory_space<vmem>>, vector<1x1x1x128x128xbf16>
      %112 = vector.shape_cast %111 : vector<1x1x1x128x128xbf16> to vector<128x128xbf16>
      %cst_115 = arith.constant dense<0.000000e+00> : vector<128x128xf32>
      %113 = tpu.matmul %110, %112, %cst_115 {dimension_numbers = #tpu.dot_dimension_numbers<[1], [0], [0], [1], [0, 0, 1, 1], [], []>} : vector<128x128xbf16>, vector<128x128xbf16>, vector<128x128xf32> -> vector<128x128xf32>
      %114 = arith.addf %108, %113 : vector<128x128xf32>
      %c0_116 = arith.constant 0 : index
      %c159 = arith.constant 159 : index
      %c0_117 = arith.constant 0 : index
      %115 = vector.load %arg7[%c0_116, %c159, %c0_117] : memref<2x388x128xbf16, #tpu.memory_space<vmem>>, vector<1x128x128xbf16>
      %116 = vector.shape_cast %115 : vector<1x128x128xbf16> to vector<128x128xbf16>
      %c0_118 = arith.constant 0 : index
      %c1_119 = arith.constant 1 : index
      %c0_120 = arith.constant 0 : index
      %c0_121 = arith.constant 0 : index
      %c0_122 = arith.constant 0 : index
      %117 = vector.load %arg3[%c0_118, %c1_119, %c0_120, %c0_121, %c0_122] : memref<1x3x3x128x128xbf16, #tpu.memory_space<vmem>>, vector<1x1x1x128x128xbf16>
      %118 = vector.shape_cast %117 : vector<1x1x1x128x128xbf16> to vector<128x128xbf16>
      %cst_123 = arith.constant dense<0.000000e+00> : vector<128x128xf32>
      %119 = tpu.matmul %116, %118, %cst_123 {dimension_numbers = #tpu.dot_dimension_numbers<[1], [0], [0], [1], [0, 0, 1, 1], [], []>} : vector<128x128xbf16>, vector<128x128xbf16>, vector<128x128xf32> -> vector<128x128xf32>
      %120 = arith.addf %114, %119 : vector<128x128xf32>
      %c0_124 = arith.constant 0 : index
      %c160 = arith.constant 160 : index
      %c0_125 = arith.constant 0 : index
      %121 = vector.load %arg7[%c0_124, %c160, %c0_125] : memref<2x388x128xbf16, #tpu.memory_space<vmem>>, vector<1x128x128xbf16>
      %122 = vector.shape_cast %121 : vector<1x128x128xbf16> to vector<128x128xbf16>
      %c0_126 = arith.constant 0 : index
      %c1_127 = arith.constant 1 : index
      %c1_128 = arith.constant 1 : index
      %c0_129 = arith.constant 0 : index
      %c0_130 = arith.constant 0 : index
      %123 = vector.load %arg3[%c0_126, %c1_127, %c1_128, %c0_129, %c0_130] : memref<1x3x3x128x128xbf16, #tpu.memory_space<vmem>>, vector<1x1x1x128x128xbf16>
      %124 = vector.shape_cast %123 : vector<1x1x1x128x128xbf16> to vector<128x128xbf16>
      %cst_131 = arith.constant dense<0.000000e+00> : vector<128x128xf32>
      %125 = tpu.matmul %122, %124, %cst_131 {dimension_numbers = #tpu.dot_dimension_numbers<[1], [0], [0], [1], [0, 0, 1, 1], [], []>} : vector<128x128xbf16>, vector<128x128xbf16>, vector<128x128xf32> -> vector<128x128xf32>
      %126 = arith.addf %120, %125 : vector<128x128xf32>
      %c0_132 = arith.constant 0 : index
      %c161 = arith.constant 161 : index
      %c0_133 = arith.constant 0 : index
      %127 = vector.load %arg7[%c0_132, %c161, %c0_133] : memref<2x388x128xbf16, #tpu.memory_space<vmem>>, vector<1x128x128xbf16>
      %128 = vector.shape_cast %127 : vector<1x128x128xbf16> to vector<128x128xbf16>
      %c0_134 = arith.constant 0 : index
      %c1_135 = arith.constant 1 : index
      %c2_136 = arith.constant 2 : index
      %c0_137 = arith.constant 0 : index
      %c0_138 = arith.constant 0 : index
      %129 = vector.load %arg3[%c0_134, %c1_135, %c2_136, %c0_137, %c0_138] : memref<1x3x3x128x128xbf16, #tpu.memory_space<vmem>>, vector<1x1x1x128x128xbf16>
      %130 = vector.shape_cast %129 : vector<1x1x1x128x128xbf16> to vector<128x128xbf16>
      %cst_139 = arith.constant dense<0.000000e+00> : vector<128x128xf32>
      %131 = tpu.matmul %128, %130, %cst_139 {dimension_numbers = #tpu.dot_dimension_numbers<[1], [0], [0], [1], [0, 0, 1, 1], [], []>} : vector<128x128xbf16>, vector<128x128xbf16>, vector<128x128xf32> -> vector<128x128xf32>
      %132 = arith.addf %126, %131 : vector<128x128xf32>
      %c0_140 = arith.constant 0 : index
      %c177 = arith.constant 177 : index
      %c0_141 = arith.constant 0 : index
      %133 = vector.load %arg7[%c0_140, %c177, %c0_141] : memref<2x388x128xbf16, #tpu.memory_space<vmem>>, vector<1x128x128xbf16>
      %134 = vector.shape_cast %133 : vector<1x128x128xbf16> to vector<128x128xbf16>
      %c0_142 = arith.constant 0 : index
      %c2_143 = arith.constant 2 : index
      %c0_144 = arith.constant 0 : index
      %c0_145 = arith.constant 0 : index
      %c0_146 = arith.constant 0 : index
      %135 = vector.load %arg3[%c0_142, %c2_143, %c0_144, %c0_145, %c0_146] : memref<1x3x3x128x128xbf16, #tpu.memory_space<vmem>>, vector<1x1x1x128x128xbf16>
      %136 = vector.shape_cast %135 : vector<1x1x1x128x128xbf16> to vector<128x128xbf16>
      %cst_147 = arith.constant dense<0.000000e+00> : vector<128x128xf32>
      %137 = tpu.matmul %134, %136, %cst_147 {dimension_numbers = #tpu.dot_dimension_numbers<[1], [0], [0], [1], [0, 0, 1, 1], [], []>} : vector<128x128xbf16>, vector<128x128xbf16>, vector<128x128xf32> -> vector<128x128xf32>
      %138 = arith.addf %132, %137 : vector<128x128xf32>
      %c0_148 = arith.constant 0 : index
      %c178 = arith.constant 178 : index
      %c0_149 = arith.constant 0 : index
      %139 = vector.load %arg7[%c0_148, %c178, %c0_149] : memref<2x388x128xbf16, #tpu.memory_space<vmem>>, vector<1x128x128xbf16>
      %140 = vector.shape_cast %139 : vector<1x128x128xbf16> to vector<128x128xbf16>
      %c0_150 = arith.constant 0 : index
      %c2_151 = arith.constant 2 : index
      %c1_152 = arith.constant 1 : index
      %c0_153 = arith.constant 0 : index
      %c0_154 = arith.constant 0 : index
      %141 = vector.load %arg3[%c0_150, %c2_151, %c1_152, %c0_153, %c0_154] : memref<1x3x3x128x128xbf16, #tpu.memory_space<vmem>>, vector<1x1x1x128x128xbf16>
      %142 = vector.shape_cast %141 : vector<1x1x1x128x128xbf16> to vector<128x128xbf16>
      %cst_155 = arith.constant dense<0.000000e+00> : vector<128x128xf32>
      %143 = tpu.matmul %140, %142, %cst_155 {dimension_numbers = #tpu.dot_dimension_numbers<[1], [0], [0], [1], [0, 0, 1, 1], [], []>} : vector<128x128xbf16>, vector<128x128xbf16>, vector<128x128xf32> -> vector<128x128xf32>
      %144 = arith.addf %138, %143 : vector<128x128xf32>
      %c0_156 = arith.constant 0 : index
      %c179 = arith.constant 179 : index
      %c0_157 = arith.constant 0 : index
      %145 = vector.load %arg7[%c0_156, %c179, %c0_157] : memref<2x388x128xbf16, #tpu.memory_space<vmem>>, vector<1x128x128xbf16>
      %146 = vector.shape_cast %145 : vector<1x128x128xbf16> to vector<128x128xbf16>
      %c0_158 = arith.constant 0 : index
      %c2_159 = arith.constant 2 : index
      %c2_160 = arith.constant 2 : index
      %c0_161 = arith.constant 0 : index
      %c0_162 = arith.constant 0 : index
      %147 = vector.load %arg3[%c0_158, %c2_159, %c2_160, %c0_161, %c0_162] : memref<1x3x3x128x128xbf16, #tpu.memory_space<vmem>>, vector<1x1x1x128x128xbf16>
      %148 = vector.shape_cast %147 : vector<1x1x1x128x128xbf16> to vector<128x128xbf16>
      %cst_163 = arith.constant dense<0.000000e+00> : vector<128x128xf32>
      %149 = tpu.matmul %146, %148, %cst_163 {dimension_numbers = #tpu.dot_dimension_numbers<[1], [0], [0], [1], [0, 0, 1, 1], [], []>} : vector<128x128xbf16>, vector<128x128xbf16>, vector<128x128xf32> -> vector<128x128xf32>
      %150 = arith.addf %144, %149 : vector<128x128xf32>
      %151 = vector.broadcast %5 : vector<1x128xf32> to vector<128x128xf32>
      %152 = arith.addf %150, %151 : vector<128x128xf32>
      %cst_164 = arith.constant 0.000000e+00 : f32
      %153 = vector.broadcast %cst_164 : f32 to vector<128x128xf32>
      %154 = arith.maximumf %152, %153 : vector<128x128xf32>
      %155 = arith.extui %3 : i1 to i32
      %c0_i32_165 = arith.constant 0 : i32
      %156 = arith.cmpi ne, %155, %c0_i32_165 : i32
      scf.if %156 {
        %c0_245 = arith.constant 0 : index
        %c128 = arith.constant 128 : index
        %c0_246 = arith.constant 0 : index
        %224 = vector.load %arg6[%c0_245, %c128, %c0_246] : memref<1x324x128xf32, #tpu.memory_space<vmem>>, vector<1x128x128xf32>
        %225 = vector.shape_cast %224 : vector<1x128x128xf32> to vector<128x128xf32>
        %226 = vector.shape_cast %154 : vector<128x128xf32> to vector<1x128x128xf32>
        tpu.vector_store %arg6[%c0_245, %c128, %c0_246], %226 {strides = array<i32>} : memref<1x324x128xf32, #tpu.memory_space<vmem>>, vector<1x128x128xf32>,
      } else {
      }
      %true_166 = arith.constant true
      %157 = arith.xori %3, %true_166 : i1
      %158 = arith.extui %157 : i1 to i32
      %c0_i32_167 = arith.constant 0 : i32
      %159 = arith.cmpi ne, %158, %c0_i32_167 : i32
      scf.if %159 {
        %c128 = arith.constant 128 : index
        %c0_245 = arith.constant 0 : index
        %224 = vector.load %arg5[%c128, %c0_245] : memref<324x1xf32, #tpu.memory_space<vmem>>, vector<128x1xf32>
        %225 = vector.broadcast %224 : vector<128x1xf32> to vector<128x128xf32>
        %226 = arith.mulf %154, %225 : vector<128x128xf32>
        %227 = arith.truncf %226 : vector<128x128xf32> to vector<128x128xbf16>
        %c1_246 = arith.constant 1 : index
        %c160_247 = arith.constant 160 : index
        %c0_248 = arith.constant 0 : index
        %228 = vector.load %arg7[%c1_246, %c160_247, %c0_248] : memref<2x388x128xbf16, #tpu.memory_space<vmem>>, vector<1x128x128xbf16>
        %229 = vector.shape_cast %228 : vector<1x128x128xbf16> to vector<128x128xbf16>
        %230 = vector.shape_cast %227 : vector<128x128xbf16> to vector<1x128x128xbf16>
        tpu.vector_store %arg7[%c1_246, %c160_247, %c0_248], %230 {strides = array<i32>} : memref<2x388x128xbf16, #tpu.memory_space<vmem>>, vector<1x128x128xbf16>,
      } else {
      }
      %cst_168 = arith.constant 0.000000e+00 : f32
      %160 = vector.broadcast %cst_168 : f32 to vector<68x128xf32>
      %c0_169 = arith.constant 0 : index
      %c269 = arith.constant 269 : index
      %c0_170 = arith.constant 0 : index
      %161 = vector.load %arg7[%c0_169, %c269, %c0_170] : memref<2x388x128xbf16, #tpu.memory_space<vmem>>, vector<1x68x128xbf16>
      %162 = vector.shape_cast %161 : vector<1x68x128xbf16> to vector<68x128xbf16>
      %c0_171 = arith.constant 0 : index
      %c0_172 = arith.constant 0 : index
      %c0_173 = arith.constant 0 : index
      %c0_174 = arith.constant 0 : index
      %c0_175 = arith.constant 0 : index
      %163 = vector.load %arg3[%c0_171, %c0_172, %c0_173, %c0_174, %c0_175] : memref<1x3x3x128x128xbf16, #tpu.memory_space<vmem>>, vector<1x1x1x128x128xbf16>
      %164 = vector.shape_cast %163 : vector<1x1x1x128x128xbf16> to vector<128x128xbf16>
      %cst_176 = arith.constant dense<0.000000e+00> : vector<68x128xf32>
      %165 = tpu.matmul %162, %164, %cst_176 {dimension_numbers = #tpu.dot_dimension_numbers<[1], [0], [0], [1], [0, 0, 1, 1], [], []>} : vector<68x128xbf16>, vector<128x128xbf16>, vector<68x128xf32> -> vector<68x128xf32>
      %166 = arith.addf %160, %165 : vector<68x128xf32>
      %c0_177 = arith.constant 0 : index
      %c270 = arith.constant 270 : index
      %c0_178 = arith.constant 0 : index
      %167 = vector.load %arg7[%c0_177, %c270, %c0_178] : memref<2x388x128xbf16, #tpu.memory_space<vmem>>, vector<1x68x128xbf16>
      %168 = vector.shape_cast %167 : vector<1x68x128xbf16> to vector<68x128xbf16>
      %c0_179 = arith.constant 0 : index
      %c0_180 = arith.constant 0 : index
      %c1_181 = arith.constant 1 : index
      %c0_182 = arith.constant 0 : index
      %c0_183 = arith.constant 0 : index
      %169 = vector.load %arg3[%c0_179, %c0_180, %c1_181, %c0_182, %c0_183] : memref<1x3x3x128x128xbf16, #tpu.memory_space<vmem>>, vector<1x1x1x128x128xbf16>
      %170 = vector.shape_cast %169 : vector<1x1x1x128x128xbf16> to vector<128x128xbf16>
      %cst_184 = arith.constant dense<0.000000e+00> : vector<68x128xf32>
      %171 = tpu.matmul %168, %170, %cst_184 {dimension_numbers = #tpu.dot_dimension_numbers<[1], [0], [0], [1], [0, 0, 1, 1], [], []>} : vector<68x128xbf16>, vector<128x128xbf16>, vector<68x128xf32> -> vector<68x128xf32>
      %172 = arith.addf %166, %171 : vector<68x128xf32>
      %c0_185 = arith.constant 0 : index
      %c271 = arith.constant 271 : index
      %c0_186 = arith.constant 0 : index
      %173 = vector.load %arg7[%c0_185, %c271, %c0_186] : memref<2x388x128xbf16, #tpu.memory_space<vmem>>, vector<1x68x128xbf16>
      %174 = vector.shape_cast %173 : vector<1x68x128xbf16> to vector<68x128xbf16>
      %c0_187 = arith.constant 0 : index
      %c0_188 = arith.constant 0 : index
      %c2_189 = arith.constant 2 : index
      %c0_190 = arith.constant 0 : index
      %c0_191 = arith.constant 0 : index
      %175 = vector.load %arg3[%c0_187, %c0_188, %c2_189, %c0_190, %c0_191] : memref<1x3x3x128x128xbf16, #tpu.memory_space<vmem>>, vector<1x1x1x128x128xbf16>
      %176 = vector.shape_cast %175 : vector<1x1x1x128x128xbf16> to vector<128x128xbf16>
      %cst_192 = arith.constant dense<0.000000e+00> : vector<68x128xf32>
      %177 = tpu.matmul %174, %176, %cst_192 {dimension_numbers = #tpu.dot_dimension_numbers<[1], [0], [0], [1], [0, 0, 1, 1], [], []>} : vector<68x128xbf16>, vector<128x128xbf16>, vector<68x128xf32> -> vector<68x128xf32>
      %178 = arith.addf %172, %177 : vector<68x128xf32>
      %c0_193 = arith.constant 0 : index
      %c287 = arith.constant 287 : index
      %c0_194 = arith.constant 0 : index
      %179 = vector.load %arg7[%c0_193, %c287, %c0_194] : memref<2x388x128xbf16, #tpu.memory_space<vmem>>, vector<1x68x128xbf16>
      %180 = vector.shape_cast %179 : vector<1x68x128xbf16> to vector<68x128xbf16>
      %c0_195 = arith.constant 0 : index
      %c1_196 = arith.constant 1 : index
      %c0_197 = arith.constant 0 : index
      %c0_198 = arith.constant 0 : index
      %c0_199 = arith.constant 0 : index
      %181 = vector.load %arg3[%c0_195, %c1_196, %c0_197, %c0_198, %c0_199] : memref<1x3x3x128x128xbf16, #tpu.memory_space<vmem>>, vector<1x1x1x128x128xbf16>
      %182 = vector.shape_cast %181 : vector<1x1x1x128x128xbf16> to vector<128x128xbf16>
      %cst_200 = arith.constant dense<0.000000e+00> : vector<68x128xf32>
      %183 = tpu.matmul %180, %182, %cst_200 {dimension_numbers = #tpu.dot_dimension_numbers<[1], [0], [0], [1], [0, 0, 1, 1], [], []>} : vector<68x128xbf16>, vector<128x128xbf16>, vector<68x128xf32> -> vector<68x128xf32>
      %184 = arith.addf %178, %183 : vector<68x128xf32>
      %c0_201 = arith.constant 0 : index
      %c288 = arith.constant 288 : index
      %c0_202 = arith.constant 0 : index
      %185 = vector.load %arg7[%c0_201, %c288, %c0_202] : memref<2x388x128xbf16, #tpu.memory_space<vmem>>, vector<1x68x128xbf16>
      %186 = vector.shape_cast %185 : vector<1x68x128xbf16> to vector<68x128xbf16>
      %c0_203 = arith.constant 0 : index
      %c1_204 = arith.constant 1 : index
      %c1_205 = arith.constant 1 : index
      %c0_206 = arith.constant 0 : index
      %c0_207 = arith.constant 0 : index
      %187 = vector.load %arg3[%c0_203, %c1_204, %c1_205, %c0_206, %c0_207] : memref<1x3x3x128x128xbf16, #tpu.memory_space<vmem>>, vector<1x1x1x128x128xbf16>
      %188 = vector.shape_cast %187 : vector<1x1x1x128x128xbf16> to vector<128x128xbf16>
      %cst_208 = arith.constant dense<0.000000e+00> : vector<68x128xf32>
      %189 = tpu.matmul %186, %188, %cst_208 {dimension_numbers = #tpu.dot_dimension_numbers<[1], [0], [0], [1], [0, 0, 1, 1], [], []>} : vector<68x128xbf16>, vector<128x128xbf16>, vector<68x128xf32> -> vector<68x128xf32>
      %190 = arith.addf %184, %189 : vector<68x128xf32>
      %c0_209 = arith.constant 0 : index
      %c289 = arith.constant 289 : index
      %c0_210 = arith.constant 0 : index
      %191 = vector.load %arg7[%c0_209, %c289, %c0_210] : memref<2x388x128xbf16, #tpu.memory_space<vmem>>, vector<1x68x128xbf16>
      %192 = vector.shape_cast %191 : vector<1x68x128xbf16> to vector<68x128xbf16>
      %c0_211 = arith.constant 0 : index
      %c1_212 = arith.constant 1 : index
      %c2_213 = arith.constant 2 : index
      %c0_214 = arith.constant 0 : index
      %c0_215 = arith.constant 0 : index
      %193 = vector.load %arg3[%c0_211, %c1_212, %c2_213, %c0_214, %c0_215] : memref<1x3x3x128x128xbf16, #tpu.memory_space<vmem>>, vector<1x1x1x128x128xbf16>
      %194 = vector.shape_cast %193 : vector<1x1x1x128x128xbf16> to vector<128x128xbf16>
      %cst_216 = arith.constant dense<0.000000e+00> : vector<68x128xf32>
      %195 = tpu.matmul %192, %194, %cst_216 {dimension_numbers = #tpu.dot_dimension_numbers<[1], [0], [0], [1], [0, 0, 1, 1], [], []>} : vector<68x128xbf16>, vector<128x128xbf16>, vector<68x128xf32> -> vector<68x128xf32>
      %196 = arith.addf %190, %195 : vector<68x128xf32>
      %c0_217 = arith.constant 0 : index
      %c305 = arith.constant 305 : index
      %c0_218 = arith.constant 0 : index
      %197 = vector.load %arg7[%c0_217, %c305, %c0_218] : memref<2x388x128xbf16, #tpu.memory_space<vmem>>, vector<1x68x128xbf16>
      %198 = vector.shape_cast %197 : vector<1x68x128xbf16> to vector<68x128xbf16>
      %c0_219 = arith.constant 0 : index
      %c2_220 = arith.constant 2 : index
      %c0_221 = arith.constant 0 : index
      %c0_222 = arith.constant 0 : index
      %c0_223 = arith.constant 0 : index
      %199 = vector.load %arg3[%c0_219, %c2_220, %c0_221, %c0_222, %c0_223] : memref<1x3x3x128x128xbf16, #tpu.memory_space<vmem>>, vector<1x1x1x128x128xbf16>
      %200 = vector.shape_cast %199 : vector<1x1x1x128x128xbf16> to vector<128x128xbf16>
      %cst_224 = arith.constant dense<0.000000e+00> : vector<68x128xf32>
      %201 = tpu.matmul %198, %200, %cst_224 {dimension_numbers = #tpu.dot_dimension_numbers<[1], [0], [0], [1], [0, 0, 1, 1], [], []>} : vector<68x128xbf16>, vector<128x128xbf16>, vector<68x128xf32> -> vector<68x128xf32>
      %202 = arith.addf %196, %201 : vector<68x128xf32>
      %c0_225 = arith.constant 0 : index
      %c306 = arith.constant 306 : index
      %c0_226 = arith.constant 0 : index
      %203 = vector.load %arg7[%c0_225, %c306, %c0_226] : memref<2x388x128xbf16, #tpu.memory_space<vmem>>, vector<1x68x128xbf16>
      %204 = vector.shape_cast %203 : vector<1x68x128xbf16> to vector<68x128xbf16>
      %c0_227 = arith.constant 0 : index
      %c2_228 = arith.constant 2 : index
      %c1_229 = arith.constant 1 : index
      %c0_230 = arith.constant 0 : index
      %c0_231 = arith.constant 0 : index
      %205 = vector.load %arg3[%c0_227, %c2_228, %c1_229, %c0_230, %c0_231] : memref<1x3x3x128x128xbf16, #tpu.memory_space<vmem>>, vector<1x1x1x128x128xbf16>
      %206 = vector.shape_cast %205 : vector<1x1x1x128x128xbf16> to vector<128x128xbf16>
      %cst_232 = arith.constant dense<0.000000e+00> : vector<68x128xf32>
      %207 = tpu.matmul %204, %206, %cst_232 {dimension_numbers = #tpu.dot_dimension_numbers<[1], [0], [0], [1], [0, 0, 1, 1], [], []>} : vector<68x128xbf16>, vector<128x128xbf16>, vector<68x128xf32> -> vector<68x128xf32>
      %208 = arith.addf %202, %207 : vector<68x128xf32>
      %c0_233 = arith.constant 0 : index
      %c307 = arith.constant 307 : index
      %c0_234 = arith.constant 0 : index
      %209 = vector.load %arg7[%c0_233, %c307, %c0_234] : memref<2x388x128xbf16, #tpu.memory_space<vmem>>, vector<1x68x128xbf16>
      %210 = vector.shape_cast %209 : vector<1x68x128xbf16> to vector<68x128xbf16>
      %c0_235 = arith.constant 0 : index
      %c2_236 = arith.constant 2 : index
      %c2_237 = arith.constant 2 : index
      %c0_238 = arith.constant 0 : index
      %c0_239 = arith.constant 0 : index
      %211 = vector.load %arg3[%c0_235, %c2_236, %c2_237, %c0_238, %c0_239] : memref<1x3x3x128x128xbf16, #tpu.memory_space<vmem>>, vector<1x1x1x128x128xbf16>
      %212 = vector.shape_cast %211 : vector<1x1x1x128x128xbf16> to vector<128x128xbf16>
      %cst_240 = arith.constant dense<0.000000e+00> : vector<68x128xf32>
      %213 = tpu.matmul %210, %212, %cst_240 {dimension_numbers = #tpu.dot_dimension_numbers<[1], [0], [0], [1], [0, 0, 1, 1], [], []>} : vector<68x128xbf16>, vector<128x128xbf16>, vector<68x128xf32> -> vector<68x128xf32>
      %214 = arith.addf %208, %213 : vector<68x128xf32>
      %215 = vector.broadcast %5 : vector<1x128xf32> to vector<68x128xf32>
      %216 = arith.addf %214, %215 : vector<68x128xf32>
      %cst_241 = arith.constant 0.000000e+00 : f32
      %217 = vector.broadcast %cst_241 : f32 to vector<68x128xf32>
      %218 = arith.maximumf %216, %217 : vector<68x128xf32>
      %219 = arith.extui %3 : i1 to i32
      %c0_i32_242 = arith.constant 0 : i32
      %220 = arith.cmpi ne, %219, %c0_i32_242 : i32
      scf.if %220 {
        %c0_245 = arith.constant 0 : index
        %c256 = arith.constant 256 : index
        %c0_246 = arith.constant 0 : index
        %224 = vector.load %arg6[%c0_245, %c256, %c0_246] : memref<1x324x128xf32, #tpu.memory_space<vmem>>, vector<1x68x128xf32>
        %225 = vector.shape_cast %224 : vector<1x68x128xf32> to vector<68x128xf32>
        %226 = vector.shape_cast %218 : vector<68x128xf32> to vector<1x68x128xf32>
        tpu.vector_store %arg6[%c0_245, %c256, %c0_246], %226 {strides = array<i32>} : memref<1x324x128xf32, #tpu.memory_space<vmem>>, vector<1x68x128xf32>,
      } else {
      }
      %true_243 = arith.constant true
      %221 = arith.xori %3, %true_243 : i1
      %222 = arith.extui %221 : i1 to i32
      %c0_i32_244 = arith.constant 0 : i32
      %223 = arith.cmpi ne, %222, %c0_i32_244 : i32
      scf.if %223 {
        %c256 = arith.constant 256 : index
        %c0_245 = arith.constant 0 : index
        %224 = vector.load %arg5[%c256, %c0_245] : memref<324x1xf32, #tpu.memory_space<vmem>>, vector<68x1xf32>
        %225 = vector.broadcast %224 : vector<68x1xf32> to vector<68x128xf32>
        %226 = arith.mulf %218, %225 : vector<68x128xf32>
        %227 = arith.truncf %226 : vector<68x128xf32> to vector<68x128xbf16>
        %c1_246 = arith.constant 1 : index
        %c288_247 = arith.constant 288 : index
        %c0_248 = arith.constant 0 : index
        %228 = vector.load %arg7[%c1_246, %c288_247, %c0_248] : memref<2x388x128xbf16, #tpu.memory_space<vmem>>, vector<1x68x128xbf16>
        %229 = vector.shape_cast %228 : vector<1x68x128xbf16> to vector<68x128xbf16>
        %230 = vector.shape_cast %227 : vector<68x128xbf16> to vector<1x68x128xbf16>
        tpu.vector_store %arg7[%c1_246, %c288_247, %c0_248], %230 {strides = array<i32>} : memref<2x388x128xbf16, #tpu.memory_space<vmem>>, vector<1x68x128xbf16>,
      } else {
      }
    } else {
    }
    return
  }
  func.func @transform_0(%arg0: i32, %arg1: i32) -> (i32, i32, i32) {
    %c0_i32 = arith.constant 0 : i32
    %c0_i32_0 = arith.constant 0 : i32
    %c0_i32_1 = arith.constant 0 : i32
    return %arg0, %c0_i32, %c0_i32_0 : i32, i32, i32
  }
  func.func @transform_1(%arg0: i32, %arg1: i32) -> (i32, i32, i32, i32, i32) {
    %c0_i32 = arith.constant 0 : i32
    %c0_i32_0 = arith.constant 0 : i32
    %c0_i32_1 = arith.constant 0 : i32
    %c0_i32_2 = arith.constant 0 : i32
    %c0_i32_3 = arith.constant 0 : i32
    return %arg1, %c0_i32, %c0_i32_0, %c0_i32_1, %c0_i32_2 : i32, i32, i32, i32, i32
  }
  func.func @transform_2(%arg0: i32, %arg1: i32) -> (i32, i32, i32) {
    %c0_i32 = arith.constant 0 : i32
    %c0_i32_0 = arith.constant 0 : i32
    %c0_i32_1 = arith.constant 0 : i32
    return %arg1, %c0_i32, %c0_i32_0 : i32, i32, i32
  }
  func.func @transform_3(%arg0: i32, %arg1: i32) -> (i32, i32) {
    %c0_i32 = arith.constant 0 : i32
    %c0_i32_0 = arith.constant 0 : i32
    %c0_i32_1 = arith.constant 0 : i32
    return %c0_i32, %c0_i32_0 : i32, i32
  }
  func.func @transform_4(%arg0: i32, %arg1: i32) -> (i32, i32, i32) {
    %c0_i32 = arith.constant 0 : i32
    %c0_i32_0 = arith.constant 0 : i32
    %c0_i32_1 = arith.constant 0 : i32
    return %arg0, %c0_i32, %c0_i32_0 : i32, i32, i32
  }
}

</mosaic_0001>

<bundles_post_ra>
// kernel: densepose_v1convx_forward.1
= control target key start
LH: loop header
LB: loop body
LE: loop exit
PB: predicated region body
PF: predicated region fallthrough
CT: control target
= control target key end

     0   :  { %s19764_s15 = smov 0   ;;  %s19766_s16 = smov 0   ;;  %s23874_s0 = inlined_call_operand.vmem [shape: bf16[2,388,128], index: 0, kind: input, shape index: {}]   ;;  %s23875_s1 = inlined_call_operand.vmem [shape: bf16[2,3,3,128,128], index: 1, kind: input, shape index: {}]   ;;  %s23876_s2 = inlined_call_operand.vmem [shape: f32[2,1,128], index: 2, kind: input, shape index: {}]   ;;  %s23877_s3 = inlined_call_operand.vmem [shape: f32[324,1], index: 3, kind: input, shape index: {}]   ;;  %s23878_s4 = inlined_call_operand.vmem [shape: f32[2,324,128], index: 4, kind: output, shape index: {}]  }
   0x1   :  { %s19768_s17 = smov 0   ;;  %s19770_s18 = smov 0  }
   0x2   :  { %s19772_s19 = smov 0  }
   0x3 LB: > { %s23_s20 = sadd.s32 1, %s19718_s17  ;;  %s26_s21 = sadd.s32 1, %s19722_s18  ;;  %s19726_s19 = sphi %s19772_s19, %s14_s19   ;;  %s19722_s18 = sphi %s19770_s18, %s23977_s18   ;;  %s19718_s17 = sphi %s19768_s17, %s23976_s17   ;;  %s19714_s16 = sphi %s19766_s16, %s23975_s16   ;;  %s19710_s15 = sphi %s19764_s15, %s23974_s15  }
   0x4   : > { %p24_p0 = scmp.ge.s32.totalorder %s23_s20, 2  ;;  %p14454_p1 = scmp.ge.s32.totalorder %s19726_s19, 1 }
   0x5   : > { %p192_p2 = scmp.lt.s32.totalorder %s19726_s19, 5 }
   0x6   : > { %s23979_s20 = smov (%p24_p0, %s23_s20), 0  ;;  %s23981_s21 = smov (!%p24_p0, %s26_s21), %s19722_s18 }
   0x7   : > { %p193_p3 = pnand %p14454_p1, %p192_p2  ;;  %p28_p4 = scmp.ge.s32.totalorder %s23981_s21, 2 }
   0x9   : > { %s23983_s21 = smov (%p28_p4, %s23981_s21), 0  ;;  %196 = sbr.rel (%p193_p3) target bundleno = 3448 (0xd78), region = 36 }
   0xe   : > { %p226_p5 = scmp.lt.s32.totalorder %s19714_s16, 1  ;;  %p231_p6 = scmp.lt.s32.totalorder %s19710_s15, 1 }
   0xf   : > { %p14458_p7 = scmp.ne.s32.totalorder %s19710_s15, 0 }
  0x10   : > { %s23985_s16 = smov (!%p226_p5, %s19714_s16), 1 }
  0x11   : > { %s19798_s22 = scalar_select %p231_p6, %s19710_s15, 1 }
  0x12   : > { %s18948_s23 = smul.u32 196, %s23985_s16 }
  0x13   : > { %s18949_s24 = smul.u32 576, %s19798_s22  ;;  %s238_s27 = scalar_lea.vmem %s23876_s2, %s19798_s22 }
  0x14   : > { %s19808_s30 = scalar_lea.vmem %s23874_s0, %s18948_s23  ;;  %s18950_s5 = smul.u32 328, %s23985_s16 }
  0x15   : > { %s19813_s8 = scalar_lea.vmem %s23875_s1, %s18949_s24  ;;  %248 = sbr.rel (%p14458_p7) target bundleno = 42 (0x2a), region = 40 }
  0x16   : > { %s19818_s11 = scalar_lea.vmem %s23878_s4, %s18950_s5 }
  0x1a   : > { %v258_v0 = vld [vmem:[%s19808_s30] sm:$0xff]   ;;  %v260_v1 = vld [vmem:[%s19808_s30 + $0x8] sm:$0xff]   ;;  %v262_v2 = vld [vmem:[%s19808_s30 + $0x10] sm:$0xff]   ;;  %v19728_v3 = vmov 0  }
  0x1b   : > { %250 = vst [vmem:[#allocation2 + $0x4] sm:$0xf] %v19728_v3  ;;  %251 = vst [vmem:[#allocation2 + $0x8] sm:$0xf] %v19728_v3  ;;  %v264_v4 = vld [vmem:[%s19808_s30 + $0x18] sm:$0xff]   ;;  %v266_v5 = vld [vmem:[%s19808_s30 + $0x20] sm:$0xff]  }
  0x1c   : > { %252 = vst [vmem:[#allocation2 + $0xc] sm:$0xf] %v19728_v3  ;;  %253 = vst [vmem:[#allocation2 + $0xb0] sm:$0xc] %v19728_v3  ;;  %v268_v6 = vld [vmem:[%s19808_s30 + $0x28] sm:$0xff]   ;;  %v270_v7 = vld [vmem:[%s19808_s30 + $0x30] sm:$0xff]  }
  0x1d   : > { %254 = vst [vmem:[#allocation2 + $0xb4] sm:$0xf] %v19728_v3  ;;  %255 = vst [vmem:[#allocation2 + $0xb8] sm:$0xf] %v19728_v3  ;;  %v272_v8 = vld [vmem:[%s19808_s30 + $0x38] sm:$0xff]   ;;  %v274_v9 = vld [vmem:[%s19808_s30 + $0x40] sm:$0xff]  }
  0x1e   : > { %308 = vst [vmem:[#allocation2 + $0xc4] sm:$0xff] %v258_v0   ;;  %310 = vst [vmem:[#allocation2 + $0xcc] sm:$0xff] %v260_v1   ;;  %v276_v10 = vld [vmem:[%s19808_s30 + $0x48] sm:$0xff]   ;;  %v278_v11 = vld [vmem:[%s19808_s30 + $0x50] sm:$0xff]  }
  0x1f   : > { %312 = vst [vmem:[#allocation2 + $0xd4] sm:$0xff] %v262_v2   ;;  %314 = vst [vmem:[#allocation2 + $0xdc] sm:$0xff] %v264_v4   ;;  %v280_v12 = vld [vmem:[%s19808_s30 + $0x58] sm:$0xff]   ;;  %v282_v13 = vld [vmem:[%s19808_s30 + $0x60] sm:$0xff]  }
  0x20   : > { %316 = vst [vmem:[#allocation2 + $0xe4] sm:$0xff] %v266_v5   ;;  %318 = vst [vmem:[#allocation2 + $0xec] sm:$0xff] %v268_v6   ;;  %v284_v14 = vld [vmem:[%s19808_s30 + $0x68] sm:$0xff]   ;;  %v286_v15 = vld [vmem:[%s19808_s30 + $0x70] sm:$0xff]  }
  0x21   : > { %320 = vst [vmem:[#allocation2 + $0xf4] sm:$0xff] %v270_v7   ;;  %322 = vst [vmem:[#allocation2 + $0xfc] sm:$0xff] %v272_v8   ;;  %v288_v16 = vld [vmem:[%s19808_s30 + $0x78] sm:$0xff]   ;;  %v290_v17 = vld [vmem:[%s19808_s30 + $0x80] sm:$0xff]  }
  0x22   : > { %324 = vst [vmem:[#allocation2 + $0x104] sm:$0xff] %v274_v9   ;;  %326 = vst [vmem:[#allocation2 + $0x10c] sm:$0xff] %v276_v10   ;;  %v292_v18 = vld [vmem:[%s19808_s30 + $0x88] sm:$0xff]   ;;  %v294_v19 = vld [vmem:[%s19808_s30 + $0x90] sm:$0xff]  }
  0x23   : > { %328 = vst [vmem:[#allocation2 + $0x114] sm:$0xff] %v278_v11   ;;  %330 = vst [vmem:[#allocation2 + $0x11c] sm:$0xff] %v280_v12   ;;  %v296_v20 = vld [vmem:[%s19808_s30 + $0x98] sm:$0xff]   ;;  %v298_v21 = vld [vmem:[%s19808_s30 + $0xa0] sm:$0xff]  }
  0x24   : > { %332 = vst [vmem:[#allocation2 + $0x124] sm:$0xff] %v282_v13   ;;  %334 = vst [vmem:[#allocation2 + $0x12c] sm:$0xff] %v284_v14   ;;  %v300_v22 = vld [vmem:[%s19808_s30 + $0xa8] sm:$0xff]   ;;  %v302_v23 = vld [vmem:[%s19808_s30 + $0xb0] sm:$0xff]  }
  0x25   : > { %336 = vst [vmem:[#allocation2 + $0x134] sm:$0xff] %v286_v15   ;;  %338 = vst [vmem:[#allocation2 + $0x13c] sm:$0xff] %v288_v16   ;;  %v304_v24 = vld [vmem:[%s19808_s30 + $0xb8] sm:$0xff]  }
  0x26   : > { %340 = vst [vmem:[#allocation2 + $0x144] sm:$0xff] %v290_v17   ;;  %342 = vst [vmem:[#allocation2 + $0x14c] sm:$0xff] %v292_v18  }
  0x27   : > { %344 = vst [vmem:[#allocation2 + $0x154] sm:$0xff] %v294_v19   ;;  %346 = vst [vmem:[#allocation2 + $0x15c] sm:$0xff] %v296_v20  }
  0x28   : > { %348 = vst [vmem:[#allocation2 + $0x164] sm:$0xff] %v298_v21   ;;  %350 = vst [vmem:[#allocation2 + $0x16c] sm:$0xff] %v300_v22  }
  0x29   : > { %352 = vst [vmem:[#allocation2 + $0x174] sm:$0xff] %v302_v23   ;;  %354 = vst [vmem:[#allocation2 + $0x17c] sm:$0xff] %v304_v24  }
  0x2a PF: > { %v19850_v25 = vld [vmem:[%s238_s27] sm:$0x1]  ;;  %p359_p8 = scmp.lt.s32.totalorder %s19710_s15, 0  ;;  %s360_s14 = ssub.s32 0, %s19710_s15 }
  0x2b   : > { %23880 = vst [vmem:[#allocation3_spill] sm:$0xff] %v19850_v25  ;;  %s14459_s16 = smin.u32 %s19710_s15, %s360_s14 }
  0x2c   : > { %s362_s23 = sand.u32 1, %s14459_s16  }
  0x2d   : > { %s363_s24 = ssub.s32 0, %s362_s23 }
  0x2e   : > { %s23987_s24 = smov (!%p359_p8, %s363_s24), %s362_s23 }
  0x2f   : > { %p14461_p9 = scmp.lt.s32.totalorder %s23987_s24, 0  ;;  %s369_s25 = sadd.s32 2, %s23987_s24 }
  0x31   : > { %s23989_s25 = smov (!%p14461_p9, %s369_s25), %s23987_s24 }
  0x32   : > { %p14462_p10 = scmp.ne.s32.totalorder %s23989_s25, 0 }
  0x34   : > { %374 = sbr.rel (%p14462_p10) target bundleno = 1749 (0x6d5), region = 44 }
  0x39   : > { %v19002_v26 = vld [vmem:[%s19813_s8 + $0x78] sm:$0xff]   ;;  %v19004_v28 = vld [vmem:[%s19813_s8 + $0x70] sm:$0xff]   ;;  %v19006_v30 = vld [vmem:[%s19813_s8 + $0x68] sm:$0xff]   ;;  %vm470_vm0 = vcmask 1044480   ;;  %vm644_vm1 = vsmask.f32 5376 }
  0x3a   : > { %v19003_v27 = vld [vmem:[%s19813_s8 + $0x38] sm:$0xff]   ;;  %17116 = vmatprep.subr.bf16.mxu0 %v19002_v26  ;;  %v19005_v29 = vld [vmem:[%s19813_s8 + $0x30] sm:$0xff]   ;;  %v19007_v31 = vld [vmem:[%s19813_s8 + $0x28] sm:$0xff]   ;;  %vm899_vm2 = vsmask.f32 4352  ;;  %vm2284_vm4 = vcmask 1046528  }
  0x3b   : > { %17148 = vmatprep.subr.bf16.mxu1 %v19003_v27  ;;  %17117 = vmatpush3.bf16.msra.mxu0 %v19002_v26  ;;  %v19008_v32 = vld [vmem:[%s19813_s8 + $0x60] sm:$0xff]   ;;  %v19010_v34 = vld [vmem:[%s19813_s8 + $0x58] sm:$0xff]   ;;  %v19012_v36 = vld [vmem:[%s19813_s8 + $0x50] sm:$0xff]   ;;  %vm1711_vm3 = vsmask.f32 7424  ;;  %p14711_p11 = scmp.ne.s32.totalorder %s19710_s15, 1 }
  0x3c   : > { %17149 = vmatpush3.bf16.msra.mxu1 %v19003_v27  ;;  %17118 = vmatprep.subr.bf16.mxu0 %v19004_v28  ;;  %v19009_v33 = vld [vmem:[%s19813_s8 + $0x20] sm:$0xff]   ;;  %v19011_v35 = vld [vmem:[%s19813_s8 + $0x18] sm:$0xff]   ;;  %v19013_v37 = vld [vmem:[%s19813_s8 + $0x10] sm:$0xff]   ;;  %vm2492_vm5 = vsmask.f32 6400 }
  0x3d   : > { %17150 = vmatprep.subr.bf16.mxu1 %v19005_v29  ;;  %v377_v38 = vld [vmem:[#allocation2 + $0xcc] sm:$0xf]  ;;  %v409_v39 = vld [vmem:[#allocation2 + $0xc8] sm:$0x8]  ;;  %v19870_v40 = vld [vmem:[#allocation2 + $0xd0] sm:$0xff]  }
  0x3e   : > { %v376_v41 = vld [vmem:[#allocation2 + $0xc8] sm:$0xc]  ;;  %v19872_v42 = vcombine.low %v409_v39, %v377_v38  ;;  %v472_v44 = vrot.slane %v19870_v40, 3  ;;  %v654_v45 = vshrl.u32 %v19870_v40, 16  ;;  %v657_v46 = vshll.u32 %v19870_v40, 16  ;;  %v19877_v47 = vld [vmem:[#allocation2 + $0xd8] sm:$0xff]  }
  0x3f   : > { %17119 = vmatpush3.bf16.msra.mxu0 %v19004_v28  ;;  %v14496_v43 = vcombine.low %v376_v41, %v377_v38  ;;  %v19014_v48 = vld [vmem:[%s19813_s8 + $0x48] sm:$0xff]   ;;  %v663_v55 = vshrl.u32 %v19877_v47, 16  ;;  %v19016_v56 = vld [vmem:[%s19813_s8 + $0x40] sm:$0xff]   ;;  %v666_v60 = vshll.u32 %v19877_v47, 16  ;;  %v474_v5 = vrot.slane %v19877_v47, 3  ;;  %v19022_v9 = vld [vmem:[%s19813_s8 + $0xb8] sm:$0xff]  }
  0x40   : > { %17151 = vmatpush3.bf16.msra.mxu1 %v19005_v29  ;;  %17120 = vmatprep.subr.bf16.mxu0 %v19006_v30  ;;  %v471_v49 = vrot.slane %v19872_v42, 3  ;;  %v19015_v52 = vld [vmem:[%s19813_s8 + $0x8] sm:$0xff]   ;;  %v656_v53 = vrot.slane %v654_v45, 2  ;;  %v659_v54 = vrot.slane %v657_v46, 3  ;;  %v19017_v61 = vld [vmem:[%s19813_s8] sm:$0xff]   ;;  %v19023_v10 = vld [vmem:[%s19813_s8 + $0xf8] sm:$0xff]  }
  0x41   : > { %17152 = vmatprep.subr.bf16.mxu1 %v19007_v31  ;;  %v646_v50 = vshrl.u32 %v14496_v43, 16  ;;  %v649_v51 = vshll.u32 %v14496_v43, 16  ;;  %v665_v0 = vrot.slane %v663_v55, 2  ;;  %v668_v1 = vrot.slane %v666_v60, 3  ;;  %v19895_v2 = vld [vmem:[#allocation2 + $0xe0] sm:$0xff]   ;;  %v19898_v4 = vld [vmem:[#allocation2 + $0xe8] sm:$0xff]  }
  0x42   : > { %v473_v57 = vsel %vm470_vm0, %v471_v49, %v472_v44  ;;  %v660_v62 = vor.u32 %v659_v54, %v656_v53  ;;  %v672_v6 = vshrl.u32 %v19895_v2, 16  ;;  %v675_v7 = vshll.u32 %v19895_v2, 16  ;;  %v19024_v15 = vld [vmem:[%s19813_s8 + $0xb0] sm:$0xff]   ;;  %v19923_v26 = vld [vmem:[#allocation2 + $0xf8] sm:$0xff]   ;;  %v19030_v39 = vld [vmem:[%s19813_s8 + $0xa0] sm:$0xff]  }
  0x43   : > { %17121 = vmatpush3.bf16.msra.mxu0 %v19006_v30  ;;  %v648_v58 = vrot.slane %v646_v50, 2  ;;  %v651_v59 = vrot.slane %v649_v51, 3  ;;  %17132 = vmatprep.mubr.bf16.mxu0 %v473_v57  ;;  %v669_v8 = vor.u32 %v668_v1, %v665_v0  ;;  %v681_v11 = vshrl.u32 %v19898_v4, 16  ;;  %v19025_v18 = vld [vmem:[%s19813_s8 + $0xf0] sm:$0xff]   ;;  %v19946_v51 = vld [vmem:[#allocation2 + $0x100] sm:$0xff]  }
  0x44   : > { %17153 = vmatpush3.bf16.msra.mxu1 %v19007_v31  ;;  %17122 = vmatprep.subr.bf16.mxu0 %v19008_v32  ;;  %v684_v12 = vshll.u32 %v19898_v4, 16  ;;  %v674_v13 = vrot.slane %v672_v6, 2  ;;  %v677_v14 = vrot.slane %v675_v7, 3  ;;  %v476_v16 = vrot.slane %v19895_v2, 3  ;;  %v19920_v23 = vld [vmem:[#allocation2 + $0xf0] sm:$0xff]   ;;  %v19031_v53 = vld [vmem:[%s19813_s8 + $0xe0] sm:$0xff]  }
  0x45   : > { %17154 = vmatprep.subr.bf16.mxu1 %v19009_v33  ;;  %v652_v63 = vor.u32 %v651_v59, %v648_v58  ;;  %v475_v17 = vsel %vm470_vm0, %v472_v44, %v474_v5  ;;  %v670_v20 = vsel %vm644_vm1, %v660_v62, %v669_v8  ;;  %v683_v21 = vrot.slane %v681_v11, 2 }
  0x46   : > { %v678_v19 = vor.u32 %v677_v14, %v674_v13  ;;  %v686_v22 = vrot.slane %v684_v12, 3  ;;  %v477_v24 = vsel %vm470_vm0, %v474_v5, %v476_v16  ;;  %v901_v27 = vshrl.u32 %v19872_v42, 16 }
  0x47   : > { %17123 = vmatpush3.bf16.msra.mxu0 %v19008_v32  ;;  %v661_v3 = vsel %vm644_vm1, %v652_v63, %v660_v62  ;;  %v478_v29 = vrot.slane %v19898_v4, 3  ;;  %v690_v30 = vshrl.u32 %v19920_v23, 16  ;;  %v693_v31 = vshll.u32 %v19920_v23, 16  ;;  %v19034_v63 = vld [vmem:[%s19813_s8 + $0x98] sm:$0xff]  }
  0x48   : > { %17155 = vmatpush3.bf16.msra.mxu1 %v19009_v33  ;;  %17124 = vmatprep.subr.bf16.mxu0 %v19010_v34  ;;  %v679_v28 = vsel %vm644_vm1, %v669_v8, %v678_v19  ;;  %v687_v32 = vor.u32 %v686_v22, %v683_v21  ;;  %v19028_v33 = vld [vmem:[%s19813_s8 + $0xa8] sm:$0xff]   ;;  %v480_v41 = vrot.slane %v19920_v23, 3  ;;  %v904_v54 = vshll.u32 %v19872_v42, 16  ;;  %v19035_v8 = vld [vmem:[%s19813_s8 + $0xd8] sm:$0xff]   ;;  %v1114_v21 = vld [vmem:[#allocation2 + $0xd0] sm:$0x8] }
  0x49   : > { %17156 = vmatprep.subr.bf16.mxu1 %v19011_v35  ;;  %17164 = vmatprep.mubr.bf16.mxu1 %v661_v3  ;;  %v695_v38 = vrot.slane %v693_v31, 3  ;;  %v708_v57 = vshrl.u32 %v19946_v51, 16  ;;  %v711_v58 = vshll.u32 %v19946_v51, 16  ;;  %v19955_v59 = vrot.slane %v901_v27, 3  ;;  %v19980_v27 = vld [vmem:[#allocation2 + $0xd8] sm:$0xf] }
  0x4a   : > { %v688_v50 = vsel %vm644_vm1, %v678_v19, %v687_v32  ;;  %v482_v62 = vrot.slane %v19923_v26, 3  ;;  %v484_v13 = vrot.slane %v19946_v51, 3  ;;  %v920_v2 = vrot.slane %v681_v11, 3  ;;  %v20040_v11 = vld [vmem:[#allocation2 + $0x100] sm:$0xf] }
  0x4b   : > { %17125 = vmatpush3.bf16.msra.mxu0 %v19010_v34  ;;  %v19029_v34 = vld [vmem:[%s19813_s8 + $0xe8] sm:$0xff]   ;;  %v710_v3 = vrot.slane %v708_v57, 2  ;;  %v713_v5 = vrot.slane %v711_v58, 3 }
  0x4c   : > { %17157 = vmatpush3.bf16.msra.mxu1 %v19011_v35  ;;  %17126 = vmatprep.subr.bf16.mxu0 %v19012_v36  ;;  %v699_v35 = vshrl.u32 %v19923_v26, 16 }
  0x4d   : > { %17158 = vmatprep.subr.bf16.mxu1 %v19013_v37  ;;  %v714_v14 = vor.u32 %v713_v5, %v710_v3 }
  0x4e   : > { %v701_v43 = vrot.slane %v699_v35, 2  ;;  %v928_v23 = vrot.slane %v699_v35, 3  ;;  %v933_v35 = vrot.slane %v711_v58, 4  ;;  %v19057_v58 = vld [vmem:[%s19813_s8 + $0x118] sm:$0xff]  }
  0x4f   : > { %17127 = vmatpush3.bf16.msra.mxu0 %v19012_v36  ;;  %v702_v36 = vshll.u32 %v19923_v26, 16  ;;  %v932_v26 = vrot.slane %v708_v57, 3 }
  0x50   : > { %17159 = vmatpush3.bf16.msra.mxu1 %v19013_v37  ;;  %17128 = vmatprep.subr.bf16.mxu0 %v19014_v48  ;;  %v692_v37 = vrot.slane %v690_v30, 2 }
  0x51   : > { %17160 = vmatprep.subr.bf16.mxu1 %v19015_v52  ;;  %v704_v44 = vrot.slane %v702_v36, 3 }
  0x52   : > { %v696_v49 = vor.u32 %v695_v38, %v692_v37  ;;  %v19040_v38 = vld [vmem:[%s19813_s8 + $0x88] sm:$0xff]  }
  0x53   : > { %17129 = vmatpush3.bf16.msra.mxu0 %v19014_v48  ;;  %v479_v48 = vsel %vm470_vm0, %v476_v16, %v478_v29  ;;  %v705_v1 = vor.u32 %v704_v44, %v701_v43  ;;  %v909_v16 = vrot.slane %v657_v46, 4 }
  0x54   : > { %17161 = vmatpush3.bf16.msra.mxu1 %v19015_v52  ;;  %17130 = vmatprep.subr.bf16.mxu0 %v19016_v56  ;;  %v19948_v52 = vld [vmem:[#allocation2 + $0x108] ss:$0 sps:$4 sm:$0x77]  }
  0x55   : > { %17162 = vmatprep.subr.bf16.mxu1 %v19017_v61  ;;  %v717_v42 = vshrl.u32 %v19948_v52, 16  ;;  %v720_v0 = vshll.u32 %v19948_v52, 16  ;;  %v706_v22 = vsel %vm644_vm1, %v696_v49, %v705_v1  ;;  %v486_v37 = vrot.slane %v19948_v52, 3 }
  0x57   : > { %17131 = vmatpush3.bf16.msra.mxu0 %v19016_v56  ;;  %v481_v56 = vsel %vm470_vm0, %v478_v29, %v480_v41  ;;  %v719_v19 = vrot.slane %v717_v42, 2  ;;  %v19989_v29 = vld [vmem:[#allocation2 + $0xe0] sm:$0xf] }
  0x58   : > { %17163 = vmatpush3.bf16.msra.mxu1 %v19017_v61  ;;  %17180 = vmatprep.subr.bf16.mxu0 %v19022_v9  ;;  %v697_v61 = vsel %vm644_vm1, %v687_v32, %v696_v49  ;;  %v19991_v32 = vld [vmem:[#allocation2 + $0xe4] sm:$0xf] }
  0x59   : > { %17212 = vmatprep.subr.bf16.mxu1 %v19023_v10  ;;  %v19042_v42 = vld [vmem:[%s19813_s8 + $0x80] sm:$0xff]  }
  0x5a   : > { %17133 = vmatmul.mubr.bf16.vlgmr.msra.gmra.mxu0 %v475_v17  ;;  %v483_v17 = vsel %vm470_vm0, %v480_v41, %v482_v62 }
  0x5b   : > { %17165 = vmatmul.mubr.bf16.vlgmr.msra.gmra.mxu1 %v670_v20  ;;  %17181 = vmatpush3.bf16.msra.mxu0 %v19022_v9  ;;  %v19967_v9 = vrot.slane %v904_v54, 4  ;;  %v722_v20 = vrot.slane %v720_v0, 3 }
  0x5c   : > { %17213 = vmatpush3.bf16.msra.mxu1 %v19023_v10  ;;  %17182 = vmatprep.subr.bf16.mxu0 %v19024_v15  ;;  %v19036_v10 = vld [vmem:[%s19813_s8 + $0x90] sm:$0xff]  }
  0x5d   : > { %17214 = vmatprep.subr.bf16.mxu1 %v19025_v18  ;;  %17136 = vmatprep.mubr.bf16.mxu0 %v477_v24  ;;  %v19978_v24 = vld [vmem:[#allocation2 + $0xd4] sm:$0xf]  ;;  %v907_v40 = vor.u32 %v19967_v9, %v19955_v59  ;;  %v723_v49 = vor.u32 %v722_v20, %v719_v19  ;;  %v20010_v20 = vld [vmem:[#allocation2 + $0xec] sm:$0xf] }
  0x5e   : > { %17168 = vmatprep.mubr.bf16.mxu1 %v679_v28  ;;  %v14546_v46 = vcombine.low %v1114_v21, %v19978_v24 }
  0x5f   : > { %17183 = vmatpush3.bf16.msra.mxu0 %v19024_v15  ;;  %v908_v15 = vrot.slane %v654_v45, 3  ;;  %v19982_v45 = vld [vmem:[#allocation2 + $0xdc] sm:$0xf]  ;;  %v724_v19 = vsel %vm644_vm1, %v714_v14, %v723_v49 }
  0x60   : > { %17215 = vmatpush3.bf16.msra.mxu1 %v19025_v18  ;;  %17184 = vmatprep.subr.bf16.mxu0 %v19028_v33  ;;  %v19037_v18 = vld [vmem:[%s19813_s8 + $0xd0] sm:$0xff]   ;;  %v14547_v28 = vcombine.low %v19980_v27, %v19982_v45  ;;  %v1192_v41 = vshrl.u32 %v14546_v46, 16  ;;  %v1195_v43 = vshll.u32 %v14546_v46, 16  ;;  %v20035_v49 = vld [vmem:[#allocation2 + $0xfc] sm:$0xf] }
  0x61   : > { %17216 = vmatprep.subr.bf16.mxu1 %v19029_v34  ;;  %v910_v0 = vor.u32 %v909_v16, %v908_v15  ;;  %v20014_v15 = vld [vmem:[#allocation2 + $0xf4] sm:$0xf]  ;;  %v916_v16 = vrot.slane %v672_v6, 3  ;;  %v921_v6 = vrot.slane %v684_v12, 4  ;;  %v20042_v12 = vld [vmem:[#allocation2 + $0x104] sm:$0xf] }
  0x62   : > { %17137 = vmatmul.mubr.bf16.gmra.mxu0 %v479_v48  ;;  %v1200_v44 = vshrl.u32 %v14547_v28, 16  ;;  %v1203_v48 = vshll.u32 %v14547_v28, 16  ;;  %v1197_v59 = vrot.slane %v1195_v43, 4 }
  0x63   : > { %17169 = vmatmul.mubr.bf16.gmra.mxu1 %v688_v50  ;;  %17185 = vmatpush3.bf16.msra.mxu0 %v19028_v33  ;;  %v485_v33 = vsel %vm470_vm0, %v482_v62, %v484_v13  ;;  %v19041_v50 = vld [vmem:[%s19813_s8 + $0xc8] sm:$0xff]  }
  0x64   : > { %17217 = vmatpush3.bf16.msra.mxu1 %v19029_v34  ;;  %17186 = vmatprep.subr.bf16.mxu0 %v19030_v39  ;;  %v715_v34 = vsel %vm644_vm1, %v705_v1, %v714_v14  ;;  %v1205_v62 = vrot.slane %v1203_v48, 4  ;;  %v913_v1 = vrot.slane %v666_v60, 4  ;;  %v20033_v48 = vld [vmem:[#allocation2 + $0xf8] sm:$0xf] }
  0x65   : > { %17218 = vmatprep.subr.bf16.mxu1 %v19031_v53  ;;  %17140 = vmatprep.mubr.bf16.mxu0 %v481_v56  ;;  %v1194_v56 = vrot.slane %v1192_v41, 3  ;;  %v14551_v4 = vcombine.low %v20033_v48, %v20035_v49 }
  0x66   : > { %17172 = vmatprep.mubr.bf16.mxu1 %v697_v61  ;;  %v1202_v61 = vrot.slane %v1200_v44, 3 }
  0x67   : > { %17187 = vmatpush3.bf16.msra.mxu0 %v19030_v39  ;;  %v14548_v39 = vcombine.low %v19989_v29, %v19991_v32  ;;  %v1198_v3 = vor.u32 %v1197_v59, %v1194_v56  ;;  %v1236_v56 = vshrl.u32 %v14551_v4, 16  ;;  %v1239_v59 = vshll.u32 %v14551_v4, 16  ;;  %v19073_v4 = vld [vmem:[#allocation2 + $0xd4] sm:$0xff]  }
  0x68   : > { %17219 = vmatpush3.bf16.msra.mxu1 %v19031_v53  ;;  %17188 = vmatprep.subr.bf16.mxu0 %v19034_v63  ;;  %v912_v53 = vrot.slane %v663_v55, 3  ;;  %v19043_v55 = vld [vmem:[%s19813_s8 + $0xc0] sm:$0xff]   ;;  %v1206_v5 = vor.u32 %v1205_v62, %v1202_v61  ;;  %v14552_v61 = vcombine.low %v20040_v11, %v20042_v12 }
  0x69   : > { %17220 = vmatprep.subr.bf16.mxu1 %v19035_v8  ;;  %v1209_v52 = vshrl.u32 %v14548_v39, 16  ;;  %v1212_v54 = vshll.u32 %v14548_v39, 16  ;;  %v19049_v39 = vld [vmem:[%s19813_s8 + $0x130] sm:$0xff]  }
  0x6a   : > { %17141 = vmatmul.mubr.bf16.gmra.mxu0 %v483_v17  ;;  %v20007_v17 = vld [vmem:[#allocation2 + $0xe8] sm:$0xf]  ;;  %v914_v14 = vor.u32 %v913_v1, %v912_v53  ;;  %v1207_v21 = vsel %vm899_vm2, %v1198_v3, %v1206_v5  ;;  %v1238_v3 = vrot.slane %v1236_v56, 3  ;;  %v19074_v56 = vld [vmem:[#allocation2 + $0xdc] sm:$0xff]  }
  0x6b   : > { %17173 = vmatmul.mubr.bf16.gmra.mxu1 %v706_v22  ;;  %17189 = vmatpush3.bf16.msra.mxu0 %v19034_v63  ;;  %v487_v63 = vsel %vm470_vm0, %v484_v13, %v486_v37  ;;  %v1214_v9 = vrot.slane %v1212_v54, 4  ;;  %v20012_v13 = vld [vmem:[#allocation2 + $0xf0] sm:$0xf]  ;;  %v14549_v47 = vcombine.low %v20007_v17, %v20010_v20  ;;  %v19051_v1 = vld [vmem:[%s19813_s8 + $0x128] sm:$0xff]  }
  0x6c   : > { %17221 = vmatpush3.bf16.msra.mxu1 %v19035_v8  ;;  %17190 = vmatprep.subr.bf16.mxu0 %v19036_v10  ;;  %v1211_v8 = vrot.slane %v1209_v52, 3  ;;  %v14550_v60 = vcombine.low %v20012_v13, %v20014_v15  ;;  %v19050_v54 = vld [vmem:[%s19813_s8 + $0x170] sm:$0xff]  }
  0x6d   : > { %17222 = vmatprep.subr.bf16.mxu1 %v19037_v18  ;;  %17144 = vmatprep.mubr.bf16.mxu0 %v485_v33  ;;  %v1218_v22 = vshrl.u32 %v14549_v47, 16  ;;  %v1221_v46 = vshll.u32 %v14549_v47, 16  ;;  %v19044_v33 = vld [vmem:[%s19813_s8 + $0x138] sm:$0xff]   ;;  %v20060_v47 = vld [vmem:[#allocation2 + $0x108] sm:$0xf] }
  0x6e   : > { %17176 = vmatprep.mubr.bf16.mxu1 %v715_v34  ;;  %v1227_v28 = vshrl.u32 %v14550_v60, 16  ;;  %v1215_v34 = vor.u32 %v1214_v9, %v1211_v8  ;;  %v1230_v37 = vshll.u32 %v14550_v60, 16  ;;  %v1245_v9 = vshrl.u32 %v14552_v61, 16 }
  0x6f   : > { %17191 = vmatpush3.bf16.msra.mxu0 %v19036_v10  ;;  %v911_v10 = vsel %vm899_vm2, %v907_v40, %v910_v0  ;;  %v19048_v40 = vld [vmem:[%s19813_s8 + $0x178] sm:$0xff]  }
  0x70   : > { %17223 = vmatpush3.bf16.msra.mxu1 %v19037_v18  ;;  %17192 = vmatprep.subr.bf16.mxu0 %v19040_v38  ;;  %v917_v18 = vrot.slane %v675_v7, 4  ;;  %v1220_v7 = vrot.slane %v1218_v22, 3  ;;  %v1229_v43 = vrot.slane %v1227_v28, 3  ;;  %v1232_v44 = vrot.slane %v1230_v37, 4  ;;  %v19056_v22 = vld [vmem:[%s19813_s8 + $0x160] sm:$0xff]  }
  0x71   : > { %17224 = vmatprep.subr.bf16.mxu1 %v19041_v50  ;;  %v1216_v52 = vsel %vm899_vm2, %v1206_v5, %v1215_v34  ;;  %v1241_v5 = vrot.slane %v1239_v59, 4  ;;  %v19061_v59 = vld [vmem:[%s19813_s8 + $0x110] sm:$0xff]  }
  0x72   : > { %17145 = vmatmul.mubr.bf16.gmra.mxu0 %v487_v63  ;;  %v918_v41 = vor.u32 %v917_v18, %v916_v16  ;;  %v922_v63 = vor.u32 %v921_v6, %v920_v2  ;;  %v1233_v8 = vor.u32 %v1232_v44, %v1229_v43  ;;  %v19063_v16 = vld [vmem:[#allocation2 + $0x108] ss:$0 sps:$4 sm:$0xff]   ;;  %v20064_v18 = vld [vmem:[#allocation2 + $0x10c] sm:$0xf] }
  0x73   : > { %17177 = vmatmul.mubr.bf16.gmra.mxu1 %v724_v19  ;;  %17193 = vmatpush3.bf16.msra.mxu0 %v19040_v38  ;;  %v1223_v38 = vrot.slane %v1221_v46, 4  ;;  %v1248_v19 = vshll.u32 %v14552_v61, 16  ;;  %v1242_v46 = vor.u32 %v1241_v5, %v1238_v3  ;;  %v937_v6 = vshrl.u32 %v19063_v16, 16  ;;  %v19062_v3 = vld [vmem:[%s19813_s8 + $0x150] sm:$0xff]  }
  0x74   : > { %17225 = vmatpush3.bf16.msra.mxu1 %v19041_v50  ;;  %17194 = vmatprep.subr.bf16.mxu0 %v19042_v42  ;;  %v915_v50 = vsel %vm899_vm2, %v910_v0, %v914_v14  ;;  %v919_v62 = vsel %vm899_vm2, %v914_v14, %v918_v41  ;;  %v925_v0 = vrot.slane %v693_v31, 4  ;;  %v929_v31 = vrot.slane %v702_v36, 4 }
  0x75   : > { %17226 = vmatprep.subr.bf16.mxu1 %v19043_v55  ;;  %17196 = vmatprep.mubr.bf16.mxu0 %v911_v10  ;;  %v1224_v53 = vor.u32 %v1223_v38, %v1220_v7  ;;  %v923_v60 = vsel %vm899_vm2, %v918_v41, %v922_v63  ;;  %v19055_v10 = vld [vmem:[%s19813_s8 + $0x120] sm:$0xff]   ;;  %v14553_v36 = vcombine.low %v20060_v47, %v20064_v18  ;;  %v940_v7 = vshll.u32 %v19063_v16, 16 }
  0x76   : > { %17228 = vmatprep.mubr.bf16.mxu1 %v1207_v21  ;;  %v20066_v21 = vld [vmem:[#allocation2 + $0x110] sm:$0xf]  ;;  %v930_v51 = vor.u32 %v929_v31, %v928_v23  ;;  %v1243_v38 = vsel %vm899_vm2, %v1233_v8, %v1242_v46  ;;  %v939_v61 = vrot.slane %v937_v6, 3  ;;  %v1713_v5 = vshrl.u32 %v19073_v4, 16  ;;  %v19068_v16 = vld [vmem:[%s19813_s8 + $0x100] sm:$0xff]  }
  0x77   : > { %17195 = vmatpush3.bf16.msra.mxu0 %v19042_v42  ;;  %v924_v42 = vrot.slane %v690_v30, 3  ;;  %v19054_v30 = vld [vmem:[%s19813_s8 + $0x168] sm:$0xff]   ;;  %v1234_v28 = vsel %vm899_vm2, %v1224_v53, %v1233_v8  ;;  %v1254_v37 = vshrl.u32 %v14553_v36, 16  ;;  %v1257_v2 = vshll.u32 %v14553_v36, 16 }
  0x78   : > { %17227 = vmatpush3.bf16.msra.mxu1 %v19043_v55  ;;  %17244 = vmatprep.subr.bf16.mxu0 %v19044_v33  ;;  %v1225_v55 = vsel %vm899_vm2, %v1215_v34, %v1224_v53  ;;  %v1250_v34 = vrot.slane %v1248_v19, 4  ;;  %v19060_v53 = vld [vmem:[%s19813_s8 + $0x158] sm:$0xff]  }
  0x79   : > { %17276 = vmatprep.subr.bf16.mxu1 %v19048_v40  ;;  %v926_v14 = vor.u32 %v925_v0, %v924_v42  ;;  %v1259_v41 = vrot.slane %v1257_v2, 4  ;;  %v1715_v42 = vshll.u32 %v19073_v4, 16  ;;  %v19078_v4 = vld [vmem:[%s19813_s8 + $0x1f0] sm:$0xff]  }
  0x7a   : > { %17197 = vmatmul.mubr.bf16.vlgmr.msra.gmra.mxu0 %v915_v50 }
  0x7b   : > { %17245 = vmatpush3.bf16.msra.mxu0 %v19044_v33  ;;  %17229 = vmatmul.mubr.bf16.vlgmr.msra.gmra.mxu1 %v1216_v52  ;;  %v1247_v33 = vrot.slane %v1245_v9, 3  ;;  %v927_v57 = vsel %vm899_vm2, %v922_v63, %v926_v14  ;;  %v931_v52 = vsel %vm899_vm2, %v926_v14, %v930_v51  ;;  %v19064_v9 = vld [vmem:[%s19813_s8 + $0x108] sm:$0xff]   ;;  %v1717_v19 = vrot.slane %v1715_v42, 1 }
  0x7c   : > { %17277 = vmatpush3.bf16.msra.mxu1 %v19048_v40  ;;  %17246 = vmatprep.subr.bf16.mxu0 %v19049_v39  ;;  %v14554_v40 = vcombine.low %v20066_v21, %v20066_v21  ;;  %v19067_v14 = vld [vmem:[%s19813_s8 + $0x148] sm:$0xff]  }
  0x7d   : > { %17278 = vmatprep.subr.bf16.mxu1 %v19050_v54  ;;  %17200 = vmatprep.mubr.bf16.mxu0 %v919_v62  ;;  %v1251_v43 = vor.u32 %v1250_v34, %v1247_v33  ;;  %v942_v62 = vrot.slane %v940_v7, 4  ;;  %v19069_v34 = vld [vmem:[%s19813_s8 + $0x140] sm:$0xff]  }
  0x7e   : > { %17232 = vmatprep.mubr.bf16.mxu1 %v1225_v55  ;;  %v1263_v44 = vshrl.u32 %v14554_v40, 16  ;;  %v1266_v50 = vshll.u32 %v14554_v40, 16  ;;  %v14579_v40 = vcombine.low %v19978_v24, %v19980_v27  ;;  %v14580_v24 = vcombine.low %v19982_v45, %v19989_v29  ;;  %v19077_v27 = vld [vmem:[%s19813_s8 + $0x1b0] sm:$0xff]  }
  0x7f   : > { %17247 = vmatpush3.bf16.msra.mxu0 %v19049_v39  ;;  %v1256_v39 = vrot.slane %v1254_v37, 3  ;;  %v1252_v0 = vsel %vm899_vm2, %v1242_v46, %v1251_v43  ;;  %v943_v23 = vor.u32 %v942_v62, %v939_v61  ;;  %v1718_v46 = vor.u32 %v1717_v19, %v1713_v5  ;;  %v19072_v37 = vld [vmem:[%s19813_s8 + $0x1b8] sm:$0xff]   ;;  %v19091_v62 = vld [vmem:[#allocation2 + $0x104] sm:$0xff]  }
  0x80   : > { %17279 = vmatpush3.bf16.msra.mxu1 %v19050_v54  ;;  %17248 = vmatprep.subr.bf16.mxu0 %v19051_v1  ;;  %v934_v54 = vor.u32 %v933_v35, %v932_v26  ;;  %v1268_v55 = vrot.slane %v1266_v50, 4  ;;  %v19082_v35 = vld [vmem:[#allocation2 + $0xec] sm:$0xff]   ;;  %v19085_v5 = vld [vmem:[%s19813_s8 + $0x1a0] sm:$0xff]  }
  0x81   : > { %17280 = vmatprep.subr.bf16.mxu1 %v19054_v30  ;;  %v1260_v63 = vor.u32 %v1259_v41, %v1256_v39  ;;  %v19090_v39 = vld [vmem:[#allocation2 + $0xfc] sm:$0xff]   ;;  %v1740_v50 = vshrl.u32 %v19082_v35, 16 }
  0x82   : > { %17201 = vmatmul.mubr.bf16.gmra.mxu0 %v923_v60  ;;  %v935_v8 = vsel %vm899_vm2, %v930_v51, %v934_v54  ;;  %v19086_v19 = vld [vmem:[%s19813_s8 + $0x1e0] sm:$0xff]  }
  0x83   : > { %17249 = vmatpush3.bf16.msra.mxu0 %v19051_v1  ;;  %17233 = vmatmul.mubr.bf16.gmra.mxu1 %v1234_v28  ;;  %v1265_v1 = vrot.slane %v1263_v44, 3  ;;  %v1261_v31 = vsel %vm899_vm2, %v1251_v43, %v1260_v63  ;;  %v1724_v28 = vshrl.u32 %v19074_v56, 16 }
  0x84   : > { %17281 = vmatpush3.bf16.msra.mxu1 %v19054_v30  ;;  %17250 = vmatprep.subr.bf16.mxu0 %v19055_v10  ;;  %v1720_v30 = vshll.u32 %v19074_v56, 16  ;;  %v19081_v56 = vld [vmem:[%s19813_s8 + $0x1a8] sm:$0xff]  }
  0x85   : > { %17282 = vmatprep.subr.bf16.mxu1 %v19056_v22  ;;  %17204 = vmatprep.mubr.bf16.mxu0 %v927_v57  ;;  %v1269_v60 = vor.u32 %v1268_v55, %v1265_v1  ;;  %v19076_v57 = vld [vmem:[%s19813_s8 + $0x1f8] sm:$0xff]   ;;  %v1950_v55 = vld [vmem:[#allocation2 + $0xe0] sm:$0xf] }
  0x86   : > { %17236 = vmatprep.mubr.bf16.mxu1 %v1243_v38  ;;  %v1722_v26 = vrot.slane %v1720_v30, 1  ;;  %v19083_v38 = vld [vmem:[#allocation2 + $0xf4] sm:$0xff]   ;;  %v1949_v1 = vld [vmem:[#allocation2 + $0xdc] sm:$0xf]  ;;  %v14583_v30 = vcombine.low %v20014_v15, %v20033_v48  ;;  %v20119_v15 = vld [vmem:[#allocation2 + $0xe4] sm:$0xff]   ;;  %v14584_v48 = vcombine.low %v20035_v49, %v20040_v11 }
  0x87   : > { %17251 = vmatpush3.bf16.msra.mxu0 %v19055_v10  ;;  %v19075_v10 = vld [vmem:[#allocation2 + $0xe4] sm:$0xff]   ;;  %v1270_v36 = vsel %vm899_vm2, %v1260_v63, %v1269_v60  ;;  %v1748_v29 = vshrl.u32 %v19083_v38, 16  ;;  %v2034_v49 = vshll.u32 %v20119_v15, 16  ;;  %v20129_v11 = vld [vmem:[#allocation2 + $0xec] sm:$0xff]  }
  0x88   : > { %17283 = vmatpush3.bf16.msra.mxu1 %v19056_v22  ;;  %17252 = vmatprep.subr.bf16.mxu0 %v19057_v58  ;;  %v944_v22 = vsel %vm899_vm2, %v934_v54, %v943_v23  ;;  %v1728_v33 = vshll.u32 %v19075_v10, 16  ;;  %v1723_v2 = vsel %vm1711_vm3, %v1718_v46, %v1722_v26  ;;  %v1732_v51 = vshrl.u32 %v19075_v10, 16  ;;  %v19084_v63 = vld [vmem:[%s19813_s8 + $0x1e8] sm:$0xff]   ;;  %v19099_v10 = vld [vmem:[#allocation2 + $0x114] ss:$0 sps:$4 sm:$0x11]  }
  0x89   : > { %17284 = vmatprep.subr.bf16.mxu1 %v19060_v53  ;;  %v1726_v6 = vor.u32 %v1724_v28, %v1722_v26  ;;  %v1752_v54 = vshll.u32 %v19090_v39, 16  ;;  %v14644_v23 = vcombine.low %v1949_v1, %v1950_v55  ;;  %v19093_v46 = vld [vmem:[%s19813_s8 + $0x190] sm:$0xff]  }
  0x8a   : > { %17205 = vmatmul.mubr.bf16.gmra.mxu0 %v931_v52  ;;  %v1730_v7 = vrot.slane %v1728_v33, 1  ;;  %v14581_v52 = vcombine.low %v19991_v32, %v20007_v17  ;;  %v19098_v32 = vld [vmem:[#allocation2 + $0x10c] sm:$0xff]   ;;  %v14582_v17 = vcombine.low %v20010_v20, %v20012_v13  ;;  %v19089_v20 = vld [vmem:[%s19813_s8 + $0x198] sm:$0xff]   ;;  %v1764_v13 = vshrl.u32 %v19091_v62, 16 }
  0x8b   : > { %17253 = vmatpush3.bf16.msra.mxu0 %v19057_v58  ;;  %17237 = vmatmul.mubr.bf16.gmra.mxu1 %v1252_v0  ;;  %v1736_v58 = vshll.u32 %v19082_v35, 16  ;;  %v1754_v42 = vrot.slane %v1752_v54, 1  ;;  %v1768_v60 = vshll.u32 %v19098_v32, 16  ;;  %v2029_v26 = vshll.u32 %v14644_v23, 16  ;;  %v19094_v35 = vld [vmem:[%s19813_s8 + $0x1d0] sm:$0xff]  }
  0x8c   : > { %17285 = vmatpush3.bf16.msra.mxu1 %v19060_v53  ;;  %17254 = vmatprep.subr.bf16.mxu0 %v19061_v59  ;;  %v1734_v41 = vor.u32 %v1732_v51, %v1730_v7  ;;  %v1731_v44 = vsel %vm1711_vm3, %v1726_v6, %v1730_v7  ;;  %v1744_v53 = vshll.u32 %v19083_v38, 16  ;;  %v1772_v33 = vshrl.u32 %v19098_v32, 16  ;;  %v19097_v7 = vld [vmem:[%s19813_s8 + $0x188] sm:$0xff]  }
  0x8d   : > { %17286 = vmatprep.subr.bf16.mxu1 %v19062_v3  ;;  %17208 = vmatprep.mubr.bf16.mxu0 %v935_v8  ;;  %v1738_v43 = vrot.slane %v1736_v58, 1  ;;  %v1756_v8 = vshrl.u32 %v19090_v39, 16  ;;  %v1770_v28 = vrot.slane %v1768_v60, 1  ;;  %v2031_v51 = vrot.slane %v2029_v26, 1  ;;  %v19111_v60 = vld [vmem:[%s19813_s8 + $0x228] sm:$0xff]  }
  0x8e   : > { %17240 = vmatprep.mubr.bf16.mxu1 %v1261_v31  ;;  %v1746_v61 = vrot.slane %v1744_v53, 1  ;;  %v2286_v53 = vrot.slane %v20119_v15, 1 }
  0x8f   : > { %17255 = vmatpush3.bf16.msra.mxu0 %v19061_v59  ;;  %v1739_v45 = vsel %vm1711_vm3, %v1734_v41, %v1738_v43  ;;  %v1742_v59 = vor.u32 %v1740_v50, %v1738_v43  ;;  %v1774_v38 = vor.u32 %v1772_v33, %v1770_v28  ;;  %v2036_v41 = vrot.slane %v2034_v49, 1 }
  0x90   : > { %17287 = vmatpush3.bf16.msra.mxu1 %v19062_v3  ;;  %17256 = vmatprep.subr.bf16.mxu0 %v19064_v9  ;;  %v1750_v0 = vor.u32 %v1748_v29, %v1746_v61  ;;  %v2038_v43 = vshrl.u32 %v20119_v15, 16 }
  0x91   : > { %17288 = vmatprep.subr.bf16.mxu1 %v19067_v14  ;;  %v1747_v3 = vsel %vm1711_vm3, %v1742_v59, %v1746_v61  ;;  %v20157_v61 = vld [vmem:[#allocation2 + $0xfc] sm:$0xff]  }
  0x92   : > { %17209 = vmatmul.mubr.bf16.gmra.mxu0 %v944_v22  ;;  %v1755_v31 = vsel %vm1711_vm3, %v1750_v0, %v1754_v42  ;;  %v19092_v22 = vld [vmem:[%s19813_s8 + $0x1d8] sm:$0xff]   ;;  %v2040_v29 = vor.u32 %v2038_v43, %v2036_v41 }
  0x93   : > { %17257 = vmatpush3.bf16.msra.mxu0 %v19064_v9  ;;  %17241 = vmatmul.mubr.bf16.gmra.mxu1 %v1270_v36  ;;  %v1760_v9 = vshll.u32 %v19091_v62, 16  ;;  %v19106_v62 = vld [vmem:[%s19813_s8 + $0x238] sm:$0xff]  }
  0x94   : > { %17289 = vmatpush3.bf16.msra.mxu1 %v19067_v14  ;;  %17258 = vmatprep.subr.bf16.mxu0 %v19068_v16  ;;  %v1758_v14 = vor.u32 %v1756_v8, %v1754_v42  ;;  %v19108_v8 = vld [vmem:[%s19813_s8 + $0x230] sm:$0xff]  }
  0x95   : > { %17290 = vmatprep.subr.bf16.mxu1 %v19069_v34  ;;  %17260 = vmatprep.mubr.bf16.mxu0 %v14579_v40 }
  0x96   : > { %17292 = vmatprep.mubr.bf16.mxu1 %v1723_v2  ;;  %v14585_v2 = vcombine.low %v20042_v12, %v20060_v47  ;;  %v14586_v12 = vcombine.low %v20064_v18, %v20066_v21  ;;  %v19100_v47 = vld [vmem:[%s19813_s8 + $0x1c8] sm:$0xff]   ;;  %v19101_v21 = vld [vmem:[%s19813_s8 + $0x180] sm:$0xff]  }
  0x97   : > { %17259 = vmatpush3.bf16.msra.mxu0 %v19068_v16  ;;  %v1762_v16 = vrot.slane %v1760_v9, 1 }
  0x98   : > { %17291 = vmatpush3.bf16.msra.mxu1 %v19069_v34  ;;  %17308 = vmatprep.subr.bf16.mxu0 %v19072_v37  ;;  %v1776_v34 = vshll.u32 %v19099_v10, 16  ;;  %v2292_v10 = vrot.slane %v20157_v61, 1 }
  0x99   : > { %17340 = vmatprep.subr.bf16.mxu1 %v19076_v57  ;;  %v1766_v36 = vor.u32 %v1764_v13, %v1762_v16  ;;  %v1763_v40 = vsel %vm1711_vm3, %v1758_v14, %v1762_v16 }
  0x9a   : > { %17261 = vmatmul.mubr.bf16.vlgmr.msra.gmra.mxu0 %v14580_v24  ;;  %v1778_v39 = vrot.slane %v1776_v34, 1  ;;  %v20138_v24 = vld [vmem:[#allocation2 + $0xf4] sm:$0xff]  }
  0x9b   : > { %17309 = vmatpush3.bf16.msra.mxu0 %v19072_v37  ;;  %17293 = vmatmul.mubr.bf16.vlgmr.msra.gmra.mxu1 %v1731_v44  ;;  %v2263_v37 = vld [vmem:[#allocation2 + $0xdc] sm:$0xe]  ;;  %v1771_v58 = vsel %vm1711_vm3, %v1766_v36, %v1770_v28  ;;  %v2042_v44 = vshll.u32 %v20129_v11, 16  ;;  %v2050_v54 = vshll.u32 %v20138_v24, 16  ;;  %v2290_v0 = vrot.slane %v20138_v24, 1  ;;  %v19112_v28 = vld [vmem:[%s19813_s8 + $0x220] sm:$0xff]  }
  0x9c   : > { %17341 = vmatpush3.bf16.msra.mxu1 %v19076_v57  ;;  %17310 = vmatprep.subr.bf16.mxu0 %v19077_v27  ;;  %v2027_v57 = vshrl.u32 %v14644_v23, 16  ;;  %v20132_v6 = vcombine.low %v2263_v37, %v1950_v55  ;;  %v1779_v18 = vsel %vm1711_vm3, %v1774_v38, %v1778_v39  ;;  %v2054_v55 = vshrl.u32 %v20138_v24, 16 }
  0x9d   : > { %17342 = vmatprep.subr.bf16.mxu1 %v19078_v4  ;;  %17264 = vmatprep.mubr.bf16.mxu0 %v14581_v52  ;;  %v2046_v52 = vshrl.u32 %v20129_v11, 16  ;;  %v2052_v32 = vrot.slane %v2050_v54, 1  ;;  %v2293_v36 = vsel %vm2284_vm4, %v2290_v0, %v2292_v10 }
  0x9e   : > { %17296 = vmatprep.mubr.bf16.mxu1 %v1739_v45  ;;  %v2285_v50 = vrot.slane %v20132_v6, 1  ;;  %v2494_v38 = vshrl.u32 %v20132_v6, 16 }
  0x9f   : > { %17311 = vmatpush3.bf16.msra.mxu0 %v19077_v27  ;;  %v2032_v27 = vor.u32 %v2031_v51, %v2027_v57  ;;  %v2056_v13 = vor.u32 %v2054_v55, %v2052_v32  ;;  %v19118_v51 = vld [vmem:[#allocation2 + $0x11c] ss:$0 sps:$4 sm:$0x11]   ;;  %v2505_v15 = vrot.slane %v2046_v52, 1 }
  0xa0   : > { %17343 = vmatpush3.bf16.msra.mxu1 %v19078_v4  ;;  %17312 = vmatprep.subr.bf16.mxu0 %v19081_v56  ;;  %v19102_v4 = vld [vmem:[%s19813_s8 + $0x1c0] sm:$0xff]   ;;  %v2287_v59 = vsel %vm2284_vm4, %v2285_v50, %v2286_v53 }
  0xa1   : > { %17344 = vmatprep.subr.bf16.mxu1 %v19084_v63  ;;  %v2037_v45 = vsel %vm1711_vm3, %v2032_v27, %v2036_v41 }
  0xa2   : > { %17265 = vmatmul.mubr.bf16.gmra.mxu0 %v14582_v17  ;;  %v20165_v17 = vld [vmem:[#allocation2 + $0x104] sm:$0xff]  }
  0xa3   : > { %17313 = vmatpush3.bf16.msra.mxu0 %v19081_v56  ;;  %17297 = vmatmul.mubr.bf16.gmra.mxu1 %v1747_v3  ;;  %v2044_v56 = vrot.slane %v2042_v44, 1  ;;  %v2058_v3 = vshll.u32 %v20157_v61, 16  ;;  %v2070_v26 = vshrl.u32 %v20165_v17, 16 }
  0xa4   : > { %17345 = vmatpush3.bf16.msra.mxu1 %v19084_v63  ;;  %17314 = vmatprep.subr.bf16.mxu0 %v19085_v5  ;;  %v2288_v63 = vrot.slane %v20129_v11, 1 }
  0xa5   : > { %17346 = vmatprep.subr.bf16.mxu1 %v19086_v19  ;;  %17268 = vmatprep.mubr.bf16.mxu0 %v14583_v30  ;;  %v2048_v42 = vor.u32 %v2046_v52, %v2044_v56  ;;  %v2045_v1 = vsel %vm1711_vm3, %v2040_v29, %v2044_v56  ;;  %v2066_v30 = vshll.u32 %v20165_v17, 16  ;;  %v2060_v23 = vrot.slane %v2058_v3, 1 }
  0xa6   : > { %17300 = vmatprep.mubr.bf16.mxu1 %v1755_v31  ;;  %v20181_v31 = vld [vmem:[#allocation2 + $0x10c] sm:$0xff]   ;;  %v2502_v56 = vrot.slane %v2034_v49, 2 }
  0xa7   : > { %17315 = vmatpush3.bf16.msra.mxu0 %v19085_v5  ;;  %v2289_v5 = vsel %vm2284_vm4, %v2286_v53, %v2288_v63  ;;  %v2053_v9 = vsel %vm1711_vm3, %v2048_v42, %v2052_v32  ;;  %v2068_v16 = vrot.slane %v2066_v30, 1  ;;  %v2078_v34 = vshrl.u32 %v20181_v31, 16  ;;  %v19119_v42 = vld [vmem:[%s19813_s8 + $0x208] sm:$0xff]  }
  0xa8   : > { %17347 = vmatpush3.bf16.msra.mxu1 %v19086_v19  ;;  %17316 = vmatprep.subr.bf16.mxu0 %v19089_v20  ;;  %v2062_v19 = vshrl.u32 %v20157_v61, 16  ;;  %v2090_v53 = vshll.u32 %v19118_v51, 16  ;;  %v2300_v32 = vrot.slane %v19118_v51, 1 }
  0xa9   : > { %17348 = vmatprep.subr.bf16.mxu1 %v19092_v22 }
  0xaa   : > { %17269 = vmatmul.mubr.bf16.gmra.mxu0 %v14584_v48  ;;  %v2064_v14 = vor.u32 %v2062_v19, %v2060_v23  ;;  %v2294_v48 = vrot.slane %v20165_v17, 1 }
  0xab   : > { %17317 = vmatpush3.bf16.msra.mxu0 %v19089_v20  ;;  %17301 = vmatmul.mubr.bf16.gmra.mxu1 %v1763_v40  ;;  %v2291_v20 = vsel %vm2284_vm4, %v2288_v63, %v2290_v0  ;;  %v2092_v63 = vrot.slane %v2090_v53, 1 }
  0xac   : > { %17349 = vmatpush3.bf16.msra.mxu1 %v19092_v22  ;;  %17318 = vmatprep.subr.bf16.mxu0 %v19093_v46  ;;  %v20189_v22 = vld [vmem:[#allocation2 + $0x114] sm:$0xff]   ;;  %v2069_v33 = vsel %vm1711_vm3, %v2064_v14, %v2068_v16  ;;  %v2295_v37 = vsel %vm2284_vm4, %v2292_v10, %v2294_v48 }
  0xad   : > { %17350 = vmatprep.subr.bf16.mxu1 %v19094_v35  ;;  %17272 = vmatprep.mubr.bf16.mxu0 %v14585_v2  ;;  %v2082_v40 = vshll.u32 %v20189_v22, 16  ;;  %v2072_v2 = vor.u32 %v2070_v26, %v2068_v16  ;;  %v2298_v27 = vrot.slane %v20189_v22, 1  ;;  %v2086_v50 = vshrl.u32 %v20189_v22, 16 }
  0xae   : > { %17304 = vmatprep.mubr.bf16.mxu1 %v1771_v58  ;;  %v19115_v58 = vld [vmem:[%s19813_s8 + $0x218] sm:$0xff]  }
  0xaf   : > { %17319 = vmatpush3.bf16.msra.mxu0 %v19093_v46  ;;  %v2061_v46 = vsel %vm1711_vm3, %v2056_v13, %v2060_v23  ;;  %v2513_v23 = vrot.slane %v2062_v19, 1  ;;  %v2521_v19 = vrot.slane %v2078_v34, 1  ;;  %v2526_v17 = vrot.slane %v2082_v40, 2 }
  0xb0   : > { %17351 = vmatpush3.bf16.msra.mxu1 %v19094_v35  ;;  %17320 = vmatprep.subr.bf16.mxu0 %v19097_v7  ;;  %v2074_v35 = vshll.u32 %v20181_v31, 16 }
  0xb1   : > { %17352 = vmatprep.subr.bf16.mxu1 %v19100_v47 }
  0xb2   : > { %17273 = vmatmul.mubr.bf16.gmra.mxu0 %v14586_v12  ;;  %v2076_v57 = vrot.slane %v2074_v35, 1  ;;  %v2084_v12 = vrot.slane %v2082_v40, 1  ;;  %v2522_v61 = vrot.slane %v2074_v35, 2 }
  0xb3   : > { %17321 = vmatpush3.bf16.msra.mxu0 %v19097_v7  ;;  %17305 = vmatmul.mubr.bf16.gmra.mxu1 %v1779_v18  ;;  %v2296_v7 = vrot.slane %v20181_v31, 1 }
  0xb4   : > { %17353 = vmatpush3.bf16.msra.mxu1 %v19100_v47  ;;  %17322 = vmatprep.subr.bf16.mxu0 %v19101_v21  ;;  %v2080_v39 = vor.u32 %v2078_v34, %v2076_v57  ;;  %v2497_v47 = vshll.u32 %v20132_v6, 16  ;;  %v2077_v41 = vsel %vm1711_vm3, %v2072_v2, %v2076_v57  ;;  %v2501_v6 = vrot.slane %v2038_v43, 1 }
  0xb5   : > { %17354 = vmatprep.subr.bf16.mxu1 %v19102_v4  ;;  %17324 = vmatprep.mubr.bf16.mxu0 %v2037_v45  ;;  %v2297_v18 = vsel %vm2284_vm4, %v2294_v48, %v2296_v7  ;;  %v2506_v43 = vrot.slane %v2042_v44, 2 }
  0xb6   : > { %17356 = vmatprep.mubr.bf16.mxu1 %v2287_v59  ;;  %v2085_v45 = vsel %vm1711_vm3, %v2080_v39, %v2084_v12  ;;  %v2499_v29 = vrot.slane %v2497_v47, 2  ;;  %v2299_v59 = vsel %vm2284_vm4, %v2296_v7, %v2298_v27 }
  0xb7   : > { %17323 = vmatpush3.bf16.msra.mxu0 %v19101_v21  ;;  %v19116_v21 = vld [vmem:[%s19813_s8 + $0x210] sm:$0xff]   ;;  %v2507_v52 = vor.u32 %v2506_v43, %v2505_v15 }
  0xb8   : > { %17355 = vmatpush3.bf16.msra.mxu1 %v19102_v4  ;;  %17372 = vmatprep.subr.bf16.mxu0 %v19106_v62  ;;  %v2496_v4 = vrot.slane %v2494_v38, 1 }
  0xba   : > { %17325 = vmatmul.mubr.bf16.vlgmr.msra.gmra.mxu0 %v2045_v1  ;;  %v2500_v0 = vor.u32 %v2499_v29, %v2496_v4  ;;  %v2503_v1 = vor.u32 %v2502_v56, %v2501_v6 }
  0xbb   : > { %17373 = vmatpush3.bf16.msra.mxu0 %v19106_v62  ;;  %17357 = vmatmul.mubr.bf16.vlgmr.msra.gmra.mxu1 %v2289_v5  ;;  %v2088_v62 = vor.u32 %v2086_v50, %v2084_v12  ;;  %v2301_v5 = vsel %vm2284_vm4, %v2298_v27, %v2300_v32 }
  0xbc   : > { %17374 = vmatprep.subr.bf16.mxu0 %v19108_v8  ;;  %17328 = vmatprep.mubr.bf16.mxu0 %v2053_v9  ;;  %v2509_v9 = vrot.slane %v2054_v55, 1  ;;  %v2504_v13 = vsel %vm2492_vm5, %v2500_v0, %v2503_v1  ;;  %v2508_v44 = vsel %vm2492_vm5, %v2503_v1, %v2507_v52  ;;  %v2514_v55 = vrot.slane %v2058_v3, 2  ;;  %v19121_v3 = vld [vmem:[#allocation2 + $0x11c] ss:$0 sps:$4 sm:$0x33]  }
  0xbd   : > { %17360 = vmatprep.mubr.bf16.mxu1 %v2291_v20  ;;  %v2093_v49 = vsel %vm1711_vm3, %v2088_v62, %v2092_v63  ;;  %v2510_v20 = vrot.slane %v2050_v54, 2  ;;  %v2517_v54 = vrot.slane %v2070_v26, 1  ;;  %v2530_v26 = vshrl.u32 %v19121_v3, 16 }
  0xbe   : > { %v2515_v10 = vor.u32 %v2514_v55, %v2513_v23 }
  0xbf   : > { %17375 = vmatpush3.bf16.msra.mxu0 %v19108_v8  ;;  %v19120_v8 = vld [vmem:[%s19813_s8 + $0x200] sm:$0xff]   ;;  %v2511_v11 = vor.u32 %v2510_v20, %v2509_v9 }
  0xc0   : > { %17376 = vmatprep.subr.bf16.mxu0 %v19111_v60 }
  0xc1   : > { %v2512_v24 = vsel %vm2492_vm5, %v2507_v52, %v2511_v11  ;;  %v2516_v16 = vsel %vm2492_vm5, %v2511_v11, %v2515_v10 }
  0xc2   : > { %17329 = vmatmul.mubr.bf16.gmra.mxu0 %v2061_v46  ;;  %v2525_v46 = vrot.slane %v2086_v50, 1 }
  0xc3   : > { %17377 = vmatpush3.bf16.msra.mxu0 %v19111_v60  ;;  %17361 = vmatmul.mubr.bf16.gmra.mxu1 %v2293_v36  ;;  %v2518_v60 = vrot.slane %v2066_v30, 2  ;;  %v2523_v30 = vor.u32 %v2522_v61, %v2521_v19  ;;  %v2533_v36 = vshll.u32 %v19121_v3, 16 }
  0xc4   : > { %17378 = vmatprep.subr.bf16.mxu0 %v19112_v28  ;;  %17332 = vmatprep.mubr.bf16.mxu0 %v2069_v33 }
  0xc5   : > { %17364 = vmatprep.mubr.bf16.mxu1 %v2295_v37  ;;  %v2519_v14 = vor.u32 %v2518_v60, %v2517_v54  ;;  %v2532_v37 = vrot.slane %v2530_v26, 1  ;;  %v2535_v34 = vrot.slane %v2533_v36, 2 }
  0xc7   : > { %17379 = vmatpush3.bf16.msra.mxu0 %v19112_v28  ;;  %v2520_v48 = vsel %vm2492_vm5, %v2515_v10, %v2519_v14  ;;  %v2527_v28 = vor.u32 %v2526_v17, %v2525_v46  ;;  %v2524_v33 = vsel %vm2492_vm5, %v2519_v14, %v2523_v30  ;;  %v2536_v35 = vor.u32 %v2535_v34, %v2532_v37 }
  0xc8   : > { %17380 = vmatprep.subr.bf16.mxu0 %v19115_v58 }
  0xc9   : > { %v2528_v31 = vsel %vm2492_vm5, %v2523_v30, %v2527_v28  ;;  %v2537_v2 = vsel %vm2492_vm5, %v2527_v28, %v2536_v35 }
  0xca   : > { %17333 = vmatmul.mubr.bf16.gmra.mxu0 %v2077_v41 }
  0xcb   : > { %17381 = vmatpush3.bf16.msra.mxu0 %v19115_v58  ;;  %17365 = vmatmul.mubr.bf16.gmra.mxu1 %v2297_v18 }
  0xcc   : > { %17382 = vmatprep.subr.bf16.mxu0 %v19116_v21  ;;  %17336 = vmatprep.mubr.bf16.mxu0 %v2085_v45 }
  0xcd   : > { %17368 = vmatprep.mubr.bf16.mxu1 %v2299_v59 }
  0xcf   : > { %17383 = vmatpush3.bf16.msra.mxu0 %v19116_v21 }
  0xd0   : > { %17384 = vmatprep.subr.bf16.mxu0 %v19119_v42 }
  0xd2   : > { %17337 = vmatmul.mubr.bf16.gmra.mxu0 %v2093_v49 }
  0xd3   : > { %17385 = vmatpush3.bf16.msra.mxu0 %v19119_v42  ;;  %17369 = vmatmul.mubr.bf16.gmra.mxu1 %v2301_v5 }
  0xd4   : > { %17386 = vmatprep.subr.bf16.mxu0 %v19120_v8  ;;  %17388 = vmatprep.mubr.bf16.mxu0 %v2504_v13 }
  0xd7   : > { %17387 = vmatpush3.bf16.msra.mxu0 %v19120_v8 }
  0xda   : > { %17389 = vmatmul.mubr.bf16.vlgmr.msra.gmra.mxu0 %v2508_v44 }
  0xdb   : > { %17392 = vmatprep.mubr.bf16.mxu0 %v2512_v24 }
  0xe2   : > { %17393 = vmatmul.mubr.bf16.gmra.mxu0 %v2516_v16 }
  0xe3   : > { %17396 = vmatprep.mubr.bf16.mxu0 %v2520_v48 }
  0xea   : > { %17397 = vmatmul.mubr.bf16.gmra.mxu0 %v2524_v33 }
  0xeb   : > { %17400 = vmatprep.mubr.bf16.mxu0 %v2528_v31 }
  0xf2   : > { %17401 = vmatmul.mubr.bf16.gmra.mxu0 %v2537_v2 }
 0x11a   : > { %v17134_v22 = vpop.f32.mrf.mxu0 }
 0x11b   : > { %v17166_v40 = vpop.f32.mrf.mxu1 }
 0x11c   : > { %v824_v57 = vadd.f32 %v17166_v40, %v17134_v22  ;;  %v578_v51 = vpop.f32.mrf.mxu0 }
 0x11d   : > { %v815_v58 = vpop.f32.mrf.mxu1 }
 0x11e   : > { %v816_v7 = vadd.f32 %v815_v58, %v578_v51  ;;  %v17135_v38 = vpop.f32.mrf.mxu0 }
 0x11f   : > { %v17167_v39 = vpop.f32.mrf.mxu1 }
 0x120   : > { %v827_v12 = vadd.f32 %v17167_v39, %v17135_v38  ;;  %v581_v47 = vpop.f32.mrf.mxu0 }
 0x121   : > { %v818_v27 = vpop.f32.mrf.mxu1 }
 0x122   : > { %v819_v41 = vadd.f32 %v818_v27, %v581_v47  ;;  %v17138_v50 = vpop.f32.mrf.mxu0 }
 0x123   : > { %v17170_v53 = vpop.f32.mrf.mxu1 }
 0x124   : > { %v840_v18 = vadd.f32 %v17170_v53, %v17138_v50  ;;  %v594_v21 = vpop.f32.mrf.mxu0 }
 0x125   : > { %v831_v4 = vpop.f32.mrf.mxu1 }
 0x126   : > { %v832_v45 = vadd.f32 %v831_v4, %v594_v21  ;;  %v17139_v29 = vpop.f32.mrf.mxu0 }
 0x127   : > { %v17171_v6 = vpop.f32.mrf.mxu1 }
 0x128   : > { %v843_v56 = vadd.f32 %v17171_v6, %v17139_v29  ;;  %v597_v59 = vpop.f32.mrf.mxu0 }
 0x129   : > { %v834_v62 = vpop.f32.mrf.mxu1 }
 0x12a   : > { %v835_v63 = vadd.f32 %v834_v62, %v597_v59  ;;  %v17142_v42 = vpop.f32.mrf.mxu0 }
 0x12b   : > { %v17174_v32 = vpop.f32.mrf.mxu1 }
 0x12c   : > { %v856_v0 = vadd.f32 %v17174_v32, %v17142_v42  ;;  %v610_v1 = vpop.f32.mrf.mxu0 }
 0x12d   : > { %v847_v15 = vpop.f32.mrf.mxu1 }
 0x12e   : > { %v848_v49 = vadd.f32 %v847_v15, %v610_v1  ;;  %v17143_v43 = vpop.f32.mrf.mxu0 }
 0x12f   : > { %v17175_v5 = vpop.f32.mrf.mxu1 }
 0x130   : > { %v859_v8 = vadd.f32 %v17175_v5, %v17143_v43  ;;  %v613_v9 = vpop.f32.mrf.mxu0 }
 0x131   : > { %v850_v20 = vpop.f32.mrf.mxu1 }
 0x132   : > { %v851_v13 = vadd.f32 %v850_v20, %v613_v9  ;;  %v17146_v52 = vpop.f32.mrf.mxu0 }
 0x133   : > { %v17178_v11 = vpop.f32.mrf.mxu1 }
 0x134   : > { %v872_v44 = vadd.f32 %v17178_v11, %v17146_v52  ;;  %v626_v23 = vpop.f32.mrf.mxu0 }
 0x135   : > { %v863_v55 = vpop.f32.mrf.mxu1 }
 0x136   : > { %v864_v24 = vadd.f32 %v863_v55, %v626_v23  ;;  %v17147_v54 = vpop.f32.mrf.mxu0 }
 0x137   : > { %v17179_v60 = vpop.f32.mrf.mxu1 }
 0x138   : > { %v875_v10 = vadd.f32 %v17179_v60, %v17147_v54  ;;  %v629_v14 = vpop.f32.mrf.mxu0 }
 0x139   : > { %v866_v16 = vpop.f32.mrf.mxu1 }
 0x13a   : > { %v867_v19 = vadd.f32 %v866_v16, %v629_v14  ;;  %v17198_v61 = vpop.f32.mrf.mxu0 }
 0x13b   : > { %v1100_v3 = vadd.f32 %v17198_v61, %v824_v57  ;;  %v17230_v48 = vpop.f32.mrf.mxu1 }
 0x13c   : > { %v1035_v46 = vpop.f32.mrf.mxu0 }
 0x13d   : > { %v1098_v17 = vadd.f32 %v1035_v46, %v816_v7  ;;  %v1426_v30 = vadd.f32 %v17230_v48, %v1100_v3  ;;  %v1361_v26 = vpop.f32.mrf.mxu1 }
 0x13e   : > { %v17199_v36 = vpop.f32.mrf.mxu0 }
 0x13f   : > { %v1101_v28 = vadd.f32 %v17199_v36, %v827_v12  ;;  %v1424_v33 = vadd.f32 %v1361_v26, %v1098_v17  ;;  %v17231_v37 = vpop.f32.mrf.mxu1 }
 0x140   : > { %v1038_v34 = vpop.f32.mrf.mxu0 }
 0x141   : > { %v1099_v31 = vadd.f32 %v1038_v34, %v819_v41  ;;  %v1427_v35 = vadd.f32 %v17231_v37, %v1101_v28  ;;  %v1364_v2 = vpop.f32.mrf.mxu1 }
 0x142   : > { %v17202_v22 = vpop.f32.mrf.mxu0 }
 0x143   : > { %v1104_v40 = vadd.f32 %v17202_v22, %v840_v18  ;;  %v1425_v51 = vadd.f32 %v1364_v2, %v1099_v31  ;;  %v17234_v58 = vpop.f32.mrf.mxu1 }
 0x144   : > { %v1051_v38 = vpop.f32.mrf.mxu0 }
 0x145   : > { %v1102_v39 = vadd.f32 %v1051_v38, %v832_v45  ;;  %v1430_v57 = vadd.f32 %v17234_v58, %v1104_v40  ;;  %v1377_v47 = vpop.f32.mrf.mxu1 }
 0x146   : > { %v17203_v27 = vpop.f32.mrf.mxu0 }
 0x147   : > { %v1105_v7 = vadd.f32 %v17203_v27, %v843_v56  ;;  %v1428_v50 = vadd.f32 %v1377_v47, %v1102_v39  ;;  %v17235_v53 = vpop.f32.mrf.mxu1 }
 0x148   : > { %v1054_v21 = vpop.f32.mrf.mxu0 }
 0x149   : > { %v1103_v12 = vadd.f32 %v1054_v21, %v835_v63  ;;  %v1431_v4 = vadd.f32 %v17235_v53, %v1105_v7  ;;  %v1380_v29 = vpop.f32.mrf.mxu1 }
 0x14a   : > { %v17206_v6 = vpop.f32.mrf.mxu0 }
 0x14b   : > { %v1108_v41 = vadd.f32 %v17206_v6, %v856_v0  ;;  %v1429_v59 = vadd.f32 %v1380_v29, %v1103_v12  ;;  %v17238_v62 = vpop.f32.mrf.mxu1 }
 0x14c   : > { %v1067_v42 = vpop.f32.mrf.mxu0 }
 0x14d   : > { %v1106_v18 = vadd.f32 %v1067_v42, %v848_v49  ;;  %v1434_v32 = vadd.f32 %v17238_v62, %v1108_v41  ;;  %v1393_v1 = vpop.f32.mrf.mxu1 }
 0x14e   : > { %v17207_v15 = vpop.f32.mrf.mxu0 }
 0x14f   : > { %v1109_v45 = vadd.f32 %v17207_v15, %v859_v8  ;;  %v1432_v43 = vadd.f32 %v1393_v1, %v1106_v18  ;;  %v17239_v5 = vpop.f32.mrf.mxu1 }
 0x150   : > { %v1070_v9 = vpop.f32.mrf.mxu0 }
 0x151   : > { %v1107_v56 = vadd.f32 %v1070_v9, %v851_v13  ;;  %v1435_v20 = vadd.f32 %v17239_v5, %v1109_v45  ;;  %v1396_v52 = vpop.f32.mrf.mxu1 }
 0x152   : > { %v17210_v11 = vpop.f32.mrf.mxu0 }
 0x153   : > { %v20258_v63 = vadd.f32 %v17210_v11, %v872_v44  ;;  %v1433_v23 = vadd.f32 %v1396_v52, %v1107_v56  ;;  %v20260_v55 = vpop.f32.mrf.mxu1 }
 0x154   : > { %v1083_v0 = vpop.f32.mrf.mxu0 }
 0x155   : > { %v20262_v54 = vadd.f32 %v1083_v0, %v864_v24  ;;  %v20264_v49 = vpop.f32.mrf.mxu1 }
 0x156   : > { %v17211_v60 = vpop.f32.mrf.mxu0 }
 0x157   : > { %v20266_v14 = vadd.f32 %v17211_v60, %v875_v10  ;;  %v20268_v8 = vpop.f32.mrf.mxu1 }
 0x158   : > { %v1086_v16 = vpop.f32.mrf.mxu0 }
 0x159   : > { %v20270_v13 = vadd.f32 %v1086_v16, %v867_v19  ;;  %v20272_v61 = vpop.f32.mrf.mxu1 }
 0x15a   : > { %23882 = vst [vmem:[#allocation5_spill] sm:$0xff] %v20272_v61  ;;  %v17262_v44 = vpop.f32.mrf.mxu0 }
 0x15b   : > { %23881 = vst [vmem:[#allocation4_spill] sm:$0xff] %v20270_v13  ;;  %v20274_v3 = vadd.f32 %v17262_v44, %v1426_v30  ;;  %v20276_v48 = vpop.f32.mrf.mxu1 }
 0x15c   : > { %v1555_v46 = vpop.f32.mrf.mxu0 }
 0x15d   : > { %v20278_v24 = vadd.f32 %v1555_v46, %v1424_v33  ;;  %v20280_v17 = vpop.f32.mrf.mxu1 }
 0x15e   : > { %v17263_v26 = vpop.f32.mrf.mxu0 }
 0x15f   : > { %v20282_v10 = vadd.f32 %v17263_v26, %v1427_v35  ;;  %v20284_v36 = vpop.f32.mrf.mxu1 }
 0x160   : > { %v1558_v28 = vpop.f32.mrf.mxu0 }
 0x161   : > { %v20286_v19 = vadd.f32 %v1558_v28, %v1425_v51  ;;  %v20288_v37 = vpop.f32.mrf.mxu1  ;;  %v1936_v61 = vadd.f32 %v20284_v36, %v20282_v10 }
 0x162   : > { %v17266_v34 = vpop.f32.mrf.mxu0 }
 0x163   : > { %v20290_v30 = vadd.f32 %v17266_v34, %v1430_v57  ;;  %v20292_v31 = vpop.f32.mrf.mxu1 }
 0x164   : > { %v1571_v2 = vpop.f32.mrf.mxu0 }
 0x165   : > { %v20294_v33 = vadd.f32 %v1571_v2, %v1428_v50  ;;  %v20296_v22 = vpop.f32.mrf.mxu1  ;;  %v2708_v2 = vlaneseq }
 0x166   : > { %v17267_v40 = vpop.f32.mrf.mxu0 }
 0x167   : > { %v20298_v35 = vadd.f32 %v17267_v40, %v1431_v4  ;;  %v20300_v58 = vpop.f32.mrf.mxu1  ;;  %v1937_v10 = vadd.f32 %v20296_v22, %v20294_v33 }
 0x168   : > { %v1574_v38 = vpop.f32.mrf.mxu0 }
 0x169   : > { %v20302_v51 = vadd.f32 %v1574_v38, %v1429_v59  ;;  %v20304_v39 = vpop.f32.mrf.mxu1 }
 0x16a   : > { %v17270_v47 = vpop.f32.mrf.mxu0 }
 0x16b   : > { %v20306_v57 = vadd.f32 %v17270_v47, %v1434_v32  ;;  %v20308_v27 = vpop.f32.mrf.mxu1  ;;  %v1938_v22 = vadd.f32 %v20304_v39, %v20302_v51 }
 0x16c   : > { %v1587_v7 = vpop.f32.mrf.mxu0 }
 0x16d   : > { %v20310_v50 = vadd.f32 %v1587_v7, %v1432_v43  ;;  %v20312_v53 = vpop.f32.mrf.mxu1  ;;  %v2709_v7 = vshrl.u32 %v2708_v2, 7 }
 0x16e   : > { %v17271_v21 = vpop.f32.mrf.mxu0 }
 0x16f   : > { %v20314_v12 = vadd.f32 %v17271_v21, %v1435_v20  ;;  %v20316_v4 = vpop.f32.mrf.mxu1 }
 0x170   : > { %v1590_v29 = vpop.f32.mrf.mxu0 }
 0x171   : > { %v20318_v6 = vadd.f32 %v1590_v29, %v1433_v23  ;;  %v20320_v41 = vpop.f32.mrf.mxu1  ;;  %v1935_v29 = vadd.f32 %v20276_v48, %v20274_v3  ;;  %v1934_v3 = vadd.f32 %v20288_v37, %v20286_v19  ;;  %v1940_v37 = vadd.f32 %v20300_v58, %v20298_v35 }
 0x172   : > { %v20322_v59 = vpop.f32.mrf.mxu0 }
 0x173   : > { %v20324_v62 = vpop.f32.mrf.mxu1 }
 0x174   : > { %23883 = vst [vmem:[#allocation6_spill] sm:$0xff] %v20324_v62  ;;  %v20326_v42 = vpop.f32.mrf.mxu0 }
 0x175   : > { %v20328_v18 = vpop.f32.mrf.mxu1 }
 0x176   : > { %23884 = vst [vmem:[#allocation7_spill] sm:$0xff] %v20328_v18  ;;  %v20330_v32 = vpop.f32.mrf.mxu0 }
 0x177   : > { %23885 = vst [vmem:[#allocation8_spill] sm:$0xff] %v20330_v32  ;;  %v20332_v1 = vpop.f32.mrf.mxu1  ;;  %v2710_v32 = vsub.s32 0, %v2709_v7 }
 0x178   : > { %23886 = vst [vmem:[#allocation9_spill] sm:$0xff] %v20332_v1  ;;  %v20334_v15 = vpop.f32.mrf.mxu0 }
 0x179   : > { %23887 = vst [vmem:[#allocation10_spill] sm:$0xff] %v20334_v15  ;;  %v20336_v45 = vpop.f32.mrf.mxu1  ;;  %v1933_v15 = vadd.f32 %v20280_v17, %v20278_v24  ;;  %v1939_v24 = vadd.f32 %v20292_v31, %v20290_v30 }
 0x17a   : > { %23888 = vst [vmem:[#allocation11_spill] sm:$0xff] %v20336_v45  ;;  %v17326_v43 = vpop.f32.mrf.mxu0 }
 0x17b   : > { %v17358_v5 = vpop.f32.mrf.mxu1  ;;  %v2249_v18 = vadd.f32 %v17326_v43, %v1935_v29 }
 0x17c   : > { %v2184_v9 = vpop.f32.mrf.mxu0 }
 0x17d   : > { %v2392_v56 = vpop.f32.mrf.mxu1  ;;  %v2457_v48 = vadd.f32 %v17358_v5, %v2249_v18 }
 0x17e   : > { %v17327_v20 = vpop.f32.mrf.mxu0 }
 0x17f   : > { %v17359_v11 = vpop.f32.mrf.mxu1 }
 0x180   : > { %v2187_v52 = vpop.f32.mrf.mxu0 }
 0x181   : > { %v2395_v0 = vpop.f32.mrf.mxu1  ;;  %v2248_v7 = vadd.f32 %v2187_v52, %v1934_v3 }
 0x182   : > { %v17330_v23 = vpop.f32.mrf.mxu0 }
 0x183   : > { %v17362_v44 = vpop.f32.mrf.mxu1  ;;  %v2253_v36 = vadd.f32 %v17330_v23, %v1939_v24  ;;  %v2456_v31 = vadd.f32 %v2395_v0, %v2248_v7  ;;  %v1943_v0 = vadd.f32 %v20308_v27, %v20306_v57 }
 0x184   : > { %v2200_v60 = vpop.f32.mrf.mxu0 }
 0x185   : > { %v2408_v28 = vpop.f32.mrf.mxu1  ;;  %v2251_v18 = vadd.f32 %v2200_v60, %v1937_v10 }
 0x186   : > { %v17331_v16 = vpop.f32.mrf.mxu0 }
 0x187   : > { %v17363_v38 = vpop.f32.mrf.mxu1  ;;  %v2459_v60 = vadd.f32 %v2408_v28, %v2251_v18  ;;  %v1436_v28 = vadd.f32 %v20264_v49, %v20262_v54  ;;  %v1942_v54 = vadd.f32 %v20320_v41, %v20318_v6  ;;  %v23896_v18 = vld [vmem:[#allocation8_spill] sm:$0xff] }
 0x188   : > { %v2203_v46 = vpop.f32.mrf.mxu0 }
 0x189   : > { %v2411_v45 = vpop.f32.mrf.mxu1  ;;  %v1630_v49 = vadd.f32 %v20326_v42, %v1436_v28 }
 0x18a   : > { %v17334_v26 = vpop.f32.mrf.mxu0 }
 0x18b   : > { %v17366_v2 = vpop.f32.mrf.mxu1  ;;  %v2257_v3 = vadd.f32 %v17334_v26, %v1943_v0 }
 0x18c   : > { %v20338_v34 = vpop.f32.mrf.mxu0 }
 0x18e   : > { %v20340_v40 = vpop.f32.mrf.mxu0 }
 0x190   : > { %v20342_v47 = vpop.f32.mrf.mxu0 }
 0x191   : > { %23889 = vst [vmem:[#allocation12_spill] sm:$0xff] %v20342_v47  ;;  %v2247_v47 = vadd.f32 %v2184_v9, %v1933_v15  ;;  %v2424_v15 = vpop.f32.mrf.mxu1 }
 0x192   : > { %v20344_v21 = vpop.f32.mrf.mxu0 }
 0x193   : > { %23890 = vst [vmem:[#allocation13_spill] sm:$0xff] %v20344_v21  ;;  %v2250_v21 = vadd.f32 %v17327_v20, %v1936_v61  ;;  %v2455_v43 = vadd.f32 %v2392_v56, %v2247_v47  ;;  %v2461_v56 = vadd.f32 %v17362_v44, %v2253_v36  ;;  %v17367_v20 = vpop.f32.mrf.mxu1  ;;  %v1941_v44 = vadd.f32 %v20312_v53, %v20310_v50 }
 0x194   : > { %v20348_v1 = vpop.f32.mrf.mxu0 }
 0x195   : > { %23891 = vst [vmem:[#allocation14_spill] sm:$0xff] %v20348_v1  ;;  %v20361_v1 = vrot.slane %v19850_v25, %v2710_v32 }
 0x196   : > { %v20352_v62 = vpop.f32.mrf.mxu0 }
 0x198   : > { %v20356_v13 = vpop.f32.mrf.mxu0 }
 0x199   : > { %23892 = vst [vmem:[#allocation15_spill] sm:$0xff] %v20356_v13  ;;  %v2458_v13 = vadd.f32 %v17359_v11, %v2250_v21  ;;  %v2254_v11 = vadd.f32 %v17331_v16, %v1940_v37  ;;  %v2252_v21 = vadd.f32 %v2203_v46, %v1938_v22  ;;  %v1438_v16 = vadd.f32 %v20260_v55, %v20258_v63  ;;  %v23898_v22 = vld [vmem:[#allocation7_spill] sm:$0xff] }
 0x19a   : > { %v17390_v17 = vpop.f32.mrf.mxu0  ;;  %v2255_v55 = vadd.f32 %v20338_v34, %v1941_v44  ;;  %v23901_v44 = vld [vmem:[#allocation9_spill] sm:$0xff] }
 0x19b   : > { %v2693_v29 = vadd.f32 %v17390_v17, %v2457_v48  ;;  %v2427_v48 = vpop.f32.mrf.mxu1  ;;  %v2462_v17 = vadd.f32 %v17363_v38, %v2254_v11  ;;  %v1632_v63 = vadd.f32 %v20322_v59, %v1438_v16  ;;  %v2460_v53 = vadd.f32 %v2411_v45, %v2252_v21 }
 0x19c   : > { %v2628_v9 = vpop.f32.mrf.mxu0  ;;  %v2463_v41 = vadd.f32 %v2424_v15, %v2255_v55 }
 0x19d   : > { %v20368_v19 = vadd.f32 %v20361_v1, %v2693_v29  ;;  %v2691_v61 = vadd.f32 %v2628_v9, %v2455_v43  ;;  %v1944_v43 = vadd.f32 %v20316_v4, %v20314_v12  ;;  %v1439_v29 = vadd.f32 %v20268_v8, %v20266_v14  ;;  %v17370_v4 = vpop.f32.mrf.mxu1  ;;  %v23893_v9 = vld [vmem:[#allocation4_spill] sm:$0xff]  ;;  %v23895_v14 = vld [vmem:[#allocation6_spill] sm:$0xff] }
 0x19e   : > { %v17391_v30 = vpop.f32.mrf.mxu0  ;;  %v2465_v12 = vadd.f32 %v17366_v2, %v2257_v3  ;;  %v1947_v8 = vadd.f32 %v23895_v14, %v1632_v63  ;;  %v23897_v2 = vld [vmem:[#allocation12_spill] sm:$0xff] }
 0x19f   : > { %v2731_v32 = vmax.f32 %v20368_v19, 0.0  ;;  %v20374_v5 = vadd.f32 %v20361_v1, %v2691_v61  ;;  %v2694_v33 = vadd.f32 %v17391_v30, %v2458_v13  ;;  %v2258_v34 = vadd.f32 %v20340_v40, %v1944_v43  ;;  %v23894_v61 = vld [vmem:[#allocation5_spill] sm:$0xff] }
 0x1a0   : > { %v2631_v52 = vpop.f32.mrf.mxu0  ;;  %v1437_v37 = vadd.f32 %v23894_v61, %v23893_v9  ;;  %v1633_v6 = vadd.f32 %v23896_v18, %v1439_v29  ;;  %v2256_v30 = vadd.f32 %v23897_v2, %v1942_v54 }
 0x1a1   : > { %v2729_v23 = vmax.f32 %v20374_v5, 0.0  ;;  %v20380_v35 = vadd.f32 %v20361_v1, %v2694_v33  ;;  %v2692_v58 = vadd.f32 %v2631_v52, %v2456_v31  ;;  %v23899_v52 = vld [vmem:[#allocation10_spill] sm:$0xff]  ;;  %v2466_v21 = vadd.f32 %v17367_v20, %v2258_v34 }
 0x1a2   : > { %v17394_v47 = vpop.f32.mrf.mxu0  ;;  %v1631_v11 = vadd.f32 %v23899_v52, %v1437_v37  ;;  %v1948_v3 = vadd.f32 %v23901_v44, %v1633_v6  ;;  %v2464_v28 = vadd.f32 %v2427_v48, %v2256_v30 }
 0x1a3   : > { %v2732_v13 = vmax.f32 %v20380_v35, 0.0  ;;  %v20386_v51 = vadd.f32 %v20361_v1, %v2692_v58  ;;  %v2697_v39 = vadd.f32 %v17394_v47, %v2461_v56  ;;  %v1945_v56 = vadd.f32 %v23898_v22, %v1630_v49  ;;  %v23900_v58 = vld [vmem:[#allocation13_spill] sm:$0xff] }
 0x1a4   : > { %v2644_v24 = vpop.f32.mrf.mxu0  ;;  %v2261_v0 = vadd.f32 %v23900_v58, %v1947_v8  ;;  %v2262_v54 = vadd.f32 %v20352_v62, %v1948_v3 }
 0x1a5   : > { %v2730_v57 = vmax.f32 %v20386_v51, 0.0  ;;  %v20394_v27 = vadd.f32 %v20361_v1, %v2697_v39  ;;  %v2695_v46 = vadd.f32 %v2644_v24, %v2459_v60  ;;  %v2440_v60 = vpop.f32.mrf.mxu1  ;;  %v23902_v24 = vld [vmem:[#allocation14_spill] sm:$0xff] }
 0x1a6   : > { %v17395_v50 = vpop.f32.mrf.mxu0 }
 0x1a7   : > { %v2735_v26 = vmax.f32 %v20394_v27, 0.0  ;;  %v20404_v38 = vadd.f32 %v20361_v1, %v2695_v46  ;;  %v2698_v7 = vadd.f32 %v17395_v50, %v2462_v17  ;;  %v2259_v17 = vadd.f32 %v23902_v24, %v1945_v56  ;;  %v23903_v50 = vld [vmem:[#allocation11_spill] sm:$0xff] }
 0x1a8   : > { %v2647_v59 = vpop.f32.mrf.mxu0  ;;  %v1946_v20 = vadd.f32 %v23903_v50, %v1631_v11 }
 0x1a9   : > { %v2733_v45 = vmax.f32 %v20404_v38, 0.0  ;;  %v20414_v10 = vadd.f32 %v20361_v1, %v2698_v7  ;;  %v2696_v36 = vadd.f32 %v2647_v59, %v2460_v53  ;;  %v2469_v53 = vadd.f32 %v17370_v4, %v2261_v0  ;;  %v17371_v7 = vpop.f32.mrf.mxu1 }
 0x1aa   : > { %v17398_v42 = vpop.f32.mrf.mxu0  ;;  %v2467_v48 = vadd.f32 %v2440_v60, %v2259_v17  ;;  %v2470_v18 = vadd.f32 %v17371_v7, %v2262_v54 }
 0x1ab   : > { %v2736_v31 = vmax.f32 %v20414_v10, 0.0  ;;  %v20423_v40 = vadd.f32 %v20361_v1, %v2696_v36  ;;  %v2701_v33 = vadd.f32 %v17398_v42, %v2465_v12  ;;  %v23904_v36 = vld [vmem:[#allocation15_spill] sm:$0xff]  ;;  %v2443_v14 = vpop.f32.mrf.mxu1 }
 0x1ac   : > { %v2660_v47 = vpop.f32.mrf.mxu0  ;;  %v2260_v9 = vadd.f32 %v23904_v36, %v1946_v20 }
 0x1ad   : > { %v2734_v15 = vmax.f32 %v20423_v40, 0.0  ;;  %v20430_v39 = vadd.f32 %v20361_v1, %v2701_v33  ;;  %v2699_v16 = vadd.f32 %v2660_v47, %v2463_v41 }
 0x1ae   : > { %v17399_v46 = vpop.f32.mrf.mxu0  ;;  %v2468_v2 = vadd.f32 %v2443_v14, %v2260_v9 }
 0x1af   : > { %v2739_v43 = vmax.f32 %v20430_v39, 0.0  ;;  %v20436_v63 = vadd.f32 %v20361_v1, %v2699_v16  ;;  %v2702_v55 = vadd.f32 %v17399_v46, %v2466_v21 }
 0x1b0   : > { %v2663_v29 = vpop.f32.mrf.mxu0 }
 0x1b1   : > { %v2737_v49 = vmax.f32 %v20436_v63, 0.0  ;;  %v20442_v12 = vadd.f32 %v20361_v1, %v2702_v55  ;;  %v2700_v59 = vadd.f32 %v2663_v29, %v2464_v28 }
 0x1b2   : > { %v17402_v34 = vpop.f32.mrf.mxu0 }
 0x1b3   : > { %v2740_v61 = vmax.f32 %v20442_v12, 0.0  ;;  %v20447_v37 = vadd.f32 %v20361_v1, %v2700_v59  ;;  %v2705_v4 = vadd.f32 %v17402_v34, %v2469_v53 }
 0x1b4   : > { %v2676_v8 = vpop.f32.mrf.mxu0 }
 0x1b5   : > { %v2738_v62 = vmax.f32 %v20447_v37, 0.0  ;;  %v20451_v6 = vadd.f32 %v20361_v1, %v2705_v4  ;;  %v2703_v41 = vadd.f32 %v2676_v8, %v2467_v48 }
 0x1b6   : > { %v17403_v42 = vpop.f32.mrf.mxu0 }
 0x1b7   : > { %v2743_v30 = vmax.f32 %v20451_v6, 0.0  ;;  %v20455_v33 = vadd.f32 %v20361_v1, %v2703_v41  ;;  %v2706_v22 = vadd.f32 %v17403_v42, %v2470_v18 }
 0x1b8   : > { %v2679_v56 = vpop.f32.mrf.mxu0 }
 0x1b9   : > { %v2741_v52 = vmax.f32 %v20455_v33, 0.0  ;;  %v20459_v11 = vadd.f32 %v20361_v1, %v2706_v22  ;;  %v2704_v58 = vadd.f32 %v2679_v56, %v2468_v2  ;;  %2747 = sbr.rel (%p14711_p11) target bundleno = 454 (0x1c6), region = 48 }
 0x1bb   : > { %v2744_v0 = vmax.f32 %v20459_v11, 0.0  ;;  %v20463_v60 = vadd.f32 %v20361_v1, %v2704_v58 }
 0x1bd   : > { %v2742_v47 = vmax.f32 %v20463_v60, 0.0 }
 0x1be   : > { %2748 = vst [vmem:[%s19818_s11] sm:$0xff] %v2729_v23  ;;  %2749 = vst [vmem:[%s19818_s11 + $0x8] sm:$0xff] %v2730_v57 }
 0x1bf   : > { %2750 = vst [vmem:[%s19818_s11 + $0x10] sm:$0xff] %v2731_v32  ;;  %2751 = vst [vmem:[%s19818_s11 + $0x18] sm:$0xff] %v2732_v13 }
 0x1c0   : > { %2752 = vst [vmem:[%s19818_s11 + $0x20] sm:$0xff] %v2733_v45  ;;  %2753 = vst [vmem:[%s19818_s11 + $0x28] sm:$0xff] %v2734_v15 }
 0x1c1   : > { %2754 = vst [vmem:[%s19818_s11 + $0x30] sm:$0xff] %v2735_v26  ;;  %2755 = vst [vmem:[%s19818_s11 + $0x38] sm:$0xff] %v2736_v31 }
 0x1c2   : > { %2756 = vst [vmem:[%s19818_s11 + $0x40] sm:$0xff] %v2737_v49  ;;  %2757 = vst [vmem:[%s19818_s11 + $0x48] sm:$0xff] %v2738_v62 }
 0x1c3   : > { %2758 = vst [vmem:[%s19818_s11 + $0x50] sm:$0xff] %v2739_v43  ;;  %2759 = vst [vmem:[%s19818_s11 + $0x58] sm:$0xff] %v2740_v61 }
 0x1c4   : > { %2760 = vst [vmem:[%s19818_s11 + $0x60] sm:$0xff] %v2741_v52  ;;  %2761 = vst [vmem:[%s19818_s11 + $0x68] sm:$0xff] %v2742_v47 }
 0x1c5   : > { %2762 = vst [vmem:[%s19818_s11 + $0x70] sm:$0xff] %v2743_v30  ;;  %2763 = vst [vmem:[%s19818_s11 + $0x78] sm:$0xff] %v2744_v0 }
 0x1c6 PF: > { %p14712_p12 = scmp.eq.s32.totalorder %s19710_s15, 1 }
 0x1c8   : > { %2767 = sbr.rel (%p14712_p12) target bundleno = 620 (0x26c), region = 52 }
 0x1cd   : > { %v2770_v21 = vld [vmem:[%s23877_s3 + $0x10] sm:$0xff]  ;;  %v2768_v16 = vld [vmem:[%s23877_s3] sm:$0xff]  ;;  %v19729_v44 = vmov 0   ;;  %v2771_v3 = vld [vmem:[%s23877_s3 + $0x18] sm:$0xff] }
 0x1ce   : > { %19123 = vset.pattern.permute.xlu1 %v19729_v44  ;;  %19122 = vset.pattern.permute.xlu0 %v19729_v44  ;;  %v2769_v24 = vld [vmem:[%s23877_s3 + $0x8] sm:$0xff]  ;;  %v2772_v46 = vld [vmem:[%s23877_s3 + $0x20] sm:$0xff]  ;;  %v2775_v28 = vld [vmem:[%s23877_s3 + $0x38] sm:$0xff] }
 0x1cf   : > { %2796 = vperm.xlu1 %19123, %v2770_v21   ;;  %2786 = vperm.xlu0 %19122, %v2768_v16   ;;  %v2773_v17 = vld [vmem:[%s23877_s3 + $0x28] sm:$0xff]  ;;  %v2774_v55 = vld [vmem:[%s23877_s3 + $0x30] sm:$0xff]  ;;  %v2776_v20 = vld [vmem:[%s23877_s3 + $0x40] sm:$0xff] }
 0x1d0   : > { %v2777_v50 = vld [vmem:[%s23877_s3 + $0x48] sm:$0xff]  ;;  %v2779_v53 = vld [vmem:[%s23877_s3 + $0x58] sm:$0xff]  ;;  %v2778_v7 = vld [vmem:[%s23877_s3 + $0x50] sm:$0xff] }
 0x1d1   : > { %v2781_v29 = vld [vmem:[%s23877_s3 + $0x68] sm:$0xff]  ;;  %v2780_v54 = vld [vmem:[%s23877_s3 + $0x60] sm:$0xff]  ;;  %v2783_v59 = vld [vmem:[%s23877_s3 + $0x78] sm:$0xff] }
 0x1d2   : > { %v2782_v48 = vld [vmem:[%s23877_s3 + $0x70] sm:$0xff] }
 0x1d3   : > { %2801 = vperm.xlu1 %19123, %v2771_v3   ;;  %2791 = vperm.xlu0 %19122, %v2769_v24  }
 0x1d7   : > { %2811 = vperm.xlu1 %19123, %v2773_v17   ;;  %2806 = vperm.xlu0 %19122, %v2772_v46  }
 0x1db   : > { %2821 = vperm.xlu1 %19123, %v2775_v28   ;;  %2816 = vperm.xlu0 %19122, %v2774_v55  }
 0x1df   : > { %2831 = vperm.xlu1 %19123, %v2777_v50   ;;  %2826 = vperm.xlu0 %19122, %v2776_v20  }
 0x1e3   : > { %2841 = vperm.xlu1 %19123, %v2779_v53   ;;  %2836 = vperm.xlu0 %19122, %v2778_v7  }
 0x1e7   : > { %2851 = vperm.xlu1 %19123, %v2781_v29   ;;  %2846 = vperm.xlu0 %19122, %v2780_v54  }
 0x1eb   : > { %2861 = vperm.xlu1 %19123, %v2783_v59   ;;  %2856 = vperm.xlu0 %19122, %v2782_v48  }
 0x24a   : > { %v2797_v34 = vpop.permute.xlu1 %2796  ;;  %v2787_v36 = vpop.permute.xlu0 %2786 }
 0x24b   : > { %v2866_v14 = vmul.f32 %v2797_v34, %v2731_v32  ;;  %v2864_v8 = vmul.f32 %v2787_v36, %v2729_v23 }
 0x24e   : > { %v2802_v9 = vpop.permute.xlu1 %2801  ;;  %v2792_v4 = vpop.permute.xlu0 %2791 }
 0x24f   : > { %v2867_v18 = vmul.f32 %v2802_v9, %v2732_v13  ;;  %v2865_v41 = vmul.f32 %v2792_v4, %v2730_v57 }
 0x251   : > { %v16092_v42 = vpack.c.bf16 %v2867_v18, %v2866_v14  ;;  %v16087_v2 = vpack.c.bf16 %v2865_v41, %v2864_v8 }
 0x252   : > { %v2812_v22 = vpop.permute.xlu1 %2811  ;;  %v2807_v56 = vpop.permute.xlu0 %2806 }
 0x253   : > { %16270 = vst [vmem:[#allocation2 + $0x18] sm:$0xff] %v16092_v42   ;;  %16269 = vst [vmem:[#allocation2 + $0x10] sm:$0xff] %v16087_v2   ;;  %v2869_v58 = vmul.f32 %v2812_v22, %v2734_v15  ;;  %v2868_v19 = vmul.f32 %v2807_v56, %v2733_v45 }
 0x255   : > { %v16097_v32 = vpack.c.bf16 %v2869_v58, %v2868_v19 }
 0x256   : > { %v2822_v5 = vpop.permute.xlu1 %2821  ;;  %v2817_v23 = vpop.permute.xlu0 %2816 }
 0x257   : > { %16271 = vst [vmem:[#allocation2 + $0x20] sm:$0xff] %v16097_v32   ;;  %v2871_v35 = vmul.f32 %v2822_v5, %v2736_v31  ;;  %v2870_v13 = vmul.f32 %v2817_v23, %v2735_v26 }
 0x259   : > { %v16102_v51 = vpack.c.bf16 %v2871_v35, %v2870_v13 }
 0x25a   : > { %v2832_v57 = vpop.permute.xlu1 %2831  ;;  %v2827_v21 = vpop.permute.xlu0 %2826 }
 0x25b   : > { %16272 = vst [vmem:[#allocation2 + $0x28] sm:$0xff] %v16102_v51   ;;  %v2873_v40 = vmul.f32 %v2832_v57, %v2738_v62  ;;  %v2872_v38 = vmul.f32 %v2827_v21, %v2737_v49 }
 0x25d   : > { %v16107_v45 = vpack.c.bf16 %v2873_v40, %v2872_v38 }
 0x25e   : > { %v2842_v15 = vpop.permute.xlu1 %2841  ;;  %v2837_v16 = vpop.permute.xlu0 %2836 }
 0x25f   : > { %16273 = vst [vmem:[#allocation2 + $0x30] sm:$0xff] %v16107_v45   ;;  %v2875_v10 = vmul.f32 %v2842_v15, %v2740_v61  ;;  %v2874_v27 = vmul.f32 %v2837_v16, %v2739_v43 }
 0x261   : > { %v16112_v26 = vpack.c.bf16 %v2875_v10, %v2874_v27 }
 0x262   : > { %v2852_v31 = vpop.permute.xlu1 %2851  ;;  %v2847_v44 = vpop.permute.xlu0 %2846 }
 0x263   : > { %16274 = vst [vmem:[#allocation2 + $0x38] sm:$0xff] %v16112_v26   ;;  %v2877_v37 = vmul.f32 %v2852_v31, %v2742_v47  ;;  %v2876_v63 = vmul.f32 %v2847_v44, %v2741_v52 }
 0x265   : > { %v16117_v49 = vpack.c.bf16 %v2877_v37, %v2876_v63 }
 0x266   : > { %v2862_v62 = vpop.permute.xlu1 %2861  ;;  %v2857_v3 = vpop.permute.xlu0 %2856 }
 0x267   : > { %16275 = vst [vmem:[#allocation2 + $0x40] sm:$0xff] %v16117_v49   ;;  %v2879_v12 = vmul.f32 %v2862_v62, %v2744_v0  ;;  %v2878_v39 = vmul.f32 %v2857_v3, %v2743_v30 }
 0x269   : > { %v16122_v43 = vpack.c.bf16 %v2879_v12, %v2878_v39 }
 0x26b   : > { %16276 = vst [vmem:[#allocation2 + $0x48] sm:$0xff] %v16122_v43  }
 0x26c PF: > { %v19124_v61 = vld [vmem:[%s19813_s8 + $0x78] sm:$0xff]   ;;  %v19126_v52 = vld [vmem:[%s19813_s8 + $0x70] sm:$0xff]   ;;  %v19128_v30 = vld [vmem:[%s19813_s8 + $0x68] sm:$0xff]  }
 0x26d   : > { %v19125_v33 = vld [vmem:[%s19813_s8 + $0x38] sm:$0xff]   ;;  %17404 = vmatprep.subr.bf16.mxu1 %v19124_v61  ;;  %v19127_v6 = vld [vmem:[%s19813_s8 + $0x30] sm:$0xff]   ;;  %v19129_v11 = vld [vmem:[%s19813_s8 + $0x28] sm:$0xff]  }
 0x26e   : > { %17436 = vmatprep.subr.bf16.mxu0 %v19125_v33  ;;  %17405 = vmatpush3.bf16.msra.mxu1 %v19124_v61  ;;  %v19130_v0 = vld [vmem:[%s19813_s8 + $0x60] sm:$0xff]   ;;  %v19132_v47 = vld [vmem:[%s19813_s8 + $0x58] sm:$0xff]   ;;  %v19134_v17 = vld [vmem:[%s19813_s8 + $0x50] sm:$0xff]  }
 0x26f   : > { %17437 = vmatpush3.bf16.msra.mxu0 %v19125_v33  ;;  %17406 = vmatprep.subr.bf16.mxu1 %v19126_v52  ;;  %v19131_v60 = vld [vmem:[%s19813_s8 + $0x20] sm:$0xff]   ;;  %v19133_v24 = vld [vmem:[%s19813_s8 + $0x18] sm:$0xff]   ;;  %v19135_v46 = vld [vmem:[%s19813_s8 + $0x10] sm:$0xff]  }
 0x270   : > { %17438 = vmatprep.subr.bf16.mxu0 %v19127_v6  ;;  %v2961_v28 = vld [vmem:[#allocation2 + $0x10c] sm:$0xf]  ;;  %v2993_v55 = vld [vmem:[#allocation2 + $0x108] sm:$0x8]  ;;  %v20612_v50 = vld [vmem:[#allocation2 + $0x110] sm:$0xff]  }
 0x271   : > { %v2960_v20 = vld [vmem:[#allocation2 + $0x108] sm:$0xc]  ;;  %v20614_v53 = vcombine.low %v2993_v55, %v2961_v28  ;;  %v20616_v29 = vld [vmem:[#allocation2 + $0x118] sm:$0xff]   ;;  %v3054_v59 = vrot.slane %v20612_v50, 3  ;;  %v3235_v48 = vshrl.u32 %v20612_v50, 16  ;;  %v3238_v34 = vshll.u32 %v20612_v50, 16 }
 0x272   : > { %17407 = vmatpush3.bf16.msra.mxu1 %v19126_v52  ;;  %v14762_v7 = vcombine.low %v2960_v20, %v2961_v28  ;;  %v19136_v54 = vld [vmem:[%s19813_s8 + $0x48] sm:$0xff]   ;;  %v3244_v41 = vshrl.u32 %v20616_v29, 16  ;;  %v3247_v42 = vshll.u32 %v20616_v29, 16  ;;  %v19138_v2 = vld [vmem:[%s19813_s8 + $0x40] sm:$0xff]   ;;  %v3056_v21 = vrot.slane %v20616_v29, 3  ;;  %v19144_v15 = vld [vmem:[%s19813_s8 + $0xb8] sm:$0xff]  }
 0x273   : > { %17439 = vmatpush3.bf16.msra.mxu0 %v19127_v6  ;;  %17408 = vmatprep.subr.bf16.mxu1 %v19128_v30  ;;  %v19137_v36 = vld [vmem:[%s19813_s8 + $0x8] sm:$0xff]   ;;  %v3053_v9 = vrot.slane %v20614_v53, 3  ;;  %v3237_v8 = vrot.slane %v3235_v48, 2  ;;  %v3240_v18 = vrot.slane %v3238_v34, 3  ;;  %v19139_v19 = vld [vmem:[%s19813_s8] sm:$0xff]   ;;  %v19145_v16 = vld [vmem:[%s19813_s8 + $0xf8] sm:$0xff]  }
 0x274   : > { %17440 = vmatprep.subr.bf16.mxu0 %v19129_v11  ;;  %v3227_v4 = vshrl.u32 %v14762_v7, 16  ;;  %v3230_v14 = vshll.u32 %v14762_v7, 16  ;;  %v3246_v23 = vrot.slane %v3244_v41, 2  ;;  %v3249_v35 = vrot.slane %v3247_v42, 3  ;;  %v20637_v13 = vld [vmem:[#allocation2 + $0x120] sm:$0xff]   ;;  %v20640_v57 = vld [vmem:[#allocation2 + $0x128] sm:$0xff]  }
 0x275   : > { %v3055_v22 = vsel %vm470_vm0, %v3053_v9, %v3054_v59  ;;  %v3241_v32 = vor.u32 %v3240_v18, %v3237_v8  ;;  %v3253_v40 = vshrl.u32 %v20637_v13, 16  ;;  %v3256_v38 = vshll.u32 %v20637_v13, 16  ;;  %v19146_v44 = vld [vmem:[%s19813_s8 + $0xb0] sm:$0xff]   ;;  %v20667_v6 = vld [vmem:[#allocation2 + $0x138] sm:$0xff]   ;;  %v19152_v7 = vld [vmem:[%s19813_s8 + $0xa0] sm:$0xff]  }
 0x276   : > { %17409 = vmatpush3.bf16.msra.mxu1 %v19128_v30  ;;  %v3229_v56 = vrot.slane %v3227_v4, 2  ;;  %v3232_v58 = vrot.slane %v3230_v14, 3  ;;  %17420 = vmatprep.mubr.bf16.mxu1 %v3055_v22  ;;  %v3250_v45 = vor.u32 %v3249_v35, %v3246_v23  ;;  %v3262_v10 = vshrl.u32 %v20640_v57, 16  ;;  %v19147_v62 = vld [vmem:[%s19813_s8 + $0xf0] sm:$0xff]   ;;  %v20693_v18 = vld [vmem:[#allocation2 + $0x140] sm:$0xff]  }
 0x277   : > { %17441 = vmatpush3.bf16.msra.mxu0 %v19129_v11  ;;  %17410 = vmatprep.subr.bf16.mxu1 %v19130_v0  ;;  %v3265_v27 = vshll.u32 %v20640_v57, 16  ;;  %v3255_v26 = vrot.slane %v3253_v40, 2  ;;  %v3258_v31 = vrot.slane %v3256_v38, 3  ;;  %v3058_v37 = vrot.slane %v20637_v13, 3  ;;  %v20663_v61 = vld [vmem:[#allocation2 + $0x130] sm:$0xff]   ;;  %v19153_v22 = vld [vmem:[%s19813_s8 + $0xe0] sm:$0xff]  }
 0x278   : > { %17442 = vmatprep.subr.bf16.mxu0 %v19131_v60  ;;  %v3233_v5 = vor.u32 %v3232_v58, %v3229_v56  ;;  %v3480_v63 = vshrl.u32 %v20614_v53, 16  ;;  %v3057_v49 = vsel %vm470_vm0, %v3054_v59, %v3056_v21  ;;  %v3251_v12 = vsel %vm644_vm1, %v3241_v32, %v3250_v45 }
 0x279   : > { %v3259_v3 = vor.u32 %v3258_v31, %v3255_v26  ;;  %v3264_v39 = vrot.slane %v3262_v10, 2  ;;  %v3267_v43 = vrot.slane %v3265_v27, 3  ;;  %v3483_v33 = vshll.u32 %v20614_v53, 16  ;;  %v19158_v26 = vld [vmem:[%s19813_s8 + $0x90] sm:$0xff]  }
 0x27a   : > { %17411 = vmatpush3.bf16.msra.mxu1 %v19130_v0  ;;  %v3242_v51 = vsel %vm644_vm1, %v3233_v5, %v3241_v32  ;;  %v3059_v52 = vsel %vm470_vm0, %v3056_v21, %v3058_v37  ;;  %v20669_v30 = vrot.slane %v3480_v63, 3  ;;  %v3060_v0 = vrot.slane %v20640_v57, 3  ;;  %v19159_v63 = vld [vmem:[%s19813_s8 + $0xd0] sm:$0xff]  }
 0x27b   : > { %17443 = vmatpush3.bf16.msra.mxu0 %v19131_v60  ;;  %17412 = vmatprep.subr.bf16.mxu1 %v19132_v47  ;;  %v3260_v11 = vsel %vm644_vm1, %v3250_v45, %v3259_v3  ;;  %v3271_v60 = vshrl.u32 %v20663_v61, 16  ;;  %v3280_v28 = vshrl.u32 %v20667_v6, 16  ;;  %v3283_v55 = vshll.u32 %v20667_v6, 16 }
 0x27c   : > { %17444 = vmatprep.subr.bf16.mxu0 %v19133_v24  ;;  %17452 = vmatprep.mubr.bf16.mxu0 %v3242_v51  ;;  %v20689_v9 = vrot.slane %v3483_v33, 4  ;;  %v3061_v4 = vsel %vm470_vm0, %v3058_v37, %v3060_v0  ;;  %v20700_v56 = vrot.slane %v3235_v48, 3  ;;  %v3292_v32 = vshll.u32 %v20693_v18, 16  ;;  %v19156_v48 = vld [vmem:[%s19813_s8 + $0x98] sm:$0xff]  }
 0x27d   : > { %v3273_v20 = vrot.slane %v3271_v60, 2  ;;  %v3282_v59 = vrot.slane %v3280_v28, 2  ;;  %v3488_v5 = vrot.slane %v3238_v34, 4  ;;  %v3064_v35 = vrot.slane %v20667_v6, 3  ;;  %v20731_v33 = vld [vmem:[#allocation2 + $0x11c] sm:$0xf] }
 0x27e   : > { %17413 = vmatpush3.bf16.msra.mxu1 %v19132_v47  ;;  %v3274_v47 = vshll.u32 %v20663_v61, 16  ;;  %v3294_v34 = vrot.slane %v3292_v32, 3  ;;  %v3066_v31 = vrot.slane %v20693_v18, 3  ;;  %v3500_v13 = vrot.slane %v3265_v27, 4  ;;  %v19172_v27 = vld [vmem:[%s19813_s8 + $0x130] sm:$0xff]  }
 0x27f   : > { %17445 = vmatpush3.bf16.msra.mxu0 %v19133_v24  ;;  %17414 = vmatprep.subr.bf16.mxu1 %v19134_v17  ;;  %v3268_v24 = vor.u32 %v3267_v43, %v3264_v39  ;;  %v20726_v39 = vld [vmem:[#allocation2 + $0x114] sm:$0xf]  ;;  %v20729_v43 = vld [vmem:[#allocation2 + $0x118] sm:$0xf] }
 0x280   : > { %17446 = vmatprep.subr.bf16.mxu0 %v19135_v46  ;;  %v3276_v53 = vrot.slane %v3274_v47, 3 }
 0x281   : > { %v3269_v8 = vsel %vm644_vm1, %v3259_v3, %v3268_v24 }
 0x282   : > { %17415 = vmatpush3.bf16.msra.mxu1 %v19134_v17  ;;  %v19150_v17 = vld [vmem:[%s19813_s8 + $0xa8] sm:$0xff]   ;;  %v3277_v14 = vor.u32 %v3276_v53, %v3273_v20 }
 0x283   : > { %17447 = vmatpush3.bf16.msra.mxu0 %v19135_v46  ;;  %17416 = vmatprep.subr.bf16.mxu1 %v19136_v54  ;;  %v19151_v46 = vld [vmem:[%s19813_s8 + $0xe8] sm:$0xff]  }
 0x284   : > { %17448 = vmatprep.subr.bf16.mxu0 %v19137_v36  ;;  %v3278_v23 = vsel %vm644_vm1, %v3268_v24, %v3277_v14  ;;  %v14813_v24 = vcombine.low %v20729_v43, %v20731_v33  ;;  %v19162_v20 = vld [vmem:[%s19813_s8 + $0x88] sm:$0xff]  }
 0x286   : > { %17417 = vmatpush3.bf16.msra.mxu1 %v19136_v54  ;;  %v3062_v54 = vrot.slane %v20663_v61, 3 }
 0x287   : > { %17449 = vmatpush3.bf16.msra.mxu0 %v19137_v36  ;;  %17418 = vmatprep.subr.bf16.mxu1 %v19138_v2  ;;  %v3285_v36 = vrot.slane %v3283_v55, 3 }
 0x288   : > { %17450 = vmatprep.subr.bf16.mxu0 %v19139_v19  ;;  %v3063_v58 = vsel %vm470_vm0, %v3060_v0, %v3062_v54  ;;  %v3065_v37 = vsel %vm470_vm0, %v3062_v54, %v3064_v35  ;;  %v3486_v0 = vor.u32 %v20689_v9, %v20669_v30  ;;  %v3781_v9 = vshll.u32 %v14813_v24, 16 }
 0x289   : > { %v3286_v45 = vor.u32 %v3285_v36, %v3282_v59  ;;  %v3778_v36 = vshrl.u32 %v14813_v24, 16 }
 0x28a   : > { %17419 = vmatpush3.bf16.msra.mxu1 %v19138_v2  ;;  %v20695_v2 = vld [vmem:[#allocation2 + $0x148] ss:$0 sps:$4 sm:$0x77]  }
 0x28b   : > { %17451 = vmatpush3.bf16.msra.mxu0 %v19139_v19  ;;  %17468 = vmatprep.subr.bf16.mxu1 %v19144_v15  ;;  %v3289_v19 = vshrl.u32 %v20693_v18, 16  ;;  %v3298_v51 = vshrl.u32 %v20695_v2, 16  ;;  %v3301_v21 = vshll.u32 %v20695_v2, 16  ;;  %v19183_v18 = vld [vmem:[%s19813_s8 + $0x158] sm:$0xff]  }
 0x28c   : > { %17500 = vmatprep.subr.bf16.mxu0 %v19145_v16 }
 0x28d   : > { %17421 = vmatmul.mubr.bf16.vlgmr.msra.gmra.mxu1 %v3057_v49  ;;  %v3291_v50 = vrot.slane %v3289_v19, 2  ;;  %v3303_v3 = vrot.slane %v3301_v21, 3 }
 0x28e   : > { %17453 = vmatmul.mubr.bf16.vlgmr.msra.gmra.mxu0 %v3251_v12  ;;  %17469 = vmatpush3.bf16.msra.mxu1 %v19144_v15  ;;  %v19157_v15 = vld [vmem:[%s19813_s8 + $0xd8] sm:$0xff]   ;;  %v3693_v12 = vld [vmem:[#allocation2 + $0x110] sm:$0x8] }
 0x28f   : > { %17501 = vmatpush3.bf16.msra.mxu0 %v19145_v16  ;;  %17470 = vmatprep.subr.bf16.mxu1 %v19146_v44  ;;  %v20719_v16 = vrot.slane %v3244_v41, 3  ;;  %v3295_v49 = vor.u32 %v3294_v34, %v3291_v50  ;;  %v3287_v41 = vsel %vm644_vm1, %v3277_v14, %v3286_v45 }
 0x290   : > { %17502 = vmatprep.subr.bf16.mxu0 %v19147_v62  ;;  %17424 = vmatprep.mubr.bf16.mxu1 %v3059_v52  ;;  %v20733_v52 = vld [vmem:[#allocation2 + $0x120] sm:$0xf] }
 0x291   : > { %17456 = vmatprep.mubr.bf16.mxu0 %v3260_v11  ;;  %v14812_v11 = vcombine.low %v3693_v12, %v20726_v39  ;;  %v3296_v59 = vsel %vm644_vm1, %v3286_v45, %v3295_v49 }
 0x292   : > { %17471 = vmatpush3.bf16.msra.mxu1 %v19146_v44  ;;  %v3068_v44 = vrot.slane %v20695_v2, 3 }
 0x293   : > { %17503 = vmatpush3.bf16.msra.mxu0 %v19147_v62  ;;  %17472 = vmatprep.subr.bf16.mxu1 %v19150_v17  ;;  %v3300_v62 = vrot.slane %v3298_v51, 2  ;;  %v3770_v53 = vshrl.u32 %v14812_v11, 16  ;;  %v19164_v51 = vld [vmem:[%s19813_s8 + $0x80] sm:$0xff]  }
 0x294   : > { %17504 = vmatprep.subr.bf16.mxu0 %v19151_v46  ;;  %v3069_v50 = vsel %vm470_vm0, %v3066_v31, %v3068_v44 }
 0x295   : > { %17425 = vmatmul.mubr.bf16.gmra.mxu1 %v3061_v4  ;;  %v3304_v30 = vor.u32 %v3303_v3, %v3300_v62  ;;  %v3772_v4 = vrot.slane %v3770_v53, 3  ;;  %v20755_v62 = vld [vmem:[#allocation2 + $0x12c] sm:$0xf] }
 0x296   : > { %17457 = vmatmul.mubr.bf16.gmra.mxu0 %v3269_v8  ;;  %17473 = vmatpush3.bf16.msra.mxu1 %v19150_v17  ;;  %v20740_v17 = vld [vmem:[#allocation2 + $0x124] sm:$0xf] }
 0x297   : > { %17505 = vmatpush3.bf16.msra.mxu0 %v19151_v46  ;;  %17474 = vmatprep.subr.bf16.mxu1 %v19152_v7  ;;  %v3067_v46 = vsel %vm470_vm0, %v3064_v35, %v3066_v31  ;;  %v14814_v54 = vcombine.low %v20733_v52, %v20740_v17  ;;  %v3780_v35 = vrot.slane %v3778_v36, 3  ;;  %v3305_v29 = vsel %vm644_vm1, %v3295_v49, %v3304_v30  ;;  %v20782_v30 = vld [vmem:[#allocation2 + $0x13c] sm:$0xf]  ;;  %v20784_v36 = vld [vmem:[#allocation2 + $0x140] sm:$0xf] }
 0x298   : > { %17506 = vmatprep.subr.bf16.mxu0 %v19153_v22  ;;  %17428 = vmatprep.mubr.bf16.mxu1 %v3063_v58  ;;  %v3489_v58 = vor.u32 %v3488_v5, %v20700_v56  ;;  %v20757_v56 = vld [vmem:[#allocation2 + $0x130] sm:$0xf]  ;;  %v20762_v5 = vld [vmem:[#allocation2 + $0x134] sm:$0xf]  ;;  %v3496_v49 = vrot.slane %v3256_v38, 4 }
 0x299   : > { %17460 = vmatprep.mubr.bf16.mxu0 %v3278_v23  ;;  %v3787_v8 = vshrl.u32 %v14814_v54, 16  ;;  %v3790_v2 = vshll.u32 %v14814_v54, 16  ;;  %v3492_v23 = vrot.slane %v3247_v42, 4  ;;  %v14816_v3 = vcombine.low %v20757_v56, %v20762_v5 }
 0x29a   : > { %17475 = vmatpush3.bf16.msra.mxu1 %v19152_v7  ;;  %v3773_v7 = vshll.u32 %v14812_v11, 16  ;;  %v3490_v31 = vsel %vm899_vm2, %v3486_v0, %v3489_v58  ;;  %v19166_v11 = vld [vmem:[%s19813_s8 + $0x138] sm:$0xff]  }
 0x29b   : > { %17507 = vmatpush3.bf16.msra.mxu0 %v19153_v22  ;;  %17476 = vmatprep.subr.bf16.mxu1 %v19156_v48  ;;  %v19163_v22 = vld [vmem:[%s19813_s8 + $0xc8] sm:$0xff]   ;;  %v3789_v21 = vrot.slane %v3787_v8, 3  ;;  %v3792_v45 = vrot.slane %v3790_v2, 4  ;;  %v3493_v44 = vor.u32 %v3492_v23, %v20719_v16  ;;  %v3499_v16 = vrot.slane %v3262_v10, 3 }
 0x29c   : > { %17508 = vmatprep.subr.bf16.mxu0 %v19157_v15  ;;  %v3775_v14 = vrot.slane %v3773_v7, 4  ;;  %v3805_v24 = vshrl.u32 %v14816_v3, 16  ;;  %v19171_v7 = vld [vmem:[%s19813_s8 + $0x178] sm:$0xff]   ;;  %v3503_v23 = vrot.slane %v3271_v60, 3 }
 0x29d   : > { %17429 = vmatmul.mubr.bf16.gmra.mxu1 %v3065_v37  ;;  %v20753_v37 = vld [vmem:[#allocation2 + $0x128] sm:$0xf]  ;;  %v3793_v53 = vor.u32 %v3792_v45, %v3789_v21  ;;  %v3494_v57 = vsel %vm899_vm2, %v3489_v58, %v3493_v44  ;;  %v3504_v58 = vrot.slane %v3274_v47, 4  ;;  %v3501_v21 = vor.u32 %v3500_v13, %v3499_v16 }
 0x29e   : > { %17461 = vmatmul.mubr.bf16.gmra.mxu0 %v3287_v41  ;;  %17477 = vmatpush3.bf16.msra.mxu1 %v19156_v48  ;;  %v3783_v48 = vrot.slane %v3781_v9, 4  ;;  %v3776_v34 = vor.u32 %v3775_v14, %v3772_v4  ;;  %v14815_v42 = vcombine.low %v20753_v37, %v20755_v62  ;;  %v20786_v9 = vld [vmem:[#allocation2 + $0x144] sm:$0xf]  ;;  %v3508_v47 = vrot.slane %v3283_v55, 4 }
 0x29f   : > { %17509 = vmatpush3.bf16.msra.mxu0 %v19157_v15  ;;  %17478 = vmatprep.subr.bf16.mxu1 %v19158_v26  ;;  %v14818_v8 = vcombine.low %v20784_v36, %v20786_v9 }
 0x2a0   : > { %17510 = vmatprep.subr.bf16.mxu0 %v19159_v63  ;;  %17432 = vmatprep.mubr.bf16.mxu1 %v3067_v46  ;;  %v3784_v15 = vor.u32 %v3783_v48, %v3780_v35  ;;  %v3796_v12 = vshrl.u32 %v14815_v42, 16  ;;  %v3799_v41 = vshll.u32 %v14815_v42, 16  ;;  %v3808_v46 = vshll.u32 %v14816_v3, 16  ;;  %v20810_v3 = vld [vmem:[#allocation2 + $0x14c] sm:$0xf] }
 0x2a1   : > { %17464 = vmatprep.mubr.bf16.mxu0 %v3296_v59  ;;  %v20780_v59 = vld [vmem:[#allocation2 + $0x138] sm:$0xf]  ;;  %v3823_v61 = vshrl.u32 %v14818_v8, 16 }
 0x2a2   : > { %17479 = vmatpush3.bf16.msra.mxu1 %v19158_v26  ;;  %v19165_v26 = vld [vmem:[%s19813_s8 + $0xc0] sm:$0xff]   ;;  %v3785_v0 = vsel %vm899_vm2, %v3776_v34, %v3784_v15  ;;  %v3801_v38 = vrot.slane %v3799_v41, 4  ;;  %v3810_v54 = vrot.slane %v3808_v46, 4  ;;  %v14817_v14 = vcombine.low %v20780_v59, %v20782_v30  ;;  %v19174_v34 = vld [vmem:[%s19813_s8 + $0x128] sm:$0xff]  }
 0x2a3   : > { %17511 = vmatpush3.bf16.msra.mxu0 %v19159_v63  ;;  %17480 = vmatprep.subr.bf16.mxu1 %v19162_v20  ;;  %v3495_v63 = vrot.slane %v3253_v40, 3  ;;  %v3798_v40 = vrot.slane %v3796_v12, 3  ;;  %v3794_v2 = vsel %vm899_vm2, %v3784_v15, %v3793_v53  ;;  %v3825_v41 = vrot.slane %v3823_v61, 3 }
 0x2a4   : > { %17512 = vmatprep.subr.bf16.mxu0 %v19163_v22  ;;  %v3814_v35 = vshrl.u32 %v14817_v14, 16  ;;  %v3817_v48 = vshll.u32 %v14817_v14, 16  ;;  %v19195_v14 = vld [vmem:[#allocation2 + $0x114] sm:$0xff]  }
 0x2a5   : > { %17433 = vmatmul.mubr.bf16.gmra.mxu1 %v3069_v50  ;;  %v3497_v10 = vor.u32 %v3496_v49, %v3495_v63  ;;  %v3802_v4 = vor.u32 %v3801_v38, %v3798_v40  ;;  %v3507_v50 = vrot.slane %v3280_v28, 3  ;;  %v19186_v28 = vld [vmem:[#allocation2 + $0x148] ss:$0 sps:$4 sm:$0xff]   ;;  %v20814_v49 = vld [vmem:[#allocation2 + $0x150] sm:$0xf]  ;;  %v3511_v40 = vrot.slane %v3289_v19, 3 }
 0x2a6   : > { %17465 = vmatmul.mubr.bf16.gmra.mxu0 %v3305_v29  ;;  %17481 = vmatpush3.bf16.msra.mxu1 %v19162_v20  ;;  %v3807_v20 = vrot.slane %v3805_v24, 3  ;;  %v19177_v29 = vld [vmem:[%s19813_s8 + $0x168] sm:$0xff]   ;;  %v3816_v60 = vrot.slane %v3814_v35, 3  ;;  %v3819_v42 = vrot.slane %v3817_v48, 4  ;;  %v14820_v46 = vcombine.low %v20814_v49, %v20814_v49  ;;  %v19180_v38 = vld [vmem:[%s19813_s8 + $0x118] sm:$0xff]  }
 0x2a7   : > { %17513 = vmatpush3.bf16.msra.mxu0 %v19163_v22  ;;  %17482 = vmatprep.subr.bf16.mxu1 %v19164_v51  ;;  %v19173_v22 = vld [vmem:[%s19813_s8 + $0x170] sm:$0xff]   ;;  %v3803_v15 = vsel %vm899_vm2, %v3793_v53, %v3802_v4  ;;  %v3502_v6 = vsel %vm899_vm2, %v3497_v10, %v3501_v21  ;;  %v19179_v53 = vld [vmem:[%s19813_s8 + $0x160] sm:$0xff]   ;;  %v3509_v13 = vor.u32 %v3508_v47, %v3507_v50 }
 0x2a8   : > { %17514 = vmatprep.subr.bf16.mxu0 %v19165_v26  ;;  %17484 = vmatprep.mubr.bf16.mxu1 %v3490_v31  ;;  %v3811_v45 = vor.u32 %v3810_v54, %v3807_v20  ;;  %v3505_v31 = vor.u32 %v3504_v58, %v3503_v23  ;;  %v3820_v12 = vor.u32 %v3819_v42, %v3816_v60  ;;  %v3512_v20 = vrot.slane %v3292_v32, 4  ;;  %v19187_v42 = vld [vmem:[%s19813_s8 + $0x108] sm:$0xff]  }
 0x2a9   : > { %17516 = vmatprep.mubr.bf16.mxu0 %v3785_v0  ;;  %v3516_v54 = vshrl.u32 %v19186_v28, 16  ;;  %v3841_v19 = vshrl.u32 %v14820_v46, 16 }
 0x2aa   : > { %17483 = vmatpush3.bf16.msra.mxu1 %v19164_v51  ;;  %v3498_v51 = vsel %vm899_vm2, %v3493_v44, %v3497_v10  ;;  %v20808_v44 = vld [vmem:[#allocation2 + $0x148] sm:$0xf]  ;;  %v3812_v55 = vsel %vm899_vm2, %v3802_v4, %v3811_v45  ;;  %v3519_v10 = vshll.u32 %v19186_v28, 16  ;;  %v3510_v32 = vsel %vm899_vm2, %v3505_v31, %v3509_v13 }
 0x2ab   : > { %17515 = vmatpush3.bf16.msra.mxu0 %v19165_v26  ;;  %17532 = vmatprep.subr.bf16.mxu1 %v19166_v11  ;;  %v3826_v26 = vshll.u32 %v14818_v8, 16  ;;  %v14819_v63 = vcombine.low %v20808_v44, %v20810_v3  ;;  %v3513_v23 = vor.u32 %v3512_v20, %v3511_v40  ;;  %v3518_v58 = vrot.slane %v3516_v54, 3 }
 0x2ac   : > { %17564 = vmatprep.subr.bf16.mxu0 %v19171_v7  ;;  %v3521_v35 = vrot.slane %v3519_v10, 4  ;;  %v3843_v50 = vrot.slane %v3841_v19, 3  ;;  %v19199_v19 = vld [vmem:[%s19813_s8 + $0x1b0] sm:$0xff]  }
 0x2ad   : > { %17485 = vmatmul.mubr.bf16.vlgmr.msra.gmra.mxu1 %v3494_v57  ;;  %v3828_v0 = vrot.slane %v3826_v26, 4  ;;  %v3832_v16 = vshrl.u32 %v14819_v63, 16  ;;  %v3835_v24 = vshll.u32 %v14819_v63, 16  ;;  %v3514_v60 = vsel %vm899_vm2, %v3509_v13, %v3513_v23  ;;  %v19197_v63 = vld [vmem:[#allocation2 + $0x124] sm:$0xff]   ;;  %v19194_v13 = vld [vmem:[%s19813_s8 + $0x1b8] sm:$0xff]  }
 0x2ae   : > { %17533 = vmatpush3.bf16.msra.mxu1 %v19166_v11  ;;  %17517 = vmatmul.mubr.bf16.vlgmr.msra.gmra.mxu0 %v3794_v2  ;;  %v19178_v11 = vld [vmem:[%s19813_s8 + $0x120] sm:$0xff]   ;;  %v3844_v2 = vshll.u32 %v14820_v46, 16  ;;  %v3522_v61 = vor.u32 %v3521_v35, %v3518_v58  ;;  %v4303_v46 = vshll.u32 %v19197_v63, 16 }
 0x2af   : > { %17565 = vmatpush3.bf16.msra.mxu0 %v19171_v7  ;;  %17534 = vmatprep.subr.bf16.mxu1 %v19172_v27  ;;  %v3506_v7 = vsel %vm899_vm2, %v3501_v21, %v3505_v31  ;;  %v3834_v57 = vrot.slane %v3832_v16, 3  ;;  %v3837_v4 = vrot.slane %v3835_v24, 4  ;;  %v3829_v8 = vor.u32 %v3828_v0, %v3825_v41  ;;  %v19204_v0 = vld [vmem:[#allocation2 + $0x12c] sm:$0xff]  }
 0x2b0   : > { %17566 = vmatprep.subr.bf16.mxu0 %v19173_v22  ;;  %17488 = vmatprep.mubr.bf16.mxu1 %v3498_v51  ;;  %v19196_v51 = vld [vmem:[#allocation2 + $0x11c] sm:$0xff]   ;;  %v4290_v21 = vshll.u32 %v19195_v14, 16  ;;  %v4311_v20 = vshll.u32 %v19204_v0, 16  ;;  %v4305_v10 = vrot.slane %v4303_v46, 1 }
 0x2b1   : > { %17520 = vmatprep.mubr.bf16.mxu0 %v3803_v15  ;;  %v3838_v48 = vor.u32 %v3837_v4, %v3834_v57  ;;  %v19185_v15 = vld [vmem:[%s19813_s8 + $0x150] sm:$0xff]   ;;  %v4295_v31 = vshll.u32 %v19196_v51, 16  ;;  %v4299_v24 = vshrl.u32 %v19196_v51, 16  ;;  %v19206_v51 = vld [vmem:[%s19813_s8 + $0x1e8] sm:$0xff]  }
 0x2b2   : > { %17535 = vmatpush3.bf16.msra.mxu1 %v19172_v27  ;;  %v3821_v27 = vsel %vm899_vm2, %v3811_v45, %v3820_v12  ;;  %v3830_v45 = vsel %vm899_vm2, %v3820_v12, %v3829_v8  ;;  %v4292_v26 = vrot.slane %v4290_v21, 1  ;;  %v3523_v12 = vsel %vm899_vm2, %v3513_v23, %v3522_v61  ;;  %v19205_v57 = vld [vmem:[#allocation2 + $0x134] sm:$0xff]   ;;  %v19213_v21 = vld [vmem:[#allocation2 + $0x144] sm:$0xff]  }
 0x2b3   : > { %17567 = vmatpush3.bf16.msra.mxu0 %v19173_v22  ;;  %17536 = vmatprep.subr.bf16.mxu1 %v19174_v34  ;;  %v19184_v22 = vld [vmem:[%s19813_s8 + $0x110] sm:$0xff]   ;;  %v3839_v47 = vsel %vm899_vm2, %v3829_v8, %v3838_v48  ;;  %v4323_v58 = vshrl.u32 %v19205_v57, 16  ;;  %v4335_v61 = vshll.u32 %v19213_v21, 16 }
 0x2b4   : > { %17568 = vmatprep.subr.bf16.mxu0 %v19177_v29 }
 0x2b5   : > { %17489 = vmatmul.mubr.bf16.gmra.mxu1 %v3502_v6  ;;  %v19190_v6 = vld [vmem:[%s19813_s8 + $0x148] sm:$0xff]  }
 0x2b6   : > { %17537 = vmatpush3.bf16.msra.mxu1 %v19174_v34  ;;  %17521 = vmatmul.mubr.bf16.gmra.mxu0 %v3812_v55  ;;  %v3846_v34 = vrot.slane %v3844_v2, 4  ;;  %v19191_v55 = vld [vmem:[%s19813_s8 + $0x100] sm:$0xff]   ;;  %v4315_v2 = vshrl.u32 %v19204_v0, 16 }
 0x2b7   : > { %17569 = vmatpush3.bf16.msra.mxu0 %v19177_v29  ;;  %17538 = vmatprep.subr.bf16.mxu1 %v19178_v11  ;;  %v4288_v29 = vshrl.u32 %v19195_v14, 16  ;;  %v4313_v14 = vrot.slane %v4311_v20, 1  ;;  %v20870_v0 = vld [vmem:[#allocation2 + $0x124] sm:$0xff]  }
 0x2b8   : > { %17570 = vmatprep.subr.bf16.mxu0 %v19179_v53  ;;  %17492 = vmatprep.mubr.bf16.mxu1 %v3506_v7  ;;  %v3847_v28 = vor.u32 %v3846_v34, %v3843_v50  ;;  %v14845_v7 = vcombine.low %v20726_v39, %v20729_v43  ;;  %v14846_v39 = vcombine.low %v20731_v33, %v20733_v52  ;;  %v19212_v43 = vld [vmem:[#allocation2 + $0x13c] sm:$0xff]   ;;  %v19203_v52 = vld [vmem:[%s19813_s8 + $0x1a8] sm:$0xff]   ;;  %v4608_v20 = vshll.u32 %v20870_v0, 16 }
 0x2b9   : > { %17524 = vmatprep.mubr.bf16.mxu0 %v3821_v27  ;;  %v4293_v41 = vor.u32 %v4292_v26, %v4288_v29  ;;  %v19198_v27 = vld [vmem:[%s19813_s8 + $0x1f8] sm:$0xff]   ;;  %v4327_v33 = vshll.u32 %v19212_v43, 16  ;;  %v4317_v35 = vor.u32 %v4315_v2, %v4313_v14 }
 0x2ba   : > { %17539 = vmatpush3.bf16.msra.mxu1 %v19178_v11  ;;  %v4297_v11 = vrot.slane %v4295_v31, 1  ;;  %v3848_v16 = vsel %vm899_vm2, %v3838_v48, %v3847_v28  ;;  %v4524_v34 = vld [vmem:[#allocation2 + $0x11c] sm:$0xf]  ;;  %v4339_v28 = vshrl.u32 %v19213_v21, 16 }
 0x2bb   : > { %17571 = vmatpush3.bf16.msra.mxu0 %v19179_v53  ;;  %17540 = vmatprep.subr.bf16.mxu1 %v19180_v38  ;;  %v19192_v53 = vld [vmem:[%s19813_s8 + $0x140] sm:$0xff]   ;;  %v19228_v21 = vld [vmem:[%s19813_s8 + $0x238] sm:$0xff]  }
 0x2bc   : > { %17572 = vmatprep.subr.bf16.mxu0 %v19183_v18  ;;  %v4298_v40 = vsel %vm1711_vm3, %v4293_v41, %v4297_v11  ;;  %v4301_v54 = vor.u32 %v4299_v24, %v4297_v11  ;;  %v19214_v41 = vld [vmem:[%s19813_s8 + $0x1d8] sm:$0xff]  }
 0x2bd   : > { %17493 = vmatmul.mubr.bf16.gmra.mxu1 %v3510_v32  ;;  %v19200_v32 = vld [vmem:[%s19813_s8 + $0x1f0] sm:$0xff]  }
 0x2be   : > { %17541 = vmatpush3.bf16.msra.mxu1 %v19180_v38  ;;  %17525 = vmatmul.mubr.bf16.gmra.mxu0 %v3830_v45  ;;  %v4307_v38 = vshrl.u32 %v19197_v63, 16  ;;  %v4306_v8 = vsel %vm1711_vm3, %v4301_v54, %v4305_v10  ;;  %v19220_v45 = vld [vmem:[#allocation2 + $0x14c] sm:$0xff]  }
 0x2bf   : > { %17573 = vmatpush3.bf16.msra.mxu0 %v19183_v18  ;;  %17542 = vmatprep.subr.bf16.mxu1 %v19184_v22  ;;  %v4319_v18 = vshll.u32 %v19205_v57, 16  ;;  %v4343_v63 = vshll.u32 %v19220_v45, 16  ;;  %v4347_v11 = vshrl.u32 %v19220_v45, 16 }
 0x2c0   : > { %17574 = vmatprep.subr.bf16.mxu0 %v19185_v15  ;;  %17496 = vmatprep.mubr.bf16.mxu1 %v3514_v60  ;;  %v4309_v4 = vor.u32 %v4307_v38, %v4305_v10  ;;  %v19207_v60 = vld [vmem:[%s19813_s8 + $0x1a0] sm:$0xff]   ;;  %v20878_v10 = vld [vmem:[#allocation2 + $0x12c] sm:$0xff]  }
 0x2c1   : > { %17528 = vmatprep.mubr.bf16.mxu0 %v3839_v47  ;;  %v4321_v48 = vrot.slane %v4319_v18, 1  ;;  %v19208_v47 = vld [vmem:[%s19813_s8 + $0x1e0] sm:$0xff]   ;;  %v4345_v46 = vrot.slane %v4343_v63, 1  ;;  %v4616_v2 = vshll.u32 %v20878_v10, 16  ;;  %v20929_v63 = vld [vmem:[#allocation2 + $0x14c] sm:$0xff]  }
 0x2c2   : > { %17543 = vmatpush3.bf16.msra.mxu1 %v19184_v22  ;;  %v14847_v22 = vcombine.low %v20740_v17, %v20753_v37  ;;  %v4314_v23 = vsel %vm1711_vm3, %v4309_v4, %v4313_v14  ;;  %v14848_v17 = vcombine.low %v20755_v62, %v20757_v56  ;;  %v4329_v37 = vrot.slane %v4327_v33, 1  ;;  %v19221_v56 = vld [vmem:[#allocation2 + $0x154] ss:$0 sps:$4 sm:$0x11]  }
 0x2c3   : > { %17575 = vmatpush3.bf16.msra.mxu0 %v19185_v15  ;;  %17544 = vmatprep.subr.bf16.mxu1 %v19187_v42  ;;  %v4325_v50 = vor.u32 %v4323_v58, %v4321_v48  ;;  %v4525_v15 = vld [vmem:[#allocation2 + $0x120] sm:$0xf]  ;;  %v4322_v29 = vsel %vm1711_vm3, %v4317_v35, %v4321_v48  ;;  %v14849_v62 = vcombine.low %v20762_v5, %v20780_v59  ;;  %v19215_v59 = vld [vmem:[%s19813_s8 + $0x190] sm:$0xff]   ;;  %v4620_v33 = vshrl.u32 %v20878_v10, 16 }
 0x2c4   : > { %17576 = vmatprep.subr.bf16.mxu0 %v19190_v6  ;;  %v14910_v26 = vcombine.low %v4524_v34, %v4525_v15  ;;  %v14850_v5 = vcombine.low %v20782_v30, %v20784_v36  ;;  %v14851_v30 = vcombine.low %v20786_v9, %v20808_v44  ;;  %v19222_v9 = vld [vmem:[%s19813_s8 + $0x1c8] sm:$0xff]   ;;  %v20884_v44 = vld [vmem:[#allocation2 + $0x134] sm:$0xff]   ;;  %v14852_v4 = vcombine.low %v20810_v3, %v20814_v49  ;;  %v19223_v3 = vld [vmem:[%s19813_s8 + $0x180] sm:$0xff]  }
 0x2c5   : > { %17497 = vmatmul.mubr.bf16.gmra.mxu1 %v3523_v12  ;;  %v4330_v31 = vsel %vm1711_vm3, %v4325_v50, %v4329_v37  ;;  %v4337_v12 = vrot.slane %v4335_v61, 1  ;;  %v19224_v49 = vld [vmem:[%s19813_s8 + $0x1c0] sm:$0xff]   ;;  %v4618_v35 = vrot.slane %v4616_v2, 1  ;;  %v4862_v34 = vrot.slane %v20884_v44, 1  ;;  %v19230_v61 = vld [vmem:[%s19813_s8 + $0x230] sm:$0xff]  }
 0x2c6   : > { %17545 = vmatpush3.bf16.msra.mxu1 %v19187_v42  ;;  %17529 = vmatmul.mubr.bf16.gmra.mxu0 %v3848_v16  ;;  %v4331_v42 = vshrl.u32 %v19212_v43, 16  ;;  %v4603_v16 = vshll.u32 %v14910_v26, 16  ;;  %v4601_v36 = vshrl.u32 %v14910_v26, 16  ;;  %v20913_v50 = vld [vmem:[#allocation2 + $0x144] sm:$0xff]  }
 0x2c7   : > { %17577 = vmatpush3.bf16.msra.mxu0 %v19190_v6  ;;  %17546 = vmatprep.subr.bf16.mxu1 %v19191_v55  ;;  %v19211_v6 = vld [vmem:[%s19813_s8 + $0x198] sm:$0xff]   ;;  %v4341_v24 = vor.u32 %v4339_v28, %v4337_v12 }
 0x2c8   : > { %17578 = vmatprep.subr.bf16.mxu0 %v19192_v53  ;;  %17548 = vmatprep.mubr.bf16.mxu1 %v14845_v7  ;;  %v4605_v38 = vrot.slane %v4603_v16, 1  ;;  %v4644_v16 = vshrl.u32 %v20913_v50, 16 }
 0x2c9   : > { %17580 = vmatprep.mubr.bf16.mxu0 %v4298_v40  ;;  %v19216_v40 = vld [vmem:[%s19813_s8 + $0x1d0] sm:$0xff]   ;;  %v4346_v54 = vsel %vm1711_vm3, %v4341_v24, %v4345_v46  ;;  %v4648_v24 = vshll.u32 %v20929_v63, 16 }
 0x2ca   : > { %17547 = vmatpush3.bf16.msra.mxu1 %v19191_v55  ;;  %v4333_v55 = vor.u32 %v4331_v42, %v4329_v37  ;;  %v4606_v14 = vor.u32 %v4605_v38, %v4601_v36  ;;  %v4622_v37 = vor.u32 %v4620_v33, %v4618_v35 }
 0x2cb   : > { %17579 = vmatpush3.bf16.msra.mxu0 %v19192_v53  ;;  %17596 = vmatprep.subr.bf16.mxu1 %v19194_v13  ;;  %v4351_v53 = vshll.u32 %v19221_v56, 16  ;;  %v4640_v56 = vshll.u32 %v20913_v50, 16  ;;  %v4650_v38 = vrot.slane %v4648_v24, 1 }
 0x2cc   : > { %17628 = vmatprep.subr.bf16.mxu0 %v19198_v27  ;;  %v4338_v7 = vsel %vm1711_vm3, %v4333_v55, %v4337_v12 }
 0x2cd   : > { %17549 = vmatmul.mubr.bf16.vlgmr.msra.gmra.mxu1 %v14846_v39  ;;  %v4349_v39 = vor.u32 %v4347_v11, %v4345_v46  ;;  %v4353_v43 = vrot.slane %v4351_v53, 1  ;;  %v19234_v53 = vld [vmem:[%s19813_s8 + $0x220] sm:$0xff]  }
 0x2ce   : > { %17597 = vmatpush3.bf16.msra.mxu1 %v19194_v13  ;;  %17581 = vmatmul.mubr.bf16.vlgmr.msra.gmra.mxu0 %v4306_v8  ;;  %v4837_v13 = vld [vmem:[#allocation2 + $0x11c] sm:$0xe]  ;;  %v4610_v8 = vrot.slane %v4608_v20, 1 }
 0x2cf   : > { %17629 = vmatpush3.bf16.msra.mxu0 %v19198_v27  ;;  %17598 = vmatprep.subr.bf16.mxu1 %v19199_v19  ;;  %v20880_v57 = vcombine.low %v4837_v13, %v4525_v15  ;;  %v19219_v27 = vld [vmem:[%s19813_s8 + $0x188] sm:$0xff]   ;;  %v4652_v13 = vshrl.u32 %v20929_v63, 16 }
 0x2d0   : > { %17630 = vmatprep.subr.bf16.mxu0 %v19200_v32  ;;  %17552 = vmatprep.mubr.bf16.mxu1 %v14847_v22  ;;  %v4354_v22 = vsel %vm1711_vm3, %v4349_v39, %v4353_v43  ;;  %v4868_v39 = vrot.slane %v20929_v63, 1 }
 0x2d1   : > { %17584 = vmatprep.mubr.bf16.mxu0 %v4314_v23  ;;  %v4857_v18 = vrot.slane %v20880_v57, 1  ;;  %v4611_v23 = vsel %vm1711_vm3, %v4606_v14, %v4610_v8  ;;  %v5064_v43 = vshrl.u32 %v20880_v57, 16  ;;  %v5067_v14 = vshll.u32 %v20880_v57, 16 }
 0x2d2   : > { %17599 = vmatpush3.bf16.msra.mxu1 %v19199_v19  ;;  %v4612_v19 = vshrl.u32 %v20870_v0, 16 }
 0x2d3   : > { %17631 = vmatpush3.bf16.msra.mxu0 %v19200_v32  ;;  %17600 = vmatprep.subr.bf16.mxu1 %v19203_v52  ;;  %v4858_v32 = vrot.slane %v20870_v0, 1 }
 0x2d4   : > { %17632 = vmatprep.subr.bf16.mxu0 %v19206_v51  ;;  %v4614_v58 = vor.u32 %v4612_v19, %v4610_v8  ;;  %v5071_v57 = vrot.slane %v4612_v19, 1  ;;  %v5075_v19 = vrot.slane %v4620_v33, 1 }
 0x2d5   : > { %17553 = vmatmul.mubr.bf16.gmra.mxu1 %v14848_v17  ;;  %v4859_v48 = vsel %vm2284_vm4, %v4857_v18, %v4858_v32  ;;  %v4860_v17 = vrot.slane %v20878_v10, 1 }
 0x2d6   : > { %17601 = vmatpush3.bf16.msra.mxu1 %v19203_v52  ;;  %17585 = vmatmul.mubr.bf16.gmra.mxu0 %v4322_v29  ;;  %v4624_v52 = vshll.u32 %v20884_v44, 16  ;;  %v4619_v15 = vsel %vm1711_vm3, %v4614_v58, %v4618_v35  ;;  %v4628_v29 = vshrl.u32 %v20884_v44, 16  ;;  %v5069_v35 = vrot.slane %v5067_v14, 2 }
 0x2d7   : > { %17633 = vmatpush3.bf16.msra.mxu0 %v19206_v51  ;;  %17602 = vmatprep.subr.bf16.mxu1 %v19207_v60  ;;  %v20905_v51 = vld [vmem:[#allocation2 + $0x13c] sm:$0xff]   ;;  %v4861_v42 = vsel %vm2284_vm4, %v4858_v32, %v4860_v17  ;;  %v4863_v26 = vsel %vm2284_vm4, %v4860_v17, %v4862_v34 }
 0x2d8   : > { %17634 = vmatprep.subr.bf16.mxu0 %v19208_v47  ;;  %17556 = vmatprep.mubr.bf16.mxu1 %v14849_v62  ;;  %v4626_v45 = vrot.slane %v4624_v52, 1  ;;  %v4636_v62 = vshrl.u32 %v20905_v51, 16  ;;  %v4864_v55 = vrot.slane %v20905_v51, 1 }
 0x2d9   : > { %17588 = vmatprep.mubr.bf16.mxu0 %v4330_v31 }
 0x2da   : > { %17603 = vmatpush3.bf16.msra.mxu1 %v19207_v60  ;;  %v4632_v60 = vshll.u32 %v20905_v51, 16  ;;  %v4630_v31 = vor.u32 %v4628_v29, %v4626_v45  ;;  %v4865_v46 = vsel %vm2284_vm4, %v4862_v34, %v4864_v55  ;;  %v5092_v51 = vrot.slane %v4648_v24, 2 }
 0x2db   : > { %17635 = vmatpush3.bf16.msra.mxu0 %v19208_v47  ;;  %17604 = vmatprep.subr.bf16.mxu1 %v19211_v6  ;;  %v4627_v47 = vsel %vm1711_vm3, %v4622_v37, %v4626_v45  ;;  %v19241_v45 = vld [vmem:[%s19813_s8 + $0x208] sm:$0xff]  }
 0x2dc   : > { %17636 = vmatprep.subr.bf16.mxu0 %v19214_v41  ;;  %v4634_v28 = vrot.slane %v4632_v60, 1 }
 0x2dd   : > { %17557 = vmatmul.mubr.bf16.gmra.mxu1 %v14850_v5  ;;  %v20937_v5 = vld [vmem:[#allocation2 + $0x154] sm:$0xff]  }
 0x2de   : > { %17605 = vmatpush3.bf16.msra.mxu1 %v19211_v6  ;;  %17589 = vmatmul.mubr.bf16.gmra.mxu0 %v4338_v7  ;;  %v19233_v6 = vld [vmem:[%s19813_s8 + $0x228] sm:$0xff]   ;;  %v4638_v12 = vor.u32 %v4636_v62, %v4634_v28  ;;  %v4635_v11 = vsel %vm1711_vm3, %v4630_v31, %v4634_v28  ;;  %v4870_v8 = vrot.slane %v20937_v5, 1  ;;  %v4660_v32 = vshrl.u32 %v20937_v5, 16 }
 0x2df   : > { %17637 = vmatpush3.bf16.msra.mxu0 %v19214_v41  ;;  %17606 = vmatprep.subr.bf16.mxu1 %v19215_v59  ;;  %v4642_v41 = vrot.slane %v4640_v56, 1  ;;  %v5080_v31 = vrot.slane %v4624_v52, 2  ;;  %v5087_v52 = vrot.slane %v4644_v16, 1 }
 0x2e0   : > { %17638 = vmatprep.subr.bf16.mxu0 %v19216_v40  ;;  %17560 = vmatprep.mubr.bf16.mxu1 %v14851_v30 }
 0x2e1   : > { %17592 = vmatprep.mubr.bf16.mxu0 %v4346_v54  ;;  %v4643_v7 = vsel %vm1711_vm3, %v4638_v12, %v4642_v41  ;;  %v4646_v36 = vor.u32 %v4644_v16, %v4642_v41  ;;  %v19240_v54 = vld [vmem:[#allocation2 + $0x15c] ss:$0 sps:$4 sm:$0x11]  }
 0x2e2   : > { %17607 = vmatpush3.bf16.msra.mxu1 %v19215_v59  ;;  %v4866_v59 = vrot.slane %v20913_v50, 1  ;;  %v4872_v34 = vrot.slane %v19240_v54, 1 }
 0x2e3   : > { %17639 = vmatpush3.bf16.msra.mxu0 %v19216_v40  ;;  %17608 = vmatprep.subr.bf16.mxu1 %v19219_v27  ;;  %v4656_v40 = vshll.u32 %v20937_v5, 16  ;;  %v4651_v18 = vsel %vm1711_vm3, %v4646_v36, %v4650_v38 }
 0x2e4   : > { %17640 = vmatprep.subr.bf16.mxu0 %v19222_v9  ;;  %v4867_v30 = vsel %vm2284_vm4, %v4864_v55, %v4866_v59  ;;  %v5088_v55 = vrot.slane %v4640_v56, 2 }
 0x2e5   : > { %17561 = vmatmul.mubr.bf16.gmra.mxu1 %v14852_v4  ;;  %v4658_v4 = vrot.slane %v4656_v40, 1  ;;  %v5096_v50 = vrot.slane %v4656_v40, 2 }
 0x2e6   : > { %17609 = vmatpush3.bf16.msra.mxu1 %v19219_v27  ;;  %17593 = vmatmul.mubr.bf16.gmra.mxu0 %v4354_v22  ;;  %v19237_v27 = vld [vmem:[%s19813_s8 + $0x218] sm:$0xff]   ;;  %v4664_v22 = vshll.u32 %v19240_v54, 16  ;;  %v5089_v41 = vor.u32 %v5088_v55, %v5087_v52 }
 0x2e7   : > { %17641 = vmatpush3.bf16.msra.mxu0 %v19222_v9  ;;  %17610 = vmatprep.subr.bf16.mxu1 %v19223_v3  ;;  %v4654_v9 = vor.u32 %v4652_v13, %v4650_v38  ;;  %v4662_v17 = vor.u32 %v4660_v32, %v4658_v4 }
 0x2e8   : > { %17642 = vmatprep.subr.bf16.mxu0 %v19224_v49  ;;  %17612 = vmatprep.mubr.bf16.mxu1 %v4611_v23  ;;  %v5066_v23 = vrot.slane %v5064_v43, 1  ;;  %v4666_v37 = vrot.slane %v4664_v22, 1 }
 0x2e9   : > { %17644 = vmatprep.mubr.bf16.mxu0 %v4859_v48  ;;  %v4659_v58 = vsel %vm1711_vm3, %v4654_v9, %v4658_v4  ;;  %v5072_v48 = vrot.slane %v4608_v20, 2  ;;  %v5076_v20 = vrot.slane %v4616_v2, 2 }
 0x2ea   : > { %17611 = vmatpush3.bf16.msra.mxu1 %v19223_v3  ;;  %v4869_v3 = vsel %vm2284_vm4, %v4866_v59, %v4868_v39  ;;  %v4667_v0 = vsel %vm1711_vm3, %v4662_v17, %v4666_v37 }
 0x2eb   : > { %17643 = vmatpush3.bf16.msra.mxu0 %v19224_v49  ;;  %17660 = vmatprep.subr.bf16.mxu1 %v19228_v21  ;;  %v19238_v49 = vld [vmem:[%s19813_s8 + $0x210] sm:$0xff]   ;;  %v5077_v33 = vor.u32 %v5076_v20, %v5075_v19 }
 0x2ed   : > { %17613 = vmatmul.mubr.bf16.vlgmr.msra.gmra.mxu1 %v4619_v15  ;;  %v5070_v15 = vor.u32 %v5069_v35, %v5066_v23 }
 0x2ee   : > { %17661 = vmatpush3.bf16.msra.mxu1 %v19228_v21  ;;  %17645 = vmatmul.mubr.bf16.vlgmr.msra.gmra.mxu0 %v4861_v42  ;;  %v4871_v21 = vsel %vm2284_vm4, %v4868_v39, %v4870_v8  ;;  %v5073_v42 = vor.u32 %v5072_v48, %v5071_v57 }
 0x2ef   : > { %17662 = vmatprep.subr.bf16.mxu1 %v19230_v61  ;;  %17616 = vmatprep.mubr.bf16.mxu1 %v4627_v47  ;;  %v19242_v47 = vld [vmem:[%s19813_s8 + $0x200] sm:$0xff]  }
 0x2f0   : > { %17648 = vmatprep.mubr.bf16.mxu0 %v4863_v26  ;;  %v5079_v26 = vrot.slane %v4628_v29, 1  ;;  %v5074_v28 = vsel %vm2492_vm5, %v5070_v15, %v5073_v42  ;;  %v5078_v2 = vsel %vm2492_vm5, %v5073_v42, %v5077_v33  ;;  %v5084_v29 = vrot.slane %v4632_v60, 2  ;;  %v19243_v60 = vld [vmem:[#allocation2 + $0x15c] ss:$0 sps:$4 sm:$0x33]  }
 0x2f1   : > { %v5100_v16 = vshrl.u32 %v19243_v60, 16 }
 0x2f2   : > { %17663 = vmatpush3.bf16.msra.mxu1 %v19230_v61  ;;  %v4873_v61 = vsel %vm2284_vm4, %v4870_v8, %v4872_v34  ;;  %v5081_v10 = vor.u32 %v5080_v31, %v5079_v26 }
 0x2f3   : > { %17664 = vmatprep.subr.bf16.mxu1 %v19233_v6  ;;  %v5102_v36 = vrot.slane %v5100_v16, 1 }
 0x2f4   : > { %v5082_v44 = vsel %vm2492_vm5, %v5077_v33, %v5081_v10 }
 0x2f5   : > { %17617 = vmatmul.mubr.bf16.gmra.mxu1 %v4635_v11 }
 0x2f6   : > { %17665 = vmatpush3.bf16.msra.mxu1 %v19233_v6  ;;  %17649 = vmatmul.mubr.bf16.gmra.mxu0 %v4865_v46  ;;  %v5083_v6 = vrot.slane %v4636_v62, 1  ;;  %v5091_v62 = vrot.slane %v4652_v13, 1  ;;  %v5095_v46 = vrot.slane %v4660_v32, 1 }
 0x2f7   : > { %17666 = vmatprep.subr.bf16.mxu1 %v19234_v53  ;;  %17620 = vmatprep.mubr.bf16.mxu1 %v4643_v7 }
 0x2f8   : > { %17652 = vmatprep.mubr.bf16.mxu0 %v4867_v30  ;;  %v5085_v12 = vor.u32 %v5084_v29, %v5083_v6  ;;  %v5093_v56 = vor.u32 %v5092_v51, %v5091_v62  ;;  %v5097_v7 = vor.u32 %v5096_v50, %v5095_v46 }
 0x2fa   : > { %17667 = vmatpush3.bf16.msra.mxu1 %v19234_v53  ;;  %v5086_v59 = vsel %vm2492_vm5, %v5081_v10, %v5085_v12  ;;  %v5090_v11 = vsel %vm2492_vm5, %v5085_v12, %v5089_v41  ;;  %v5103_v53 = vshll.u32 %v19243_v60, 16  ;;  %v5094_v30 = vsel %vm2492_vm5, %v5089_v41, %v5093_v56 }
 0x2fb   : > { %17668 = vmatprep.subr.bf16.mxu1 %v19237_v27  ;;  %v5098_v63 = vsel %vm2492_vm5, %v5093_v56, %v5097_v7 }
 0x2fc   : > { %v5105_v13 = vrot.slane %v5103_v53, 2 }
 0x2fd   : > { %17621 = vmatmul.mubr.bf16.gmra.mxu1 %v4651_v18 }
 0x2fe   : > { %17669 = vmatpush3.bf16.msra.mxu1 %v19237_v27  ;;  %17653 = vmatmul.mubr.bf16.gmra.mxu0 %v4869_v3  ;;  %v5106_v24 = vor.u32 %v5105_v13, %v5102_v36 }
 0x2ff   : > { %17670 = vmatprep.subr.bf16.mxu1 %v19238_v49  ;;  %17624 = vmatprep.mubr.bf16.mxu1 %v4659_v58 }
 0x300   : > { %17656 = vmatprep.mubr.bf16.mxu0 %v4871_v21  ;;  %v5107_v38 = vsel %vm2492_vm5, %v5097_v7, %v5106_v24 }
 0x302   : > { %17671 = vmatpush3.bf16.msra.mxu1 %v19238_v49 }
 0x303   : > { %17672 = vmatprep.subr.bf16.mxu1 %v19241_v45 }
 0x305   : > { %17625 = vmatmul.mubr.bf16.gmra.mxu1 %v4667_v0 }
 0x306   : > { %17673 = vmatpush3.bf16.msra.mxu1 %v19241_v45  ;;  %17657 = vmatmul.mubr.bf16.gmra.mxu0 %v4873_v61 }
 0x307   : > { %17674 = vmatprep.subr.bf16.mxu1 %v19242_v47  ;;  %17676 = vmatprep.mubr.bf16.mxu1 %v5074_v28 }
 0x30a   : > { %17675 = vmatpush3.bf16.msra.mxu1 %v19242_v47 }
 0x30d   : > { %17677 = vmatmul.mubr.bf16.vlgmr.msra.gmra.mxu1 %v5078_v2 }
 0x30e   : > { %17680 = vmatprep.mubr.bf16.mxu1 %v5082_v44 }
 0x315   : > { %17681 = vmatmul.mubr.bf16.gmra.mxu1 %v5086_v59 }
 0x316   : > { %17684 = vmatprep.mubr.bf16.mxu1 %v5090_v11 }
 0x31d   : > { %17685 = vmatmul.mubr.bf16.gmra.mxu1 %v5094_v30 }
 0x31e   : > { %17688 = vmatprep.mubr.bf16.mxu1 %v5098_v63 }
 0x325   : > { %17689 = vmatmul.mubr.bf16.gmra.mxu1 %v5107_v38 }
 0x34d   : > { %v17422_v5 = vpop.f32.mrf.mxu1 }
 0x34e   : > { %v17454_v40 = vpop.f32.mrf.mxu0 }
 0x34f   : > { %v3405_v54 = vadd.f32 %v17454_v40, %v17422_v5  ;;  %v3160_v27 = vpop.f32.mrf.mxu1 }
 0x350   : > { %v3396_v39 = vpop.f32.mrf.mxu0 }
 0x351   : > { %v3397_v43 = vadd.f32 %v3396_v39, %v3160_v27  ;;  %v17423_v9 = vpop.f32.mrf.mxu1 }
 0x352   : > { %v17455_v4 = vpop.f32.mrf.mxu0 }
 0x353   : > { %v3408_v14 = vadd.f32 %v17455_v4, %v17423_v9  ;;  %v3163_v8 = vpop.f32.mrf.mxu1 }
 0x354   : > { %v3399_v18 = vpop.f32.mrf.mxu0 }
 0x355   : > { %v3400_v32 = vadd.f32 %v3399_v18, %v3163_v8  ;;  %v17426_v22 = vpop.f32.mrf.mxu1 }
 0x356   : > { %v17458_v3 = vpop.f32.mrf.mxu0 }
 0x357   : > { %v3421_v49 = vadd.f32 %v17458_v3, %v17426_v22  ;;  %v3176_v23 = vpop.f32.mrf.mxu1 }
 0x358   : > { %v3412_v58 = vpop.f32.mrf.mxu0 }
 0x359   : > { %v3413_v35 = vadd.f32 %v3412_v58, %v3176_v23  ;;  %v17427_v57 = vpop.f32.mrf.mxu1 }
 0x35a   : > { %v17459_v48 = vpop.f32.mrf.mxu0 }
 0x35b   : > { %v3424_v21 = vadd.f32 %v17459_v48, %v17427_v57  ;;  %v3179_v17 = vpop.f32.mrf.mxu1 }
 0x35c   : > { %v3415_v37 = vpop.f32.mrf.mxu0 }
 0x35d   : > { %v3416_v45 = vadd.f32 %v3415_v37, %v3179_v17  ;;  %v17430_v34 = vpop.f32.mrf.mxu1 }
 0x35e   : > { %v17462_v15 = vpop.f32.mrf.mxu0 }
 0x35f   : > { %v3437_v42 = vadd.f32 %v17462_v15, %v17430_v34  ;;  %v3192_v19 = vpop.f32.mrf.mxu1 }
 0x360   : > { %v3428_v0 = vpop.f32.mrf.mxu0 }
 0x361   : > { %v3429_v20 = vadd.f32 %v3428_v0, %v3192_v19  ;;  %v17431_v61 = vpop.f32.mrf.mxu1 }
 0x362   : > { %v17463_v47 = vpop.f32.mrf.mxu0 }
 0x363   : > { %v3440_v26 = vadd.f32 %v17463_v47, %v17431_v61  ;;  %v3195_v31 = vpop.f32.mrf.mxu1 }
 0x364   : > { %v3431_v28 = vpop.f32.mrf.mxu0 }
 0x365   : > { %v3432_v33 = vadd.f32 %v3431_v28, %v3195_v31  ;;  %v17434_v10 = vpop.f32.mrf.mxu1 }
 0x366   : > { %v17466_v2 = vpop.f32.mrf.mxu0 }
 0x367   : > { %v3453_v6 = vadd.f32 %v17466_v2, %v17434_v10  ;;  %v3208_v29 = vpop.f32.mrf.mxu1 }
 0x368   : > { %v3444_v44 = vpop.f32.mrf.mxu0 }
 0x369   : > { %v3445_v52 = vadd.f32 %v3444_v44, %v3208_v29  ;;  %v17435_v55 = vpop.f32.mrf.mxu1 }
 0x36a   : > { %v17467_v12 = vpop.f32.mrf.mxu0 }
 0x36b   : > { %v3456_v41 = vadd.f32 %v17467_v12, %v17435_v55  ;;  %v3211_v59 = vpop.f32.mrf.mxu1 }
 0x36c   : > { %v3447_v62 = vpop.f32.mrf.mxu0 }
 0x36d   : > { %v3448_v51 = vadd.f32 %v3447_v62, %v3211_v59  ;;  %v17486_v60 = vpop.f32.mrf.mxu1 }
 0x36e   : > { %v3679_v11 = vadd.f32 %v17486_v60, %v3405_v54  ;;  %v17518_v46 = vpop.f32.mrf.mxu0 }
 0x36f   : > { %v3614_v50 = vpop.f32.mrf.mxu1 }
 0x370   : > { %v3677_v56 = vadd.f32 %v3614_v50, %v3397_v43  ;;  %v4004_v16 = vadd.f32 %v17518_v46, %v3679_v11  ;;  %v3939_v53 = vpop.f32.mrf.mxu0 }
 0x371   : > { %v17487_v7 = vpop.f32.mrf.mxu1 }
 0x372   : > { %v3680_v30 = vadd.f32 %v17487_v7, %v3408_v14  ;;  %v4002_v36 = vadd.f32 %v3939_v53, %v3677_v56  ;;  %v17519_v13 = vpop.f32.mrf.mxu0 }
 0x373   : > { %v3617_v63 = vpop.f32.mrf.mxu1 }
 0x374   : > { %v3678_v24 = vadd.f32 %v3617_v63, %v3400_v32  ;;  %v4005_v38 = vadd.f32 %v17519_v13, %v3680_v30  ;;  %v3942_v5 = vpop.f32.mrf.mxu0 }
 0x375   : > { %v17490_v40 = vpop.f32.mrf.mxu1 }
 0x376   : > { %v3683_v27 = vadd.f32 %v17490_v40, %v3421_v49  ;;  %v4003_v39 = vadd.f32 %v3942_v5, %v3678_v24  ;;  %v17522_v9 = vpop.f32.mrf.mxu0 }
 0x377   : > { %v3630_v4 = vpop.f32.mrf.mxu1 }
 0x378   : > { %v3681_v8 = vadd.f32 %v3630_v4, %v3413_v35  ;;  %v4008_v54 = vadd.f32 %v17522_v9, %v3683_v27  ;;  %v3955_v18 = vpop.f32.mrf.mxu0 }
 0x379   : > { %v17491_v22 = vpop.f32.mrf.mxu1 }
 0x37a   : > { %v3684_v43 = vadd.f32 %v17491_v22, %v3424_v21  ;;  %v4006_v3 = vadd.f32 %v3955_v18, %v3681_v8  ;;  %v17523_v23 = vpop.f32.mrf.mxu0 }
 0x37b   : > { %v3633_v58 = vpop.f32.mrf.mxu1 }
 0x37c   : > { %v3682_v14 = vadd.f32 %v3633_v58, %v3416_v45  ;;  %v4009_v57 = vadd.f32 %v17523_v23, %v3684_v43  ;;  %v3958_v48 = vpop.f32.mrf.mxu0 }
 0x37d   : > { %v17494_v17 = vpop.f32.mrf.mxu1 }
 0x37e   : > { %v3687_v32 = vadd.f32 %v17494_v17, %v3437_v42  ;;  %v4007_v37 = vadd.f32 %v3958_v48, %v3682_v14  ;;  %v17526_v34 = vpop.f32.mrf.mxu0 }
 0x37f   : > { %v3646_v15 = vpop.f32.mrf.mxu1 }
 0x380   : > { %v3685_v49 = vadd.f32 %v3646_v15, %v3429_v20  ;;  %v4012_v19 = vadd.f32 %v17526_v34, %v3687_v32  ;;  %v3971_v0 = vpop.f32.mrf.mxu0 }
 0x381   : > { %v17495_v61 = vpop.f32.mrf.mxu1 }
 0x382   : > { %v3688_v35 = vadd.f32 %v17495_v61, %v3440_v26  ;;  %v4010_v47 = vadd.f32 %v3971_v0, %v3685_v49  ;;  %v17527_v31 = vpop.f32.mrf.mxu0 }
 0x383   : > { %v3649_v28 = vpop.f32.mrf.mxu1 }
 0x384   : > { %v3686_v21 = vadd.f32 %v3649_v28, %v3432_v33  ;;  %v4013_v10 = vadd.f32 %v17527_v31, %v3688_v35  ;;  %v3974_v2 = vpop.f32.mrf.mxu0 }
 0x385   : > { %v17498_v29 = vpop.f32.mrf.mxu1 }
 0x386   : > { %v21006_v45 = vadd.f32 %v17498_v29, %v3453_v6  ;;  %v4011_v44 = vadd.f32 %v3974_v2, %v3686_v21  ;;  %v21008_v55 = vpop.f32.mrf.mxu0 }
 0x387   : > { %v3662_v42 = vpop.f32.mrf.mxu1 }
 0x388   : > { %v21010_v12 = vadd.f32 %v3662_v42, %v3445_v52  ;;  %v21012_v20 = vpop.f32.mrf.mxu0 }
 0x389   : > { %v17499_v59 = vpop.f32.mrf.mxu1 }
 0x38a   : > { %v21014_v62 = vadd.f32 %v17499_v59, %v3456_v41  ;;  %v21016_v26 = vpop.f32.mrf.mxu0 }
 0x38b   : > { %v3665_v60 = vpop.f32.mrf.mxu1 }
 0x38c   : > { %v21018_v33 = vadd.f32 %v3665_v60, %v3448_v51  ;;  %v21020_v11 = vpop.f32.mrf.mxu0 }
 0x38d   : > { %23906 = vst [vmem:[#allocation5_spill] sm:$0xff] %v21020_v11  ;;  %v17550_v6 = vpop.f32.mrf.mxu1 }
 0x38e   : > { %23905 = vst [vmem:[#allocation4_spill] sm:$0xff] %v21018_v33  ;;  %v21022_v46 = vadd.f32 %v17550_v6, %v4004_v16  ;;  %v17582_v50 = vpop.f32.mrf.mxu0 }
 0x38f   : > { %v4132_v56 = vpop.f32.mrf.mxu1 }
 0x390   : > { %v21024_v53 = vadd.f32 %v4132_v56, %v4002_v36  ;;  %v4445_v52 = vpop.f32.mrf.mxu0 }
 0x391   : > { %v17551_v7 = vpop.f32.mrf.mxu1 }
 0x392   : > { %v21026_v30 = vadd.f32 %v17551_v7, %v4005_v38  ;;  %v17583_v41 = vpop.f32.mrf.mxu0 }
 0x393   : > { %v4135_v13 = vpop.f32.mrf.mxu1 }
 0x394   : > { %v21028_v63 = vadd.f32 %v4135_v13, %v4003_v39  ;;  %v21030_v24 = vpop.f32.mrf.mxu0 }
 0x395   : > { %v17554_v51 = vpop.f32.mrf.mxu1 }
 0x396   : > { %v21032_v5 = vadd.f32 %v17554_v51, %v4008_v54  ;;  %v21034_v40 = vpop.f32.mrf.mxu0 }
 0x397   : > { %v4148_v16 = vpop.f32.mrf.mxu1 }
 0x398   : > { %v21036_v27 = vadd.f32 %v4148_v16, %v4006_v3  ;;  %v21038_v36 = vpop.f32.mrf.mxu0 }
 0x399   : > { %v17555_v9 = vpop.f32.mrf.mxu1 }
 0x39a   : > { %v21040_v4 = vadd.f32 %v17555_v9, %v4009_v57  ;;  %v21042_v38 = vpop.f32.mrf.mxu0 }
 0x39b   : > { %v4151_v8 = vpop.f32.mrf.mxu1 }
 0x39c   : > { %v21044_v39 = vadd.f32 %v4151_v8, %v4007_v37  ;;  %v21046_v18 = vpop.f32.mrf.mxu0 }
 0x39d   : > { %v17558_v22 = vpop.f32.mrf.mxu1 }
 0x39e   : > { %v21048_v54 = vadd.f32 %v17558_v22, %v4012_v19  ;;  %v21050_v43 = vpop.f32.mrf.mxu0 }
 0x39f   : > { %v4164_v23 = vpop.f32.mrf.mxu1 }
 0x3a0   : > { %v21052_v3 = vadd.f32 %v4164_v23, %v4010_v47  ;;  %v21054_v58 = vpop.f32.mrf.mxu0 }
 0x3a1   : > { %v17559_v14 = vpop.f32.mrf.mxu1 }
 0x3a2   : > { %v21056_v57 = vadd.f32 %v17559_v14, %v4013_v10  ;;  %v21058_v48 = vpop.f32.mrf.mxu0  ;;  %v4510_v14 = vadd.f32 %v17582_v50, %v21022_v46  ;;  %v4514_v46 = vadd.f32 %v21034_v40, %v21032_v5 }
 0x3a3   : > { %v4167_v17 = vpop.f32.mrf.mxu1 }
 0x3a4   : > { %v21060_v32 = vadd.f32 %v4167_v17, %v4011_v44  ;;  %v21062_v37 = vpop.f32.mrf.mxu0 }
 0x3a5   : > { %v21064_v34 = vpop.f32.mrf.mxu1 }
 0x3a6   : > { %v21066_v15 = vpop.f32.mrf.mxu0 }
 0x3a7   : > { %23907 = vst [vmem:[#allocation6_spill] sm:$0xff] %v21066_v15  ;;  %v21068_v49 = vpop.f32.mrf.mxu1 }
 0x3a8   : > { %v21070_v19 = vpop.f32.mrf.mxu0 }
 0x3a9   : > { %23908 = vst [vmem:[#allocation8_spill] sm:$0xff] %v21070_v19  ;;  %v21072_v0 = vpop.f32.mrf.mxu1  ;;  %v4511_v19 = vadd.f32 %v17583_v41, %v21026_v30 }
 0x3aa   : > { %23909 = vst [vmem:[#allocation12_spill] sm:$0xff] %v21072_v0  ;;  %v21074_v61 = vpop.f32.mrf.mxu0 }
 0x3ab   : > { %23910 = vst [vmem:[#allocation7_spill] sm:$0xff] %v21074_v61  ;;  %v21076_v35 = vpop.f32.mrf.mxu1 }
 0x3ac   : > { %23911 = vst [vmem:[#allocation10_spill] sm:$0xff] %v21076_v35  ;;  %v21078_v47 = vpop.f32.mrf.mxu0 }
 0x3ad   : > { %23912 = vst [vmem:[#allocation13_spill] sm:$0xff] %v21078_v47  ;;  %v17614_v31 = vpop.f32.mrf.mxu1  ;;  %v4508_v47 = vadd.f32 %v4445_v52, %v21024_v53 }
 0x3ae   : > { %v17646_v28 = vpop.f32.mrf.mxu0  ;;  %v4823_v61 = vadd.f32 %v17614_v31, %v4510_v14  ;;  %v4512_v31 = vadd.f32 %v21038_v36, %v21036_v27  ;;  %v4513_v36 = vadd.f32 %v21046_v18, %v21044_v39 }
 0x3af   : > { %v4758_v21 = vpop.f32.mrf.mxu1 }
 0x3b0   : > { %v4964_v10 = vpop.f32.mrf.mxu0  ;;  %v4821_v0 = vadd.f32 %v4758_v21, %v4508_v47 }
 0x3b1   : > { %v17615_v2 = vpop.f32.mrf.mxu1 }
 0x3b2   : > { %v17647_v44 = vpop.f32.mrf.mxu0  ;;  %v4824_v33 = vadd.f32 %v17615_v2, %v4511_v19 }
 0x3b3   : > { %v4761_v29 = vpop.f32.mrf.mxu1 }
 0x3b4   : > { %v4967_v59 = vpop.f32.mrf.mxu0  ;;  %v5030_v21 = vadd.f32 %v17647_v44, %v4824_v33 }
 0x3b5   : > { %v17618_v42 = vpop.f32.mrf.mxu1 }
 0x3b6   : > { %v17650_v56 = vpop.f32.mrf.mxu0  ;;  %v4827_v30 = vadd.f32 %v17618_v42, %v4514_v46 }
 0x3b7   : > { %v4774_v60 = vpop.f32.mrf.mxu1 }
 0x3b8   : > { %v4980_v51 = vpop.f32.mrf.mxu0  ;;  %v4825_v19 = vadd.f32 %v4774_v60, %v4512_v31  ;;  %v5033_v33 = vadd.f32 %v17650_v56, %v4827_v30  ;;  %v4516_v56 = vadd.f32 %v21054_v58, %v21052_v3  ;;  %v4017_v31 = vadd.f32 %v21016_v26, %v21014_v62  ;;  %v23918_v62 = vld [vmem:[#allocation6_spill] sm:$0xff] }
 0x3b9   : > { %v17619_v6 = vpop.f32.mrf.mxu1 }
 0x3ba   : > { %v17651_v8 = vpop.f32.mrf.mxu0  ;;  %v5031_v44 = vadd.f32 %v4980_v51, %v4825_v19  ;;  %v4014_v51 = vadd.f32 %v21012_v20, %v21010_v12  ;;  %v4517_v12 = vadd.f32 %v21062_v37, %v21060_v32  ;;  %v23919_v19 = vld [vmem:[#allocation12_spill] sm:$0xff] }
 0x3bb   : > { %v4777_v7 = vpop.f32.mrf.mxu1  ;;  %v4210_v32 = vadd.f32 %v23919_v19, %v4017_v31 }
 0x3bc   : > { %v4983_v17 = vpop.f32.mrf.mxu0  ;;  %v4207_v20 = vadd.f32 %v21068_v49, %v4014_v51 }
 0x3bd   : > { %v17622_v13 = vpop.f32.mrf.mxu1 }
 0x3be   : > { %v17654_v15 = vpop.f32.mrf.mxu0 }
 0x3bf   : > { %v21080_v16 = vpop.f32.mrf.mxu1 }
 0x3c0   : > { %v4996_v41 = vpop.f32.mrf.mxu0 }
 0x3c1   : > { %v21082_v9 = vpop.f32.mrf.mxu1 }
 0x3c3   : > { %v21084_v22 = vpop.f32.mrf.mxu1 }
 0x3c4   : > { %23913 = vst [vmem:[#allocation9_spill] sm:$0xff] %v21084_v22  ;;  %v4509_v22 = vadd.f32 %v21030_v24, %v21028_v63  ;;  %v4515_v24 = vadd.f32 %v21042_v38, %v21040_v4 }
 0x3c5   : > { %v21086_v23 = vpop.f32.mrf.mxu1 }
 0x3c6   : > { %23914 = vst [vmem:[#allocation14_spill] sm:$0xff] %v21086_v23  ;;  %v5029_v23 = vadd.f32 %v17646_v28, %v4823_v61  ;;  %v4822_v53 = vadd.f32 %v4761_v29, %v4509_v22  ;;  %v17655_v28 = vpop.f32.mrf.mxu0  ;;  %v4828_v2 = vadd.f32 %v17619_v6, %v4515_v24  ;;  %v4518_v29 = vadd.f32 %v21050_v43, %v21048_v54 }
 0x3c7   : > { %v21089_v25 = vpop.f32.mrf.mxu1  ;;  %v4016_v6 = vadd.f32 %v21008_v55, %v21006_v45  ;;  %v4829_v55 = vadd.f32 %v21080_v16, %v4516_v56  ;;  %v23924_v56 = vld [vmem:[#allocation7_spill] sm:$0xff] }
 0x3c8   : > { %23915 = vst [vmem:[#allocation11_spill] sm:$0xff] %v21089_v25  ;;  %v5027_v25 = vadd.f32 %v4964_v10, %v4821_v0  ;;  %v5028_v40 = vadd.f32 %v4967_v59, %v4822_v53  ;;  %v4826_v59 = vadd.f32 %v4777_v7, %v4513_v36  ;;  %v4831_v22 = vadd.f32 %v17622_v13, %v4518_v29  ;;  %v23921_v36 = vld [vmem:[#allocation8_spill] sm:$0xff] }
 0x3c9   : > { %v21092_v35 = vpop.f32.mrf.mxu1  ;;  %v4519_v53 = vadd.f32 %v21058_v48, %v21056_v57  ;;  %v4209_v45 = vadd.f32 %v21064_v34, %v4016_v6  ;;  %v5035_v37 = vadd.f32 %v4996_v41, %v4829_v55 }
 0x3ca   : > { %v5032_v58 = vadd.f32 %v4983_v17, %v4826_v59  ;;  %v5037_v57 = vadd.f32 %v17654_v15, %v4831_v22  ;;  %v4523_v22 = vadd.f32 %v23924_v56, %v4210_v32 }
 0x3cb   : > { %v21095_v11 = vpop.f32.mrf.mxu1  ;;  %v4832_v16 = vadd.f32 %v21082_v9, %v4519_v53  ;;  %v4522_v26 = vadd.f32 %v23918_v62, %v4209_v45  ;;  %v23920_v15 = vld [vmem:[#allocation9_spill] sm:$0xff] }
 0x3cd   : > { %v17678_v50 = vpop.f32.mrf.mxu1  ;;  %v5038_v59 = vadd.f32 %v17655_v28, %v4832_v16 }
 0x3ce   : > { %v5263_v52 = vadd.f32 %v17678_v50, %v5029_v23  ;;  %v4999_v23 = vpop.f32.mrf.mxu0  ;;  %v5034_v50 = vadd.f32 %v17651_v8, %v4828_v2 }
 0x3cf   : > { %v5198_v47 = vpop.f32.mrf.mxu1 }
 0x3d0   : > { %v21104_v14 = vadd.f32 %v5263_v52, %v20361_v1  ;;  %v5261_v63 = vadd.f32 %v5198_v47, %v5027_v25  ;;  %v17658_v48 = vpop.f32.mrf.mxu0 }
 0x3d1   : > { %v17679_v5 = vpop.f32.mrf.mxu1 }
 0x3d2   : > { %v5295_v0 = vmax.f32 %v21104_v14, 0.0  ;;  %v21110_v61 = vadd.f32 %v5261_v63, %v20361_v1  ;;  %v5264_v27 = vadd.f32 %v17679_v5, %v5030_v21  ;;  %v23916_v21 = vld [vmem:[#allocation4_spill] sm:$0xff]  ;;  %v23917_v63 = vld [vmem:[#allocation5_spill] sm:$0xff]  ;;  %v4830_v5 = vadd.f32 %v23920_v15, %v4517_v12 }
 0x3d3   : > { %v5201_v10 = vpop.f32.mrf.mxu1  ;;  %v4015_v24 = vadd.f32 %v23917_v63, %v23916_v21  ;;  %v4836_v12 = vadd.f32 %v21092_v35, %v4523_v22 }
 0x3d4   : > { %v5293_v25 = vmax.f32 %v21110_v61, 0.0  ;;  %v21116_v4 = vadd.f32 %v5264_v27, %v20361_v1  ;;  %v5262_v38 = vadd.f32 %v5201_v10, %v5028_v40  ;;  %v23922_v10 = vld [vmem:[#allocation10_spill] sm:$0xff]  ;;  %v5036_v51 = vadd.f32 %v4999_v23, %v4830_v5 }
 0x3d5   : > { %v17682_v42 = vpop.f32.mrf.mxu1  ;;  %v4208_v2 = vadd.f32 %v23922_v10, %v4015_v24 }
 0x3d6   : > { %v5296_v60 = vmax.f32 %v21116_v4, 0.0  ;;  %v21122_v39 = vadd.f32 %v5262_v38, %v20361_v1  ;;  %v5267_v18 = vadd.f32 %v17682_v42, %v5033_v33  ;;  %v4520_v33 = vadd.f32 %v23921_v36, %v4207_v20  ;;  %v23923_v38 = vld [vmem:[#allocation14_spill] sm:$0xff] }
 0x3d7   : > { %v5214_v46 = vpop.f32.mrf.mxu1  ;;  %v4835_v29 = vadd.f32 %v23923_v38, %v4522_v26 }
 0x3d8   : > { %v5294_v54 = vmax.f32 %v21122_v39, 0.0  ;;  %v21130_v43 = vadd.f32 %v5267_v18, %v20361_v1  ;;  %v5265_v7 = vadd.f32 %v5214_v46, %v5031_v44  ;;  %v5012_v44 = vpop.f32.mrf.mxu0  ;;  %v23925_v46 = vld [vmem:[#allocation11_spill] sm:$0xff] }
 0x3d9   : > { %v17683_v3 = vpop.f32.mrf.mxu1 }
 0x3da   : > { %v5299_v13 = vmax.f32 %v21130_v43, 0.0  ;;  %v21140_v8 = vadd.f32 %v5265_v7, %v20361_v1  ;;  %v5268_v52 = vadd.f32 %v17683_v3, %v5034_v50  ;;  %v4833_v50 = vadd.f32 %v23925_v46, %v4520_v33  ;;  %v23926_v3 = vld [vmem:[#allocation13_spill] sm:$0xff] }
 0x3db   : > { %v5217_v34 = vpop.f32.mrf.mxu1  ;;  %v4521_v28 = vadd.f32 %v23926_v3, %v4208_v2 }
 0x3dc   : > { %v5297_v17 = vmax.f32 %v21140_v8, 0.0  ;;  %v21150_v30 = vadd.f32 %v5268_v52, %v20361_v1  ;;  %v5266_v47 = vadd.f32 %v5217_v34, %v5032_v58  ;;  %v5041_v58 = vadd.f32 %v17658_v48, %v4835_v29  ;;  %v17659_v52 = vpop.f32.mrf.mxu0 }
 0x3dd   : > { %v17686_v49 = vpop.f32.mrf.mxu1  ;;  %v5039_v23 = vadd.f32 %v5012_v44, %v4833_v50  ;;  %v5042_v26 = vadd.f32 %v17659_v52, %v4836_v12 }
 0x3de   : > { %v5300_v40 = vmax.f32 %v21150_v30, 0.0  ;;  %v21159_v9 = vadd.f32 %v5266_v47, %v20361_v1  ;;  %v5271_v27 = vadd.f32 %v17686_v49, %v5037_v57  ;;  %v4834_v47 = vadd.f32 %v21095_v11, %v4521_v28  ;;  %v5015_v24 = vpop.f32.mrf.mxu0 }
 0x3df   : > { %v5230_v42 = vpop.f32.mrf.mxu1 }
 0x3e0   : > { %v5298_v41 = vmax.f32 %v21159_v9, 0.0  ;;  %v21166_v18 = vadd.f32 %v5271_v27, %v20361_v1  ;;  %v5269_v6 = vadd.f32 %v5230_v42, %v5035_v37  ;;  %v5040_v49 = vadd.f32 %v5015_v24, %v4834_v47 }
 0x3e1   : > { %v17687_v7 = vpop.f32.mrf.mxu1 }
 0x3e2   : > { %v5303_v53 = vmax.f32 %v21166_v18, 0.0  ;;  %v21172_v45 = vadd.f32 %v5269_v6, %v20361_v1  ;;  %v5272_v55 = vadd.f32 %v17687_v7, %v5038_v59 }
 0x3e3   : > { %v5233_v31 = vpop.f32.mrf.mxu1 }
 0x3e4   : > { %v5301_v20 = vmax.f32 %v21172_v45, 0.0  ;;  %v21178_v57 = vadd.f32 %v5272_v55, %v20361_v1  ;;  %v5270_v34 = vadd.f32 %v5233_v31, %v5036_v51 }
 0x3e5   : > { %v17690_v16 = vpop.f32.mrf.mxu1 }
 0x3e6   : > { %v5304_v21 = vmax.f32 %v21178_v57, 0.0  ;;  %v21183_v63 = vadd.f32 %v5270_v34, %v20361_v1  ;;  %v5275_v48 = vadd.f32 %v17690_v16, %v5041_v58 }
 0x3e7   : > { %v5246_v62 = vpop.f32.mrf.mxu1 }
 0x3e8   : > { %v5302_v35 = vmax.f32 %v21183_v63, 0.0  ;;  %v21187_v19 = vadd.f32 %v5275_v48, %v20361_v1  ;;  %v5273_v32 = vadd.f32 %v5246_v62, %v5039_v23 }
 0x3e9   : > { %v17691_v37 = vpop.f32.mrf.mxu1 }
 0x3ea   : > { %v5307_v15 = vmax.f32 %v21187_v19, 0.0  ;;  %v21191_v11 = vadd.f32 %v5273_v32, %v20361_v1  ;;  %v5276_v5 = vadd.f32 %v17691_v37, %v5042_v26 }
 0x3eb   : > { %v5249_v27 = vpop.f32.mrf.mxu1 }
 0x3ec   : > { %v5305_v36 = vmax.f32 %v21191_v11, 0.0  ;;  %v21195_v33 = vadd.f32 %v5276_v5, %v20361_v1  ;;  %v5274_v10 = vadd.f32 %v5249_v27, %v5040_v49  ;;  %5311 = sbr.rel (%p14711_p11) target bundleno = 1017 (0x3f9), region = 56 }
 0x3ee   : > { %v5308_v2 = vmax.f32 %v21195_v33, 0.0  ;;  %v21199_v38 = vadd.f32 %v5274_v10, %v20361_v1 }
 0x3f0   : > { %v5306_v29 = vmax.f32 %v21199_v38, 0.0 }
 0x3f1   : > { %5312 = vst [vmem:[%s19818_s11 + $0x80] sm:$0xff] %v5293_v25  ;;  %5313 = vst [vmem:[%s19818_s11 + $0x88] sm:$0xff] %v5294_v54 }
 0x3f2   : > { %5314 = vst [vmem:[%s19818_s11 + $0x90] sm:$0xff] %v5295_v0  ;;  %5315 = vst [vmem:[%s19818_s11 + $0x98] sm:$0xff] %v5296_v60 }
 0x3f3   : > { %5316 = vst [vmem:[%s19818_s11 + $0xa0] sm:$0xff] %v5297_v17  ;;  %5317 = vst [vmem:[%s19818_s11 + $0xa8] sm:$0xff] %v5298_v41 }
 0x3f4   : > { %5318 = vst [vmem:[%s19818_s11 + $0xb0] sm:$0xff] %v5299_v13  ;;  %5319 = vst [vmem:[%s19818_s11 + $0xb8] sm:$0xff] %v5300_v40 }
 0x3f5   : > { %5320 = vst [vmem:[%s19818_s11 + $0xc0] sm:$0xff] %v5301_v20  ;;  %5321 = vst [vmem:[%s19818_s11 + $0xc8] sm:$0xff] %v5302_v35 }
 0x3f6   : > { %5322 = vst [vmem:[%s19818_s11 + $0xd0] sm:$0xff] %v5303_v53  ;;  %5323 = vst [vmem:[%s19818_s11 + $0xd8] sm:$0xff] %v5304_v21 }
 0x3f7   : > { %5324 = vst [vmem:[%s19818_s11 + $0xe0] sm:$0xff] %v5305_v36  ;;  %5325 = vst [vmem:[%s19818_s11 + $0xe8] sm:$0xff] %v5306_v29 }
 0x3f8   : > { %5326 = vst [vmem:[%s19818_s11 + $0xf0] sm:$0xff] %v5307_v15  ;;  %5327 = vst [vmem:[%s19818_s11 + $0xf8] sm:$0xff] %v5308_v2 }
 0x3f9 PF: > { %5330 = sbr.rel (%p14712_p12) target bundleno = 1181 (0x49d), region = 60 }
 0x3fe   : > { %v5333_v44 = vld [vmem:[%s23877_s3 + $0x90] sm:$0xff]  ;;  %v5331_v42 = vld [vmem:[%s23877_s3 + $0x80] sm:$0xff]  ;;  %v19730_v59 = vmov 0   ;;  %v5334_v6 = vld [vmem:[%s23877_s3 + $0x98] sm:$0xff] }
 0x3ff   : > { %19245 = vset.pattern.permute.xlu1 %v19730_v59  ;;  %19244 = vset.pattern.permute.xlu0 %v19730_v59  ;;  %v5332_v56 = vld [vmem:[%s23877_s3 + $0x88] sm:$0xff]  ;;  %v5335_v46 = vld [vmem:[%s23877_s3 + $0xa0] sm:$0xff]  ;;  %v5338_v50 = vld [vmem:[%s23877_s3 + $0xb8] sm:$0xff] }
 0x400   : > { %5359 = vperm.xlu1 %19245, %v5333_v44   ;;  %5349 = vperm.xlu0 %19244, %v5331_v42   ;;  %v5336_v22 = vld [vmem:[%s23877_s3 + $0xa8] sm:$0xff]  ;;  %v5337_v7 = vld [vmem:[%s23877_s3 + $0xb0] sm:$0xff]  ;;  %v5339_v55 = vld [vmem:[%s23877_s3 + $0xc0] sm:$0xff] }
 0x401   : > { %v5340_v51 = vld [vmem:[%s23877_s3 + $0xc8] sm:$0xff]  ;;  %v5342_v3 = vld [vmem:[%s23877_s3 + $0xd8] sm:$0xff]  ;;  %v5341_v28 = vld [vmem:[%s23877_s3 + $0xd0] sm:$0xff] }
 0x402   : > { %v5344_v58 = vld [vmem:[%s23877_s3 + $0xe8] sm:$0xff]  ;;  %v5343_v52 = vld [vmem:[%s23877_s3 + $0xe0] sm:$0xff]  ;;  %v5346_v31 = vld [vmem:[%s23877_s3 + $0xf8] sm:$0xff] }
 0x403   : > { %v5345_v12 = vld [vmem:[%s23877_s3 + $0xf0] sm:$0xff] }
 0x404   : > { %5364 = vperm.xlu1 %19245, %v5334_v6   ;;  %5354 = vperm.xlu0 %19244, %v5332_v56  }
 0x408   : > { %5374 = vperm.xlu1 %19245, %v5336_v22   ;;  %5369 = vperm.xlu0 %19244, %v5335_v46  }
 0x40c   : > { %5384 = vperm.xlu1 %19245, %v5338_v50   ;;  %5379 = vperm.xlu0 %19244, %v5337_v7  }
 0x410   : > { %5394 = vperm.xlu1 %19245, %v5340_v51   ;;  %5389 = vperm.xlu0 %19244, %v5339_v55  }
 0x414   : > { %5404 = vperm.xlu1 %19245, %v5342_v3   ;;  %5399 = vperm.xlu0 %19244, %v5341_v28  }
 0x418   : > { %5414 = vperm.xlu1 %19245, %v5344_v58   ;;  %5409 = vperm.xlu0 %19244, %v5343_v52  }
 0x41c   : > { %5424 = vperm.xlu1 %19245, %v5346_v31   ;;  %5419 = vperm.xlu0 %19244, %v5345_v12  }
 0x47b   : > { %v5360_v34 = vpop.permute.xlu1 %5359  ;;  %v5350_v23 = vpop.permute.xlu0 %5349 }
 0x47c   : > { %v5429_v48 = vmul.f32 %v5360_v34, %v5295_v0  ;;  %v5427_v24 = vmul.f32 %v5350_v23, %v5293_v25 }
 0x47f   : > { %v5365_v16 = vpop.permute.xlu1 %5364  ;;  %v5355_v47 = vpop.permute.xlu0 %5354 }
 0x480   : > { %v5430_v62 = vmul.f32 %v5365_v16, %v5296_v60  ;;  %v5428_v26 = vmul.f32 %v5355_v47, %v5294_v54 }
 0x482   : > { %v16132_v32 = vpack.c.bf16 %v5430_v62, %v5429_v48  ;;  %v16127_v37 = vpack.c.bf16 %v5428_v26, %v5427_v24 }
 0x483   : > { %v5375_v49 = vpop.permute.xlu1 %5374  ;;  %v5370_v5 = vpop.permute.xlu0 %5369 }
 0x484   : > { %16278 = vst [vmem:[#allocation2 + $0x58] sm:$0xff] %v16132_v32   ;;  %16277 = vst [vmem:[#allocation2 + $0x50] sm:$0xff] %v16127_v37   ;;  %v5432_v27 = vmul.f32 %v5375_v49, %v5298_v41  ;;  %v5431_v14 = vmul.f32 %v5370_v5, %v5297_v17 }
 0x486   : > { %v16137_v0 = vpack.c.bf16 %v5432_v27, %v5431_v14 }
 0x487   : > { %v5385_v61 = vpop.permute.xlu1 %5384  ;;  %v5380_v25 = vpop.permute.xlu0 %5379 }
 0x488   : > { %16279 = vst [vmem:[#allocation2 + $0x60] sm:$0xff] %v16137_v0   ;;  %v5434_v4 = vmul.f32 %v5385_v61, %v5300_v40  ;;  %v5433_v60 = vmul.f32 %v5380_v25, %v5299_v13 }
 0x48a   : > { %v16142_v39 = vpack.c.bf16 %v5434_v4, %v5433_v60 }
 0x48b   : > { %v5395_v54 = vpop.permute.xlu1 %5394  ;;  %v5390_v10 = vpop.permute.xlu0 %5389 }
 0x48c   : > { %16280 = vst [vmem:[#allocation2 + $0x68] sm:$0xff] %v16142_v39   ;;  %v5436_v9 = vmul.f32 %v5395_v54, %v5302_v35  ;;  %v5435_v8 = vmul.f32 %v5390_v10, %v5301_v20 }
 0x48e   : > { %v16147_v17 = vpack.c.bf16 %v5436_v9, %v5435_v8 }
 0x48f   : > { %v5405_v41 = vpop.permute.xlu1 %5404  ;;  %v5400_v44 = vpop.permute.xlu0 %5399 }
 0x490   : > { %16281 = vst [vmem:[#allocation2 + $0x70] sm:$0xff] %v16147_v17   ;;  %v5438_v30 = vmul.f32 %v5405_v41, %v5304_v21  ;;  %v5437_v43 = vmul.f32 %v5400_v44, %v5303_v53 }
 0x492   : > { %v16152_v13 = vpack.c.bf16 %v5438_v30, %v5437_v43 }
 0x493   : > { %v5415_v40 = vpop.permute.xlu1 %5414  ;;  %v5410_v42 = vpop.permute.xlu0 %5409 }
 0x494   : > { %16282 = vst [vmem:[#allocation2 + $0x78] sm:$0xff] %v16152_v13   ;;  %v5440_v63 = vmul.f32 %v5415_v40, %v5306_v29  ;;  %v5439_v45 = vmul.f32 %v5410_v42, %v5305_v36 }
 0x496   : > { %v16157_v20 = vpack.c.bf16 %v5440_v63, %v5439_v45 }
 0x497   : > { %v5425_v35 = vpop.permute.xlu1 %5424  ;;  %v5420_v59 = vpop.permute.xlu0 %5419 }
 0x498   : > { %16283 = vst [vmem:[#allocation2 + $0x80] sm:$0xff] %v16157_v20   ;;  %v5442_v57 = vmul.f32 %v5425_v35, %v5308_v2  ;;  %v5441_v18 = vmul.f32 %v5420_v59, %v5307_v15 }
 0x49a   : > { %v16162_v53 = vpack.c.bf16 %v5442_v57, %v5441_v18 }
 0x49c   : > { %16284 = vst [vmem:[#allocation2 + $0x88] sm:$0xff] %v16162_v53  }
 0x49d PF: > { %v19246_v21 = vld [vmem:[%s19813_s8 + $0x78] sm:$0xff]   ;;  %v19731_v11 = vmov 0.0   ;;  %v19248_v19 = vld [vmem:[%s19813_s8 + $0x70] sm:$0xff]   ;;  %vm19732_vm6 = vmmov 0   ;;  %v19250_v33 = vld [vmem:[%s19813_s8 + $0x68] sm:$0xff]  }
 0x49e   : > { %17692 = vmatprep.subr.bf16.mxu0 %v19731_v11  ;;  %17728 = vmatprep.subr.bf16.mxu1 %v19731_v11  ;;  %v19247_v36 = vld [vmem:[%s19813_s8 + $0x38] sm:$0xff]   ;;  %v19249_v15 = vld [vmem:[%s19813_s8 + $0x30] sm:$0xff]   ;;  %v19251_v2 = vld [vmem:[%s19813_s8 + $0x28] sm:$0xff]  }
 0x49f   : > { %17693 = vmatpush3.bf16.msra.mxu0 %v19246_v21  ;;  %17708 = vmatprep.mubr.msk.bf16.mxu0 %vm19732_vm6, %v19731_v11  ;;  %v19252_v38 = vld [vmem:[%s19813_s8 + $0x60] sm:$0xff]   ;;  %v19254_v6 = vld [vmem:[%s19813_s8 + $0x58] sm:$0xff]   ;;  %v5524_v22 = vld [vmem:[#allocation2 + $0x14c] sm:$0xf] }
 0x4a0   : > { %17729 = vmatpush3.bf16.msra.mxu1 %v19247_v36  ;;  %17694 = vmatprep.subr.bf16.mxu0 %v19731_v11  ;;  %v19253_v29 = vld [vmem:[%s19813_s8 + $0x20] sm:$0xff]   ;;  %v19255_v56 = vld [vmem:[%s19813_s8 + $0x18] sm:$0xff]   ;;  %v19256_v46 = vld [vmem:[%s19813_s8 + $0x50] sm:$0xff]  }
 0x4a1   : > { %17730 = vmatprep.subr.bf16.mxu1 %v19731_v11  ;;  %17744 = vmatprep.mubr.msk.bf16.mxu1 %vm19732_vm6, %v19731_v11  ;;  %v21359_v50 = vld [vmem:[#allocation2 + $0x150] sm:$0xff]   ;;  %v5523_v7 = vld [vmem:[#allocation2 + $0x148] sm:$0xc]  ;;  %v21374_v48 = vld [vmem:[#allocation2 + $0x158] sm:$0xff]  }
 0x4a2   : > { %v5549_v51 = vld [vmem:[#allocation2 + $0x148] sm:$0x8]  ;;  %v15024_v55 = vcombine.low %v5523_v7, %v5524_v22  ;;  %v19257_v3 = vld [vmem:[%s19813_s8 + $0x10] sm:$0xff]   ;;  %v5737_v28 = vshrl.u32 %v21359_v50, 16  ;;  %v5740_v58 = vshll.u32 %v21359_v50, 16  ;;  %v19260_v26 = vld [vmem:[%s19813_s8 + $0x40] sm:$0xff]  }
 0x4a3   : > { %17695 = vmatpush3.bf16.msra.mxu0 %v19248_v19  ;;  %v19258_v12 = vld [vmem:[%s19813_s8 + $0x48] sm:$0xff]   ;;  %v21367_v34 = vcombine.low %v5549_v51, %v5524_v22  ;;  %v5592_v37 = vrot.slane %v21359_v50, 3  ;;  %v19261_v49 = vld [vmem:[%s19813_s8] sm:$0xff]   ;;  %v5746_v14 = vshrl.u32 %v21374_v48, 16  ;;  %v5749_v0 = vshll.u32 %v21374_v48, 16  ;;  %v19265_v61 = vld [vmem:[%s19813_s8 + $0xb8] sm:$0xff]  }
 0x4a4   : > { %17731 = vmatpush3.bf16.msra.mxu1 %v19249_v15  ;;  %17696 = vmatprep.subr.bf16.mxu0 %v19731_v11  ;;  %v5729_v52 = vshrl.u32 %v15024_v55, 16  ;;  %v5732_v31 = vshll.u32 %v15024_v55, 16  ;;  %v19259_v23 = vld [vmem:[%s19813_s8 + $0x8] sm:$0xff]   ;;  %v5739_v16 = vrot.slane %v5737_v28, 2  ;;  %v5742_v47 = vrot.slane %v5740_v58, 3  ;;  %v21388_v4 = vld [vmem:[#allocation2 + $0x160] sm:$0xff]  }
 0x4a5   : > { %17732 = vmatprep.subr.bf16.mxu1 %v19731_v11  ;;  %v5591_v32 = vrot.slane %v21367_v34, 3  ;;  %v5748_v39 = vrot.slane %v5746_v14, 2  ;;  %v5751_v54 = vrot.slane %v5749_v0, 3  ;;  %v19268_v10 = vld [vmem:[%s19813_s8 + $0xf8] sm:$0xff]   ;;  %v19266_v9 = vld [vmem:[%s19813_s8 + $0xb0] sm:$0xff]   ;;  %v5594_v8 = vrot.slane %v21374_v48, 3 }
 0x4a6   : > { %v5731_v24 = vrot.slane %v5729_v52, 2  ;;  %v5734_v62 = vrot.slane %v5732_v31, 3  ;;  %v5743_v27 = vor.u32 %v5742_v47, %v5739_v16  ;;  %v19270_v17 = vld [vmem:[%s19813_s8 + $0xf0] sm:$0xff]   ;;  %v5755_v41 = vshrl.u32 %v21388_v4, 16  ;;  %v21408_v43 = vld [vmem:[#allocation2 + $0x168] sm:$0xf] }
 0x4a7   : > { %17697 = vmatpush3.bf16.msra.mxu0 %v19250_v33  ;;  %v5593_v25 = vsel %vm470_vm0, %v5591_v32, %v5592_v37  ;;  %v5758_v44 = vshll.u32 %v21388_v4, 16  ;;  %v5752_v30 = vor.u32 %v5751_v54, %v5748_v39  ;;  %v5532_v13 = vld [vmem:[#allocation2 + $0x16c] sm:$0x1]  ;;  %v5595_v40 = vsel %vm470_vm0, %v5592_v37, %v5594_v8  ;;  %v19272_v18 = vld [vmem:[%s19813_s8 + $0xa0] sm:$0xff]   ;;  %v19274_v33 = vld [vmem:[%s19813_s8 + $0x98] sm:$0xff]  }
 0x4a8   : > { %17733 = vmatpush3.bf16.msra.mxu1 %v19251_v2  ;;  %17698 = vmatprep.subr.bf16.mxu0 %v19731_v11  ;;  %v5735_v5 = vor.u32 %v5734_v62, %v5731_v24  ;;  %v19269_v42 = vld [vmem:[%s19813_s8 + $0xa8] sm:$0xff]   ;;  %v5757_v45 = vrot.slane %v5755_v41, 2  ;;  %v21420_v35 = vcombine.low %v21408_v43, %v5532_v13  ;;  %v5596_v57 = vrot.slane %v21388_v4, 3  ;;  %v19275_v19 = vld [vmem:[%s19813_s8 + $0xe0] sm:$0xff]   ;;  %v6080_v22 = vld [vmem:[#allocation2 + $0x150] sm:$0x8] }
 0x4a9   : > { %17734 = vmatprep.subr.bf16.mxu1 %v19731_v11  ;;  %v5753_v63 = vsel %vm644_vm1, %v5743_v27, %v5752_v30  ;;  %v5760_v20 = vrot.slane %v5758_v44, 3  ;;  %v19273_v59 = vld [vmem:[%s19813_s8 + $0xe8] sm:$0xff]   ;;  %v21442_v7 = vld [vmem:[#allocation2 + $0x154] sm:$0xf]  ;;  %v21444_v51 = vld [vmem:[#allocation2 + $0x158] sm:$0xf] }
 0x4aa   : > { %v5744_v60 = vsel %vm644_vm1, %v5735_v5, %v5743_v27  ;;  %v5764_v21 = vshrl.u32 %v21420_v35, 16  ;;  %v5767_v36 = vshll.u32 %v21420_v35, 16  ;;  %v5597_v15 = vsel %vm470_vm0, %v5594_v8, %v5596_v57  ;;  %v21447_v55 = vld [vmem:[#allocation2 + $0x15c] sm:$0xf]  ;;  %v19279_v52 = vld [vmem:[%s19813_s8 + $0xd0] sm:$0xff]   ;;  %v19280_v47 = vld [vmem:[%s19813_s8 + $0x88] sm:$0xff]  }
 0x4ab   : > { %17699 = vmatpush3.bf16.msra.mxu0 %v19252_v38  ;;  %v5761_v53 = vor.u32 %v5760_v20, %v5757_v45  ;;  %v5598_v2 = vrot.slane %v21420_v35, 3  ;;  %v19277_v38 = vld [vmem:[%s19813_s8 + $0xd8] sm:$0xff]   ;;  %v15074_v31 = vcombine.low %v6080_v22, %v21442_v7  ;;  %v19281_v24 = vld [vmem:[%s19813_s8 + $0xc8] sm:$0xff]   ;;  %v5918_v62 = vshrl.u32 %v21367_v34, 16 }
 0x4ac   : > { %17735 = vmatpush3.bf16.msra.mxu1 %v19253_v29  ;;  %17700 = vmatprep.subr.bf16.mxu0 %v19731_v11  ;;  %v5925_v39 = vrot.slane %v5737_v28, 3 }
 0x4ad   : > { %17736 = vmatprep.subr.bf16.mxu1 %v19731_v11  ;;  %v5762_v29 = vsel %vm644_vm1, %v5752_v30, %v5761_v53  ;;  %v6132_v32 = vshrl.u32 %v15074_v31, 16  ;;  %v6135_v37 = vshll.u32 %v15074_v31, 16 }
 0x4af   : > { %17701 = vmatpush3.bf16.msra.mxu0 %v19254_v6  ;;  %v5766_v6 = vrot.slane %v5764_v21, 2  ;;  %v6134_v8 = vrot.slane %v6132_v32, 3 }
 0x4b0   : > { %17737 = vmatpush3.bf16.msra.mxu1 %v19255_v56  ;;  %17702 = vmatprep.subr.bf16.mxu0 %v19731_v11  ;;  %v5769_v56 = vrot.slane %v5767_v36, 3 }
 0x4b1   : > { %17738 = vmatprep.subr.bf16.mxu1 %v19731_v11 }
 0x4b3   : > { %17703 = vmatpush3.bf16.msra.mxu0 %v19256_v46  ;;  %v19278_v46 = vld [vmem:[%s19813_s8 + $0x90] sm:$0xff]  }
 0x4b4   : > { %17739 = vmatpush3.bf16.msra.mxu1 %v19257_v3  ;;  %17704 = vmatprep.subr.bf16.mxu0 %v19731_v11  ;;  %v5770_v3 = vor.u32 %v5769_v56, %v5766_v6  ;;  %v19292_v6 = vld [vmem:[%s19813_s8 + $0x170] sm:$0xff]   ;;  %v5897_v56 = vld [vmem:[#allocation2 + $0x16c] sm:$0x3] }
 0x4b5   : > { %17740 = vmatprep.subr.bf16.mxu1 %v19731_v11  ;;  %v15049_v31 = vcombine.low %v21408_v43, %v5897_v56 }
 0x4b6   : > { %v5771_v16 = vsel %vm644_vm1, %v5761_v53, %v5770_v3  ;;  %v5930_v53 = vrot.slane %v5749_v0, 4  ;;  %v21514_v0 = vld [vmem:[#allocation2 + $0x174] sm:$0x3] }
 0x4b7   : > { %17705 = vmatpush3.bf16.msra.mxu0 %v19258_v12  ;;  %v15075_v12 = vcombine.low %v21444_v51, %v21447_v55 }
 0x4b8   : > { %17741 = vmatpush3.bf16.msra.mxu1 %v19259_v23  ;;  %17706 = vmatprep.subr.bf16.mxu0 %v19731_v11  ;;  %v5599_v23 = vsel %vm470_vm0, %v5596_v57, %v5598_v2  ;;  %v19286_v57 = vld [vmem:[%s19813_s8 + $0x138] sm:$0xff]  }
 0x4b9   : > { %17742 = vmatprep.subr.bf16.mxu1 %v19731_v11  ;;  %v6140_v5 = vshrl.u32 %v15075_v12, 16  ;;  %v6143_v27 = vshll.u32 %v15075_v12, 16 }
 0x4bb   : > { %17707 = vmatpush3.bf16.msra.mxu0 %v19260_v26  ;;  %v5921_v26 = vshll.u32 %v21367_v34, 16  ;;  %v19283_v34 = vld [vmem:[%s19813_s8 + $0xc0] sm:$0xff]   ;;  %v6142_v30 = vrot.slane %v6140_v5, 3  ;;  %v6145_v13 = vrot.slane %v6143_v27, 4  ;;  %v19296_v5 = vld [vmem:[%s19813_s8 + $0x118] sm:$0xff]  }
 0x4bc   : > { %17743 = vmatpush3.bf16.msra.mxu1 %v19261_v49  ;;  %17764 = vmatprep.subr.bf16.mxu0 %v19731_v11  ;;  %v19282_v49 = vld [vmem:[%s19813_s8 + $0x80] sm:$0xff]  }
 0x4bd   : > { %17800 = vmatprep.subr.bf16.mxu1 %v19731_v11  ;;  %v6146_v20 = vor.u32 %v6145_v13, %v6142_v30  ;;  %v19302_v30 = vld [vmem:[%s19813_s8 + $0x150] sm:$0xff]  }
 0x4be   : > { %17709 = vmatmul.mubr.bf16.vlgmr.msra.gmra.mxu0 %v5593_v25  ;;  %v21472_v25 = vld [vmem:[#allocation2 + $0x164] sm:$0xf] }
 0x4bf   : > { %17745 = vmatmul.mubr.bf16.vlgmr.msra.gmra.mxu1 %v5744_v60  ;;  %17765 = vmatpush3.bf16.msra.mxu0 %v19265_v61  ;;  %v21470_v61 = vld [vmem:[#allocation2 + $0x160] sm:$0xf]  ;;  %v5920_v60 = vrot.slane %v5918_v62, 3 }
 0x4c0   : > { %17766 = vmatprep.subr.bf16.mxu0 %v19731_v11  ;;  %17712 = vmatprep.mubr.msk.bf16.mxu0 %vm19732_vm6, %v19731_v11  ;;  %v15076_v54 = vcombine.low %v21470_v61, %v21472_v25  ;;  %v19294_v62 = vld [vmem:[%s19813_s8 + $0x120] sm:$0xff]  }
 0x4c1   : > { %17748 = vmatprep.mubr.msk.bf16.mxu1 %vm19732_vm6, %v19731_v11  ;;  %17801 = vmatpush3.bf16.msra.mxu1 %v19268_v10  ;;  %v5923_v10 = vrot.slane %v5921_v26, 4 }
 0x4c2   : > { %17802 = vmatprep.subr.bf16.mxu1 %v19731_v11 }
 0x4c3   : > { %17767 = vmatpush3.bf16.msra.mxu0 %v19266_v9  ;;  %v5926_v9 = vrot.slane %v5740_v58, 4  ;;  %v5924_v50 = vor.u32 %v5923_v10, %v5920_v60  ;;  %v21489_v58 = vld [vmem:[#allocation2 + $0x168] sm:$0xf]  ;;  %v19300_v10 = vld [vmem:[%s19813_s8 + $0x158] sm:$0xff]  }
 0x4c4   : > { %17768 = vmatprep.subr.bf16.mxu0 %v19731_v11 }
 0x4c5   : > { %17803 = vmatpush3.bf16.msra.mxu1 %v19270_v17  ;;  %v6137_v17 = vrot.slane %v6135_v37, 4  ;;  %v5927_v28 = vor.u32 %v5926_v9, %v5925_v39  ;;  %v19297_v37 = vld [vmem:[%s19813_s8 + $0x160] sm:$0xff]  }
 0x4c6   : > { %17713 = vmatmul.mubr.bf16.gmra.mxu0 %v5595_v40  ;;  %17804 = vmatprep.subr.bf16.mxu1 %v19731_v11  ;;  %v6149_v40 = vshrl.u32 %v15076_v54, 16 }
 0x4c7   : > { %17749 = vmatmul.mubr.bf16.gmra.mxu1 %v5753_v63  ;;  %17769 = vmatpush3.bf16.msra.mxu0 %v19269_v42  ;;  %v6152_v42 = vshll.u32 %v15076_v54, 16  ;;  %v21491_v63 = vld [vmem:[#allocation2 + $0x16c] sm:$0xf]  ;;  %v6138_v45 = vor.u32 %v6137_v17, %v6134_v8  ;;  %v19301_v8 = vld [vmem:[%s19813_s8 + $0x110] sm:$0xff]  }
 0x4c8   : > { %17716 = vmatprep.mubr.msk.bf16.mxu0 %vm19732_vm6, %v19731_v11  ;;  %17752 = vmatprep.mubr.msk.bf16.mxu1 %vm19732_vm6, %v19731_v11  ;;  %v15077_v35 = vcombine.low %v21489_v58, %v21491_v63  ;;  %v6151_v36 = vrot.slane %v6149_v40, 3 }
 0x4c9   : > { %17770 = vmatprep.subr.bf16.mxu0 %v19731_v11  ;;  %17805 = vmatpush3.bf16.msra.mxu1 %v19273_v59  ;;  %v5928_v59 = vsel %vm899_vm2, %v5924_v50, %v5927_v28  ;;  %v6147_v21 = vsel %vm899_vm2, %v6138_v45, %v6146_v20  ;;  %v15103_v50 = vcombine.low %v21442_v7, %v21444_v51  ;;  %v19306_v7 = vld [vmem:[%s19813_s8 + $0x140] sm:$0xff]  }
 0x4ca   : > { %17806 = vmatprep.subr.bf16.mxu1 %v19731_v11  ;;  %v15104_v45 = vcombine.low %v21447_v55, %v21470_v61 }
 0x4cb   : > { %17771 = vmatpush3.bf16.msra.mxu0 %v19272_v18  ;;  %v5929_v18 = vrot.slane %v5746_v14, 3  ;;  %v21510_v14 = vld [vmem:[#allocation2 + $0x170] sm:$0xf]  ;;  %v6485_v51 = vshrl.u32 %v15103_v50, 16 }
 0x4cc   : > { %17772 = vmatprep.subr.bf16.mxu0 %v19731_v11 }
 0x4cd   : > { %17807 = vmatpush3.bf16.msra.mxu1 %v19275_v19  ;;  %v6154_v19 = vrot.slane %v6152_v42, 4  ;;  %v19303_v42 = vld [vmem:[%s19813_s8 + $0x108] sm:$0xff]  }
 0x4ce   : > { %17717 = vmatmul.mubr.bf16.gmra.mxu0 %v5597_v15  ;;  %17808 = vmatprep.subr.bf16.mxu1 %v19731_v11  ;;  %v19287_v15 = vld [vmem:[%s19813_s8 + $0x130] sm:$0xff]  }
 0x4cf   : > { %17753 = vmatmul.mubr.bf16.gmra.mxu1 %v5762_v29  ;;  %17773 = vmatpush3.bf16.msra.mxu0 %v19274_v33  ;;  %v19290_v33 = vld [vmem:[%s19813_s8 + $0x178] sm:$0xff]   ;;  %v5931_v29 = vor.u32 %v5930_v53, %v5929_v18  ;;  %v6155_v48 = vor.u32 %v6154_v19, %v6151_v36  ;;  %v15105_v18 = vcombine.low %v21472_v25, %v21489_v58  ;;  %v6496_v36 = vshrl.u32 %v15104_v45, 16 }
 0x4d0   : > { %17720 = vmatprep.mubr.msk.bf16.mxu0 %vm19732_vm6, %v19731_v11  ;;  %17756 = vmatprep.mubr.msk.bf16.mxu1 %vm19732_vm6, %v19731_v11  ;;  %v19308_v53 = vld [vmem:[%s19813_s8 + $0x1b8] sm:$0xff]   ;;  %v15106_v58 = vcombine.low %v21491_v63, %v21510_v14  ;;  %v19315_v63 = vld [vmem:[%s19813_s8 + $0x1a0] sm:$0xff]  }
 0x4d1   : > { %17774 = vmatprep.subr.bf16.mxu0 %v19731_v11  ;;  %17809 = vmatpush3.bf16.msra.mxu1 %v19277_v38  ;;  %v6161_v38 = vshll.u32 %v15077_v35, 16  ;;  %v5932_v22 = vsel %vm899_vm2, %v5927_v28, %v5931_v29  ;;  %v6156_v12 = vsel %vm899_vm2, %v6146_v20, %v6155_v48  ;;  %v19304_v28 = vld [vmem:[%s19813_s8 + $0x148] sm:$0xff]   ;;  %v19305_v20 = vld [vmem:[%s19813_s8 + $0x100] sm:$0xff]   ;;  %v6500_v19 = vshll.u32 %v15105_v18, 16 }
 0x4d2   : > { %17810 = vmatprep.subr.bf16.mxu1 %v19731_v11  ;;  %v6504_v56 = vshrl.u32 %v15105_v18, 16 }
 0x4d3   : > { %17775 = vmatpush3.bf16.msra.mxu0 %v19278_v46  ;;  %v19291_v46 = vld [vmem:[%s19813_s8 + $0x128] sm:$0xff]   ;;  %v6502_v25 = vrot.slane %v6500_v19, 1 }
 0x4d4   : > { %17776 = vmatprep.subr.bf16.mxu0 %v19731_v11 }
 0x4d5   : > { %17811 = vmatpush3.bf16.msra.mxu1 %v19279_v52  ;;  %v5934_v52 = vrot.slane %v5758_v44, 4  ;;  %v5941_v44 = vshll.u32 %v15049_v31, 16 }
 0x4d6   : > { %17721 = vmatmul.mubr.bf16.gmra.mxu0 %v5599_v23  ;;  %17812 = vmatprep.subr.bf16.mxu1 %v19731_v11 }
 0x4d7   : > { %17757 = vmatmul.mubr.bf16.gmra.mxu1 %v5771_v16  ;;  %17724 = vmatprep.mubr.msk.bf16.mxu0 %vm19732_vm6, %v19731_v11  ;;  %v6163_v16 = vrot.slane %v6161_v38, 4  ;;  %v19313_v38 = vld [vmem:[%s19813_s8 + $0x1f0] sm:$0xff]  }
 0x4d8   : > { %17760 = vmatprep.mubr.msk.bf16.mxu1 %vm19732_vm6, %v19731_v11  ;;  %17777 = vmatpush3.bf16.msra.mxu0 %v19280_v47  ;;  %v15078_v47 = vcombine.low %v21510_v14, %v21514_v0  ;;  %v6506_v14 = vor.u32 %v6504_v56, %v6502_v25 }
 0x4d9   : > { %17813 = vmatpush3.bf16.msra.mxu1 %v19281_v24  ;;  %17778 = vmatprep.subr.bf16.mxu0 %v19731_v11  ;;  %v19295_v24 = vld [vmem:[%s19813_s8 + $0x168] sm:$0xff]  }
 0x4da   : > { %17814 = vmatprep.subr.bf16.mxu1 %v19731_v11  ;;  %v6167_v26 = vshrl.u32 %v15078_v47, 16  ;;  %v6170_v32 = vshll.u32 %v15078_v47, 16  ;;  %v19320_v47 = vld [vmem:[%s19813_s8 + $0x1d8] sm:$0xff]  }
 0x4dc   : > { %17779 = vmatpush3.bf16.msra.mxu0 %v19282_v49  ;;  %v6169_v39 = vrot.slane %v6167_v26, 3  ;;  %v6172_v54 = vrot.slane %v6170_v32, 4 }
 0x4dd   : > { %17815 = vmatpush3.bf16.msra.mxu1 %v19283_v34  ;;  %17836 = vmatprep.subr.bf16.mxu0 %v19731_v11  ;;  %v5943_v34 = vrot.slane %v5941_v44, 4  ;;  %v6658_v44 = vld [vmem:[#allocation2 + $0x160] sm:$0xf] }
 0x4de   : > { %17725 = vmatmul.mubr.bf16.gmra.mxu0 %v5598_v2  ;;  %17872 = vmatprep.subr.bf16.mxu1 %v19731_v11  ;;  %v6158_v2 = vshrl.u32 %v15077_v35, 16  ;;  %v6173_v17 = vor.u32 %v6172_v54, %v6169_v39  ;;  %v6487_v35 = vshll.u32 %v15103_v50, 16  ;;  %v19327_v39 = vld [vmem:[%s19813_s8 + $0x1c0] sm:$0xff]   ;;  %v6878_v54 = vld [vmem:[#allocation2 + $0x15c] sm:$0xe] }
 0x4df   : > { %17761 = vmatmul.mubr.bf16.gmra.mxu1 %v5770_v3  ;;  %17780 = vmatprep.mubr.msk.bf16.mxu0 %vm19732_vm6, %v19731_v11  ;;  %v5933_v3 = vrot.slane %v5755_v41, 3  ;;  %v5938_v41 = vshrl.u32 %v15049_v31, 16  ;;  %v19317_v31 = vld [vmem:[%s19813_s8 + $0x198] sm:$0xff]  }
 0x4e0   : > { %17816 = vmatprep.mubr.msk.bf16.mxu1 %vm19732_vm6, %v19731_v11  ;;  %v6160_v23 = vrot.slane %v6158_v2, 3 }
 0x4e1   : > { %v5935_v4 = vor.u32 %v5934_v52, %v5933_v3  ;;  %v5940_v27 = vrot.slane %v5938_v41, 3  ;;  %v19319_v3 = vld [vmem:[#allocation2 + $0x174] ss:$0 sps:$4 sm:$0x77]   ;;  %v19318_v52 = vld [vmem:[%s19813_s8 + $0x1e0] sm:$0xff]  }
 0x4e2   : > { %v6164_v43 = vor.u32 %v6163_v16, %v6160_v23  ;;  %v6512_v23 = vshrl.u32 %v15106_v58, 16  ;;  %v6516_v16 = vshll.u32 %v19319_v3, 16  ;;  %v6657_v41 = vld [vmem:[#allocation2 + $0x15c] sm:$0xf] }
 0x4e3   : > { %v5936_v49 = vsel %vm899_vm2, %v5931_v29, %v5935_v4  ;;  %v5944_v9 = vor.u32 %v5943_v34, %v5940_v27  ;;  %v19312_v29 = vld [vmem:[%s19813_s8 + $0x1a8] sm:$0xff]   ;;  %v15157_v26 = vcombine.low %v6657_v41, %v6658_v44 }
 0x4e4   : > { %v6165_v60 = vsel %vm899_vm2, %v6155_v48, %v6164_v43  ;;  %v6174_v40 = vsel %vm899_vm2, %v6164_v43, %v6173_v17  ;;  %v6508_v48 = vshll.u32 %v15106_v58, 16  ;;  %v19322_v43 = vld [vmem:[%s19813_s8 + $0x1d0] sm:$0xff]   ;;  %v21624_v27 = vld [vmem:[#allocation2 + $0x164] sm:$0xff]  }
 0x4e5   : > { %v5945_v13 = vsel %vm899_vm2, %v5935_v4, %v5944_v9  ;;  %v6518_v4 = vrot.slane %v6516_v16, 1  ;;  %v6708_v34 = vshll.u32 %v15157_v26, 16 }
 0x4e6   : > { %17781 = vmatmul.mubr.bf16.vlgmr.msra.gmra.mxu0 %v5928_v59  ;;  %v6489_v59 = vrot.slane %v6487_v35, 1  ;;  %v6717_v35 = vshrl.u32 %v21624_v27, 16 }
 0x4e7   : > { %17817 = vmatmul.mubr.bf16.vlgmr.msra.gmra.mxu1 %v6147_v21  ;;  %17837 = vmatpush3.bf16.msra.mxu0 %v19286_v57  ;;  %v6492_v57 = vshll.u32 %v15104_v45, 16 }
 0x4e8   : > { %17838 = vmatprep.subr.bf16.mxu0 %v19731_v11  ;;  %17784 = vmatprep.mubr.msk.bf16.mxu0 %vm19732_vm6, %v19731_v11  ;;  %v6490_v55 = vor.u32 %v6489_v59, %v6485_v51  ;;  %v19332_v59 = vld [vmem:[%s19813_s8 + $0x230] sm:$0xff]  }
 0x4e9   : > { %17820 = vmatprep.mubr.msk.bf16.mxu1 %vm19732_vm6, %v19731_v11  ;;  %17873 = vmatpush3.bf16.msra.mxu1 %v19290_v33  ;;  %v6494_v61 = vrot.slane %v6492_v57, 1  ;;  %v19309_v33 = vld [vmem:[%s19813_s8 + $0x1b0] sm:$0xff]  }
 0x4ea   : > { %17874 = vmatprep.subr.bf16.mxu1 %v19731_v11 }
 0x4eb   : > { %17839 = vmatpush3.bf16.msra.mxu0 %v19287_v15  ;;  %v6495_v21 = vsel %vm1711_vm3, %v6490_v55, %v6494_v61  ;;  %v19311_v15 = vld [vmem:[%s19813_s8 + $0x1f8] sm:$0xff]   ;;  %v6498_v2 = vor.u32 %v6496_v36, %v6494_v61 }
 0x4ec   : > { %17840 = vmatprep.subr.bf16.mxu0 %v19731_v11  ;;  %v21659_v61 = vld [vmem:[#allocation2 + $0x174] sm:$0xff]  }
 0x4ed   : > { %17875 = vmatpush3.bf16.msra.mxu1 %v19292_v6  ;;  %v6503_v6 = vsel %vm1711_vm3, %v6498_v2, %v6502_v25  ;;  %v6729_v19 = vshll.u32 %v21659_v61, 16  ;;  %v19336_v25 = vld [vmem:[%s19813_s8 + $0x220] sm:$0xff]   ;;  %v6733_v56 = vshrl.u32 %v21659_v61, 16 }
 0x4ee   : > { %17785 = vmatmul.mubr.bf16.gmra.mxu0 %v5932_v22  ;;  %17876 = vmatprep.subr.bf16.mxu1 %v19731_v11  ;;  %v19316_v22 = vld [vmem:[%s19813_s8 + $0x1e8] sm:$0xff]  }
 0x4ef   : > { %17821 = vmatmul.mubr.bf16.gmra.mxu1 %v6156_v12  ;;  %17841 = vmatpush3.bf16.msra.mxu0 %v19291_v46  ;;  %v6510_v46 = vrot.slane %v6508_v48, 1  ;;  %v6731_v2 = vrot.slane %v6729_v19, 1 }
 0x4f0   : > { %17788 = vmatprep.mubr.msk.bf16.mxu0 %vm19732_vm6, %v19731_v11  ;;  %17824 = vmatprep.mubr.msk.bf16.mxu1 %vm19732_vm6, %v19731_v11 }
 0x4f1   : > { %17842 = vmatprep.subr.bf16.mxu0 %v19731_v11  ;;  %17877 = vmatpush3.bf16.msra.mxu1 %v19295_v24  ;;  %v6511_v12 = vsel %vm1711_vm3, %v6506_v14, %v6510_v46  ;;  %v19321_v24 = vld [vmem:[%s19813_s8 + $0x190] sm:$0xff]  }
 0x4f2   : > { %17878 = vmatprep.subr.bf16.mxu1 %v19731_v11 }
 0x4f3   : > { %17843 = vmatpush3.bf16.msra.mxu0 %v19294_v62  ;;  %v6514_v62 = vor.u32 %v6512_v23, %v6510_v46  ;;  %v19339_v46 = vld [vmem:[%s19813_s8 + $0x210] sm:$0xff]   ;;  %v19342_v23 = vld [vmem:[#allocation2 + $0x17c] ss:$0 sps:$4 sm:$0xff]  }
 0x4f4   : > { %17844 = vmatprep.subr.bf16.mxu0 %v19731_v11  ;;  %v7085_v41 = vshll.u32 %v19342_v23, 16 }
 0x4f5   : > { %17879 = vmatpush3.bf16.msra.mxu1 %v19297_v37  ;;  %v6519_v32 = vsel %vm1711_vm3, %v6514_v62, %v6518_v4  ;;  %v19323_v37 = vld [vmem:[%s19813_s8 + $0x188] sm:$0xff]   ;;  %v19341_v62 = vld [vmem:[%s19813_s8 + $0x200] sm:$0xff]  }
 0x4f6   : > { %17789 = vmatmul.mubr.bf16.gmra.mxu0 %v5936_v49  ;;  %17880 = vmatprep.subr.bf16.mxu1 %v19731_v11  ;;  %v19325_v49 = vld [vmem:[%s19813_s8 + $0x1c8] sm:$0xff]  }
 0x4f7   : > { %17825 = vmatmul.mubr.bf16.gmra.mxu1 %v6165_v60  ;;  %17845 = vmatpush3.bf16.msra.mxu0 %v19296_v5  ;;  %v6520_v5 = vshrl.u32 %v19319_v3, 16  ;;  %v19326_v60 = vld [vmem:[%s19813_s8 + $0x180] sm:$0xff]  }
 0x4f8   : > { %17792 = vmatprep.mubr.msk.bf16.mxu0 %vm19732_vm6, %v19731_v11  ;;  %17828 = vmatprep.mubr.msk.bf16.mxu1 %vm19732_vm6, %v19731_v11 }
 0x4f9   : > { %17846 = vmatprep.subr.bf16.mxu0 %v19731_v11  ;;  %17881 = vmatpush3.bf16.msra.mxu1 %v19300_v10  ;;  %v15107_v10 = vcombine.low %v21514_v0, %v21514_v0 }
 0x4fa   : > { %17882 = vmatprep.subr.bf16.mxu1 %v19731_v11 }
 0x4fb   : > { %17847 = vmatpush3.bf16.msra.mxu0 %v19301_v8  ;;  %v6706_v8 = vshrl.u32 %v15157_v26, 16 }
 0x4fc   : > { %17848 = vmatprep.subr.bf16.mxu0 %v19731_v11 }
 0x4fd   : > { %17883 = vmatpush3.bf16.msra.mxu1 %v19302_v30  ;;  %v6713_v30 = vshll.u32 %v21624_v27, 16 }
 0x4fe   : > { %17793 = vmatmul.mubr.bf16.gmra.mxu0 %v5945_v13  ;;  %17884 = vmatprep.subr.bf16.mxu1 %v19731_v11  ;;  %v21635_v13 = vcombine.low %v6878_v54, %v6658_v44 }
 0x4ff   : > { %17829 = vmatmul.mubr.bf16.gmra.mxu1 %v6174_v40  ;;  %17796 = vmatprep.mubr.msk.bf16.mxu0 %vm19732_vm6, %v19731_v11  ;;  %v6715_v40 = vrot.slane %v6713_v30, 1 }
 0x500   : > { %17832 = vmatprep.mubr.msk.bf16.mxu1 %vm19732_vm6, %v19731_v11  ;;  %17849 = vmatpush3.bf16.msra.mxu0 %v19303_v42  ;;  %v21643_v42 = vld [vmem:[#allocation2 + $0x16c] sm:$0xff]  }
 0x501   : > { %17885 = vmatpush3.bf16.msra.mxu1 %v19304_v28  ;;  %17850 = vmatprep.subr.bf16.mxu0 %v19731_v11  ;;  %v6899_v28 = vrot.slane %v21624_v27, 1  ;;  %v6719_v57 = vor.u32 %v6717_v35, %v6715_v40  ;;  %v6725_v36 = vshrl.u32 %v21643_v42, 16 }
 0x502   : > { %17886 = vmatprep.subr.bf16.mxu1 %v19731_v11 }
 0x504   : > { %17851 = vmatpush3.bf16.msra.mxu0 %v19305_v20  ;;  %v19331_v20 = vld [vmem:[%s19813_s8 + $0x238] sm:$0xff]  }
 0x505   : > { %17887 = vmatpush3.bf16.msra.mxu1 %v19306_v7  ;;  %17908 = vmatprep.subr.bf16.mxu0 %v19731_v11  ;;  %v6721_v7 = vshll.u32 %v21643_v42, 16 }
 0x506   : > { %17797 = vmatmul.mubr.bf16.gmra.mxu0 %v5944_v9  ;;  %17944 = vmatprep.subr.bf16.mxu1 %v19731_v11  ;;  %v6522_v9 = vor.u32 %v6520_v5, %v6518_v4  ;;  %v7082_v4 = vshrl.u32 %v19342_v23, 16  ;;  %v7077_v5 = vrot.slane %v6733_v56, 1 }
 0x507   : > { %17833 = vmatmul.mubr.bf16.gmra.mxu1 %v6173_v17  ;;  %17852 = vmatprep.mubr.msk.bf16.mxu0 %vm19732_vm6, %v19731_v11  ;;  %v6710_v17 = vrot.slane %v6708_v34, 1  ;;  %v6723_v55 = vrot.slane %v6721_v7, 1 }
 0x508   : > { %17888 = vmatprep.mubr.msk.bf16.mxu1 %vm19732_vm6, %v19731_v11  ;;  %v7084_v34 = vrot.slane %v7082_v4, 1 }
 0x509   : > { %v6711_v0 = vor.u32 %v6710_v17, %v6706_v8  ;;  %v7073_v8 = vrot.slane %v6725_v36, 1  ;;  %v7074_v17 = vrot.slane %v6721_v7, 2 }
 0x50e   : > { %17853 = vmatmul.mubr.bf16.vlgmr.msra.gmra.mxu0 %v15103_v50  ;;  %v6898_v50 = vrot.slane %v21635_v13, 1 }
 0x50f   : > { %17889 = vmatmul.mubr.bf16.vlgmr.msra.gmra.mxu1 %v6495_v21  ;;  %17909 = vmatpush3.bf16.msra.mxu0 %v19308_v53  ;;  %v6724_v53 = vsel %vm1711_vm3, %v6719_v57, %v6723_v55  ;;  %v19334_v21 = vld [vmem:[%s19813_s8 + $0x228] sm:$0xff]  }
 0x510   : > { %17910 = vmatprep.subr.bf16.mxu0 %v19731_v11  ;;  %17856 = vmatprep.mubr.msk.bf16.mxu0 %vm19732_vm6, %v19731_v11  ;;  %v6900_v51 = vsel %vm2284_vm4, %v6898_v50, %v6899_v28 }
 0x511   : > { %17892 = vmatprep.mubr.msk.bf16.mxu1 %vm19732_vm6, %v19731_v11  ;;  %17945 = vmatpush3.bf16.msra.mxu1 %v19311_v15 }
 0x512   : > { %17946 = vmatprep.subr.bf16.mxu1 %v19731_v11 }
 0x513   : > { %17911 = vmatpush3.bf16.msra.mxu0 %v19309_v33  ;;  %v6727_v33 = vor.u32 %v6725_v36, %v6723_v55 }
 0x514   : > { %17912 = vmatprep.subr.bf16.mxu0 %v19731_v11 }
 0x515   : > { %17947 = vmatpush3.bf16.msra.mxu1 %v19313_v38  ;;  %v6903_v38 = vrot.slane %v21659_v61, 1 }
 0x516   : > { %17857 = vmatmul.mubr.bf16.gmra.mxu0 %v15104_v45  ;;  %17948 = vmatprep.subr.bf16.mxu1 %v19731_v11  ;;  %v6716_v45 = vsel %vm1711_vm3, %v6711_v0, %v6715_v40 }
 0x517   : > { %17893 = vmatmul.mubr.bf16.gmra.mxu1 %v6503_v6  ;;  %17913 = vmatpush3.bf16.msra.mxu0 %v19312_v29  ;;  %v6732_v29 = vsel %vm1711_vm3, %v6727_v33, %v6731_v2  ;;  %v19337_v6 = vld [vmem:[%s19813_s8 + $0x218] sm:$0xff]  }
 0x518   : > { %17860 = vmatprep.mubr.msk.bf16.mxu0 %vm19732_vm6, %v19731_v11  ;;  %17896 = vmatprep.mubr.msk.bf16.mxu1 %vm19732_vm6, %v19731_v11 }
 0x519   : > { %17914 = vmatprep.subr.bf16.mxu0 %v19731_v11  ;;  %17949 = vmatpush3.bf16.msra.mxu1 %v19316_v22 }
 0x51a   : > { %17950 = vmatprep.subr.bf16.mxu1 %v19731_v11 }
 0x51b   : > { %17915 = vmatpush3.bf16.msra.mxu0 %v19315_v63  ;;  %v6735_v63 = vor.u32 %v6733_v56, %v6731_v2 }
 0x51c   : > { %17916 = vmatprep.subr.bf16.mxu0 %v19731_v11 }
 0x51d   : > { %17951 = vmatpush3.bf16.msra.mxu1 %v19318_v52 }
 0x51e   : > { %17861 = vmatmul.mubr.bf16.gmra.mxu0 %v15105_v18  ;;  %17952 = vmatprep.subr.bf16.mxu1 %v19731_v11  ;;  %v6901_v18 = vrot.slane %v21643_v42, 1 }
 0x51f   : > { %17897 = vmatmul.mubr.bf16.gmra.mxu1 %v6511_v12  ;;  %17917 = vmatpush3.bf16.msra.mxu0 %v19317_v31  ;;  %v19340_v12 = vld [vmem:[%s19813_s8 + $0x208] sm:$0xff]  }
 0x520   : > { %17864 = vmatprep.mubr.msk.bf16.mxu0 %vm19732_vm6, %v19731_v11  ;;  %17900 = vmatprep.mubr.msk.bf16.mxu1 %vm19732_vm6, %v19731_v11  ;;  %v6902_v15 = vsel %vm2284_vm4, %v6899_v28, %v6901_v18  ;;  %v6904_v22 = vsel %vm2284_vm4, %v6901_v18, %v6903_v38 }
 0x521   : > { %17918 = vmatprep.subr.bf16.mxu0 %v19731_v11  ;;  %17953 = vmatpush3.bf16.msra.mxu1 %v19320_v47  ;;  %v7062_v47 = vshrl.u32 %v21635_v13, 16 }
 0x522   : > { %17954 = vmatprep.subr.bf16.mxu1 %v19731_v11 }
 0x523   : > { %17919 = vmatpush3.bf16.msra.mxu0 %v19321_v24  ;;  %v7065_v24 = vshll.u32 %v21635_v13, 16  ;;  %v7064_v26 = vrot.slane %v7062_v47, 1  ;;  %v7075_v13 = vor.u32 %v7074_v17, %v7073_v8 }
 0x524   : > { %17920 = vmatprep.subr.bf16.mxu0 %v19731_v11 }
 0x525   : > { %17955 = vmatpush3.bf16.msra.mxu1 %v19322_v43  ;;  %v7069_v43 = vrot.slane %v6717_v35, 1 }
 0x526   : > { %17865 = vmatmul.mubr.bf16.gmra.mxu0 %v15106_v58  ;;  %17956 = vmatprep.subr.bf16.mxu1 %v19731_v11  ;;  %v19338_v58 = vld [vmem:[#allocation2 + $0x17c] ss:$0 sps:$4 sm:$0x77]  }
 0x527   : > { %17901 = vmatmul.mubr.bf16.gmra.mxu1 %v6519_v32  ;;  %17868 = vmatprep.mubr.msk.bf16.mxu0 %vm19732_vm6, %v19731_v11  ;;  %v6737_v48 = vshll.u32 %v19338_v58, 16  ;;  %v6905_v3 = vrot.slane %v19338_v58, 1  ;;  %v6741_v16 = vshrl.u32 %v19338_v58, 16  ;;  %v7067_v32 = vrot.slane %v7065_v24, 2 }
 0x528   : > { %17904 = vmatprep.mubr.msk.bf16.mxu1 %vm19732_vm6, %v19731_v11  ;;  %17921 = vmatpush3.bf16.msra.mxu0 %v19323_v37  ;;  %v7070_v37 = vrot.slane %v6713_v30, 2 }
 0x529   : > { %17957 = vmatpush3.bf16.msra.mxu1 %v19325_v49  ;;  %17922 = vmatprep.subr.bf16.mxu0 %v19731_v11  ;;  %v6739_v14 = vrot.slane %v6737_v48, 1  ;;  %v6906_v31 = vsel %vm2284_vm4, %v6903_v38, %v6905_v3  ;;  %v7078_v49 = vrot.slane %v6729_v19, 2 }
 0x52a   : > { %17958 = vmatprep.subr.bf16.mxu1 %v19731_v11  ;;  %v7071_v54 = vor.u32 %v7070_v37, %v7069_v43 }
 0x52b   : > { %v6740_v52 = vsel %vm1711_vm3, %v6735_v63, %v6739_v14  ;;  %v6743_v44 = vor.u32 %v6741_v16, %v6739_v14  ;;  %v7079_v27 = vor.u32 %v7078_v49, %v7077_v5 }
 0x52c   : > { %17923 = vmatpush3.bf16.msra.mxu0 %v19326_v60  ;;  %v7087_v60 = vrot.slane %v7085_v41, 2  ;;  %v7076_v0 = vsel %vm2492_vm5, %v7071_v54, %v7075_v13 }
 0x52d   : > { %17959 = vmatpush3.bf16.msra.mxu1 %v19327_v39  ;;  %17980 = vmatprep.subr.bf16.mxu0 %v19731_v11  ;;  %v7068_v39 = vor.u32 %v7067_v32, %v7064_v26  ;;  %v7080_v40 = vsel %vm2492_vm5, %v7075_v13, %v7079_v27 }
 0x52e   : > { %17869 = vmatmul.mubr.bf16.gmra.mxu0 %v15107_v10  ;;  %18916 = vmatprep.subr.bf16.mxu1 %v19731_v11  ;;  %v7088_v10 = vor.u32 %v7087_v60, %v7084_v34 }
 0x52f   : > { %17905 = vmatmul.mubr.bf16.gmra.mxu1 %v6522_v9  ;;  %17924 = vmatprep.mubr.msk.bf16.mxu0 %vm19732_vm6, %v19731_v11  ;;  %v7072_v9 = vsel %vm2492_vm5, %v7068_v39, %v7071_v54 }
 0x530   : > { %17960 = vmatprep.mubr.msk.bf16.mxu1 %vm19732_vm6, %v19731_v11  ;;  %v7089_v30 = vsel %vm2492_vm5, %v7079_v27, %v7088_v10 }
 0x536   : > { %17925 = vmatmul.mubr.bf16.vlgmr.msra.gmra.mxu0 %v6716_v45 }
 0x537   : > { %17961 = vmatmul.mubr.bf16.vlgmr.msra.gmra.mxu1 %v6900_v51  ;;  %17981 = vmatpush3.bf16.msra.mxu0 %v19331_v20 }
 0x538   : > { %17982 = vmatprep.subr.bf16.mxu0 %v19731_v11  ;;  %17928 = vmatprep.mubr.msk.bf16.mxu0 %vm19732_vm6, %v19731_v11 }
 0x539   : > { %17964 = vmatprep.mubr.msk.bf16.mxu1 %vm19732_vm6, %v19731_v11  ;;  %18924 = vmatpush3.bf16.msra.mxu1 %v19331_v20 }
 0x53a   : > { %18917 = vmatprep.subr.bf16.mxu1 %v19731_v11 }
 0x53b   : > { %17983 = vmatpush3.bf16.msra.mxu0 %v19332_v59 }
 0x53c   : > { %17984 = vmatprep.subr.bf16.mxu0 %v19731_v11 }
 0x53d   : > { %18925 = vmatpush3.bf16.msra.mxu1 %v19332_v59 }
 0x53e   : > { %17929 = vmatmul.mubr.bf16.gmra.mxu0 %v6724_v53  ;;  %18918 = vmatprep.subr.bf16.mxu1 %v19731_v11 }
 0x53f   : > { %17965 = vmatmul.mubr.bf16.gmra.mxu1 %v6902_v15  ;;  %17985 = vmatpush3.bf16.msra.mxu0 %v19334_v21 }
 0x540   : > { %17932 = vmatprep.mubr.msk.bf16.mxu0 %vm19732_vm6, %v19731_v11  ;;  %17968 = vmatprep.mubr.msk.bf16.mxu1 %vm19732_vm6, %v19731_v11 }
 0x541   : > { %17986 = vmatprep.subr.bf16.mxu0 %v19731_v11  ;;  %18926 = vmatpush3.bf16.msra.mxu1 %v19334_v21 }
 0x542   : > { %18919 = vmatprep.subr.bf16.mxu1 %v19731_v11 }
 0x543   : > { %17987 = vmatpush3.bf16.msra.mxu0 %v19336_v25 }
 0x544   : > { %17988 = vmatprep.subr.bf16.mxu0 %v19731_v11 }
 0x545   : > { %18927 = vmatpush3.bf16.msra.mxu1 %v19336_v25 }
 0x546   : > { %17933 = vmatmul.mubr.bf16.gmra.mxu0 %v6732_v29  ;;  %18920 = vmatprep.subr.bf16.mxu1 %v19731_v11 }
 0x547   : > { %17969 = vmatmul.mubr.bf16.gmra.mxu1 %v6904_v22  ;;  %17989 = vmatpush3.bf16.msra.mxu0 %v19337_v6 }
 0x548   : > { %17936 = vmatprep.mubr.msk.bf16.mxu0 %vm19732_vm6, %v19731_v11  ;;  %17972 = vmatprep.mubr.msk.bf16.mxu1 %vm19732_vm6, %v19731_v11 }
 0x549   : > { %18928 = vmatpush3.bf16.msra.mxu1 %v19337_v6  ;;  %17990 = vmatprep.subr.bf16.mxu0 %v19731_v11 }
 0x54a   : > { %18921 = vmatprep.subr.bf16.mxu1 %v19731_v11 }
 0x54b   : > { %17991 = vmatpush3.bf16.msra.mxu0 %v19339_v46 }
 0x54c   : > { %17992 = vmatprep.subr.bf16.mxu0 %v19731_v11 }
 0x54d   : > { %18929 = vmatpush3.bf16.msra.mxu1 %v19339_v46 }
 0x54e   : > { %17937 = vmatmul.mubr.bf16.gmra.mxu0 %v6740_v52  ;;  %18922 = vmatprep.subr.bf16.mxu1 %v19731_v11 }
 0x54f   : > { %17973 = vmatmul.mubr.bf16.gmra.mxu1 %v6906_v31  ;;  %17940 = vmatprep.mubr.msk.bf16.mxu0 %vm19732_vm6, %v19731_v11 }
 0x550   : > { %17976 = vmatprep.mubr.msk.bf16.mxu1 %vm19732_vm6, %v19731_v11  ;;  %17993 = vmatpush3.bf16.msra.mxu0 %v19340_v12 }
 0x551   : > { %18930 = vmatpush3.bf16.msra.mxu1 %v19340_v12  ;;  %17994 = vmatprep.subr.bf16.mxu0 %v19731_v11 }
 0x552   : > { %18923 = vmatprep.subr.bf16.mxu1 %v19731_v11 }
 0x554   : > { %17995 = vmatpush3.bf16.msra.mxu0 %v19341_v62 }
 0x555   : > { %18931 = vmatpush3.bf16.msra.mxu1 %v19341_v62 }
 0x556   : > { %17941 = vmatmul.mubr.bf16.gmra.mxu0 %v6743_v44 }
 0x557   : > { %17977 = vmatmul.mubr.bf16.gmra.mxu1 %v6905_v3  ;;  %17996 = vmatprep.mubr.msk.bf16.mxu0 %vm19732_vm6, %v19731_v11 }
 0x558   : > { %18008 = vmatprep.mubr.msk.bf16.mxu1 %vm19732_vm6, %v19731_v11 }
 0x55e   : > { %17997 = vmatmul.mubr.bf16.vlgmr.msra.gmra.mxu0 %v7072_v9 }
 0x55f   : > { %18009 = vmatmul.mubr.bf16.vlgmr.msra.gmra.mxu1 %v7089_v30  ;;  %18000 = vmatprep.mubr.msk.bf16.mxu0 %vm19732_vm6, %v19731_v11 }
 0x560   : > { %18012 = vmatprep.mubr.msk.bf16.mxu1 %vm19732_vm6, %v19731_v11 }
 0x566   : > { %18001 = vmatmul.mubr.bf16.gmra.mxu0 %v7076_v0 }
 0x567   : > { %18013 = vmatmul.mubr.bf16.gmra.mxu1 %v7088_v10  ;;  %18004 = vmatprep.mubr.msk.bf16.mxu0 %vm19732_vm6, %v19731_v11 }
 0x56e   : > { %18005 = vmatmul.mubr.bf16.gmra.mxu0 %v7080_v40 }
 0x57e   : > { %v5687_v42 = vpop.f32.mrf.mxu0 }
 0x57f   : > { %v5859_v50 = vpop.f32.mrf.mxu1 }
 0x580   : > { %v5860_v28 = vadd.f32 %v5859_v50, %v5687_v42  ;;  %v17710_v45 = vpop.f32.mrf.mxu0 }
 0x581   : > { %v17746_v20 = vpop.f32.mrf.mxu1 }
 0x582   : > { %v5690_v35 = vpop.f32.mrf.mxu0 }
 0x583   : > { %v5862_v7 = vpop.f32.mrf.mxu1 }
 0x584   : > { %v5863_v51 = vadd.f32 %v5862_v7, %v5690_v35  ;;  %v17711_v59 = vpop.f32.mrf.mxu0 }
 0x585   : > { %v17747_v57 = vpop.f32.mrf.mxu1 }
 0x586   : > { %v5695_v55 = vpop.f32.mrf.mxu0 }
 0x587   : > { %v5867_v61 = vpop.f32.mrf.mxu1 }
 0x588   : > { %v5868_v18 = vadd.f32 %v5867_v61, %v5695_v55  ;;  %v17714_v53 = vpop.f32.mrf.mxu0 }
 0x589   : > { %v17750_v21 = vpop.f32.mrf.mxu1 }
 0x58a   : > { %v5698_v36 = vpop.f32.mrf.mxu0 }
 0x58b   : > { %v5870_v11 = vpop.f32.mrf.mxu1 }
 0x58c   : > { %v5871_v19 = vadd.f32 %v5870_v11, %v5698_v36  ;;  %v17715_v15 = vpop.f32.mrf.mxu0 }
 0x58d   : > { %v17751_v33 = vpop.f32.mrf.mxu1 }
 0x58e   : > { %v5703_v2 = vpop.f32.mrf.mxu0 }
 0x58f   : > { %v5875_v25 = vpop.f32.mrf.mxu1 }
 0x590   : > { %v5876_v58 = vadd.f32 %v5875_v25, %v5703_v2  ;;  %v17718_v38 = vpop.f32.mrf.mxu0 }
 0x591   : > { %v17754_v29 = vpop.f32.mrf.mxu1 }
 0x592   : > { %v5706_v6 = vpop.f32.mrf.mxu0 }
 0x593   : > { %v5878_v56 = vpop.f32.mrf.mxu1 }
 0x594   : > { %v5879_v48 = vadd.f32 %v5878_v56, %v5706_v6  ;;  %v17719_v22 = vpop.f32.mrf.mxu0 }
 0x595   : > { %v17755_v63 = vpop.f32.mrf.mxu1 }
 0x596   : > { %v5711_v14 = vpop.f32.mrf.mxu0 }
 0x597   : > { %v5883_v46 = vpop.f32.mrf.mxu1 }
 0x598   : > { %v5884_v3 = vadd.f32 %v5883_v46, %v5711_v14  ;;  %v17722_v52 = vpop.f32.mrf.mxu0 }
 0x599   : > { %v17758_v31 = vpop.f32.mrf.mxu1 }
 0x59a   : > { %v5714_v12 = vpop.f32.mrf.mxu0 }
 0x59b   : > { %v5886_v23 = vpop.f32.mrf.mxu1 }
 0x59c   : > { %v5887_v16 = vadd.f32 %v5886_v23, %v5714_v12  ;;  %v17723_v47 = vpop.f32.mrf.mxu0 }
 0x59d   : > { %v17759_v24 = vpop.f32.mrf.mxu1 }
 0x59e   : > { %v5719_v62 = vpop.f32.mrf.mxu0 }
 0x59f   : > { %v5891_v4 = vpop.f32.mrf.mxu1 }
 0x5a0   : > { %v5892_v41 = vadd.f32 %v5891_v4, %v5719_v62  ;;  %v17726_v44 = vpop.f32.mrf.mxu0 }
 0x5a1   : > { %v17762_v43 = vpop.f32.mrf.mxu1 }
 0x5a2   : > { %v5722_v26 = vpop.f32.mrf.mxu0 }
 0x5a3   : > { %v5894_v32 = vpop.f32.mrf.mxu1 }
 0x5a4   : > { %v17727_v37 = vpop.f32.mrf.mxu0 }
 0x5a5   : > { %v17763_v49 = vpop.f32.mrf.mxu1 }
 0x5a6   : > { %v6033_v5 = vpop.f32.mrf.mxu0 }
 0x5a7   : > { %v6071_v34 = vadd.f32 %v6033_v5, %v5860_v28  ;;  %v6262_v60 = vpop.f32.mrf.mxu1 }
 0x5a8   : > { %v17782_v39 = vpop.f32.mrf.mxu0 }
 0x5a9   : > { %v6300_v54 = vadd.f32 %v6262_v60, %v6071_v34  ;;  %v17818_v27 = vpop.f32.mrf.mxu1 }
 0x5aa   : > { %v6036_v10 = vpop.f32.mrf.mxu0 }
 0x5ab   : > { %v6072_v9 = vadd.f32 %v6036_v10, %v5863_v51  ;;  %v6265_v8 = vpop.f32.mrf.mxu1 }
 0x5ac   : > { %v17783_v17 = vpop.f32.mrf.mxu0 }
 0x5ad   : > { %v6301_v30 = vadd.f32 %v6265_v8, %v6072_v9  ;;  %v17819_v13 = vpop.f32.mrf.mxu1 }
 0x5ae   : > { %v6041_v0 = vpop.f32.mrf.mxu0 }
 0x5af   : > { %v6073_v40 = vadd.f32 %v6041_v0, %v5868_v18  ;;  %v6270_v42 = vpop.f32.mrf.mxu1 }
 0x5b0   : > { %v17786_v50 = vpop.f32.mrf.mxu0 }
 0x5b1   : > { %v6302_v45 = vadd.f32 %v6270_v42, %v6073_v40  ;;  %v17822_v20 = vpop.f32.mrf.mxu1 }
 0x5b2   : > { %v6044_v35 = vpop.f32.mrf.mxu0 }
 0x5b3   : > { %v6074_v7 = vadd.f32 %v6044_v35, %v5871_v19  ;;  %v6273_v59 = vpop.f32.mrf.mxu1 }
 0x5b4   : > { %v17787_v28 = vpop.f32.mrf.mxu0 }
 0x5b5   : > { %v6303_v57 = vadd.f32 %v6273_v59, %v6074_v7  ;;  %v17823_v55 = vpop.f32.mrf.mxu1 }
 0x5b6   : > { %v6049_v61 = vpop.f32.mrf.mxu0 }
 0x5b7   : > { %v6075_v53 = vadd.f32 %v6049_v61, %v5876_v58  ;;  %v6278_v21 = vpop.f32.mrf.mxu1 }
 0x5b8   : > { %v17790_v51 = vpop.f32.mrf.mxu0 }
 0x5b9   : > { %v6304_v36 = vadd.f32 %v6278_v21, %v6075_v53  ;;  %v17826_v11 = vpop.f32.mrf.mxu1 }
 0x5ba   : > { %v6052_v15 = vpop.f32.mrf.mxu0 }
 0x5bb   : > { %v6076_v33 = vadd.f32 %v6052_v15, %v5879_v48  ;;  %v6281_v2 = vpop.f32.mrf.mxu1 }
 0x5bc   : > { %v17791_v18 = vpop.f32.mrf.mxu0 }
 0x5bd   : > { %v6305_v25 = vadd.f32 %v6281_v2, %v6076_v33  ;;  %v17827_v38 = vpop.f32.mrf.mxu1 }
 0x5be   : > { %v6057_v29 = vpop.f32.mrf.mxu0 }
 0x5bf   : > { %v6077_v6 = vadd.f32 %v6057_v29, %v5884_v3  ;;  %v6286_v56 = vpop.f32.mrf.mxu1 }
 0x5c0   : > { %v17794_v19 = vpop.f32.mrf.mxu0 }
 0x5c1   : > { %v6306_v22 = vadd.f32 %v6286_v56, %v6077_v6  ;;  %v17830_v63 = vpop.f32.mrf.mxu1 }
 0x5c2   : > { %v6060_v14 = vpop.f32.mrf.mxu0 }
 0x5c3   : > { %v6078_v46 = vadd.f32 %v6060_v14, %v5887_v16  ;;  %v6289_v52 = vpop.f32.mrf.mxu1 }
 0x5c4   : > { %v17795_v58 = vpop.f32.mrf.mxu0 }
 0x5c5   : > { %v6307_v31 = vadd.f32 %v6289_v52, %v6078_v46  ;;  %v17831_v12 = vpop.f32.mrf.mxu1 }
 0x5c6   : > { %v6065_v23 = vpop.f32.mrf.mxu0 }
 0x5c7   : > { %v6079_v47 = vadd.f32 %v6065_v23, %v5892_v41  ;;  %v6294_v24 = vpop.f32.mrf.mxu1 }
 0x5c8   : > { %v17798_v48 = vpop.f32.mrf.mxu0 }
 0x5c9   : > { %v21738_v62 = vadd.f32 %v6294_v24, %v6079_v47  ;;  %v17834_v4 = vpop.f32.mrf.mxu1 }
 0x5ca   : > { %v6068_v44 = vpop.f32.mrf.mxu0 }
 0x5cb   : > { %v6297_v43 = vpop.f32.mrf.mxu1 }
 0x5cc   : > { %v17799_v3 = vpop.f32.mrf.mxu0 }
 0x5cd   : > { %v17835_v26 = vpop.f32.mrf.mxu1 }
 0x5ce   : > { %v6417_v32 = vpop.f32.mrf.mxu0 }
 0x5cf   : > { %v6455_v37 = vadd.f32 %v6417_v32, %v6300_v54  ;;  %v6610_v49 = vpop.f32.mrf.mxu1 }
 0x5d0   : > { %v17854_v5 = vpop.f32.mrf.mxu0 }
 0x5d1   : > { %v21740_v16 = vadd.f32 %v6610_v49, %v6455_v37  ;;  %v17890_v34 = vpop.f32.mrf.mxu1 }
 0x5d2   : > { %v6420_v60 = vpop.f32.mrf.mxu0 }
 0x5d3   : > { %v6456_v39 = vadd.f32 %v6420_v60, %v6301_v30  ;;  %v6613_v27 = vpop.f32.mrf.mxu1 }
 0x5d4   : > { %v17855_v41 = vpop.f32.mrf.mxu0 }
 0x5d5   : > { %v21742_v10 = vadd.f32 %v6613_v27, %v6456_v39  ;;  %v17891_v9 = vpop.f32.mrf.mxu1 }
 0x5d6   : > { %v6425_v8 = vpop.f32.mrf.mxu0 }
 0x5d7   : > { %v6457_v17 = vadd.f32 %v6425_v8, %v6302_v45  ;;  %v6618_v13 = vpop.f32.mrf.mxu1 }
 0x5d8   : > { %v17858_v0 = vpop.f32.mrf.mxu0 }
 0x5d9   : > { %v21744_v40 = vadd.f32 %v6618_v13, %v6457_v17  ;;  %v17894_v42 = vpop.f32.mrf.mxu1 }
 0x5da   : > { %v6428_v54 = vpop.f32.mrf.mxu0 }
 0x5db   : > { %v6458_v50 = vadd.f32 %v6428_v54, %v6303_v57  ;;  %v6621_v20 = vpop.f32.mrf.mxu1 }
 0x5dc   : > { %v17859_v35 = vpop.f32.mrf.mxu0 }
 0x5dd   : > { %v21746_v7 = vadd.f32 %v6621_v20, %v6458_v50  ;;  %v17895_v59 = vpop.f32.mrf.mxu1 }
 0x5de   : > { %v6433_v30 = vpop.f32.mrf.mxu0 }
 0x5df   : > { %v6459_v28 = vadd.f32 %v6433_v30, %v6304_v36  ;;  %v6626_v55 = vpop.f32.mrf.mxu1 }
 0x5e0   : > { %v17862_v61 = vpop.f32.mrf.mxu0 }
 0x5e1   : > { %v21748_v53 = vadd.f32 %v6626_v55, %v6459_v28  ;;  %v17898_v21 = vpop.f32.mrf.mxu1 }
 0x5e2   : > { %v6436_v45 = vpop.f32.mrf.mxu0 }
 0x5e3   : > { %v6460_v51 = vadd.f32 %v6436_v45, %v6305_v25  ;;  %v6629_v11 = vpop.f32.mrf.mxu1 }
 0x5e4   : > { %v17863_v15 = vpop.f32.mrf.mxu0 }
 0x5e5   : > { %v21750_v33 = vadd.f32 %v6629_v11, %v6460_v51  ;;  %v17899_v2 = vpop.f32.mrf.mxu1 }
 0x5e6   : > { %v6441_v57 = vpop.f32.mrf.mxu0 }
 0x5e7   : > { %v6461_v18 = vadd.f32 %v6441_v57, %v6306_v22  ;;  %v6634_v38 = vpop.f32.mrf.mxu1 }
 0x5e8   : > { %v17866_v29 = vpop.f32.mrf.mxu0 }
 0x5e9   : > { %v6654_v6 = vadd.f32 %v6634_v38, %v6461_v18  ;;  %v17902_v56 = vpop.f32.mrf.mxu1 }
 0x5ea   : > { %v6444_v19 = vpop.f32.mrf.mxu0 }
 0x5eb   : > { %v6462_v36 = vadd.f32 %v6444_v19, %v6307_v31  ;;  %v6637_v63 = vpop.f32.mrf.mxu1 }
 0x5ec   : > { %v17867_v14 = vpop.f32.mrf.mxu0 }
 0x5ed   : > { %v6655_v46 = vadd.f32 %v6637_v63, %v6462_v36  ;;  %v17903_v52 = vpop.f32.mrf.mxu1 }
 0x5ee   : > { %v6449_v58 = vpop.f32.mrf.mxu0 }
 0x5ef   : > { %v6642_v12 = vpop.f32.mrf.mxu1  ;;  %v6463_v56 = vadd.f32 %v6449_v58, %v21738_v62 }
 0x5f0   : > { %v17870_v25 = vpop.f32.mrf.mxu0 }
 0x5f1   : > { %v17906_v23 = vpop.f32.mrf.mxu1 }
 0x5f2   : > { %v6452_v47 = vpop.f32.mrf.mxu0 }
 0x5f3   : > { %v6645_v24 = vpop.f32.mrf.mxu1 }
 0x5f4   : > { %v17871_v48 = vpop.f32.mrf.mxu0 }
 0x5f5   : > { %v17907_v4 = vpop.f32.mrf.mxu1  ;;  %v6656_v48 = vadd.f32 %v6642_v12, %v6463_v56 }
 0x5f6   : > { %v6831_v44 = vpop.f32.mrf.mxu0 }
 0x5f7   : > { %v6994_v22 = vpop.f32.mrf.mxu1  ;;  %v6869_v2 = vadd.f32 %v6831_v44, %v21740_v16 }
 0x5f8   : > { %v17926_v43 = vpop.f32.mrf.mxu0 }
 0x5f9   : > { %v17962_v3 = vpop.f32.mrf.mxu1  ;;  %v7032_v36 = vadd.f32 %v6994_v22, %v6869_v2 }
 0x5fa   : > { %v6834_v26 = vpop.f32.mrf.mxu0 }
 0x5fb   : > { %v6997_v32 = vpop.f32.mrf.mxu1  ;;  %v6870_v63 = vadd.f32 %v6834_v26, %v21742_v10 }
 0x5fc   : > { %v17927_v37 = vpop.f32.mrf.mxu0 }
 0x5fd   : > { %v17963_v31 = vpop.f32.mrf.mxu1  ;;  %v7033_v16 = vadd.f32 %v6997_v32, %v6870_v63 }
 0x5fe   : > { %v6839_v49 = vpop.f32.mrf.mxu0 }
 0x5ff   : > { %v7002_v5 = vpop.f32.mrf.mxu1 }
 0x600   : > { %v17930_v34 = vpop.f32.mrf.mxu0 }
 0x601   : > { %v17966_v60 = vpop.f32.mrf.mxu1 }
 0x602   : > { %v6842_v39 = vpop.f32.mrf.mxu0 }
 0x603   : > { %v21752_v27 = vpop.f32.mrf.mxu1 }
 0x604   : > { %v17931_v41 = vpop.f32.mrf.mxu0 }
 0x605   : > { %v17967_v9 = vpop.f32.mrf.mxu1 }
 0x606   : > { %v21754_v8 = vpop.f32.mrf.mxu0 }
 0x607   : > { %v21756_v17 = vpop.f32.mrf.mxu1 }
 0x608   : > { %v17934_v13 = vpop.f32.mrf.mxu0 }
 0x609   : > { %v17970_v0 = vpop.f32.mrf.mxu1 }
 0x60a   : > { %v21758_v42 = vpop.f32.mrf.mxu0 }
 0x60b   : > { %v21760_v54 = vpop.f32.mrf.mxu1 }
 0x60c   : > { %v17935_v50 = vpop.f32.mrf.mxu0 }
 0x60d   : > { %v17971_v20 = vpop.f32.mrf.mxu1 }
 0x60e   : > { %v6855_v35 = vpop.f32.mrf.mxu0 }
 0x60f   : > { %v7018_v59 = vpop.f32.mrf.mxu1  ;;  %v6875_v18 = vadd.f32 %v6855_v35, %v6654_v6  ;;  %v6871_v6 = vadd.f32 %v6839_v49, %v21744_v40  ;;  %v6872_v40 = vadd.f32 %v6842_v39, %v21746_v7  ;;  %v6873_v7 = vadd.f32 %v21754_v8, %v21748_v53 }
 0x610   : > { %v17938_v30 = vpop.f32.mrf.mxu0 }
 0x611   : > { %v17974_v28 = vpop.f32.mrf.mxu1  ;;  %v7038_v52 = vadd.f32 %v7018_v59, %v6875_v18  ;;  %v7034_v34 = vadd.f32 %v7002_v5, %v6871_v6  ;;  %v7035_v5 = vadd.f32 %v21752_v27, %v6872_v40  ;;  %v7036_v2 = vadd.f32 %v21756_v17, %v6873_v7 }
 0x612   : > { %v6858_v55 = vpop.f32.mrf.mxu0  ;;  %v6874_v27 = vadd.f32 %v21758_v42, %v21750_v33 }
 0x613   : > { %v7021_v61 = vpop.f32.mrf.mxu1  ;;  %v6876_v25 = vadd.f32 %v6858_v55, %v6655_v46 }
 0x614   : > { %v17939_v21 = vpop.f32.mrf.mxu0  ;;  %v7037_v56 = vadd.f32 %v21760_v54, %v6874_v27 }
 0x615   : > { %v17975_v45 = vpop.f32.mrf.mxu1  ;;  %v7039_v58 = vadd.f32 %v7021_v61, %v6876_v25 }
 0x616   : > { %v6863_v51 = vpop.f32.mrf.mxu0 }
 0x617   : > { %v7026_v11 = vpop.f32.mrf.mxu1  ;;  %v6877_v22 = vadd.f32 %v6863_v51, %v6656_v48 }
 0x618   : > { %v17942_v15 = vpop.f32.mrf.mxu0 }
 0x619   : > { %v17978_v57 = vpop.f32.mrf.mxu1  ;;  %v7040_v41 = vadd.f32 %v7026_v11, %v6877_v22 }
 0x61a   : > { %v6866_v38 = vpop.f32.mrf.mxu0 }
 0x61b   : > { %v7029_v29 = vpop.f32.mrf.mxu1 }
 0x61c   : > { %v17943_v19 = vpop.f32.mrf.mxu0 }
 0x61d   : > { %v17979_v14 = vpop.f32.mrf.mxu1 }
 0x61e   : > { %v7177_v23 = vpop.f32.mrf.mxu0 }
 0x61f   : > { %v7215_v47 = vadd.f32 %v7177_v23, %v7032_v36  ;;  %v7201_v24 = vpop.f32.mrf.mxu1 }
 0x620   : > { %v7221_v4 = vadd.f32 %v7201_v24, %v7038_v52  ;;  %v17998_v43 = vpop.f32.mrf.mxu0 }
 0x621   : > { %v21767_v44 = vadd.f32 %v7215_v47, %v20361_v1  ;;  %v18010_v62 = vpop.f32.mrf.mxu1 }
 0x622   : > { %v21770_v10 = vadd.f32 %v7221_v4, %v20361_v1  ;;  %v7180_v3 = vpop.f32.mrf.mxu0 }
 0x623   : > { %v7233_v46 = vmax.f32 %v21767_v44, 0.0  ;;  %v7216_v26 = vadd.f32 %v7180_v3, %v7033_v16  ;;  %v7204_v37 = vpop.f32.mrf.mxu1 }
 0x624   : > { %v7239_v12 = vmax.f32 %v21770_v10, 0.0  ;;  %v7222_v31 = vadd.f32 %v7204_v37, %v7039_v58  ;;  %v17999_v32 = vpop.f32.mrf.mxu0 }
 0x625   : > { %v21776_v49 = vadd.f32 %v7216_v26, %v20361_v1  ;;  %v18011_v60 = vpop.f32.mrf.mxu1 }
 0x626   : > { %v21779_v9 = vadd.f32 %v7222_v31, %v20361_v1  ;;  %v7185_v13 = vpop.f32.mrf.mxu0 }
 0x627   : > { %v7234_v0 = vmax.f32 %v21776_v49, 0.0  ;;  %v7217_v50 = vadd.f32 %v7185_v13, %v7034_v34  ;;  %v7209_v20 = vpop.f32.mrf.mxu1 }
 0x628   : > { %v7240_v35 = vmax.f32 %v21779_v9, 0.0  ;;  %v7223_v59 = vadd.f32 %v7209_v20, %v7040_v41  ;;  %v18002_v30 = vpop.f32.mrf.mxu0 }
 0x629   : > { %v7226_v39 = vadd.f32 %v7217_v50, %v20361_v1  ;;  %v18014_v28 = vpop.f32.mrf.mxu1 }
 0x62a   : > { %v21788_v55 = vadd.f32 %v7223_v59, %v20361_v1  ;;  %v7188_v61 = vpop.f32.mrf.mxu0 }
 0x62b   : > { %v7235_v21 = vmax.f32 %v7226_v39, 0.0  ;;  %v7218_v45 = vadd.f32 %v7188_v61, %v7035_v5  ;;  %v7212_v51 = vpop.f32.mrf.mxu1 }
 0x62c   : > { %v7241_v11 = vmax.f32 %v21788_v55, 0.0  ;;  %v18003_v15 = vpop.f32.mrf.mxu0 }
 0x62d   : > { %v7227_v53 = vadd.f32 %v7218_v45, %v20361_v1  ;;  %v18015_v8 = vpop.f32.mrf.mxu1 }
 0x62e   : > { %v7193_v57 = vpop.f32.mrf.mxu0 }
 0x62f   : > { %v7236_v18 = vmax.f32 %v7227_v53, 0.0  ;;  %v7219_v38 = vadd.f32 %v7193_v57, %v7036_v2 }
 0x630   : > { %v18006_v29 = vpop.f32.mrf.mxu0 }
 0x631   : > { %v7228_v19 = vadd.f32 %v7219_v38, %v20361_v1 }
 0x632   : > { %v7196_v36 = vpop.f32.mrf.mxu0 }
 0x633   : > { %v7237_v63 = vmax.f32 %v7228_v19, 0.0  ;;  %v7220_v14 = vadd.f32 %v7196_v36, %v7037_v56  ;;  %7244 = sbr.rel (%p14711_p11) target bundleno = 1597 (0x63d), region = 64 }
 0x634   : > { %v18007_v52 = vpop.f32.mrf.mxu0 }
 0x635   : > { %v7229_v17 = vadd.f32 %v7220_v14, %v20361_v1 }
 0x637   : > { %v7238_v25 = vmax.f32 %v7229_v17, 0.0 }
 0x638   : > { %7245 = vst [vmem:[%s19818_s11 + $0x100] sm:$0xff] %v7233_v46  ;;  %7246 = vst [vmem:[%s19818_s11 + $0x108] sm:$0xff] %v7234_v0 }
 0x639   : > { %7247 = vst [vmem:[%s19818_s11 + $0x110] sm:$0xff] %v7235_v21  ;;  %7248 = vst [vmem:[%s19818_s11 + $0x118] sm:$0xff] %v7236_v18 }
 0x63a   : > { %7249 = vst [vmem:[%s19818_s11 + $0x120] sm:$0xff] %v7237_v63  ;;  %7250 = vst [vmem:[%s19818_s11 + $0x128] sm:$0xff] %v7238_v25 }
 0x63b   : > { %7251 = vst [vmem:[%s19818_s11 + $0x130] sm:$0xff] %v7239_v12  ;;  %7252 = vst [vmem:[%s19818_s11 + $0x138] sm:$0xff] %v7240_v35 }
 0x63c   : > { %7253 = vst [vmem:[%s19818_s11 + $0x140] sm:$0xf] %v7241_v11 }
 0x63d PF: > { %7256 = sbr.rel (%p14712_p12) target bundleno = 1749 (0x6d5), region = 68 }
 0x642   : > { %v7259_v1 = vld [vmem:[%s23877_s3 + $0x110] sm:$0xff]  ;;  %v7257_v33 = vld [vmem:[%s23877_s3 + $0x100] sm:$0xff]  ;;  %v19733_v42 = vmov 0   ;;  %v7260_v54 = vld [vmem:[%s23877_s3 + $0x118] sm:$0xff] }
 0x643   : > { %19344 = vset.pattern.permute.xlu1 %v19733_v42  ;;  %19343 = vset.pattern.permute.xlu0 %v19733_v42  ;;  %v7258_v23 = vld [vmem:[%s23877_s3 + $0x108] sm:$0xff]  ;;  %v7261_v24 = vld [vmem:[%s23877_s3 + $0x120] sm:$0xff]  ;;  %v7264_v48 = vld [vmem:[%s23877_s3 + $0x138] sm:$0xff] }
 0x644   : > { %7278 = vperm.xlu1 %19344, %v7259_v1   ;;  %7268 = vperm.xlu0 %19343, %v7257_v33   ;;  %v7262_v47 = vld [vmem:[%s23877_s3 + $0x128] sm:$0xff]  ;;  %v7263_v4 = vld [vmem:[%s23877_s3 + $0x130] sm:$0xff]  ;;  %v7265_v43 = vld [vmem:[%s23877_s3 + $0x140] sm:$0xf] }
 0x648   : > { %7283 = vperm.xlu1 %19344, %v7260_v54   ;;  %7273 = vperm.xlu0 %19343, %v7258_v23  }
 0x64c   : > { %7293 = vperm.xlu1 %19344, %v7262_v47   ;;  %7288 = vperm.xlu0 %19343, %v7261_v24  }
 0x650   : > { %7303 = vperm.xlu1 %19344, %v7264_v48   ;;  %7298 = vperm.xlu0 %19343, %v7263_v4  }
 0x654   : > { %7308 = vperm.xlu0 %19343, %v7265_v43  }
 0x6bf   : > { %v7279_v16 = vpop.permute.xlu1 %7278  ;;  %v7269_v6 = vpop.permute.xlu0 %7268 }
 0x6c0   : > { %v7313_v62 = vmul.f32 %v7279_v16, %v7235_v21  ;;  %v7311_v3 = vmul.f32 %v7269_v6, %v7233_v46 }
 0x6c3   : > { %v7284_v58 = vpop.permute.xlu1 %7283  ;;  %v7274_v22 = vpop.permute.xlu0 %7273 }
 0x6c4   : > { %v7314_v26 = vmul.f32 %v7284_v58, %v7236_v18  ;;  %v7312_v37 = vmul.f32 %v7274_v22, %v7234_v0 }
 0x6c6   : > { %v16172_v31 = vpack.c.bf16 %v7314_v26, %v7313_v62  ;;  %v16167_v32 = vpack.c.bf16 %v7312_v37, %v7311_v3 }
 0x6c7   : > { %v7294_v34 = vpop.permute.xlu1 %7293  ;;  %v7289_v40 = vpop.permute.xlu0 %7288 }
 0x6c8   : > { %16286 = vst [vmem:[#allocation2 + $0x98] sm:$0xff] %v16172_v31   ;;  %16285 = vst [vmem:[#allocation2 + $0x90] sm:$0xff] %v16167_v32   ;;  %v7316_v60 = vmul.f32 %v7294_v34, %v7238_v25  ;;  %v7315_v41 = vmul.f32 %v7289_v40, %v7237_v63 }
 0x6ca   : > { %v16177_v13 = vpack.c.bf16 %v7316_v60, %v7315_v41 }
 0x6cb   : > { %v7304_v50 = vpop.permute.xlu1 %7303  ;;  %v7299_v20 = vpop.permute.xlu0 %7298 }
 0x6cc   : > { %16287 = vst [vmem:[#allocation2 + $0xa0] sm:$0xff] %v16177_v13   ;;  %v7318_v44 = vmul.f32 %v7304_v50, %v7240_v35  ;;  %v7317_v46 = vmul.f32 %v7299_v20, %v7239_v12 }
 0x6ce   : > { %v16182_v49 = vpack.c.bf16 %v7318_v44, %v7317_v46 }
 0x6cf   : > { %v7309_v0 = vpop.permute.xlu0 %7308 }
 0x6d0   : > { %16288 = vst [vmem:[#allocation2 + $0xa8] sm:$0xff] %v16182_v49   ;;  %v7319_v59 = vmul.f32 %v7309_v0, %v7241_v11 }
 0x6d2   : > { %v16042_v30 = vpack.c.bf16 %v7319_v59, %v7319_v59 }
 0x6d4   : > { %7365 = vst [vmem:[#allocation2 + $0xb0] sm:$0x3] %v16042_v30 }
 0x6d5 PF: > { %p15231_p13 = scmp.ne.s32.totalorder %s23989_s25, 1 }
 0x6d7   : > { %7369 = sbr.rel (%p15231_p13) target bundleno = 3448 (0xd78), region = 72 }
 0x6dc   : > { %v19345_v10 = vld [vmem:[%s19813_s8 + $0x78] sm:$0xff]   ;;  %v19347_v9 = vld [vmem:[%s19813_s8 + $0x70] sm:$0xff]   ;;  %v19349_v5 = vld [vmem:[%s19813_s8 + $0x68] sm:$0xff]   ;;  %vm7464_vm7 = vcmask 1044480   ;;  %vm7638_vm8 = vsmask.f32 5376 }
 0x6dd   : > { %v19346_v12 = vld [vmem:[%s19813_s8 + $0x38] sm:$0xff]   ;;  %18016 = vmatprep.subr.bf16.mxu0 %v19345_v10  ;;  %v19348_v35 = vld [vmem:[%s19813_s8 + $0x30] sm:$0xff]   ;;  %v19350_v7 = vld [vmem:[%s19813_s8 + $0x28] sm:$0xff]   ;;  %vm7893_vm9 = vsmask.f32 4352  ;;  %vm9278_vm11 = vcmask 1046528  }
 0x6de   : > { %18048 = vmatprep.subr.bf16.mxu1 %v19346_v12  ;;  %18017 = vmatpush3.bf16.msra.mxu0 %v19345_v10  ;;  %v19351_v39 = vld [vmem:[%s19813_s8 + $0x60] sm:$0xff]   ;;  %v19353_v55 = vld [vmem:[%s19813_s8 + $0x58] sm:$0xff]   ;;  %v19355_v21 = vld [vmem:[%s19813_s8 + $0x50] sm:$0xff]   ;;  %vm8705_vm10 = vsmask.f32 7424  ;;  %p15480_p0 = scmp.ne.s32.totalorder %s19710_s15, 1 }
 0x6df   : > { %18049 = vmatpush3.bf16.msra.mxu1 %v19346_v12  ;;  %18018 = vmatprep.subr.bf16.mxu0 %v19347_v9  ;;  %v19352_v28 = vld [vmem:[%s19813_s8 + $0x20] sm:$0xff]   ;;  %v19354_v61 = vld [vmem:[%s19813_s8 + $0x18] sm:$0xff]   ;;  %v19356_v45 = vld [vmem:[%s19813_s8 + $0x10] sm:$0xff]   ;;  %vm9486_vm12 = vsmask.f32 6400 }
 0x6e0   : > { %18050 = vmatprep.subr.bf16.mxu1 %v19348_v35  ;;  %v7371_v51 = vld [vmem:[#allocation2 + $0x8] sm:$0xf]  ;;  %v7403_v11 = vld [vmem:[#allocation2 + $0x4] sm:$0x8]  ;;  %v21871_v15 = vld [vmem:[#allocation2 + $0xc] sm:$0xff]  }
 0x6e1   : > { %v7370_v2 = vld [vmem:[#allocation2 + $0x4] sm:$0xc]  ;;  %v21873_v27 = vcombine.low %v7403_v11, %v7371_v51  ;;  %v7466_v8 = vrot.slane %v21871_v15, 3  ;;  %v7648_v57 = vshrl.u32 %v21871_v15, 16  ;;  %v7651_v18 = vshll.u32 %v21871_v15, 16  ;;  %v21878_v38 = vld [vmem:[#allocation2 + $0x14] sm:$0xff]  }
 0x6e2   : > { %18019 = vmatpush3.bf16.msra.mxu0 %v19347_v9  ;;  %v15265_v53 = vcombine.low %v7370_v2, %v7371_v51  ;;  %v19357_v29 = vld [vmem:[%s19813_s8 + $0x48] sm:$0xff]   ;;  %v7657_v17 = vshrl.u32 %v21878_v38, 16  ;;  %v19359_v25 = vld [vmem:[%s19813_s8 + $0x40] sm:$0xff]   ;;  %v7660_v54 = vshll.u32 %v21878_v38, 16  ;;  %v7468_v62 = vrot.slane %v21878_v38, 3  ;;  %v19365_v26 = vld [vmem:[%s19813_s8 + $0xb8] sm:$0xff]  }
 0x6e3   : > { %18051 = vmatpush3.bf16.msra.mxu1 %v19348_v35  ;;  %18020 = vmatprep.subr.bf16.mxu0 %v19349_v5  ;;  %v7465_v56 = vrot.slane %v21873_v27, 3  ;;  %v19358_v63 = vld [vmem:[%s19813_s8 + $0x8] sm:$0xff]   ;;  %v7650_v14 = vrot.slane %v7648_v57, 2  ;;  %v7653_v52 = vrot.slane %v7651_v18, 3  ;;  %v19360_v23 = vld [vmem:[%s19813_s8] sm:$0xff]   ;;  %v19366_v37 = vld [vmem:[%s19813_s8 + $0xf8] sm:$0xff]  }
 0x6e4   : > { %18052 = vmatprep.subr.bf16.mxu1 %v19350_v7  ;;  %v7640_v19 = vshrl.u32 %v15265_v53, 16  ;;  %v7643_v36 = vshll.u32 %v15265_v53, 16  ;;  %v7659_v48 = vrot.slane %v7657_v17, 2  ;;  %v7662_v4 = vrot.slane %v7660_v54, 3  ;;  %v21896_v43 = vld [vmem:[#allocation2 + $0x1c] sm:$0xff]   ;;  %v21899_v6 = vld [vmem:[#allocation2 + $0x24] sm:$0xff]  }
 0x6e5   : > { %v7467_v1 = vsel %vm7464_vm7, %v7465_v56, %v7466_v8  ;;  %v7654_v47 = vor.u32 %v7653_v52, %v7650_v14  ;;  %v7666_v58 = vshrl.u32 %v21896_v43, 16  ;;  %v7669_v22 = vshll.u32 %v21896_v43, 16  ;;  %v19367_v60 = vld [vmem:[%s19813_s8 + $0xb0] sm:$0xff]   ;;  %v19373_v51 = vld [vmem:[%s19813_s8 + $0xa0] sm:$0xff]  }
 0x6e6   : > { %18021 = vmatpush3.bf16.msra.mxu0 %v19349_v5  ;;  %v7642_v33 = vrot.slane %v7640_v19, 2  ;;  %v7645_v42 = vrot.slane %v7643_v36, 3  ;;  %18032 = vmatprep.mubr.bf16.mxu0 %v7467_v1  ;;  %v7663_v3 = vor.u32 %v7662_v4, %v7659_v48  ;;  %v7675_v31 = vshrl.u32 %v21899_v6, 16  ;;  %v19368_v50 = vld [vmem:[%s19813_s8 + $0xf0] sm:$0xff]   ;;  %v21947_v19 = vld [vmem:[#allocation2 + $0x3c] sm:$0xff]  }
 0x6e7   : > { %18053 = vmatpush3.bf16.msra.mxu1 %v19350_v7  ;;  %18022 = vmatprep.subr.bf16.mxu0 %v19351_v39  ;;  %v7678_v32 = vshll.u32 %v21899_v6, 16  ;;  %v7668_v34 = vrot.slane %v7666_v58, 2  ;;  %v7671_v40 = vrot.slane %v7669_v22, 3  ;;  %v7470_v41 = vrot.slane %v21896_v43, 3  ;;  %v21921_v0 = vld [vmem:[#allocation2 + $0x2c] sm:$0xff]   ;;  %v21924_v30 = vld [vmem:[#allocation2 + $0x34] sm:$0xff]  }
 0x6e8   : > { %18054 = vmatprep.subr.bf16.mxu1 %v19352_v28  ;;  %v7646_v24 = vor.u32 %v7645_v42, %v7642_v33  ;;  %v7469_v13 = vsel %vm7464_vm7, %v7466_v8, %v7468_v62  ;;  %v7664_v44 = vsel %vm7638_vm8, %v7654_v47, %v7663_v3  ;;  %v7677_v46 = vrot.slane %v7675_v31, 2  ;;  %v21949_v36 = vld [vmem:[#allocation2 + $0x44] ss:$0 sps:$4 sm:$0x77]  }
 0x6e9   : > { %v7672_v20 = vor.u32 %v7671_v40, %v7668_v34  ;;  %v7680_v49 = vrot.slane %v7678_v32, 3  ;;  %v7471_v59 = vsel %vm7464_vm7, %v7468_v62, %v7470_v41  ;;  %v7895_v10 = vshrl.u32 %v21873_v27, 16  ;;  %v19378_v62 = vld [vmem:[%s19813_s8 + $0xd8] sm:$0xff]  }
 0x6ea   : > { %18023 = vmatpush3.bf16.msra.mxu0 %v19351_v39  ;;  %v7655_v16 = vsel %vm7638_vm8, %v7646_v24, %v7654_v47  ;;  %v7472_v9 = vrot.slane %v21899_v6, 3  ;;  %v7684_v35 = vshrl.u32 %v21921_v0, 16  ;;  %v7687_v5 = vshll.u32 %v21921_v0, 16  ;;  %v19371_v39 = vld [vmem:[%s19813_s8 + $0xa8] sm:$0xff]   ;;  %v19377_v47 = vld [vmem:[%s19813_s8 + $0x98] sm:$0xff]  }
 0x6eb   : > { %18055 = vmatpush3.bf16.msra.mxu1 %v19352_v28  ;;  %18024 = vmatprep.subr.bf16.mxu0 %v19353_v55  ;;  %v7673_v12 = vsel %vm7638_vm8, %v7663_v3, %v7672_v20  ;;  %v7681_v7 = vor.u32 %v7680_v49, %v7677_v46  ;;  %v19372_v28 = vld [vmem:[%s19813_s8 + $0xe8] sm:$0xff]   ;;  %v7474_v11 = vrot.slane %v21921_v0, 3  ;;  %v7898_v14 = vshll.u32 %v21873_v27, 16  ;;  %v21979_v49 = vld [vmem:[#allocation2 + $0x10] sm:$0xf] }
 0x6ec   : > { %18056 = vmatprep.subr.bf16.mxu1 %v19354_v61  ;;  %18064 = vmatprep.mubr.bf16.mxu1 %v7655_v16  ;;  %v7473_v8 = vsel %vm7464_vm7, %v7470_v41, %v7472_v9  ;;  %v7705_v1 = vshll.u32 %v21947_v19, 16  ;;  %v21956_v33 = vrot.slane %v7895_v10, 3  ;;  %v7711_v27 = vshrl.u32 %v21949_v36, 16 }
 0x6ed   : > { %v7682_v56 = vsel %vm7638_vm8, %v7672_v20, %v7681_v7  ;;  %v7475_v52 = vsel %vm7464_vm7, %v7472_v9, %v7474_v11  ;;  %v7714_v24 = vshll.u32 %v21949_v36, 16  ;;  %v21968_v3 = vrot.slane %v7898_v14, 4  ;;  %v21992_v9 = vld [vmem:[#allocation2 + $0x20] sm:$0xf] }
 0x6ee   : > { %18025 = vmatpush3.bf16.msra.mxu0 %v19353_v55  ;;  %v7693_v55 = vshrl.u32 %v21924_v30, 16  ;;  %v7707_v16 = vrot.slane %v7705_v1, 3  ;;  %v7902_v40 = vrot.slane %v7648_v57, 3  ;;  %v21983_v57 = vld [vmem:[#allocation2 + $0x18] sm:$0xf]  ;;  %v7914_v43 = vrot.slane %v7675_v31, 3 }
 0x6ef   : > { %18057 = vmatpush3.bf16.msra.mxu1 %v19354_v61  ;;  %18026 = vmatprep.subr.bf16.mxu0 %v19355_v21  ;;  %v7696_v61 = vshll.u32 %v21924_v30, 16  ;;  %v7716_v20 = vrot.slane %v7714_v24, 3  ;;  %v7901_v15 = vor.u32 %v21968_v3, %v21956_v33  ;;  %v7907_v24 = vrot.slane %v7660_v54, 4  ;;  %v22008_v3 = vld [vmem:[#allocation2 + $0x24] sm:$0xf] }
 0x6f0   : > { %18058 = vmatprep.subr.bf16.mxu1 %v19356_v45  ;;  %v7695_v2 = vrot.slane %v7693_v55, 2  ;;  %v22041_v31 = vld [vmem:[#allocation2 + $0x3c] sm:$0xf]  ;;  %v7922_v0 = vrot.slane %v7693_v55, 3  ;;  %v7927_v55 = vrot.slane %v7705_v1, 4 }
 0x6f1   : > { %v7698_v53 = vrot.slane %v7696_v61, 3  ;;  %v19400_v1 = vld [vmem:[%s19813_s8 + $0x118] sm:$0xff]  }
 0x6f2   : > { %18027 = vmatpush3.bf16.msra.mxu0 %v19355_v21  ;;  %v7686_v21 = vrot.slane %v7684_v35, 2 }
 0x6f3   : > { %18059 = vmatpush3.bf16.msra.mxu1 %v19356_v45  ;;  %18028 = vmatprep.subr.bf16.mxu0 %v19357_v29  ;;  %v7689_v45 = vrot.slane %v7687_v5, 3  ;;  %v7699_v48 = vor.u32 %v7698_v53, %v7695_v2 }
 0x6f4   : > { %18060 = vmatprep.subr.bf16.mxu1 %v19358_v63 }
 0x6f6   : > { %18029 = vmatpush3.bf16.msra.mxu0 %v19357_v29  ;;  %v7690_v29 = vor.u32 %v7689_v45, %v7686_v21  ;;  %v19383_v21 = vld [vmem:[%s19813_s8 + $0x88] sm:$0xff]  }
 0x6f7   : > { %18061 = vmatpush3.bf16.msra.mxu1 %v19358_v63  ;;  %18030 = vmatprep.subr.bf16.mxu0 %v19359_v25  ;;  %v19374_v63 = vld [vmem:[%s19813_s8 + $0xe0] sm:$0xff]  }
 0x6f8   : > { %18062 = vmatprep.subr.bf16.mxu1 %v19360_v23  ;;  %v7691_v42 = vsel %vm7638_vm8, %v7681_v7, %v7690_v29  ;;  %v7700_v46 = vsel %vm7638_vm8, %v7690_v29, %v7699_v48  ;;  %v19384_v29 = vld [vmem:[%s19813_s8 + $0xc8] sm:$0xff]  }
 0x6fa   : > { %18031 = vmatpush3.bf16.msra.mxu0 %v19359_v25  ;;  %v7702_v25 = vshrl.u32 %v21947_v19, 16 }
 0x6fb   : > { %18063 = vmatpush3.bf16.msra.mxu1 %v19360_v23  ;;  %18080 = vmatprep.subr.bf16.mxu0 %v19365_v26  ;;  %v7476_v23 = vrot.slane %v21924_v30, 3 }
 0x6fc   : > { %18112 = vmatprep.subr.bf16.mxu1 %v19366_v37  ;;  %v7704_v4 = vrot.slane %v7702_v25, 2  ;;  %v7926_v30 = vrot.slane %v7702_v25, 3 }
 0x6fd   : > { %18033 = vmatmul.mubr.bf16.vlgmr.msra.gmra.mxu0 %v7469_v13  ;;  %v7477_v41 = vsel %vm7464_vm7, %v7474_v11, %v7476_v23  ;;  %v19380_v13 = vld [vmem:[%s19813_s8 + $0xd0] sm:$0xff]  }
 0x6fe   : > { %18065 = vmatmul.mubr.bf16.vlgmr.msra.gmra.mxu1 %v7664_v44  ;;  %18081 = vmatpush3.bf16.msra.mxu0 %v19365_v26  ;;  %v19379_v26 = vld [vmem:[%s19813_s8 + $0x90] sm:$0xff]   ;;  %v7708_v34 = vor.u32 %v7707_v16, %v7704_v4  ;;  %v8108_v44 = vld [vmem:[#allocation2 + $0xc] sm:$0x8] }
 0x6ff   : > { %18113 = vmatpush3.bf16.msra.mxu1 %v19366_v37  ;;  %18082 = vmatprep.subr.bf16.mxu0 %v19367_v60  ;;  %v7478_v37 = vrot.slane %v21947_v19, 3 }
 0x700   : > { %18114 = vmatprep.subr.bf16.mxu1 %v19368_v50  ;;  %18036 = vmatprep.mubr.bf16.mxu0 %v7471_v59  ;;  %v21981_v59 = vld [vmem:[#allocation2 + $0x14] sm:$0xf] }
 0x701   : > { %18068 = vmatprep.mubr.bf16.mxu1 %v7673_v12  ;;  %v15316_v10 = vcombine.low %v21981_v59, %v21983_v57  ;;  %v21990_v12 = vld [vmem:[#allocation2 + $0x1c] sm:$0xf]  ;;  %v7479_v7 = vsel %vm7464_vm7, %v7476_v23, %v7478_v37 }
 0x702   : > { %18083 = vmatpush3.bf16.msra.mxu0 %v19367_v60  ;;  %v7903_v60 = vrot.slane %v7651_v18, 4  ;;  %v15315_v18 = vcombine.low %v8108_v44, %v21979_v49  ;;  %v15317_v45 = vcombine.low %v21990_v12, %v21992_v9 }
 0x703   : > { %18115 = vmatpush3.bf16.msra.mxu1 %v19368_v50  ;;  %18084 = vmatprep.subr.bf16.mxu0 %v19371_v39  ;;  %v7713_v50 = vrot.slane %v7711_v27, 2  ;;  %v8194_v2 = vshrl.u32 %v15316_v10, 16  ;;  %v8197_v53 = vshll.u32 %v15316_v10, 16  ;;  %v19387_v10 = vld [vmem:[%s19813_s8 + $0x138] sm:$0xff]  }
 0x704   : > { %18116 = vmatprep.subr.bf16.mxu1 %v19372_v28  ;;  %v8189_v11 = vshll.u32 %v15315_v18, 16  ;;  %v7904_v27 = vor.u32 %v7903_v60, %v7902_v40  ;;  %v22015_v40 = vld [vmem:[#allocation2 + $0x30] sm:$0xf]  ;;  %v7910_v60 = vrot.slane %v7666_v58, 3  ;;  %v7915_v58 = vrot.slane %v7678_v32, 4 }
 0x705   : > { %18037 = vmatmul.mubr.bf16.gmra.mxu0 %v7473_v8  ;;  %v7717_v8 = vor.u32 %v7716_v20, %v7713_v50  ;;  %v8196_v33 = vrot.slane %v8194_v2, 3  ;;  %v22011_v50 = vld [vmem:[#allocation2 + $0x28] sm:$0xf]  ;;  %v22034_v2 = vld [vmem:[#allocation2 + $0x34] sm:$0xf] }
 0x706   : > { %18069 = vmatmul.mubr.bf16.gmra.mxu1 %v7682_v56  ;;  %18085 = vmatpush3.bf16.msra.mxu0 %v19371_v39  ;;  %v7709_v39 = vsel %vm7638_vm8, %v7699_v48, %v7708_v34  ;;  %v7906_v56 = vrot.slane %v7657_v17, 3  ;;  %v19386_v17 = vld [vmem:[%s19813_s8 + $0xc0] sm:$0xff]   ;;  %v15318_v38 = vcombine.low %v22008_v3, %v22011_v50 }
 0x707   : > { %18117 = vmatpush3.bf16.msra.mxu1 %v19372_v28  ;;  %18086 = vmatprep.subr.bf16.mxu0 %v19373_v51  ;;  %v7480_v28 = vrot.slane %v21949_v36, 3  ;;  %v8203_v36 = vshrl.u32 %v15317_v45, 16  ;;  %v22043_v32 = vld [vmem:[#allocation2 + $0x40] sm:$0xf] }
 0x708   : > { %18118 = vmatprep.subr.bf16.mxu1 %v19374_v63  ;;  %18040 = vmatprep.mubr.bf16.mxu0 %v7475_v52  ;;  %v8191_v52 = vrot.slane %v8189_v11, 4  ;;  %v8212_v44 = vshrl.u32 %v15318_v38, 16 }
 0x709   : > { %18072 = vmatprep.mubr.bf16.mxu1 %v7691_v42  ;;  %v8199_v42 = vrot.slane %v8197_v53, 4  ;;  %v7481_v23 = vsel %vm7464_vm7, %v7478_v37, %v7480_v28  ;;  %v8205_v16 = vrot.slane %v8203_v36, 3  ;;  %v22013_v37 = vld [vmem:[#allocation2 + $0x2c] sm:$0xf]  ;;  %v22036_v53 = vld [vmem:[#allocation2 + $0x38] sm:$0xf] }
 0x70a   : > { %18087 = vmatpush3.bf16.msra.mxu0 %v19373_v51  ;;  %v8186_v51 = vshrl.u32 %v15315_v18, 16  ;;  %v15319_v54 = vcombine.low %v22013_v37, %v22015_v40  ;;  %v15320_v6 = vcombine.low %v22034_v2, %v22036_v53  ;;  %v19393_v36 = vld [vmem:[%s19813_s8 + $0x170] sm:$0xff]  }
 0x70b   : > { %18119 = vmatpush3.bf16.msra.mxu1 %v19374_v63  ;;  %18088 = vmatprep.subr.bf16.mxu0 %v19377_v47  ;;  %v8206_v63 = vshll.u32 %v15317_v45, 16  ;;  %v8200_v4 = vor.u32 %v8199_v42, %v8196_v33  ;;  %v7916_v42 = vor.u32 %v7915_v58, %v7914_v43 }
 0x70c   : > { %18120 = vmatprep.subr.bf16.mxu1 %v19378_v62  ;;  %v8188_v14 = vrot.slane %v8186_v51, 3  ;;  %v8221_v18 = vshrl.u32 %v15319_v54, 16 }
 0x70d   : > { %18041 = vmatmul.mubr.bf16.gmra.mxu0 %v7477_v41  ;;  %v7718_v41 = vsel %vm7638_vm8, %v7708_v34, %v7717_v8  ;;  %v7908_v34 = vor.u32 %v7907_v24, %v7906_v56 }
 0x70e   : > { %18073 = vmatmul.mubr.bf16.gmra.mxu1 %v7700_v46  ;;  %18089 = vmatpush3.bf16.msra.mxu0 %v19377_v47  ;;  %v19385_v47 = vld [vmem:[%s19813_s8 + $0x80] sm:$0xff]   ;;  %v8192_v48 = vor.u32 %v8191_v52, %v8188_v14  ;;  %v8215_v46 = vshll.u32 %v15318_v38, 16  ;;  %v8223_v51 = vrot.slane %v8221_v18, 3  ;;  %v8233_v14 = vshll.u32 %v15320_v6, 16 }
 0x70f   : > { %18121 = vmatpush3.bf16.msra.mxu1 %v19378_v62  ;;  %18090 = vmatprep.subr.bf16.mxu0 %v19379_v26  ;;  %v8208_v62 = vrot.slane %v8206_v63, 4  ;;  %v7909_v8 = vsel %vm7893_vm9, %v7904_v27, %v7908_v34  ;;  %v8230_v63 = vshrl.u32 %v15320_v6, 16  ;;  %v15321_v52 = vcombine.low %v22041_v31, %v22043_v32 }
 0x710   : > { %18122 = vmatprep.subr.bf16.mxu1 %v19380_v13  ;;  %18044 = vmatprep.mubr.bf16.mxu0 %v7479_v7  ;;  %v8201_v20 = vsel %vm7893_vm9, %v8192_v48, %v8200_v4  ;;  %v8217_v28 = vrot.slane %v8215_v46, 4  ;;  %v8235_v48 = vrot.slane %v8233_v14, 4 }
 0x711   : > { %18076 = vmatprep.mubr.bf16.mxu1 %v7709_v39  ;;  %v8209_v7 = vor.u32 %v8208_v62, %v8205_v16  ;;  %v8224_v39 = vshll.u32 %v15319_v54, 16  ;;  %v8239_v16 = vshrl.u32 %v15321_v52, 16  ;;  %v8242_v62 = vshll.u32 %v15321_v52, 16  ;;  %v19398_v54 = vld [vmem:[%s19813_s8 + $0x120] sm:$0xff]  }
 0x712   : > { %18091 = vmatpush3.bf16.msra.mxu0 %v19379_v26  ;;  %v7905_v26 = vsel %vm7893_vm9, %v7901_v15, %v7904_v27  ;;  %v19391_v15 = vld [vmem:[%s19813_s8 + $0x178] sm:$0xff]   ;;  %v19394_v27 = vld [vmem:[%s19813_s8 + $0x128] sm:$0xff]  }
 0x713   : > { %18123 = vmatpush3.bf16.msra.mxu1 %v19380_v13  ;;  %18092 = vmatprep.subr.bf16.mxu0 %v19383_v21  ;;  %v7911_v13 = vrot.slane %v7669_v22, 4  ;;  %v8214_v22 = vrot.slane %v8212_v44, 3  ;;  %v8226_v11 = vrot.slane %v8224_v39, 4  ;;  %v8210_v56 = vsel %vm7893_vm9, %v8200_v4, %v8209_v7 }
 0x714   : > { %18124 = vmatprep.subr.bf16.mxu1 %v19384_v29  ;;  %v8241_v18 = vrot.slane %v8239_v16, 3 }
 0x715   : > { %18045 = vmatmul.mubr.bf16.gmra.mxu0 %v7481_v23  ;;  %v7912_v45 = vor.u32 %v7911_v13, %v7910_v60  ;;  %v7918_v23 = vrot.slane %v7684_v35, 3  ;;  %v8227_v4 = vor.u32 %v8226_v11, %v8223_v51  ;;  %v19397_v35 = vld [vmem:[%s19813_s8 + $0x168] sm:$0xff]  }
 0x716   : > { %18077 = vmatmul.mubr.bf16.gmra.mxu1 %v7718_v41  ;;  %18093 = vmatpush3.bf16.msra.mxu0 %v19383_v21  ;;  %v19392_v21 = vld [vmem:[%s19813_s8 + $0x130] sm:$0xff]   ;;  %v22061_v41 = vld [vmem:[#allocation2 + $0x44] sm:$0xf]  ;;  %v22065_v60 = vld [vmem:[#allocation2 + $0x48] sm:$0xf] }
 0x717   : > { %18125 = vmatpush3.bf16.msra.mxu1 %v19384_v29  ;;  %18094 = vmatprep.subr.bf16.mxu0 %v19385_v47  ;;  %v8218_v29 = vor.u32 %v8217_v28, %v8214_v22  ;;  %v7913_v33 = vsel %vm7893_vm9, %v7908_v34, %v7912_v45  ;;  %v7917_v38 = vsel %vm7893_vm9, %v7912_v45, %v7916_v42  ;;  %v19406_v34 = vld [vmem:[#allocation2 + $0x44] ss:$0 sps:$4 sm:$0xff]   ;;  %v22067_v13 = vld [vmem:[#allocation2 + $0x4c] sm:$0xf] }
 0x718   : > { %18126 = vmatprep.subr.bf16.mxu1 %v19386_v17  ;;  %18096 = vmatprep.mubr.bf16.mxu0 %v7905_v26  ;;  %v7931_v43 = vshrl.u32 %v19406_v34, 16  ;;  %v7934_v58 = vshll.u32 %v19406_v34, 16 }
 0x719   : > { %18128 = vmatprep.mubr.bf16.mxu1 %v8201_v20  ;;  %v8219_v24 = vsel %vm7893_vm9, %v8209_v7, %v8218_v29  ;;  %v19399_v20 = vld [vmem:[%s19813_s8 + $0x160] sm:$0xff]   ;;  %v8228_v46 = vsel %vm7893_vm9, %v8218_v29, %v8227_v4  ;;  %v15323_v7 = vcombine.low %v22067_v13, %v22067_v13  ;;  %v19416_v29 = vld [vmem:[#allocation2 + $0x10] sm:$0xff]  }
 0x71a   : > { %18095 = vmatpush3.bf16.msra.mxu0 %v19385_v47  ;;  %v7919_v47 = vrot.slane %v7687_v5, 4  ;;  %v7923_v5 = vrot.slane %v7696_v61, 4  ;;  %v15322_v61 = vcombine.low %v22061_v41, %v22065_v60  ;;  %v7933_v14 = vrot.slane %v7931_v43, 3 }
 0x71b   : > { %18127 = vmatpush3.bf16.msra.mxu1 %v19386_v17  ;;  %18144 = vmatprep.subr.bf16.mxu0 %v19387_v10  ;;  %v8232_v17 = vrot.slane %v8230_v63, 3  ;;  %v8257_v51 = vshrl.u32 %v15323_v7, 16  ;;  %v8260_v11 = vshll.u32 %v15323_v7, 16  ;;  %v19404_v63 = vld [vmem:[%s19813_s8 + $0x110] sm:$0xff]   ;;  %v7936_v52 = vrot.slane %v7934_v58, 4  ;;  %v19415_v7 = vld [vmem:[%s19813_s8 + $0x1b8] sm:$0xff]  }
 0x71c   : > { %18176 = vmatprep.subr.bf16.mxu1 %v19391_v15  ;;  %v7920_v26 = vor.u32 %v7919_v47, %v7918_v23  ;;  %v8251_v39 = vshll.u32 %v15322_v61, 16  ;;  %v7924_v19 = vor.u32 %v7923_v5, %v7922_v0  ;;  %v19426_v58 = vld [vmem:[#allocation2 + $0x30] sm:$0xff]  }
 0x71d   : > { %18097 = vmatmul.mubr.bf16.vlgmr.msra.gmra.mxu0 %v7909_v8  ;;  %v8236_v44 = vor.u32 %v8235_v48, %v8232_v17  ;;  %v19403_v8 = vld [vmem:[%s19813_s8 + $0x158] sm:$0xff]   ;;  %v8259_v47 = vrot.slane %v8257_v51, 3  ;;  %v8707_v17 = vshrl.u32 %v19416_v29, 16 }
 0x71e   : > { %18145 = vmatpush3.bf16.msra.mxu0 %v19387_v10  ;;  %18129 = vmatmul.mubr.bf16.vlgmr.msra.gmra.mxu1 %v8210_v56  ;;  %v8244_v10 = vrot.slane %v8242_v62, 4  ;;  %v7921_v25 = vsel %vm7893_vm9, %v7916_v42, %v7920_v26  ;;  %v7925_v6 = vsel %vm7893_vm9, %v7920_v26, %v7924_v19  ;;  %v7928_v56 = vor.u32 %v7927_v55, %v7926_v30  ;;  %v19411_v26 = vld [vmem:[%s19813_s8 + $0x100] sm:$0xff]   ;;  %v19425_v30 = vld [vmem:[#allocation2 + $0x28] sm:$0xff]  }
 0x71f   : > { %18177 = vmatpush3.bf16.msra.mxu1 %v19391_v15  ;;  %18146 = vmatprep.subr.bf16.mxu0 %v19392_v21  ;;  %v8248_v15 = vshrl.u32 %v15322_v61, 16  ;;  %v8237_v22 = vsel %vm7893_vm9, %v8227_v4, %v8236_v44  ;;  %v8709_v42 = vshll.u32 %v19416_v29, 16  ;;  %v19407_v4 = vld [vmem:[%s19813_s8 + $0x108] sm:$0xff]   ;;  %v8734_v51 = vshrl.u32 %v19425_v30, 16 }
 0x720   : > { %18178 = vmatprep.subr.bf16.mxu1 %v19393_v36  ;;  %18100 = vmatprep.mubr.bf16.mxu0 %v7913_v33  ;;  %v8245_v45 = vor.u32 %v8244_v10, %v8241_v18  ;;  %v7929_v48 = vsel %vm7893_vm9, %v7924_v19, %v7928_v56  ;;  %v19412_v18 = vld [vmem:[%s19813_s8 + $0x140] sm:$0xff]   ;;  %v15348_v10 = vcombine.low %v21979_v49, %v21981_v59  ;;  %v8730_v19 = vshll.u32 %v19425_v30, 16  ;;  %v19420_v59 = vld [vmem:[%s19813_s8 + $0x1b0] sm:$0xff]  }
 0x721   : > { %18132 = vmatprep.mubr.bf16.mxu1 %v8219_v24  ;;  %v8250_v28 = vrot.slane %v8248_v15, 3  ;;  %v19405_v24 = vld [vmem:[%s19813_s8 + $0x150] sm:$0xff]   ;;  %v8711_v16 = vrot.slane %v8709_v42, 1  ;;  %v15349_v49 = vcombine.low %v21983_v57, %v21990_v12  ;;  %v15350_v29 = vcombine.low %v21992_v9, %v22008_v3  ;;  %v19441_v9 = vld [vmem:[#allocation2 + $0x48] sm:$0xff]  }
 0x722   : > { %18147 = vmatpush3.bf16.msra.mxu0 %v19392_v21  ;;  %v8253_v21 = vrot.slane %v8251_v39, 4  ;;  %v8246_v23 = vsel %vm7893_vm9, %v8236_v44, %v8245_v45  ;;  %v19419_v39 = vld [vmem:[%s19813_s8 + $0x1f8] sm:$0xff]   ;;  %v8742_v12 = vshrl.u32 %v19426_v58, 16  ;;  %v15351_v3 = vcombine.low %v22011_v50, %v22013_v37 }
 0x723   : > { %18179 = vmatpush3.bf16.msra.mxu1 %v19393_v36  ;;  %18148 = vmatprep.subr.bf16.mxu0 %v19394_v27  ;;  %v19417_v36 = vld [vmem:[#allocation2 + $0x18] sm:$0xff]  }
 0x724   : > { %18180 = vmatprep.subr.bf16.mxu1 %v19397_v35  ;;  %v8254_v33 = vor.u32 %v8253_v21, %v8250_v28  ;;  %v8714_v62 = vshll.u32 %v19417_v36, 16  ;;  %v8718_v61 = vshrl.u32 %v19417_v36, 16  ;;  %v8732_v21 = vrot.slane %v8730_v19, 1  ;;  %v19432_v50 = vld [vmem:[%s19813_s8 + $0x198] sm:$0xff]  }
 0x725   : > { %18101 = vmatmul.mubr.bf16.gmra.mxu0 %v7917_v38  ;;  %v19418_v38 = vld [vmem:[#allocation2 + $0x20] sm:$0xff]  }
 0x726   : > { %18149 = vmatpush3.bf16.msra.mxu0 %v19394_v27  ;;  %18133 = vmatmul.mubr.bf16.gmra.mxu1 %v8228_v46  ;;  %v8262_v27 = vrot.slane %v8260_v11, 4  ;;  %v8255_v0 = vsel %vm7893_vm9, %v8245_v45, %v8254_v33  ;;  %v8716_v44 = vrot.slane %v8714_v62, 1  ;;  %v8722_v46 = vshll.u32 %v19418_v38, 16 }
 0x727   : > { %18181 = vmatpush3.bf16.msra.mxu1 %v19397_v35  ;;  %18150 = vmatprep.subr.bf16.mxu0 %v19398_v54  ;;  %v7937_v35 = vor.u32 %v7936_v52, %v7933_v14  ;;  %v8738_v11 = vshll.u32 %v19426_v58, 16  ;;  %v8736_v36 = vor.u32 %v8734_v51, %v8732_v21  ;;  %v19434_v14 = vld [vmem:[#allocation2 + $0x40] sm:$0xff]   ;;  %v19427_v52 = vld [vmem:[%s19813_s8 + $0x1e8] sm:$0xff]  }
 0x728   : > { %18182 = vmatprep.subr.bf16.mxu1 %v19399_v20  ;;  %18104 = vmatprep.mubr.bf16.mxu0 %v7921_v25  ;;  %v8263_v5 = vor.u32 %v8262_v27, %v8259_v47  ;;  %v8726_v25 = vshrl.u32 %v19418_v38, 16  ;;  %v8724_v43 = vrot.slane %v8722_v46, 1  ;;  %v8944_v47 = vld [vmem:[#allocation2 + $0x1c] sm:$0xf]  ;;  %v8758_v37 = vshrl.u32 %v19434_v14, 16 }
 0x729   : > { %18136 = vmatprep.mubr.bf16.mxu1 %v8237_v22  ;;  %v7938_v34 = vsel %vm7893_vm9, %v7928_v56, %v7937_v35  ;;  %v19433_v22 = vld [vmem:[#allocation2 + $0x38] sm:$0xff]   ;;  %v19424_v56 = vld [vmem:[%s19813_s8 + $0x1a8] sm:$0xff]  }
 0x72a   : > { %18151 = vmatpush3.bf16.msra.mxu0 %v19398_v54  ;;  %v19410_v54 = vld [vmem:[%s19813_s8 + $0x148] sm:$0xff]   ;;  %v8264_v55 = vsel %vm7893_vm9, %v8254_v33, %v8263_v5  ;;  %v8728_v28 = vor.u32 %v8726_v25, %v8724_v43  ;;  %v19442_v5 = vld [vmem:[#allocation2 + $0x50] ss:$0 sps:$4 sm:$0x11]  }
 0x72b   : > { %18183 = vmatpush3.bf16.msra.mxu1 %v19399_v20  ;;  %18152 = vmatprep.subr.bf16.mxu0 %v19400_v1  ;;  %v8712_v20 = vor.u32 %v8711_v16, %v8707_v17  ;;  %v8750_v17 = vshrl.u32 %v19433_v22, 16  ;;  %v15352_v16 = vcombine.low %v22015_v40, %v22034_v2  ;;  %v22120_v40 = vld [vmem:[#allocation2 + $0x20] sm:$0xff]   ;;  %v15353_v2 = vcombine.low %v22036_v53, %v22041_v31  ;;  %v22130_v31 = vld [vmem:[#allocation2 + $0x28] sm:$0xff]  }
 0x72c   : > { %18184 = vmatprep.subr.bf16.mxu1 %v19403_v8  ;;  %v8733_v57 = vsel %vm8705_vm10, %v8728_v28, %v8732_v21  ;;  %v8770_v46 = vshll.u32 %v19442_v5, 16  ;;  %v9028_v53 = vshll.u32 %v22120_v40, 16  ;;  %v9032_v28 = vshrl.u32 %v22120_v40, 16 }
 0x72d   : > { %18105 = vmatmul.mubr.bf16.gmra.mxu0 %v7925_v6  ;;  %v8717_v15 = vsel %vm8705_vm10, %v8712_v20, %v8716_v44  ;;  %v8746_v6 = vshll.u32 %v19433_v22, 16  ;;  %v22139_v22 = vld [vmem:[#allocation2 + $0x30] sm:$0xff]   ;;  %v9036_v21 = vshll.u32 %v22130_v31, 16  ;;  %v9280_v51 = vrot.slane %v22120_v40, 1 }
 0x72e   : > { %18153 = vmatpush3.bf16.msra.mxu0 %v19400_v1  ;;  %18137 = vmatmul.mubr.bf16.gmra.mxu1 %v8246_v23  ;;  %v8720_v1 = vor.u32 %v8718_v61, %v8716_v44  ;;  %v8943_v23 = vld [vmem:[#allocation2 + $0x18] sm:$0xf]  ;;  %v19437_v44 = vld [vmem:[%s19813_s8 + $0x1d0] sm:$0xff]   ;;  %v8766_v61 = vshrl.u32 %v19441_v9, 16  ;;  %v8772_v58 = vrot.slane %v8770_v46, 1 }
 0x72f   : > { %18185 = vmatpush3.bf16.msra.mxu1 %v19403_v8  ;;  %18154 = vmatprep.subr.bf16.mxu0 %v19404_v63  ;;  %v19421_v8 = vld [vmem:[%s19813_s8 + $0x1f0] sm:$0xff]   ;;  %v8748_v33 = vrot.slane %v8746_v6, 1  ;;  %v15413_v62 = vcombine.low %v8943_v23, %v8944_v47  ;;  %v9048_v23 = vshrl.u32 %v22139_v22, 16 }
 0x730   : > { %18186 = vmatprep.subr.bf16.mxu1 %v19405_v24  ;;  %18108 = vmatprep.mubr.bf16.mxu0 %v7929_v48  ;;  %v8725_v45 = vsel %vm8705_vm10, %v8720_v1, %v8724_v43  ;;  %v8754_v48 = vshll.u32 %v19434_v14, 16  ;;  %v19440_v1 = vld [vmem:[%s19813_s8 + $0x188] sm:$0xff]   ;;  %v9282_v14 = vrot.slane %v22130_v31, 1 }
 0x731   : > { %18140 = vmatprep.mubr.bf16.mxu1 %v8255_v0  ;;  %v8762_v0 = vshll.u32 %v19441_v9, 16  ;;  %v8752_v38 = vor.u32 %v8750_v17, %v8748_v33  ;;  %v9023_v20 = vshll.u32 %v15413_v62, 16  ;;  %v22166_v9 = vld [vmem:[#allocation2 + $0x40] sm:$0xff]  }
 0x732   : > { %18155 = vmatpush3.bf16.msra.mxu0 %v19404_v63  ;;  %v8740_v63 = vrot.slane %v8738_v11, 1  ;;  %v19445_v11 = vld [vmem:[%s19813_s8 + $0x1c0] sm:$0xff]  }
 0x733   : > { %18187 = vmatpush3.bf16.msra.mxu1 %v19405_v24  ;;  %18156 = vmatprep.subr.bf16.mxu0 %v19407_v4  ;;  %v19428_v24 = vld [vmem:[%s19813_s8 + $0x1a0] sm:$0xff]  }
 0x734   : > { %18188 = vmatprep.subr.bf16.mxu1 %v19410_v54  ;;  %v8744_v42 = vor.u32 %v8742_v12, %v8740_v63  ;;  %v8741_v27 = vsel %vm8705_vm10, %v8736_v36, %v8740_v63  ;;  %v9038_v12 = vrot.slane %v9036_v21, 1  ;;  %v22158_v36 = vld [vmem:[#allocation2 + $0x38] sm:$0xff]  }
 0x735   : > { %18109 = vmatmul.mubr.bf16.gmra.mxu0 %v7938_v34  ;;  %v19436_v34 = vld [vmem:[%s19813_s8 + $0x190] sm:$0xff]   ;;  %v19449_v63 = vld [vmem:[%s19813_s8 + $0x238] sm:$0xff]  }
 0x736   : > { %18157 = vmatpush3.bf16.msra.mxu0 %v19407_v4  ;;  %18141 = vmatmul.mubr.bf16.gmra.mxu1 %v8264_v55  ;;  %v19429_v4 = vld [vmem:[%s19813_s8 + $0x1e0] sm:$0xff]   ;;  %v8749_v35 = vsel %vm8705_vm10, %v8744_v42, %v8748_v33  ;;  %v8764_v55 = vrot.slane %v8762_v0, 1  ;;  %v9286_v0 = vrot.slane %v22158_v36, 1 }
 0x737   : > { %18189 = vmatpush3.bf16.msra.mxu1 %v19410_v54  ;;  %18158 = vmatprep.subr.bf16.mxu0 %v19411_v26  ;;  %v8756_v54 = vrot.slane %v8754_v48, 1  ;;  %v9056_v48 = vshrl.u32 %v22158_v36, 16 }
 0x738   : > { %18190 = vmatprep.subr.bf16.mxu1 %v19412_v18  ;;  %18160 = vmatprep.mubr.bf16.mxu0 %v15348_v10  ;;  %v9257_v10 = vld [vmem:[#allocation2 + $0x18] sm:$0xe]  ;;  %v8768_v43 = vor.u32 %v8766_v61, %v8764_v55 }
 0x739   : > { %18192 = vmatprep.mubr.bf16.mxu1 %v8717_v15  ;;  %v8760_v30 = vor.u32 %v8758_v37, %v8756_v54  ;;  %v9021_v15 = vshrl.u32 %v15413_v62, 16  ;;  %v22133_v19 = vcombine.low %v9257_v10, %v8944_v47  ;;  %v9052_v47 = vshll.u32 %v22158_v36, 16  ;;  %v22182_v62 = vld [vmem:[#allocation2 + $0x48] sm:$0xff]  }
 0x73a   : > { %18159 = vmatpush3.bf16.msra.mxu0 %v19411_v26  ;;  %v19435_v26 = vld [vmem:[%s19813_s8 + $0x1d8] sm:$0xff]   ;;  %v9072_v61 = vshrl.u32 %v22182_v62, 16 }
 0x73b   : > { %18191 = vmatpush3.bf16.msra.mxu1 %v19412_v18  ;;  %18208 = vmatprep.subr.bf16.mxu0 %v19415_v7  ;;  %v8757_v18 = vsel %vm8705_vm10, %v8752_v38, %v8756_v54  ;;  %v8765_v25 = vsel %vm8705_vm10, %v8760_v30, %v8764_v55  ;;  %v9054_v37 = vrot.slane %v9052_v47, 1  ;;  %v22190_v54 = vld [vmem:[#allocation2 + $0x50] sm:$0xff]   ;;  %v19455_v30 = vld [vmem:[%s19813_s8 + $0x220] sm:$0xff]  }
 0x73c   : > { %18240 = vmatprep.subr.bf16.mxu1 %v19419_v39  ;;  %v9076_v46 = vshll.u32 %v22190_v54, 16 }
 0x73d   : > { %18161 = vmatmul.mubr.bf16.vlgmr.msra.gmra.mxu0 %v15349_v49  ;;  %v9058_v5 = vor.u32 %v9056_v48, %v9054_v37 }
 0x73e   : > { %18209 = vmatpush3.bf16.msra.mxu0 %v19415_v7  ;;  %18193 = vmatmul.mubr.bf16.vlgmr.msra.gmra.mxu1 %v8725_v45  ;;  %v15354_v7 = vcombine.low %v22043_v32, %v22061_v41  ;;  %v15355_v32 = vcombine.low %v22065_v60, %v22067_v13  ;;  %v19443_v41 = vld [vmem:[%s19813_s8 + $0x1c8] sm:$0xff]   ;;  %v9279_v45 = vrot.slane %v22133_v19, 1  ;;  %v8773_v60 = vsel %vm8705_vm10, %v8768_v43, %v8772_v58  ;;  %v19444_v13 = vld [vmem:[%s19813_s8 + $0x180] sm:$0xff]  }
 0x73f   : > { %18241 = vmatpush3.bf16.msra.mxu1 %v19419_v39  ;;  %18210 = vmatprep.subr.bf16.mxu0 %v19420_v59  ;;  %v9025_v39 = vrot.slane %v9023_v20, 1  ;;  %v9068_v20 = vshll.u32 %v22182_v62, 16  ;;  %v9078_v58 = vrot.slane %v9076_v46, 1 }
 0x740   : > { %18242 = vmatprep.subr.bf16.mxu1 %v19421_v8  ;;  %18164 = vmatprep.mubr.bf16.mxu0 %v15350_v29  ;;  %v9044_v29 = vshll.u32 %v22139_v22, 16 }
 0x741   : > { %18196 = vmatprep.mubr.bf16.mxu1 %v8733_v57  ;;  %v9026_v49 = vor.u32 %v9025_v39, %v9021_v15  ;;  %v19461_v15 = vld [vmem:[#allocation2 + $0x58] ss:$0 sps:$4 sm:$0x11]   ;;  %v9516_v36 = vrot.slane %v9068_v20, 2 }
 0x742   : > { %18211 = vmatpush3.bf16.msra.mxu0 %v19420_v59  ;;  %v9030_v59 = vrot.slane %v9028_v53, 1  ;;  %v9046_v33 = vrot.slane %v9044_v29, 1  ;;  %v19458_v39 = vld [vmem:[%s19813_s8 + $0x218] sm:$0xff]  }
 0x743   : > { %18243 = vmatpush3.bf16.msra.mxu1 %v19421_v8  ;;  %18212 = vmatprep.subr.bf16.mxu0 %v19424_v56  ;;  %v9040_v8 = vshrl.u32 %v22130_v31, 16 }
 0x744   : > { %18244 = vmatprep.subr.bf16.mxu1 %v19427_v52  ;;  %v9031_v6 = vsel %vm8705_vm10, %v9026_v49, %v9030_v59  ;;  %v9034_v57 = vor.u32 %v9032_v28, %v9030_v59  ;;  %v9080_v59 = vshrl.u32 %v22190_v54, 16 }
 0x745   : > { %18165 = vmatmul.mubr.bf16.gmra.mxu0 %v15351_v3  ;;  %v9284_v3 = vrot.slane %v22139_v22, 1  ;;  %v9499_v40 = vrot.slane %v9040_v8, 1 }
 0x746   : > { %18213 = vmatpush3.bf16.msra.mxu0 %v19424_v56  ;;  %18197 = vmatmul.mubr.bf16.gmra.mxu1 %v8741_v27  ;;  %v9281_v56 = vsel %vm9278_vm11, %v9279_v45, %v9280_v51  ;;  %v9039_v42 = vsel %vm8705_vm10, %v9034_v57, %v9038_v12  ;;  %v9283_v27 = vsel %vm9278_vm11, %v9280_v51, %v9282_v14  ;;  %v9084_v45 = vshll.u32 %v19461_v15, 16 }
 0x747   : > { %18245 = vmatpush3.bf16.msra.mxu1 %v19427_v52  ;;  %18214 = vmatprep.subr.bf16.mxu0 %v19428_v24  ;;  %v9042_v52 = vor.u32 %v9040_v8, %v9038_v12  ;;  %v9496_v57 = vrot.slane %v9028_v53, 2 }
 0x748   : > { %18246 = vmatprep.subr.bf16.mxu1 %v19429_v4  ;;  %18168 = vmatprep.mubr.bf16.mxu0 %v15352_v16  ;;  %v9285_v16 = vsel %vm9278_vm11, %v9282_v14, %v9284_v3  ;;  %v19462_v14 = vld [vmem:[%s19813_s8 + $0x208] sm:$0xff]  }
 0x749   : > { %18200 = vmatprep.mubr.bf16.mxu1 %v8749_v35  ;;  %v9047_v17 = vsel %vm8705_vm10, %v9042_v52, %v9046_v33  ;;  %v19454_v35 = vld [vmem:[%s19813_s8 + $0x228] sm:$0xff]   ;;  %v9294_v52 = vrot.slane %v19461_v15, 1 }
 0x74a   : > { %18215 = vmatpush3.bf16.msra.mxu0 %v19428_v24  ;;  %v19451_v24 = vld [vmem:[%s19813_s8 + $0x230] sm:$0xff]  }
 0x74b   : > { %18247 = vmatpush3.bf16.msra.mxu1 %v19429_v4  ;;  %18216 = vmatprep.subr.bf16.mxu0 %v19432_v50  ;;  %v9060_v4 = vshll.u32 %v22166_v9, 16 }
 0x74c   : > { %18248 = vmatprep.subr.bf16.mxu1 %v19435_v26 }
 0x74d   : > { %18169 = vmatmul.mubr.bf16.gmra.mxu0 %v15353_v2  ;;  %v9062_v38 = vrot.slane %v9060_v4, 1 }
 0x74e   : > { %18217 = vmatpush3.bf16.msra.mxu0 %v19432_v50  ;;  %18201 = vmatmul.mubr.bf16.gmra.mxu1 %v8757_v18  ;;  %v9050_v50 = vor.u32 %v9048_v23, %v9046_v33 }
 0x74f   : > { %18249 = vmatpush3.bf16.msra.mxu1 %v19435_v26  ;;  %18218 = vmatprep.subr.bf16.mxu0 %v19436_v34  ;;  %v9288_v26 = vrot.slane %v22166_v9, 1  ;;  %v9063_v55 = vsel %vm8705_vm10, %v9058_v5, %v9062_v38 }
 0x750   : > { %18250 = vmatprep.subr.bf16.mxu1 %v19437_v44  ;;  %18172 = vmatprep.mubr.bf16.mxu0 %v15354_v7  ;;  %v9055_v2 = vsel %vm8705_vm10, %v9050_v50, %v9054_v37  ;;  %v9070_v7 = vrot.slane %v9068_v20, 1  ;;  %v9507_v50 = vrot.slane %v9056_v48, 1  ;;  %v9512_v37 = vrot.slane %v9060_v4, 2 }
 0x751   : > { %18204 = vmatprep.mubr.bf16.mxu1 %v8765_v25  ;;  %v9289_v18 = vsel %vm9278_vm11, %v9286_v0, %v9288_v26  ;;  %v9290_v25 = vrot.slane %v22182_v62, 1  ;;  %v9515_v48 = vrot.slane %v9072_v61, 1 }
 0x752   : > { %18219 = vmatpush3.bf16.msra.mxu0 %v19436_v34  ;;  %v9064_v34 = vshrl.u32 %v22166_v9, 16  ;;  %v9074_v43 = vor.u32 %v9072_v61, %v9070_v7  ;;  %v9520_v9 = vrot.slane %v9076_v46, 2 }
 0x753   : > { %18251 = vmatpush3.bf16.msra.mxu1 %v19437_v44  ;;  %18220 = vmatprep.subr.bf16.mxu0 %v19440_v1  ;;  %v9287_v44 = vsel %vm9278_vm11, %v9284_v3, %v9286_v0  ;;  %v9291_v51 = vsel %vm9278_vm11, %v9288_v26, %v9290_v25  ;;  %v9519_v26 = vrot.slane %v9080_v59, 1  ;;  %v9517_v4 = vor.u32 %v9516_v36, %v9515_v48 }
 0x754   : > { %18252 = vmatprep.subr.bf16.mxu1 %v19443_v41  ;;  %v9066_v10 = vor.u32 %v9064_v34, %v9062_v38 }
 0x755   : > { %18173 = vmatmul.mubr.bf16.gmra.mxu0 %v15355_v32  ;;  %v9491_v32 = vshll.u32 %v22133_v19, 16 }
 0x756   : > { %18221 = vmatpush3.bf16.msra.mxu0 %v19440_v1  ;;  %18205 = vmatmul.mubr.bf16.gmra.mxu1 %v8773_v60  ;;  %v9488_v1 = vshrl.u32 %v22133_v19, 16  ;;  %v9071_v49 = vsel %vm8705_vm10, %v9066_v10, %v9070_v7  ;;  %v19459_v60 = vld [vmem:[%s19813_s8 + $0x210] sm:$0xff]   ;;  %v9495_v19 = vrot.slane %v9032_v28, 1  ;;  %v9500_v28 = vrot.slane %v9036_v21, 2 }
 0x757   : > { %18253 = vmatpush3.bf16.msra.mxu1 %v19443_v41  ;;  %18222 = vmatprep.subr.bf16.mxu0 %v19444_v13  ;;  %v9292_v41 = vrot.slane %v22190_v54, 1 }
 0x758   : > { %18254 = vmatprep.subr.bf16.mxu1 %v19445_v11  ;;  %18224 = vmatprep.mubr.bf16.mxu0 %v9031_v6  ;;  %v9493_v6 = vrot.slane %v9491_v32, 2  ;;  %v9497_v3 = vor.u32 %v9496_v57, %v9495_v19  ;;  %v9501_v8 = vor.u32 %v9500_v28, %v9499_v40 }
 0x759   : > { %18256 = vmatprep.mubr.bf16.mxu1 %v9281_v56  ;;  %v9293_v12 = vsel %vm9278_vm11, %v9290_v25, %v9292_v41  ;;  %v9082_v56 = vor.u32 %v9080_v59, %v9078_v58 }
 0x75a   : > { %18223 = vmatpush3.bf16.msra.mxu0 %v19444_v13  ;;  %v9490_v13 = vrot.slane %v9488_v1, 1  ;;  %v9502_v21 = vsel %vm9486_vm12, %v9497_v3, %v9501_v8 }
 0x75b   : > { %18255 = vmatpush3.bf16.msra.mxu1 %v19445_v11  ;;  %18272 = vmatprep.subr.bf16.mxu0 %v19449_v63  ;;  %v9079_v11 = vsel %vm8705_vm10, %v9074_v43, %v9078_v58 }
 0x75c   : > { %v9494_v33 = vor.u32 %v9493_v6, %v9490_v13 }
 0x75d   : > { %18225 = vmatmul.mubr.bf16.vlgmr.msra.gmra.mxu0 %v9039_v42  ;;  %v9295_v42 = vsel %vm9278_vm11, %v9292_v41, %v9294_v52 }
 0x75e   : > { %18273 = vmatpush3.bf16.msra.mxu0 %v19449_v63  ;;  %18257 = vmatmul.mubr.bf16.vlgmr.msra.gmra.mxu1 %v9283_v27  ;;  %v9086_v63 = vrot.slane %v9084_v45, 1  ;;  %v19463_v27 = vld [vmem:[%s19813_s8 + $0x200] sm:$0xff]  }
 0x75f   : > { %18274 = vmatprep.subr.bf16.mxu0 %v19451_v24  ;;  %18228 = vmatprep.mubr.bf16.mxu0 %v9047_v17  ;;  %v9504_v17 = vrot.slane %v9044_v29, 2  ;;  %v9511_v29 = vrot.slane %v9064_v34, 1 }
 0x760   : > { %18260 = vmatprep.mubr.bf16.mxu1 %v9285_v16  ;;  %v9087_v53 = vsel %vm8705_vm10, %v9082_v56, %v9086_v63  ;;  %v9498_v16 = vsel %vm9486_vm12, %v9494_v33, %v9497_v3 }
 0x761   : > { %v9513_v0 = vor.u32 %v9512_v37, %v9511_v29 }
 0x762   : > { %18275 = vmatpush3.bf16.msra.mxu0 %v19451_v24  ;;  %v9503_v24 = vrot.slane %v9048_v23, 1  ;;  %v9508_v23 = vrot.slane %v9052_v47, 2  ;;  %v19464_v47 = vld [vmem:[#allocation2 + $0x58] ss:$0 sps:$4 sm:$0x33]  }
 0x763   : > { %18276 = vmatprep.subr.bf16.mxu0 %v19454_v35  ;;  %v9527_v34 = vshll.u32 %v19464_v47, 16 }
 0x764   : > { %v9505_v31 = vor.u32 %v9504_v17, %v9503_v24 }
 0x765   : > { %18229 = vmatmul.mubr.bf16.gmra.mxu0 %v9055_v2  ;;  %v9524_v2 = vshrl.u32 %v19464_v47, 16  ;;  %v9529_v61 = vrot.slane %v9527_v34, 2 }
 0x766   : > { %18277 = vmatpush3.bf16.msra.mxu0 %v19454_v35  ;;  %18261 = vmatmul.mubr.bf16.gmra.mxu1 %v9287_v44  ;;  %v9506_v22 = vsel %vm9486_vm12, %v9501_v8, %v9505_v31  ;;  %v9509_v35 = vor.u32 %v9508_v23, %v9507_v50  ;;  %v9521_v44 = vor.u32 %v9520_v9, %v9519_v26 }
 0x767   : > { %18278 = vmatprep.subr.bf16.mxu0 %v19455_v30  ;;  %18232 = vmatprep.mubr.bf16.mxu0 %v9063_v55  ;;  %v9526_v55 = vrot.slane %v9524_v2, 1 }
 0x768   : > { %18264 = vmatprep.mubr.bf16.mxu1 %v9289_v18  ;;  %v9510_v5 = vsel %vm9486_vm12, %v9505_v31, %v9509_v35  ;;  %v9514_v38 = vsel %vm9486_vm12, %v9509_v35, %v9513_v0  ;;  %v9522_v62 = vsel %vm9486_vm12, %v9517_v4, %v9521_v44 }
 0x769   : > { %v9530_v20 = vor.u32 %v9529_v61, %v9526_v55 }
 0x76a   : > { %18279 = vmatpush3.bf16.msra.mxu0 %v19455_v30  ;;  %v9518_v30 = vsel %vm9486_vm12, %v9513_v0, %v9517_v4 }
 0x76b   : > { %18280 = vmatprep.subr.bf16.mxu0 %v19458_v39  ;;  %v9531_v18 = vsel %vm9486_vm12, %v9521_v44, %v9530_v20 }
 0x76d   : > { %18233 = vmatmul.mubr.bf16.gmra.mxu0 %v9071_v49 }
 0x76e   : > { %18281 = vmatpush3.bf16.msra.mxu0 %v19458_v39  ;;  %18265 = vmatmul.mubr.bf16.gmra.mxu1 %v9291_v51 }
 0x76f   : > { %18282 = vmatprep.subr.bf16.mxu0 %v19459_v60  ;;  %18236 = vmatprep.mubr.bf16.mxu0 %v9079_v11 }
 0x770   : > { %18268 = vmatprep.mubr.bf16.mxu1 %v9293_v12 }
 0x772   : > { %18283 = vmatpush3.bf16.msra.mxu0 %v19459_v60 }
 0x773   : > { %18284 = vmatprep.subr.bf16.mxu0 %v19462_v14 }
 0x775   : > { %18237 = vmatmul.mubr.bf16.gmra.mxu0 %v9087_v53 }
 0x776   : > { %18285 = vmatpush3.bf16.msra.mxu0 %v19462_v14  ;;  %18269 = vmatmul.mubr.bf16.gmra.mxu1 %v9295_v42 }
 0x777   : > { %18286 = vmatprep.subr.bf16.mxu0 %v19463_v27  ;;  %18288 = vmatprep.mubr.bf16.mxu0 %v9498_v16 }
 0x77a   : > { %18287 = vmatpush3.bf16.msra.mxu0 %v19463_v27 }
 0x77d   : > { %18289 = vmatmul.mubr.bf16.vlgmr.msra.gmra.mxu0 %v9502_v21 }
 0x77e   : > { %18292 = vmatprep.mubr.bf16.mxu0 %v9506_v22 }
 0x785   : > { %18293 = vmatmul.mubr.bf16.gmra.mxu0 %v9510_v5 }
 0x786   : > { %18296 = vmatprep.mubr.bf16.mxu0 %v9514_v38 }
 0x78d   : > { %18297 = vmatmul.mubr.bf16.gmra.mxu0 %v9518_v30 }
 0x78e   : > { %18300 = vmatprep.mubr.bf16.mxu0 %v9522_v62 }
 0x795   : > { %18301 = vmatmul.mubr.bf16.gmra.mxu0 %v9531_v18 }
 0x7bd   : > { %v18034_v54 = vpop.f32.mrf.mxu0 }
 0x7be   : > { %v18066_v46 = vpop.f32.mrf.mxu1 }
 0x7bf   : > { %v7818_v10 = vadd.f32 %v18066_v46, %v18034_v54  ;;  %v7572_v7 = vpop.f32.mrf.mxu0 }
 0x7c0   : > { %v7809_v15 = vpop.f32.mrf.mxu1 }
 0x7c1   : > { %v7810_v39 = vadd.f32 %v7809_v15, %v7572_v7  ;;  %v18035_v25 = vpop.f32.mrf.mxu0 }
 0x7c2   : > { %v18067_v1 = vpop.f32.mrf.mxu1 }
 0x7c3   : > { %v7821_v43 = vadd.f32 %v18067_v1, %v18035_v25  ;;  %v7575_v58 = vpop.f32.mrf.mxu0 }
 0x7c4   : > { %v7812_v32 = vpop.f32.mrf.mxu1 }
 0x7c5   : > { %v7813_v41 = vadd.f32 %v7812_v32, %v7575_v58  ;;  %v18038_v49 = vpop.f32.mrf.mxu0 }
 0x7c6   : > { %v18070_v59 = vpop.f32.mrf.mxu1 }
 0x7c7   : > { %v7834_v45 = vadd.f32 %v18070_v59, %v18038_v49  ;;  %v7588_v51 = vpop.f32.mrf.mxu0 }
 0x7c8   : > { %v7825_v60 = vpop.f32.mrf.mxu1 }
 0x7c9   : > { %v7826_v13 = vadd.f32 %v7825_v60, %v7588_v51  ;;  %v18039_v11 = vpop.f32.mrf.mxu0 }
 0x7ca   : > { %v18071_v6 = vpop.f32.mrf.mxu1 }
 0x7cb   : > { %v7837_v19 = vadd.f32 %v18071_v6, %v18039_v11  ;;  %v7591_v57 = vpop.f32.mrf.mxu0 }
 0x7cc   : > { %v7828_v12 = vpop.f32.mrf.mxu1 }
 0x7cd   : > { %v7829_v56 = vadd.f32 %v7828_v12, %v7591_v57  ;;  %v18042_v63 = vpop.f32.mrf.mxu0 }
 0x7ce   : > { %v18074_v14 = vpop.f32.mrf.mxu1 }
 0x7cf   : > { %v7850_v52 = vadd.f32 %v18074_v14, %v18042_v63  ;;  %v7604_v33 = vpop.f32.mrf.mxu0 }
 0x7d0   : > { %v7841_v3 = vpop.f32.mrf.mxu1 }
 0x7d1   : > { %v7842_v40 = vadd.f32 %v7841_v3, %v7604_v33  ;;  %v18043_v53 = vpop.f32.mrf.mxu0 }
 0x7d2   : > { %v18075_v28 = vpop.f32.mrf.mxu1 }
 0x7d3   : > { %v7853_v42 = vadd.f32 %v18075_v28, %v18043_v53  ;;  %v7607_v27 = vpop.f32.mrf.mxu0 }
 0x7d4   : > { %v7844_v24 = vpop.f32.mrf.mxu1 }
 0x7d5   : > { %v7845_v17 = vadd.f32 %v7844_v24, %v7607_v27  ;;  %v18046_v16 = vpop.f32.mrf.mxu0 }
 0x7d6   : > { %v18078_v8 = vpop.f32.mrf.mxu1 }
 0x7d7   : > { %v7866_v31 = vadd.f32 %v18078_v8, %v18046_v16  ;;  %v7620_v21 = vpop.f32.mrf.mxu0 }
 0x7d8   : > { %v7857_v50 = vpop.f32.mrf.mxu1 }
 0x7d9   : > { %v7858_v23 = vadd.f32 %v7857_v50, %v7620_v21  ;;  %v18047_v22 = vpop.f32.mrf.mxu0 }
 0x7da   : > { %v18079_v29 = vpop.f32.mrf.mxu1 }
 0x7db   : > { %v7869_v37 = vadd.f32 %v18079_v29, %v18047_v22  ;;  %v7623_v35 = vpop.f32.mrf.mxu0 }
 0x7dc   : > { %v7860_v0 = vpop.f32.mrf.mxu1 }
 0x7dd   : > { %v7861_v5 = vadd.f32 %v7860_v0, %v7623_v35  ;;  %v18098_v48 = vpop.f32.mrf.mxu0 }
 0x7de   : > { %v8094_v36 = vadd.f32 %v18098_v48, %v7818_v10  ;;  %v18130_v47 = vpop.f32.mrf.mxu1 }
 0x7df   : > { %v8029_v38 = vpop.f32.mrf.mxu0 }
 0x7e0   : > { %v8092_v26 = vadd.f32 %v8029_v38, %v7810_v39  ;;  %v8420_v9 = vadd.f32 %v18130_v47, %v8094_v36  ;;  %v8355_v4 = vpop.f32.mrf.mxu1 }
 0x7e1   : > { %v18099_v2 = vpop.f32.mrf.mxu0 }
 0x7e2   : > { %v8095_v34 = vadd.f32 %v18099_v2, %v7821_v43  ;;  %v8418_v44 = vadd.f32 %v8355_v4, %v8092_v26  ;;  %v18131_v30 = vpop.f32.mrf.mxu1 }
 0x7e3   : > { %v8032_v55 = vpop.f32.mrf.mxu0 }
 0x7e4   : > { %v8093_v61 = vadd.f32 %v8032_v55, %v7813_v41  ;;  %v8421_v62 = vadd.f32 %v18131_v30, %v8095_v34  ;;  %v8358_v20 = vpop.f32.mrf.mxu1 }
 0x7e5   : > { %v18102_v18 = vpop.f32.mrf.mxu0 }
 0x7e6   : > { %v8098_v54 = vadd.f32 %v18102_v18, %v7834_v45  ;;  %v8419_v46 = vadd.f32 %v8358_v20, %v8093_v61  ;;  %v18134_v7 = vpop.f32.mrf.mxu1 }
 0x7e7   : > { %v8045_v15 = vpop.f32.mrf.mxu0 }
 0x7e8   : > { %v8096_v25 = vadd.f32 %v8045_v15, %v7826_v13  ;;  %v8424_v10 = vadd.f32 %v18134_v7, %v8098_v54  ;;  %v8371_v1 = vpop.f32.mrf.mxu1 }
 0x7e9   : > { %v18103_v58 = vpop.f32.mrf.mxu0 }
 0x7ea   : > { %v8099_v39 = vadd.f32 %v18103_v58, %v7837_v19  ;;  %v8422_v32 = vadd.f32 %v8371_v1, %v8096_v25  ;;  %v18135_v49 = vpop.f32.mrf.mxu1 }
 0x7eb   : > { %v8048_v59 = vpop.f32.mrf.mxu0 }
 0x7ec   : > { %v8097_v43 = vadd.f32 %v8048_v59, %v7829_v56  ;;  %v8425_v51 = vadd.f32 %v18135_v49, %v8099_v39  ;;  %v8374_v60 = vpop.f32.mrf.mxu1 }
 0x7ed   : > { %v18106_v11 = vpop.f32.mrf.mxu0 }
 0x7ee   : > { %v8102_v41 = vadd.f32 %v18106_v11, %v7850_v52  ;;  %v8423_v6 = vadd.f32 %v8374_v60, %v8097_v43  ;;  %v18138_v57 = vpop.f32.mrf.mxu1 }
 0x7ef   : > { %v8061_v12 = vpop.f32.mrf.mxu0 }
 0x7f0   : > { %v8100_v45 = vadd.f32 %v8061_v12, %v7842_v40  ;;  %v8428_v63 = vadd.f32 %v18138_v57, %v8102_v41  ;;  %v8387_v14 = vpop.f32.mrf.mxu1 }
 0x7f1   : > { %v18107_v33 = vpop.f32.mrf.mxu0 }
 0x7f2   : > { %v8103_v13 = vadd.f32 %v18107_v33, %v7853_v42  ;;  %v8426_v3 = vadd.f32 %v8387_v14, %v8100_v45  ;;  %v18139_v53 = vpop.f32.mrf.mxu1 }
 0x7f3   : > { %v8064_v28 = vpop.f32.mrf.mxu0 }
 0x7f4   : > { %v8101_v19 = vadd.f32 %v8064_v28, %v7845_v17  ;;  %v8429_v27 = vadd.f32 %v18139_v53, %v8103_v13  ;;  %v8390_v24 = vpop.f32.mrf.mxu1 }
 0x7f5   : > { %v18110_v16 = vpop.f32.mrf.mxu0 }
 0x7f6   : > { %v22259_v56 = vadd.f32 %v18110_v16, %v7866_v31  ;;  %v8427_v8 = vadd.f32 %v8390_v24, %v8101_v19  ;;  %v22261_v21 = vpop.f32.mrf.mxu1 }
 0x7f7   : > { %v8077_v52 = vpop.f32.mrf.mxu0 }
 0x7f8   : > { %v22263_v50 = vadd.f32 %v8077_v52, %v7858_v23  ;;  %v22265_v40 = vpop.f32.mrf.mxu1 }
 0x7f9   : > { %v18111_v22 = vpop.f32.mrf.mxu0 }
 0x7fa   : > { %v22267_v29 = vadd.f32 %v18111_v22, %v7869_v37  ;;  %v22269_v42 = vpop.f32.mrf.mxu1 }
 0x7fb   : > { %v8080_v35 = vpop.f32.mrf.mxu0 }
 0x7fc   : > { %v22271_v17 = vadd.f32 %v8080_v35, %v7861_v5  ;;  %v22273_v0 = vpop.f32.mrf.mxu1 }
 0x7fd   : > { %23928 = vst [vmem:[#allocation17_spill] sm:$0xff] %v22273_v0  ;;  %v18162_v31 = vpop.f32.mrf.mxu0 }
 0x7fe   : > { %23927 = vst [vmem:[#allocation16_spill] sm:$0xff] %v22271_v17  ;;  %v22275_v48 = vadd.f32 %v18162_v31, %v8420_v9  ;;  %v22277_v36 = vpop.f32.mrf.mxu1 }
 0x7ff   : > { %v8549_v47 = vpop.f32.mrf.mxu0 }
 0x800   : > { %v22279_v23 = vadd.f32 %v8549_v47, %v8418_v44  ;;  %v22281_v38 = vpop.f32.mrf.mxu1 }
 0x801   : > { %v18163_v26 = vpop.f32.mrf.mxu0 }
 0x802   : > { %v22283_v37 = vadd.f32 %v18163_v26, %v8421_v62  ;;  %v22285_v4 = vpop.f32.mrf.mxu1 }
 0x803   : > { %v8552_v2 = vpop.f32.mrf.mxu0 }
 0x804   : > { %v22287_v5 = vadd.f32 %v8552_v2, %v8419_v46  ;;  %v22289_v34 = vpop.f32.mrf.mxu1 }
 0x805   : > { %v18166_v30 = vpop.f32.mrf.mxu0 }
 0x806   : > { %v22291_v9 = vadd.f32 %v18166_v30, %v8424_v10  ;;  %v22293_v55 = vpop.f32.mrf.mxu1  ;;  %v9702_v30 = vlaneseq }
 0x807   : > { %v8565_v61 = vpop.f32.mrf.mxu0 }
 0x808   : > { %v22295_v44 = vadd.f32 %v8565_v61, %v8422_v32  ;;  %v22297_v20 = vpop.f32.mrf.mxu1 }
 0x809   : > { %v18167_v18 = vpop.f32.mrf.mxu0 }
 0x80a   : > { %v22299_v62 = vadd.f32 %v18167_v18, %v8425_v51  ;;  %v22301_v54 = vpop.f32.mrf.mxu1 }
 0x80b   : > { %v8568_v7 = vpop.f32.mrf.mxu0 }
 0x80c   : > { %v22303_v46 = vadd.f32 %v8568_v7, %v8423_v6  ;;  %v22305_v15 = vpop.f32.mrf.mxu1 }
 0x80d   : > { %v18170_v25 = vpop.f32.mrf.mxu0 }
 0x80e   : > { %v22307_v10 = vadd.f32 %v18170_v25, %v8428_v63  ;;  %v22309_v1 = vpop.f32.mrf.mxu1  ;;  %v9703_v25 = vshrl.u32 %v9702_v30, 7 }
 0x80f   : > { %v8581_v58 = vpop.f32.mrf.mxu0 }
 0x810   : > { %v22311_v39 = vadd.f32 %v8581_v58, %v8426_v3  ;;  %v22313_v32 = vpop.f32.mrf.mxu1 }
 0x811   : > { %v18171_v49 = vpop.f32.mrf.mxu0 }
 0x812   : > { %v22315_v59 = vadd.f32 %v18171_v49, %v8429_v27  ;;  %v22317_v43 = vpop.f32.mrf.mxu1  ;;  %v8929_v49 = vadd.f32 %v22277_v36, %v22275_v48  ;;  %v8928_v48 = vadd.f32 %v22289_v34, %v22287_v5 }
 0x813   : > { %v8584_v51 = vpop.f32.mrf.mxu0 }
 0x814   : > { %v22319_v60 = vadd.f32 %v8584_v51, %v8427_v8  ;;  %v22321_v11 = vpop.f32.mrf.mxu1 }
 0x815   : > { %v22323_v41 = vpop.f32.mrf.mxu0 }
 0x816   : > { %v22325_v6 = vpop.f32.mrf.mxu1 }
 0x817   : > { %23929 = vst [vmem:[#allocation18_spill] sm:$0xff] %v22325_v6  ;;  %v22327_v57 = vpop.f32.mrf.mxu0  ;;  %v8930_v6 = vadd.f32 %v22285_v4, %v22283_v37  ;;  %v8931_v37 = vadd.f32 %v22297_v20, %v22295_v44  ;;  %v8932_v20 = vadd.f32 %v22305_v15, %v22303_v46 }
 0x818   : > { %v22329_v12 = vpop.f32.mrf.mxu1 }
 0x819   : > { %23930 = vst [vmem:[#allocation19_spill] sm:$0xff] %v22329_v12  ;;  %v22331_v45 = vpop.f32.mrf.mxu0  ;;  %v9704_v12 = vsub.s32 0, %v9703_v25 }
 0x81a   : > { %23931 = vst [vmem:[#allocation20_spill] sm:$0xff] %v22331_v45  ;;  %v22333_v63 = vpop.f32.mrf.mxu1 }
 0x81b   : > { %23932 = vst [vmem:[#allocation21_spill] sm:$0xff] %v22333_v63  ;;  %v22335_v14 = vpop.f32.mrf.mxu0  ;;  %v8927_v63 = vadd.f32 %v22281_v38, %v22279_v23  ;;  %v8933_v23 = vadd.f32 %v22293_v55, %v22291_v9 }
 0x81c   : > { %23933 = vst [vmem:[#allocation22_spill] sm:$0xff] %v22335_v14  ;;  %v22337_v33 = vpop.f32.mrf.mxu1 }
 0x81d   : > { %23934 = vst [vmem:[#allocation23_spill] sm:$0xff] %v22337_v33  ;;  %v18226_v13 = vpop.f32.mrf.mxu0 }
 0x81e   : > { %v18258_v3 = vpop.f32.mrf.mxu1  ;;  %v9243_v14 = vadd.f32 %v18226_v13, %v8929_v49 }
 0x81f   : > { %v9178_v53 = vpop.f32.mrf.mxu0 }
 0x820   : > { %v9386_v28 = vpop.f32.mrf.mxu1  ;;  %v9451_v36 = vadd.f32 %v18258_v3, %v9243_v14 }
 0x821   : > { %v18227_v19 = vpop.f32.mrf.mxu0 }
 0x822   : > { %v18259_v24 = vpop.f32.mrf.mxu1 }
 0x823   : > { %v9181_v27 = vpop.f32.mrf.mxu0 }
 0x824   : > { %v9389_v8 = vpop.f32.mrf.mxu1  ;;  %v9242_v25 = vadd.f32 %v9181_v27, %v8928_v48 }
 0x825   : > { %v18230_v16 = vpop.f32.mrf.mxu0 }
 0x826   : > { %v18262_v35 = vpop.f32.mrf.mxu1  ;;  %v9247_v4 = vadd.f32 %v18230_v16, %v8933_v23  ;;  %v9450_v55 = vadd.f32 %v9389_v8, %v9242_v25  ;;  %v8937_v16 = vadd.f32 %v22309_v1, %v22307_v10  ;;  %v8433_v25 = vadd.f32 %v22269_v42, %v22267_v29  ;;  %v23942_v29 = vld [vmem:[#allocation18_spill] sm:$0xff] }
 0x827   : > { %v9194_v52 = vpop.f32.mrf.mxu0 }
 0x828   : > { %v9402_v26 = vpop.f32.mrf.mxu1  ;;  %v9455_v3 = vadd.f32 %v18262_v35, %v9247_v4  ;;  %v8935_v35 = vadd.f32 %v22313_v32, %v22311_v39  ;;  %v23940_v4 = vld [vmem:[#allocation16_spill] sm:$0xff] }
 0x829   : > { %v18231_v22 = vpop.f32.mrf.mxu0 }
 0x82a   : > { %v18263_v18 = vpop.f32.mrf.mxu1 }
 0x82b   : > { %v9197_v31 = vpop.f32.mrf.mxu0 }
 0x82c   : > { %v9405_v51 = vpop.f32.mrf.mxu1 }
 0x82d   : > { %v18234_v47 = vpop.f32.mrf.mxu0 }
 0x82e   : > { %v18266_v30 = vpop.f32.mrf.mxu1 }
 0x82f   : > { %v22339_v2 = vpop.f32.mrf.mxu0 }
 0x831   : > { %v22341_v61 = vpop.f32.mrf.mxu0 }
 0x833   : > { %v22343_v7 = vpop.f32.mrf.mxu0 }
 0x834   : > { %23935 = vst [vmem:[#allocation24_spill] sm:$0xff] %v22343_v7  ;;  %v9241_v7 = vadd.f32 %v9178_v53, %v8927_v63  ;;  %v9418_v63 = vpop.f32.mrf.mxu1 }
 0x835   : > { %v22345_v58 = vpop.f32.mrf.mxu0 }
 0x836   : > { %23936 = vst [vmem:[#allocation25_spill] sm:$0xff] %v22345_v58  ;;  %v9244_v58 = vadd.f32 %v18227_v19, %v8930_v6  ;;  %v9449_v13 = vadd.f32 %v9386_v28, %v9241_v7  ;;  %v8934_v6 = vadd.f32 %v22301_v54, %v22299_v62  ;;  %v18267_v28 = vpop.f32.mrf.mxu1  ;;  %v9246_v7 = vadd.f32 %v9197_v31, %v8932_v20 }
 0x837   : > { %v22349_v33 = vpop.f32.mrf.mxu0 }
 0x838   : > { %23937 = vst [vmem:[#allocation26_spill] sm:$0xff] %v22349_v33  ;;  %v23939_v33 = vld [vmem:[#allocation3_spill] sm:$0xff]  ;;  %v9248_v27 = vadd.f32 %v18231_v22, %v8934_v6  ;;  %v8432_v22 = vadd.f32 %v22261_v21, %v22259_v56  ;;  %v9421_v48 = vpop.f32.mrf.mxu1  ;;  %v9249_v21 = vadd.f32 %v22339_v2, %v8935_v35  ;;  %v9454_v32 = vadd.f32 %v9405_v51, %v9246_v7  ;;  %v23943_v6 = vld [vmem:[#allocation20_spill] sm:$0xff] }
 0x839   : > { %v22353_v45 = vpop.f32.mrf.mxu0  ;;  %v22362_v17 = vrot.slane %v23939_v33, %v9704_v12  ;;  %v9245_v12 = vadd.f32 %v9194_v52, %v8931_v37 }
 0x83a   : > { %v9456_v23 = vadd.f32 %v18263_v18, %v9248_v27  ;;  %v8626_v56 = vadd.f32 %v22323_v41, %v8432_v22  ;;  %v23948_v22 = vld [vmem:[#allocation21_spill] sm:$0xff] }
 0x83b   : > { %v22357_v0 = vpop.f32.mrf.mxu0  ;;  %v9453_v8 = vadd.f32 %v9402_v26, %v9245_v12  ;;  %v8430_v26 = vadd.f32 %v22265_v40, %v22263_v50  ;;  %v8936_v50 = vadd.f32 %v22321_v11, %v22319_v60  ;;  %v8627_v60 = vadd.f32 %v23943_v6, %v8433_v25 }
 0x83c   : > { %23938 = vst [vmem:[#allocation27_spill] sm:$0xff] %v22357_v0  ;;  %v9452_v0 = vadd.f32 %v18259_v24, %v9244_v58  ;;  %v9251_v58 = vadd.f32 %v18234_v47, %v8937_v16  ;;  %v8941_v42 = vadd.f32 %v23942_v29, %v8626_v56  ;;  %v9457_v11 = vadd.f32 %v9418_v63, %v9249_v21  ;;  %v23950_v21 = vld [vmem:[#allocation23_spill] sm:$0xff] }
 0x83d   : > { %v18290_v38 = vpop.f32.mrf.mxu0  ;;  %v8624_v40 = vadd.f32 %v22327_v57, %v8430_v26  ;;  %v23947_v27 = vld [vmem:[#allocation25_spill] sm:$0xff]  ;;  %v8942_v35 = vadd.f32 %v23948_v22, %v8627_v60 }
 0x83e   : > { %v9687_v49 = vadd.f32 %v18290_v38, %v9451_v36  ;;  %v8938_v38 = vadd.f32 %v22317_v43, %v22315_v59  ;;  %v9459_v59 = vadd.f32 %v18266_v30, %v9251_v58  ;;  %v18270_v43 = vpop.f32.mrf.mxu1  ;;  %v23944_v30 = vld [vmem:[#allocation24_spill] sm:$0xff] }
 0x83f   : > { %v9622_v53 = vpop.f32.mrf.mxu0  ;;  %v9250_v12 = vadd.f32 %v23944_v30, %v8936_v50  ;;  %v23949_v58 = vld [vmem:[#allocation26_spill] sm:$0xff]  ;;  %v9256_v25 = vadd.f32 %v22353_v45, %v8942_v35 }
 0x840   : > { %v22369_v5 = vadd.f32 %v22362_v17, %v9687_v49  ;;  %v9685_v34 = vadd.f32 %v9622_v53, %v9449_v13  ;;  %v9252_v2 = vadd.f32 %v22341_v61, %v8938_v38  ;;  %v23941_v53 = vld [vmem:[#allocation17_spill] sm:$0xff]  ;;  %v9434_v16 = vpop.f32.mrf.mxu1 }
 0x841   : > { %v18291_v9 = vpop.f32.mrf.mxu0 }
 0x842   : > { %v9725_v14 = vmax.f32 %v22369_v5, 0.0  ;;  %v22375_v33 = vadd.f32 %v22362_v17, %v9685_v34  ;;  %v9688_v44 = vadd.f32 %v18291_v9, %v9452_v0  ;;  %v8431_v34 = vadd.f32 %v23941_v53, %v23940_v4 }
 0x843   : > { %v9625_v19 = vpop.f32.mrf.mxu0 }
 0x844   : > { %v9723_v24 = vmax.f32 %v22375_v33, 0.0  ;;  %v22381_v62 = vadd.f32 %v22362_v17, %v9688_v44  ;;  %v9686_v54 = vadd.f32 %v9625_v19, %v9450_v55  ;;  %v23945_v44 = vld [vmem:[#allocation19_spill] sm:$0xff] }
 0x845   : > { %v18294_v52 = vpop.f32.mrf.mxu0  ;;  %v8939_v20 = vadd.f32 %v23945_v44, %v8624_v40 }
 0x846   : > { %v9726_v0 = vmax.f32 %v22381_v62, 0.0  ;;  %v22387_v46 = vadd.f32 %v22362_v17, %v9686_v54  ;;  %v9691_v15 = vadd.f32 %v18294_v52, %v9455_v3  ;;  %v23946_v3 = vld [vmem:[#allocation22_spill] sm:$0xff]  ;;  %v9255_v54 = vadd.f32 %v23947_v27, %v8941_v42 }
 0x847   : > { %v9638_v36 = vpop.f32.mrf.mxu0  ;;  %v8625_v19 = vadd.f32 %v23946_v3, %v8431_v34  ;;  %v9460_v52 = vadd.f32 %v18267_v28, %v9252_v2  ;;  %v23951_v2 = vld [vmem:[#allocation27_spill] sm:$0xff] }
 0x848   : > { %v9724_v10 = vmax.f32 %v22387_v46, 0.0  ;;  %v22395_v1 = vadd.f32 %v22362_v17, %v9691_v15  ;;  %v9689_v31 = vadd.f32 %v9638_v36, %v9453_v8  ;;  %v9253_v36 = vadd.f32 %v23949_v58, %v8939_v20 }
 0x849   : > { %v18295_v39 = vpop.f32.mrf.mxu0  ;;  %v8940_v28 = vadd.f32 %v23950_v21, %v8625_v19 }
 0x84a   : > { %v9729_v47 = vmax.f32 %v22395_v1, 0.0  ;;  %v22405_v18 = vadd.f32 %v22362_v17, %v9689_v31  ;;  %v9692_v13 = vadd.f32 %v18295_v39, %v9456_v23  ;;  %v9458_v31 = vadd.f32 %v9421_v48, %v9250_v12 }
 0x84b   : > { %v9641_v41 = vpop.f32.mrf.mxu0  ;;  %v9463_v39 = vadd.f32 %v18270_v43, %v9255_v54  ;;  %v9461_v48 = vadd.f32 %v9434_v16, %v9253_v36 }
 0x84c   : > { %v9727_v51 = vmax.f32 %v22405_v18, 0.0  ;;  %v22415_v49 = vadd.f32 %v22362_v17, %v9692_v13  ;;  %v9690_v37 = vadd.f32 %v9641_v41, %v9454_v32  ;;  %v18271_v32 = vpop.f32.mrf.mxu1 }
 0x84d   : > { %v18298_v57 = vpop.f32.mrf.mxu0  ;;  %v9464_v42 = vadd.f32 %v18271_v32, %v9256_v25 }
 0x84e   : > { %v9730_v9 = vmax.f32 %v22415_v49, 0.0  ;;  %v22424_v61 = vadd.f32 %v22362_v17, %v9690_v37  ;;  %v9695_v55 = vadd.f32 %v18298_v57, %v9459_v59  ;;  %v9254_v37 = vadd.f32 %v23951_v2, %v8940_v28  ;;  %v9437_v34 = vpop.f32.mrf.mxu1 }
 0x84f   : > { %v9654_v8 = vpop.f32.mrf.mxu0 }
 0x850   : > { %v9728_v63 = vmax.f32 %v22424_v61, 0.0  ;;  %v22431_v7 = vadd.f32 %v22362_v17, %v9695_v55  ;;  %v9693_v15 = vadd.f32 %v9654_v8, %v9457_v11  ;;  %v9462_v57 = vadd.f32 %v9437_v34, %v9254_v37 }
 0x851   : > { %v18299_v23 = vpop.f32.mrf.mxu0 }
 0x852   : > { %v9733_v26 = vmax.f32 %v22431_v7, 0.0  ;;  %v22437_v38 = vadd.f32 %v22362_v17, %v9693_v15  ;;  %v9696_v56 = vadd.f32 %v18299_v23, %v9460_v52 }
 0x853   : > { %v9657_v13 = vpop.f32.mrf.mxu0 }
 0x854   : > { %v9731_v50 = vmax.f32 %v22437_v38, 0.0  ;;  %v22443_v40 = vadd.f32 %v22362_v17, %v9696_v56  ;;  %v9694_v59 = vadd.f32 %v9657_v13, %v9458_v31 }
 0x855   : > { %v18302_v41 = vpop.f32.mrf.mxu0 }
 0x856   : > { %v9734_v4 = vmax.f32 %v22443_v40, 0.0  ;;  %v22448_v53 = vadd.f32 %v22362_v17, %v9694_v59  ;;  %v9699_v43 = vadd.f32 %v18302_v41, %v9463_v39 }
 0x857   : > { %v9670_v29 = vpop.f32.mrf.mxu0 }
 0x858   : > { %v9732_v45 = vmax.f32 %v22448_v53, 0.0  ;;  %v22452_v6 = vadd.f32 %v22362_v17, %v9699_v43  ;;  %v9697_v60 = vadd.f32 %v9670_v29, %v9461_v48 }
 0x859   : > { %v18303_v11 = vpop.f32.mrf.mxu0 }
 0x85a   : > { %v9737_v30 = vmax.f32 %v22452_v6, 0.0  ;;  %v22456_v12 = vadd.f32 %v22362_v17, %v9697_v60  ;;  %v9700_v55 = vadd.f32 %v18303_v11, %v9464_v42 }
 0x85b   : > { %v9673_v44 = vpop.f32.mrf.mxu0 }
 0x85c   : > { %v9735_v20 = vmax.f32 %v22456_v12, 0.0  ;;  %v22460_v3 = vadd.f32 %v22362_v17, %v9700_v55  ;;  %v9698_v19 = vadd.f32 %v9673_v44, %v9462_v57  ;;  %9741 = sbr.rel (%p15480_p0) target bundleno = 2153 (0x869), region = 76 }
 0x85e   : > { %v9738_v27 = vmax.f32 %v22460_v3, 0.0  ;;  %v22464_v54 = vadd.f32 %v22362_v17, %v9698_v19 }
 0x860   : > { %v9736_v16 = vmax.f32 %v22464_v54, 0.0 }
 0x861   : > { %9742 = vst [vmem:[%s19818_s11] sm:$0xff] %v9723_v24  ;;  %9743 = vst [vmem:[%s19818_s11 + $0x8] sm:$0xff] %v9724_v10 }
 0x862   : > { %9744 = vst [vmem:[%s19818_s11 + $0x10] sm:$0xff] %v9725_v14  ;;  %9745 = vst [vmem:[%s19818_s11 + $0x18] sm:$0xff] %v9726_v0 }
 0x863   : > { %9746 = vst [vmem:[%s19818_s11 + $0x20] sm:$0xff] %v9727_v51  ;;  %9747 = vst [vmem:[%s19818_s11 + $0x28] sm:$0xff] %v9728_v63 }
 0x864   : > { %9748 = vst [vmem:[%s19818_s11 + $0x30] sm:$0xff] %v9729_v47  ;;  %9749 = vst [vmem:[%s19818_s11 + $0x38] sm:$0xff] %v9730_v9 }
 0x865   : > { %9750 = vst [vmem:[%s19818_s11 + $0x40] sm:$0xff] %v9731_v50  ;;  %9751 = vst [vmem:[%s19818_s11 + $0x48] sm:$0xff] %v9732_v45 }
 0x866   : > { %9752 = vst [vmem:[%s19818_s11 + $0x50] sm:$0xff] %v9733_v26  ;;  %9753 = vst [vmem:[%s19818_s11 + $0x58] sm:$0xff] %v9734_v4 }
 0x867   : > { %9754 = vst [vmem:[%s19818_s11 + $0x60] sm:$0xff] %v9735_v20  ;;  %9755 = vst [vmem:[%s19818_s11 + $0x68] sm:$0xff] %v9736_v16 }
 0x868   : > { %9756 = vst [vmem:[%s19818_s11 + $0x70] sm:$0xff] %v9737_v30  ;;  %9757 = vst [vmem:[%s19818_s11 + $0x78] sm:$0xff] %v9738_v27 }
 0x869 PF: > { %p15481_p1 = scmp.eq.s32.totalorder %s19710_s15, 1 }
 0x86b   : > { %9761 = sbr.rel (%p15481_p1) target bundleno = 2319 (0x90f), region = 80 }
 0x870   : > { %v9764_v8 = vld [vmem:[%s23877_s3 + $0x10] sm:$0xff]  ;;  %v9762_v52 = vld [vmem:[%s23877_s3] sm:$0xff]  ;;  %v19734_v15 = vmov 0   ;;  %v9765_v22 = vld [vmem:[%s23877_s3 + $0x18] sm:$0xff] }
 0x871   : > { %19466 = vset.pattern.permute.xlu1 %v19734_v15  ;;  %19465 = vset.pattern.permute.xlu0 %v19734_v15  ;;  %v9763_v35 = vld [vmem:[%s23877_s3 + $0x8] sm:$0xff]  ;;  %v9766_v36 = vld [vmem:[%s23877_s3 + $0x20] sm:$0xff]  ;;  %v9769_v23 = vld [vmem:[%s23877_s3 + $0x38] sm:$0xff] }
 0x872   : > { %9790 = vperm.xlu1 %19466, %v9764_v8   ;;  %9780 = vperm.xlu0 %19465, %v9762_v52   ;;  %v9767_v58 = vld [vmem:[%s23877_s3 + $0x28] sm:$0xff]  ;;  %v9768_v31 = vld [vmem:[%s23877_s3 + $0x30] sm:$0xff]  ;;  %v9770_v21 = vld [vmem:[%s23877_s3 + $0x40] sm:$0xff] }
 0x873   : > { %v9771_v56 = vld [vmem:[%s23877_s3 + $0x48] sm:$0xff]  ;;  %v9773_v28 = vld [vmem:[%s23877_s3 + $0x58] sm:$0xff]  ;;  %v9772_v39 = vld [vmem:[%s23877_s3 + $0x50] sm:$0xff] }
 0x874   : > { %v9775_v32 = vld [vmem:[%s23877_s3 + $0x68] sm:$0xff]  ;;  %v9774_v13 = vld [vmem:[%s23877_s3 + $0x60] sm:$0xff]  ;;  %v9777_v25 = vld [vmem:[%s23877_s3 + $0x78] sm:$0xff] }
 0x875   : > { %v9776_v59 = vld [vmem:[%s23877_s3 + $0x70] sm:$0xff] }
 0x876   : > { %9795 = vperm.xlu1 %19466, %v9765_v22   ;;  %9785 = vperm.xlu0 %19465, %v9763_v35  }
 0x87a   : > { %9805 = vperm.xlu1 %19466, %v9767_v58   ;;  %9800 = vperm.xlu0 %19465, %v9766_v36  }
 0x87e   : > { %9815 = vperm.xlu1 %19466, %v9769_v23   ;;  %9810 = vperm.xlu0 %19465, %v9768_v31  }
 0x882   : > { %9825 = vperm.xlu1 %19466, %v9771_v56   ;;  %9820 = vperm.xlu0 %19465, %v9770_v21  }
 0x886   : > { %9835 = vperm.xlu1 %19466, %v9773_v28   ;;  %9830 = vperm.xlu0 %19465, %v9772_v39  }
 0x88a   : > { %9845 = vperm.xlu1 %19466, %v9775_v32   ;;  %9840 = vperm.xlu0 %19465, %v9774_v13  }
 0x88e   : > { %9855 = vperm.xlu1 %19466, %v9777_v25   ;;  %9850 = vperm.xlu0 %19465, %v9776_v59  }
 0x8ed   : > { %v9791_v48 = vpop.permute.xlu1 %9790  ;;  %v9781_v41 = vpop.permute.xlu0 %9780 }
 0x8ee   : > { %v9858_v2 = vmul.f32 %v9781_v41, %v9723_v24  ;;  %v9860_v29 = vmul.f32 %v9791_v48, %v9725_v14 }
 0x8f0   : > { %v16043_v37 = vpack.c.bf16 %v9858_v2, %v9858_v2 }
 0x8f1   : > { %v9796_v43 = vpop.permute.xlu1 %9795  ;;  %v9786_v34 = vpop.permute.xlu0 %9785 }
 0x8f2   : > { %9939 = vst [vmem:[#allocation2 + $0xd4] sm:$0xf] %v16043_v37  ;;  %v9859_v42 = vmul.f32 %v9786_v34, %v9724_v10  ;;  %v9861_v55 = vmul.f32 %v9796_v43, %v9726_v0 }
 0x8f4   : > { %v16187_v60 = vpack.c.bf16 %v9860_v29, %v9859_v42 }
 0x8f5   : > { %v9806_v11 = vpop.permute.xlu1 %9805  ;;  %v9801_v57 = vpop.permute.xlu0 %9800 }
 0x8f6   : > { %16289 = vst [vmem:[#allocation2 + $0xd8] sm:$0xff] %v16187_v60   ;;  %v9862_v33 = vmul.f32 %v9801_v57, %v9727_v51  ;;  %v9863_v5 = vmul.f32 %v9806_v11, %v9728_v63 }
 0x8f8   : > { %v16192_v24 = vpack.c.bf16 %v9862_v33, %v9861_v55 }
 0x8f9   : > { %v9816_v44 = vpop.permute.xlu1 %9815  ;;  %v9811_v19 = vpop.permute.xlu0 %9810 }
 0x8fa   : > { %16290 = vst [vmem:[#allocation2 + $0xe0] sm:$0xff] %v16192_v24   ;;  %v9864_v14 = vmul.f32 %v9811_v19, %v9729_v47  ;;  %v9865_v62 = vmul.f32 %v9816_v44, %v9730_v9 }
 0x8fc   : > { %v16197_v46 = vpack.c.bf16 %v9864_v14, %v9863_v5 }
 0x8fd   : > { %v9826_v10 = vpop.permute.xlu1 %9825  ;;  %v9821_v8 = vpop.permute.xlu0 %9820 }
 0x8fe   : > { %16291 = vst [vmem:[#allocation2 + $0xe8] sm:$0xff] %v16197_v46   ;;  %v9866_v0 = vmul.f32 %v9821_v8, %v9731_v50  ;;  %v9867_v61 = vmul.f32 %v9826_v10, %v9732_v45 }
 0x900   : > { %v16202_v18 = vpack.c.bf16 %v9866_v0, %v9865_v62 }
 0x901   : > { %v9836_v51 = vpop.permute.xlu1 %9835  ;;  %v9831_v52 = vpop.permute.xlu0 %9830 }
 0x902   : > { %16292 = vst [vmem:[#allocation2 + $0xf0] sm:$0xff] %v16202_v18   ;;  %v9868_v1 = vmul.f32 %v9831_v52, %v9733_v26  ;;  %v9869_v49 = vmul.f32 %v9836_v51, %v9734_v4 }
 0x904   : > { %v16207_v47 = vpack.c.bf16 %v9868_v1, %v9867_v61 }
 0x905   : > { %v9846_v63 = vpop.permute.xlu1 %9845  ;;  %v9841_v15 = vpop.permute.xlu0 %9840 }
 0x906   : > { %16293 = vst [vmem:[#allocation2 + $0xf8] sm:$0xff] %v16207_v47   ;;  %v9870_v9 = vmul.f32 %v9841_v15, %v9735_v20  ;;  %v9871_v53 = vmul.f32 %v9846_v63, %v9736_v16 }
 0x908   : > { %v16212_v38 = vpack.c.bf16 %v9870_v9, %v9869_v49 }
 0x909   : > { %v9856_v50 = vpop.permute.xlu1 %9855  ;;  %v9851_v22 = vpop.permute.xlu0 %9850 }
 0x90a   : > { %16294 = vst [vmem:[#allocation2 + $0x100] sm:$0xff] %v16212_v38   ;;  %v9873_v7 = vmul.f32 %v9856_v50, %v9738_v27  ;;  %v9872_v26 = vmul.f32 %v9851_v22, %v9737_v30 }
 0x90c   : > { %v16058_v45 = vpack.c.bf16 %v9873_v7, %v9873_v7  ;;  %v16217_v40 = vpack.c.bf16 %v9872_v26, %v9871_v53 }
 0x90e   : > { %9954 = vst [vmem:[#allocation2 + $0x110] sm:$0xf] %v16058_v45  ;;  %16295 = vst [vmem:[#allocation2 + $0x108] sm:$0xff] %v16217_v40  }
 0x90f PF: > { %v19467_v4 = vld [vmem:[%s19813_s8 + $0x78] sm:$0xff]   ;;  %v19469_v20 = vld [vmem:[%s19813_s8 + $0x70] sm:$0xff]   ;;  %v19471_v30 = vld [vmem:[%s19813_s8 + $0x68] sm:$0xff]  }
 0x910   : > { %v19468_v12 = vld [vmem:[%s19813_s8 + $0x38] sm:$0xff]   ;;  %18304 = vmatprep.subr.bf16.mxu1 %v19467_v4  ;;  %v19470_v6 = vld [vmem:[%s19813_s8 + $0x30] sm:$0xff]   ;;  %v19472_v3 = vld [vmem:[%s19813_s8 + $0x28] sm:$0xff]  }
 0x911   : > { %18336 = vmatprep.subr.bf16.mxu0 %v19468_v12  ;;  %18305 = vmatpush3.bf16.msra.mxu1 %v19467_v4  ;;  %v19473_v27 = vld [vmem:[%s19813_s8 + $0x60] sm:$0xff]   ;;  %v19475_v16 = vld [vmem:[%s19813_s8 + $0x58] sm:$0xff]   ;;  %v19477_v58 = vld [vmem:[%s19813_s8 + $0x50] sm:$0xff]  }
 0x912   : > { %18337 = vmatpush3.bf16.msra.mxu0 %v19468_v12  ;;  %18306 = vmatprep.subr.bf16.mxu1 %v19469_v20  ;;  %v19474_v54 = vld [vmem:[%s19813_s8 + $0x20] sm:$0xff]   ;;  %v19476_v35 = vld [vmem:[%s19813_s8 + $0x18] sm:$0xff]   ;;  %v19478_v36 = vld [vmem:[%s19813_s8 + $0x10] sm:$0xff]  }
 0x913   : > { %18338 = vmatprep.subr.bf16.mxu0 %v19470_v6  ;;  %v9956_v23 = vld [vmem:[#allocation2 + $0x48] sm:$0xf]  ;;  %v9988_v31 = vld [vmem:[#allocation2 + $0x44] sm:$0x8]  ;;  %v22613_v56 = vld [vmem:[#allocation2 + $0x4c] sm:$0xff]  }
 0x914   : > { %v9955_v21 = vld [vmem:[#allocation2 + $0x44] sm:$0xc]  ;;  %v22615_v28 = vcombine.low %v9988_v31, %v9956_v23  ;;  %v22617_v32 = vld [vmem:[#allocation2 + $0x54] sm:$0xff]   ;;  %v19479_v13 = vld [vmem:[%s19813_s8 + $0x48] sm:$0xff]   ;;  %v10049_v25 = vrot.slane %v22613_v56, 3  ;;  %v10230_v59 = vshrl.u32 %v22613_v56, 16 }
 0x915   : > { %18307 = vmatpush3.bf16.msra.mxu1 %v19469_v20  ;;  %v15531_v39 = vcombine.low %v9955_v21, %v9956_v23  ;;  %v10233_v48 = vshll.u32 %v22613_v56, 16  ;;  %v19480_v41 = vld [vmem:[%s19813_s8 + $0x8] sm:$0xff]   ;;  %v10239_v42 = vshrl.u32 %v22617_v32, 16  ;;  %v10242_v60 = vshll.u32 %v22617_v32, 16  ;;  %v19481_v11 = vld [vmem:[%s19813_s8 + $0x40] sm:$0xff]   ;;  %v19487_v52 = vld [vmem:[%s19813_s8 + $0xb8] sm:$0xff]  }
 0x916   : > { %18339 = vmatpush3.bf16.msra.mxu0 %v19470_v6  ;;  %18308 = vmatprep.subr.bf16.mxu1 %v19471_v30  ;;  %v10048_v2 = vrot.slane %v22615_v28, 3  ;;  %v10232_v34 = vrot.slane %v10230_v59, 2  ;;  %v19482_v24 = vld [vmem:[%s19813_s8] sm:$0xff]   ;;  %v10051_v62 = vrot.slane %v22617_v32, 3  ;;  %v19488_v61 = vld [vmem:[%s19813_s8 + $0xf8] sm:$0xff]   ;;  %v19489_v49 = vld [vmem:[%s19813_s8 + $0xb0] sm:$0xff]  }
 0x917   : > { %18340 = vmatprep.subr.bf16.mxu0 %v19472_v3  ;;  %v10222_v37 = vshrl.u32 %v15531_v39, 16  ;;  %v10225_v43 = vshll.u32 %v15531_v39, 16  ;;  %v10235_v29 = vrot.slane %v10233_v48, 3  ;;  %v10241_v5 = vrot.slane %v10239_v42, 2  ;;  %v22638_v46 = vld [vmem:[#allocation2 + $0x5c] sm:$0xff]   ;;  %v22641_v8 = vld [vmem:[#allocation2 + $0x64] sm:$0xff]  }
 0x918   : > { %v10050_v57 = vsel %vm7464_vm7, %v10048_v2, %v10049_v25  ;;  %v10244_v14 = vrot.slane %v10242_v60, 3  ;;  %v10248_v0 = vshrl.u32 %v22638_v46, 16  ;;  %v10251_v18 = vshll.u32 %v22638_v46, 16  ;;  %v19490_v22 = vld [vmem:[%s19813_s8 + $0xf0] sm:$0xff]  }
 0x919   : > { %18309 = vmatpush3.bf16.msra.mxu1 %v19471_v30  ;;  %v10224_v55 = vrot.slane %v10222_v37, 2  ;;  %v10227_v33 = vrot.slane %v10225_v43, 3  ;;  %18320 = vmatprep.mubr.bf16.mxu1 %v10050_v57  ;;  %v10236_v44 = vor.u32 %v10235_v29, %v10232_v34  ;;  %v10257_v1 = vshrl.u32 %v22641_v8, 16  ;;  %v22664_v40 = vld [vmem:[#allocation2 + $0x6c] sm:$0xff]   ;;  %v22668_v20 = vld [vmem:[#allocation2 + $0x74] sm:$0xff]   ;;  %v22694_v34 = vld [vmem:[#allocation2 + $0x7c] sm:$0xff]  }
 0x91a   : > { %18341 = vmatpush3.bf16.msra.mxu0 %v19472_v3  ;;  %18310 = vmatprep.subr.bf16.mxu1 %v19473_v27  ;;  %v10245_v51 = vor.u32 %v10244_v14, %v10241_v5  ;;  %v10260_v47 = vshll.u32 %v22641_v8, 16  ;;  %v10250_v63 = vrot.slane %v10248_v0, 2  ;;  %v10253_v15 = vrot.slane %v10251_v18, 3  ;;  %v22696_v29 = vld [vmem:[#allocation2 + $0x84] ss:$0 sps:$4 sm:$0x77]  }
 0x91b   : > { %18342 = vmatprep.subr.bf16.mxu0 %v19474_v54  ;;  %v10228_v19 = vor.u32 %v10227_v33, %v10224_v55  ;;  %v10053_v9 = vrot.slane %v22638_v46, 3  ;;  %v10475_v38 = vshrl.u32 %v22615_v28, 16  ;;  %v10052_v50 = vsel %vm7464_vm7, %v10049_v25, %v10051_v62 }
 0x91c   : > { %v10254_v53 = vor.u32 %v10253_v15, %v10250_v63  ;;  %v10246_v7 = vsel %vm7638_vm8, %v10236_v44, %v10245_v51  ;;  %v10259_v26 = vrot.slane %v10257_v1, 2  ;;  %v10262_v45 = vrot.slane %v10260_v47, 3 }
 0x91d   : > { %18311 = vmatpush3.bf16.msra.mxu1 %v19473_v27  ;;  %v10237_v10 = vsel %vm7638_vm8, %v10228_v19, %v10236_v44  ;;  %v10478_v4 = vshll.u32 %v22615_v28, 16  ;;  %v10054_v12 = vsel %vm7464_vm7, %v10051_v62, %v10053_v9  ;;  %v22670_v6 = vrot.slane %v10475_v38, 3  ;;  %v19495_v28 = vld [vmem:[%s19813_s8 + $0xa0] sm:$0xff]  }
 0x91e   : > { %18343 = vmatpush3.bf16.msra.mxu0 %v19474_v54  ;;  %18312 = vmatprep.subr.bf16.mxu1 %v19475_v16  ;;  %v10255_v30 = vsel %vm7638_vm8, %v10245_v51, %v10254_v53  ;;  %v10055_v3 = vrot.slane %v22641_v8, 3  ;;  %v10266_v27 = vshrl.u32 %v22664_v40, 16  ;;  %v10269_v54 = vshll.u32 %v22664_v40, 16  ;;  %v19500_v51 = vld [vmem:[%s19813_s8 + $0xd8] sm:$0xff]  }
 0x91f   : > { %18344 = vmatprep.subr.bf16.mxu0 %v19476_v35  ;;  %18352 = vmatprep.mubr.bf16.mxu0 %v10237_v10  ;;  %v10278_v23 = vshll.u32 %v22668_v20, 16  ;;  %v10057_v39 = vrot.slane %v22664_v40, 3  ;;  %v22701_v57 = vrot.slane %v10230_v59, 3  ;;  %v10284_v33 = vshrl.u32 %v22694_v34, 16  ;;  %v19499_v59 = vld [vmem:[%s19813_s8 + $0x98] sm:$0xff]  }
 0x920   : > { %v10268_v31 = vrot.slane %v10266_v27, 2  ;;  %v10271_v21 = vrot.slane %v10269_v54, 3  ;;  %v10056_v2 = vsel %vm7464_vm7, %v10053_v9, %v10055_v3  ;;  %v10483_v44 = vrot.slane %v10233_v48, 4  ;;  %v19502_v9 = vld [vmem:[%s19813_s8 + $0xd0] sm:$0xff]  }
 0x921   : > { %18313 = vmatpush3.bf16.msra.mxu1 %v19475_v16  ;;  %v10263_v16 = vor.u32 %v10262_v45, %v10259_v26  ;;  %v10280_v25 = vrot.slane %v10278_v23, 3  ;;  %v10058_v55 = vsel %vm7464_vm7, %v10055_v3, %v10057_v39  ;;  %v10059_v5 = vrot.slane %v22668_v20, 3  ;;  %v22730_v26 = vld [vmem:[#allocation2 + $0x54] sm:$0xf]  ;;  %v22732_v45 = vld [vmem:[#allocation2 + $0x58] sm:$0xf] }
 0x922   : > { %18345 = vmatpush3.bf16.msra.mxu0 %v19476_v35  ;;  %18314 = vmatprep.subr.bf16.mxu1 %v19477_v58  ;;  %v19493_v35 = vld [vmem:[%s19813_s8 + $0xa8] sm:$0xff]   ;;  %v10272_v37 = vor.u32 %v10271_v21, %v10268_v31  ;;  %v10293_v14 = vshrl.u32 %v22696_v29, 16  ;;  %v10296_v10 = vshll.u32 %v22696_v29, 16  ;;  %v10286_v56 = vrot.slane %v10284_v33, 2 }
 0x923   : > { %18346 = vmatprep.subr.bf16.mxu0 %v19478_v36  ;;  %v10264_v43 = vsel %vm7638_vm8, %v10254_v53, %v10263_v16  ;;  %v10061_v63 = vrot.slane %v22694_v34, 3  ;;  %v10063_v15 = vrot.slane %v22696_v29, 3  ;;  %v10688_v53 = vld [vmem:[#allocation2 + $0x4c] sm:$0x8]  ;;  %v15582_v3 = vcombine.low %v22730_v26, %v22732_v45 }
 0x924   : > { %v10273_v19 = vsel %vm7638_vm8, %v10263_v16, %v10272_v37  ;;  %v22741_v16 = vld [vmem:[#allocation2 + $0x60] sm:$0xf]  ;;  %v19506_v29 = vld [vmem:[%s19813_s8 + $0xc8] sm:$0xff]   ;;  %v10495_v46 = vrot.slane %v10260_v47, 4  ;;  %v19515_v47 = vld [vmem:[%s19813_s8 + $0x130] sm:$0xff]  }
 0x925   : > { %18315 = vmatpush3.bf16.msra.mxu1 %v19477_v58  ;;  %v19494_v58 = vld [vmem:[%s19813_s8 + $0xe8] sm:$0xff]  }
 0x926   : > { %18347 = vmatpush3.bf16.msra.mxu0 %v19478_v36  ;;  %18316 = vmatprep.subr.bf16.mxu1 %v19479_v13  ;;  %v10275_v36 = vshrl.u32 %v22668_v20, 16 }
 0x927   : > { %18348 = vmatprep.subr.bf16.mxu0 %v19480_v41 }
 0x929   : > { %18317 = vmatpush3.bf16.msra.mxu1 %v19479_v13  ;;  %v10277_v13 = vrot.slane %v10275_v36, 2 }
 0x92a   : > { %18349 = vmatpush3.bf16.msra.mxu0 %v19480_v41  ;;  %18318 = vmatprep.subr.bf16.mxu1 %v19481_v11  ;;  %v22690_v41 = vrot.slane %v10478_v4, 4  ;;  %v22734_v4 = vld [vmem:[#allocation2 + $0x5c] sm:$0xf] }
 0x92b   : > { %18350 = vmatprep.subr.bf16.mxu0 %v19482_v24  ;;  %v10281_v62 = vor.u32 %v10280_v25, %v10277_v13  ;;  %v10773_v13 = vshrl.u32 %v15582_v3, 16  ;;  %v10776_v25 = vshll.u32 %v15582_v3, 16 }
 0x92d   : > { %18319 = vmatpush3.bf16.msra.mxu1 %v19481_v11  ;;  %v19496_v11 = vld [vmem:[%s19813_s8 + $0xe0] sm:$0xff]  }
 0x92e   : > { %18351 = vmatpush3.bf16.msra.mxu0 %v19482_v24  ;;  %18368 = vmatprep.subr.bf16.mxu1 %v19487_v52  ;;  %v10287_v24 = vshll.u32 %v22694_v34, 16  ;;  %v19526_v34 = vld [vmem:[%s19813_s8 + $0x158] sm:$0xff]  }
 0x92f   : > { %18400 = vmatprep.subr.bf16.mxu0 %v19488_v61 }
 0x930   : > { %18321 = vmatmul.mubr.bf16.vlgmr.msra.gmra.mxu1 %v10052_v50  ;;  %v10289_v48 = vrot.slane %v10287_v24, 3  ;;  %v10295_v50 = vrot.slane %v10293_v14, 2 }
 0x931   : > { %18353 = vmatmul.mubr.bf16.vlgmr.msra.gmra.mxu0 %v10246_v7  ;;  %18369 = vmatpush3.bf16.msra.mxu1 %v19487_v52  ;;  %v22720_v52 = vrot.slane %v10239_v42, 3  ;;  %v22727_v7 = vld [vmem:[#allocation2 + $0x50] sm:$0xf]  ;;  %v10282_v42 = vsel %vm7638_vm8, %v10272_v37, %v10281_v62 }
 0x932   : > { %18401 = vmatpush3.bf16.msra.mxu0 %v19488_v61  ;;  %18370 = vmatprep.subr.bf16.mxu1 %v19489_v49  ;;  %v19501_v61 = vld [vmem:[%s19813_s8 + $0x90] sm:$0xff]   ;;  %v10290_v38 = vor.u32 %v10289_v48, %v10286_v56 }
 0x933   : > { %18402 = vmatprep.subr.bf16.mxu0 %v19490_v22  ;;  %18324 = vmatprep.mubr.bf16.mxu1 %v10054_v12  ;;  %v15581_v12 = vcombine.low %v10688_v53, %v22727_v7 }
 0x934   : > { %18356 = vmatprep.mubr.bf16.mxu0 %v10255_v30  ;;  %v10481_v30 = vor.u32 %v22690_v41, %v22670_v6 }
 0x935   : > { %18371 = vmatpush3.bf16.msra.mxu1 %v19489_v49  ;;  %v10060_v49 = vsel %vm7464_vm7, %v10057_v39, %v10059_v5  ;;  %v10765_v31 = vshrl.u32 %v15581_v12, 16  ;;  %v10768_v21 = vshll.u32 %v15581_v12, 16  ;;  %v10291_v39 = vsel %vm7638_vm8, %v10281_v62, %v10290_v38 }
 0x936   : > { %18403 = vmatpush3.bf16.msra.mxu0 %v19490_v22  ;;  %18372 = vmatprep.subr.bf16.mxu1 %v19493_v35  ;;  %v10298_v22 = vrot.slane %v10296_v10, 3  ;;  %v10064_v62 = vsel %vm7464_vm7, %v10061_v63, %v10063_v15 }
 0x937   : > { %18404 = vmatprep.subr.bf16.mxu0 %v19494_v58  ;;  %v10767_v41 = vrot.slane %v10765_v31, 3  ;;  %v19514_v31 = vld [vmem:[%s19813_s8 + $0x178] sm:$0xff]  }
 0x938   : > { %18325 = vmatmul.mubr.bf16.gmra.mxu1 %v10056_v2  ;;  %v10299_v6 = vor.u32 %v10298_v22, %v10295_v50  ;;  %v10770_v2 = vrot.slane %v10768_v21, 4 }
 0x939   : > { %18357 = vmatmul.mubr.bf16.gmra.mxu0 %v10264_v43  ;;  %18373 = vmatpush3.bf16.msra.mxu1 %v19493_v35  ;;  %v10062_v35 = vsel %vm7464_vm7, %v10059_v5, %v10061_v63  ;;  %v10778_v5 = vrot.slane %v10776_v25, 4 }
 0x93a   : > { %18405 = vmatpush3.bf16.msra.mxu0 %v19494_v58  ;;  %18374 = vmatprep.subr.bf16.mxu1 %v19495_v28  ;;  %v19505_v58 = vld [vmem:[%s19813_s8 + $0x88] sm:$0xff]   ;;  %v10771_v56 = vor.u32 %v10770_v2, %v10767_v41  ;;  %v10300_v32 = vsel %vm7638_vm8, %v10290_v38, %v10299_v6  ;;  %v10491_v38 = vrot.slane %v10251_v18, 4  ;;  %v22785_v6 = vld [vmem:[#allocation2 + $0x7c] sm:$0xf] }
 0x93b   : > { %18406 = vmatprep.subr.bf16.mxu0 %v19496_v11  ;;  %18328 = vmatprep.mubr.bf16.mxu1 %v10058_v55  ;;  %v10487_v55 = vrot.slane %v10242_v60, 4 }
 0x93c   : > { %18360 = vmatprep.mubr.bf16.mxu0 %v10273_v19  ;;  %v10775_v19 = vrot.slane %v10773_v13, 3  ;;  %v22787_v13 = vld [vmem:[#allocation2 + $0x80] sm:$0xf] }
 0x93d   : > { %18375 = vmatpush3.bf16.msra.mxu1 %v19495_v28  ;;  %v15583_v28 = vcombine.low %v22734_v4, %v22741_v16  ;;  %v10488_v15 = vor.u32 %v10487_v55, %v22720_v52  ;;  %v10494_v52 = vrot.slane %v10257_v1, 3  ;;  %v15587_v2 = vcombine.low %v22785_v6, %v22787_v13 }
 0x93e   : > { %18407 = vmatpush3.bf16.msra.mxu0 %v19496_v11  ;;  %18376 = vmatprep.subr.bf16.mxu1 %v19499_v59  ;;  %v10484_v11 = vor.u32 %v10483_v44, %v22701_v57  ;;  %v10779_v48 = vor.u32 %v10778_v5, %v10775_v19  ;;  %v22758_v57 = vld [vmem:[#allocation2 + $0x6c] sm:$0xf]  ;;  %v22763_v44 = vld [vmem:[#allocation2 + $0x70] sm:$0xf] }
 0x93f   : > { %18408 = vmatprep.subr.bf16.mxu0 %v19500_v51  ;;  %v10782_v37 = vshrl.u32 %v15583_v28, 16  ;;  %v10785_v43 = vshll.u32 %v15583_v28, 16  ;;  %v15585_v50 = vcombine.low %v22758_v57, %v22763_v44  ;;  %v22781_v28 = vld [vmem:[#allocation2 + $0x74] sm:$0xf]  ;;  %v10818_v40 = vshrl.u32 %v15587_v2, 16 }
 0x940   : > { %18329 = vmatmul.mubr.bf16.gmra.mxu1 %v10060_v49  ;;  %v22756_v49 = vld [vmem:[#allocation2 + $0x68] sm:$0xf]  ;;  %v10485_v63 = vsel %vm7893_vm9, %v10481_v30, %v10484_v11  ;;  %v10780_v12 = vsel %vm7893_vm9, %v10771_v56, %v10779_v48  ;;  %v10489_v8 = vsel %vm7893_vm9, %v10484_v11, %v10488_v15  ;;  %v10499_v11 = vrot.slane %v10269_v54, 4 }
 0x941   : > { %18361 = vmatmul.mubr.bf16.gmra.mxu0 %v10282_v42  ;;  %18377 = vmatpush3.bf16.msra.mxu1 %v19499_v59  ;;  %v19507_v59 = vld [vmem:[%s19813_s8 + $0x80] sm:$0xff]   ;;  %v10784_v14 = vrot.slane %v10782_v37, 3  ;;  %v10787_v10 = vrot.slane %v10785_v43, 4  ;;  %v19509_v42 = vld [vmem:[%s19813_s8 + $0x138] sm:$0xff]   ;;  %v10800_v30 = vshrl.u32 %v15585_v50, 16  ;;  %v10803_v3 = vshll.u32 %v15585_v50, 16 }
 0x942   : > { %18409 = vmatpush3.bf16.msra.mxu0 %v19500_v51  ;;  %18378 = vmatprep.subr.bf16.mxu1 %v19501_v61  ;;  %v22754_v51 = vld [vmem:[#allocation2 + $0x64] sm:$0xf]  ;;  %v19516_v43 = vld [vmem:[%s19813_s8 + $0x170] sm:$0xff]   ;;  %v10503_v54 = vrot.slane %v10278_v23, 4 }
 0x943   : > { %18410 = vmatprep.subr.bf16.mxu0 %v19502_v9  ;;  %18332 = vmatprep.mubr.bf16.mxu1 %v10062_v35  ;;  %v15584_v60 = vcombine.low %v22754_v51, %v22756_v49  ;;  %v10788_v35 = vor.u32 %v10787_v10, %v10784_v14  ;;  %v10805_v21 = vrot.slane %v10803_v3, 4  ;;  %v10502_v10 = vrot.slane %v10275_v36, 3  ;;  %v19529_v36 = vld [vmem:[#allocation2 + $0x84] ss:$0 sps:$4 sm:$0xff]  }
 0x944   : > { %18364 = vmatprep.mubr.bf16.mxu0 %v10291_v39  ;;  %v22783_v39 = vld [vmem:[#allocation2 + $0x78] sm:$0xf]  ;;  %v19522_v3 = vld [vmem:[%s19813_s8 + $0x160] sm:$0xff]  }
 0x945   : > { %18379 = vmatpush3.bf16.msra.mxu1 %v19501_v61  ;;  %v19508_v61 = vld [vmem:[%s19813_s8 + $0xc0] sm:$0xff]   ;;  %v10791_v22 = vshrl.u32 %v15584_v60, 16  ;;  %v10794_v53 = vshll.u32 %v15584_v60, 16  ;;  %v15586_v41 = vcombine.low %v22781_v28, %v22783_v39  ;;  %v10789_v37 = vsel %vm7893_vm9, %v10779_v48, %v10788_v35  ;;  %v19520_v48 = vld [vmem:[%s19813_s8 + $0x168] sm:$0xff]  }
 0x946   : > { %18411 = vmatpush3.bf16.msra.mxu0 %v19502_v9  ;;  %18380 = vmatprep.subr.bf16.mxu1 %v19505_v58  ;;  %v10490_v9 = vrot.slane %v10248_v0, 3  ;;  %v10821_v60 = vshll.u32 %v15587_v2, 16 }
 0x947   : > { %18412 = vmatprep.subr.bf16.mxu0 %v19506_v29  ;;  %v10793_v0 = vrot.slane %v10791_v22, 3  ;;  %v10796_v18 = vrot.slane %v10794_v53, 4  ;;  %v10809_v55 = vshrl.u32 %v15586_v41, 16  ;;  %v10812_v19 = vshll.u32 %v15586_v41, 16  ;;  %v19521_v53 = vld [vmem:[%s19813_s8 + $0x120] sm:$0xff]  }
 0x948   : > { %18333 = vmatmul.mubr.bf16.gmra.mxu1 %v10064_v62  ;;  %v10492_v1 = vor.u32 %v10491_v38, %v10490_v9  ;;  %v19517_v62 = vld [vmem:[%s19813_s8 + $0x128] sm:$0xff]   ;;  %v10820_v22 = vrot.slane %v10818_v40, 3 }
 0x949   : > { %18365 = vmatmul.mubr.bf16.gmra.mxu0 %v10300_v32  ;;  %18381 = vmatpush3.bf16.msra.mxu1 %v19505_v58  ;;  %v10802_v58 = vrot.slane %v10800_v30, 3  ;;  %v10797_v25 = vor.u32 %v10796_v18, %v10793_v0  ;;  %v10814_v32 = vrot.slane %v10812_v19, 4  ;;  %v22815_v9 = vld [vmem:[#allocation2 + $0x8c] sm:$0xf]  ;;  %v19523_v0 = vld [vmem:[%s19813_s8 + $0x118] sm:$0xff]   ;;  %v10507_v18 = vrot.slane %v10287_v24, 4 }
 0x94a   : > { %18413 = vmatpush3.bf16.msra.mxu0 %v19506_v29  ;;  %18382 = vmatprep.subr.bf16.mxu1 %v19507_v59  ;;  %v10498_v29 = vrot.slane %v10266_v27, 3  ;;  %v10493_v5 = vsel %vm7893_vm9, %v10488_v15, %v10492_v1  ;;  %v10811_v27 = vrot.slane %v10809_v55, 3  ;;  %v22811_v15 = vld [vmem:[#allocation2 + $0x88] sm:$0xf]  ;;  %v15589_v30 = vcombine.low %v22815_v9, %v22815_v9  ;;  %v19539_v19 = vld [vmem:[#allocation2 + $0x58] sm:$0xff]  }
 0x94b   : > { %18414 = vmatprep.subr.bf16.mxu0 %v19508_v61  ;;  %18384 = vmatprep.mubr.bf16.mxu1 %v10485_v63  ;;  %v10806_v14 = vor.u32 %v10805_v21, %v10802_v58  ;;  %v10798_v56 = vsel %vm7893_vm9, %v10788_v35, %v10797_v25  ;;  %v22809_v63 = vld [vmem:[#allocation2 + $0x84] sm:$0xf]  ;;  %v10511_v58 = vshrl.u32 %v19529_v36, 16  ;;  %v10514_v21 = vshll.u32 %v19529_v36, 16 }
 0x94c   : > { %18416 = vmatprep.mubr.bf16.mxu0 %v10780_v12  ;;  %v15588_v50 = vcombine.low %v22809_v63, %v22811_v15  ;;  %v10815_v38 = vor.u32 %v10814_v32, %v10811_v27  ;;  %v10839_v2 = vshll.u32 %v15589_v30, 16  ;;  %v19530_v27 = vld [vmem:[%s19813_s8 + $0x108] sm:$0xff]   ;;  %v19540_v36 = vld [vmem:[#allocation2 + $0x60] sm:$0xff]  }
 0x94d   : > { %18383 = vmatpush3.bf16.msra.mxu1 %v19507_v59  ;;  %v10496_v59 = vor.u32 %v10495_v46, %v10494_v52  ;;  %v10807_v23 = vsel %vm7893_vm9, %v10797_v25, %v10806_v14  ;;  %v10506_v46 = vrot.slane %v10284_v33, 3  ;;  %v19538_v25 = vld [vmem:[#allocation2 + $0x50] sm:$0xff]   ;;  %v10836_v33 = vshrl.u32 %v15589_v30, 16  ;;  %v19535_v30 = vld [vmem:[%s19813_s8 + $0x140] sm:$0xff]  }
 0x94e   : > { %18415 = vmatpush3.bf16.msra.mxu0 %v19508_v61  ;;  %18432 = vmatprep.subr.bf16.mxu1 %v19509_v42  ;;  %v10500_v61 = vor.u32 %v10499_v11, %v10498_v29  ;;  %v10827_v12 = vshrl.u32 %v15588_v50, 16  ;;  %v10830_v52 = vshll.u32 %v15588_v50, 16  ;;  %v10513_v29 = vrot.slane %v10511_v58, 3  ;;  %v19533_v50 = vld [vmem:[%s19813_s8 + $0x148] sm:$0xff]  }
 0x94f   : > { %18464 = vmatprep.subr.bf16.mxu0 %v19514_v31  ;;  %v10497_v20 = vsel %vm7893_vm9, %v10492_v1, %v10496_v59  ;;  %v10516_v11 = vrot.slane %v10514_v21, 4  ;;  %v19548_v21 = vld [vmem:[#allocation2 + $0x70] sm:$0xff]  }
 0x950   : > { %18385 = vmatmul.mubr.bf16.vlgmr.msra.gmra.mxu1 %v10489_v8  ;;  %v10501_v35 = vsel %vm7893_vm9, %v10496_v59, %v10500_v61  ;;  %v10829_v1 = vrot.slane %v10827_v12, 3  ;;  %v10816_v8 = vsel %vm7893_vm9, %v10806_v14, %v10815_v38  ;;  %v10838_v14 = vrot.slane %v10836_v33, 3 }
 0x951   : > { %18433 = vmatpush3.bf16.msra.mxu1 %v19509_v42  ;;  %18417 = vmatmul.mubr.bf16.vlgmr.msra.gmra.mxu0 %v10789_v37  ;;  %v10823_v42 = vrot.slane %v10821_v60, 4  ;;  %v19527_v37 = vld [vmem:[%s19813_s8 + $0x110] sm:$0xff]   ;;  %v10517_v32 = vor.u32 %v10516_v11, %v10513_v29  ;;  %v11290_v60 = vshll.u32 %v19539_v19, 16  ;;  %v11294_v12 = vshrl.u32 %v19539_v19, 16  ;;  %v19556_v19 = vld [vmem:[#allocation2 + $0x80] sm:$0xff]  }
 0x952   : > { %18465 = vmatpush3.bf16.msra.mxu0 %v19514_v31  ;;  %18434 = vmatprep.subr.bf16.mxu1 %v19515_v47  ;;  %v10504_v31 = vor.u32 %v10503_v54, %v10502_v10  ;;  %v10841_v10 = vrot.slane %v10839_v2, 4  ;;  %v11314_v2 = vshll.u32 %v19548_v21, 16 }
 0x953   : > { %18466 = vmatprep.subr.bf16.mxu0 %v19516_v43  ;;  %18388 = vmatprep.mubr.bf16.mxu1 %v10493_v5  ;;  %v10824_v41 = vor.u32 %v10823_v42, %v10820_v22  ;;  %v11285_v5 = vshll.u32 %v19538_v25, 16  ;;  %v11292_v22 = vrot.slane %v11290_v60, 1  ;;  %v11334_v60 = vshrl.u32 %v19556_v19, 16 }
 0x954   : > { %18420 = vmatprep.mubr.bf16.mxu0 %v10798_v56  ;;  %v10505_v24 = vsel %vm7893_vm9, %v10500_v61, %v10504_v31  ;;  %v11283_v56 = vshrl.u32 %v19538_v25, 16  ;;  %v10842_v61 = vor.u32 %v10841_v10, %v10838_v14  ;;  %v11316_v11 = vrot.slane %v11314_v2, 1  ;;  %v11519_v14 = vld [vmem:[#allocation2 + $0x58] sm:$0xf]  ;;  %v11520_v10 = vld [vmem:[#allocation2 + $0x5c] sm:$0xf] }
 0x955   : > { %18435 = vmatpush3.bf16.msra.mxu1 %v19515_v47  ;;  %v10832_v47 = vrot.slane %v10830_v52, 4  ;;  %v10825_v59 = vsel %vm7893_vm9, %v10815_v38, %v10824_v41  ;;  %v11287_v54 = vrot.slane %v11285_v5, 1  ;;  %v11298_v52 = vshll.u32 %v19540_v36, 16  ;;  %v19563_v5 = vld [vmem:[#allocation2 + $0x88] sm:$0xff]  }
 0x956   : > { %18467 = vmatpush3.bf16.msra.mxu0 %v19516_v43  ;;  %18436 = vmatprep.subr.bf16.mxu1 %v19517_v62  ;;  %v10508_v43 = vor.u32 %v10507_v18, %v10506_v46  ;;  %v11302_v46 = vshrl.u32 %v19540_v36, 16  ;;  %v11296_v18 = vor.u32 %v11294_v12, %v11292_v22  ;;  %v19554_v36 = vld [vmem:[%s19813_s8 + $0x198] sm:$0xff]  }
 0x957   : > { %18468 = vmatprep.subr.bf16.mxu0 %v19520_v48  ;;  %v10833_v55 = vor.u32 %v10832_v47, %v10829_v1  ;;  %v11288_v38 = vor.u32 %v11287_v54, %v11283_v56  ;;  %v11300_v58 = vrot.slane %v11298_v52, 1  ;;  %v19541_v1 = vld [vmem:[%s19813_s8 + $0x1f8] sm:$0xff]   ;;  %v19550_v56 = vld [vmem:[%s19813_s8 + $0x1a0] sm:$0xff]  }
 0x958   : > { %18389 = vmatmul.mubr.bf16.gmra.mxu1 %v10497_v20  ;;  %v19534_v20 = vld [vmem:[%s19813_s8 + $0x100] sm:$0xff]  }
 0x959   : > { %18437 = vmatpush3.bf16.msra.mxu1 %v19517_v62  ;;  %18421 = vmatmul.mubr.bf16.gmra.mxu0 %v10807_v23  ;;  %v19528_v62 = vld [vmem:[%s19813_s8 + $0x150] sm:$0xff]   ;;  %v10834_v40 = vsel %vm7893_vm9, %v10824_v41, %v10833_v55  ;;  %v10518_v23 = vsel %vm7893_vm9, %v10508_v43, %v10517_v32  ;;  %v10843_v42 = vsel %vm7893_vm9, %v10833_v55, %v10842_v61  ;;  %v19549_v55 = vld [vmem:[%s19813_s8 + $0x1e8] sm:$0xff]   ;;  %v19551_v32 = vld [vmem:[%s19813_s8 + $0x1e0] sm:$0xff]   ;;  %v11338_v61 = vshll.u32 %v19563_v5, 16 }
 0x95a   : > { %18469 = vmatpush3.bf16.msra.mxu0 %v19520_v48  ;;  %18438 = vmatprep.subr.bf16.mxu1 %v19521_v53  ;;  %v10509_v48 = vsel %vm7893_vm9, %v10504_v31, %v10508_v43  ;;  %v11293_v31 = vsel %vm8705_vm10, %v11288_v38, %v11292_v22  ;;  %v11301_v25 = vsel %vm8705_vm10, %v11296_v18, %v11300_v58  ;;  %v19542_v41 = vld [vmem:[%s19813_s8 + $0x1b0] sm:$0xff]   ;;  %v11318_v43 = vshrl.u32 %v19548_v21, 16  ;;  %v22871_v22 = vld [vmem:[#allocation2 + $0x60] sm:$0xff]   ;;  %v22879_v18 = vld [vmem:[#allocation2 + $0x68] sm:$0xff]  }
 0x95b   : > { %18470 = vmatprep.subr.bf16.mxu0 %v19522_v3  ;;  %18392 = vmatprep.mubr.bf16.mxu1 %v10501_v35  ;;  %v19537_v35 = vld [vmem:[%s19813_s8 + $0x1b8] sm:$0xff]   ;;  %v11342_v38 = vshrl.u32 %v19563_v5, 16  ;;  %v11340_v12 = vrot.slane %v11338_v61, 1  ;;  %v19562_v21 = vld [vmem:[%s19813_s8 + $0x188] sm:$0xff]   ;;  %v11853_v2 = vrot.slane %v22871_v22, 1  ;;  %v22914_v5 = vld [vmem:[#allocation2 + $0x80] sm:$0xff]  }
 0x95c   : > { %18424 = vmatprep.mubr.bf16.mxu0 %v10816_v8  ;;  %v11304_v8 = vor.u32 %v11302_v46, %v11300_v58  ;;  %v11603_v46 = vshll.u32 %v22871_v22, 16  ;;  %v19576_v61 = vld [vmem:[%s19813_s8 + $0x228] sm:$0xff]  }
 0x95d   : > { %18439 = vmatpush3.bf16.msra.mxu1 %v19521_v53  ;;  %v19547_v53 = vld [vmem:[#allocation2 + $0x68] sm:$0xff]  }
 0x95e   : > { %18471 = vmatpush3.bf16.msra.mxu0 %v19522_v3  ;;  %18440 = vmatprep.subr.bf16.mxu1 %v19523_v0  ;;  %v15614_v3 = vcombine.low %v22727_v7, %v22730_v26  ;;  %v15615_v7 = vcombine.low %v22732_v45, %v22734_v4  ;;  %v19555_v26 = vld [vmem:[#allocation2 + $0x78] sm:$0xff]   ;;  %v11310_v33 = vshrl.u32 %v19547_v53, 16  ;;  %v19546_v4 = vld [vmem:[%s19813_s8 + $0x1a8] sm:$0xff]  }
 0x95f   : > { %18472 = vmatprep.subr.bf16.mxu0 %v19526_v34  ;;  %v11322_v45 = vshll.u32 %v19555_v26, 16 }
 0x960   : > { %18393 = vmatmul.mubr.bf16.gmra.mxu1 %v10505_v24  ;;  %v15616_v24 = vcombine.low %v22741_v16, %v22754_v51  ;;  %v15617_v16 = vcombine.low %v22756_v49, %v22758_v57  ;;  %v15618_v49 = vcombine.low %v22763_v44, %v22781_v28  ;;  %v19564_v57 = vld [vmem:[#allocation2 + $0x90] ss:$0 sps:$4 sm:$0x11]   ;;  %v15619_v44 = vcombine.low %v22783_v39, %v22785_v6 }
 0x961   : > { %18441 = vmatpush3.bf16.msra.mxu1 %v19523_v0  ;;  %18425 = vmatmul.mubr.bf16.gmra.mxu0 %v10825_v59  ;;  %v11306_v0 = vshll.u32 %v19547_v53, 16  ;;  %v11324_v51 = vrot.slane %v11322_v45, 1  ;;  %v11320_v59 = vor.u32 %v11318_v43, %v11316_v11  ;;  %v19558_v28 = vld [vmem:[%s19813_s8 + $0x190] sm:$0xff]   ;;  %v11346_v52 = vshll.u32 %v19564_v57, 16 }
 0x962   : > { %18473 = vmatpush3.bf16.msra.mxu0 %v19526_v34  ;;  %18442 = vmatprep.subr.bf16.mxu1 %v19527_v37  ;;  %v19543_v34 = vld [vmem:[%s19813_s8 + $0x1f0] sm:$0xff]   ;;  %v15620_v39 = vcombine.low %v22787_v13, %v22809_v63  ;;  %v19565_v13 = vld [vmem:[%s19813_s8 + $0x1c8] sm:$0xff]  }
 0x963   : > { %18474 = vmatprep.subr.bf16.mxu0 %v19528_v62  ;;  %18396 = vmatprep.mubr.bf16.mxu1 %v10509_v48  ;;  %v11308_v47 = vrot.slane %v11306_v0, 1  ;;  %v11326_v48 = vshrl.u32 %v19555_v26, 16  ;;  %v11325_v54 = vsel %vm8705_vm10, %v11320_v59, %v11324_v51  ;;  %v22885_v63 = vld [vmem:[#allocation2 + $0x70] sm:$0xff]   ;;  %v15621_v26 = vcombine.low %v22811_v15, %v22815_v9  ;;  %v19566_v15 = vld [vmem:[%s19813_s8 + $0x180] sm:$0xff]  }
 0x964   : > { %18428 = vmatprep.mubr.bf16.mxu0 %v10834_v40  ;;  %v15679_v40 = vcombine.low %v11519_v14, %v11520_v10  ;;  %v19567_v9 = vld [vmem:[%s19813_s8 + $0x1c0] sm:$0xff]   ;;  %v11619_v45 = vshll.u32 %v22885_v63, 16  ;;  %v11857_v59 = vrot.slane %v22885_v63, 1 }
 0x965   : > { %18443 = vmatpush3.bf16.msra.mxu1 %v19527_v37  ;;  %v11309_v37 = vsel %vm8705_vm10, %v11304_v8, %v11308_v47  ;;  %v11312_v29 = vor.u32 %v11310_v33, %v11308_v47  ;;  %v11605_v47 = vrot.slane %v11603_v46, 1 }
 0x966   : > { %18475 = vmatpush3.bf16.msra.mxu0 %v19528_v62  ;;  %18444 = vmatprep.subr.bf16.mxu1 %v19530_v27  ;;  %v11598_v53 = vshll.u32 %v15679_v40, 16  ;;  %v11596_v6 = vshrl.u32 %v15679_v40, 16 }
 0x967   : > { %18476 = vmatprep.subr.bf16.mxu0 %v19533_v50  ;;  %v11317_v62 = vsel %vm8705_vm10, %v11312_v29, %v11316_v11  ;;  %v22906_v11 = vld [vmem:[#allocation2 + $0x78] sm:$0xff]  }
 0x968   : > { %18397 = vmatmul.mubr.bf16.gmra.mxu1 %v10518_v23  ;;  %v19557_v23 = vld [vmem:[%s19813_s8 + $0x1d8] sm:$0xff]  }
 0x969   : > { %18445 = vmatpush3.bf16.msra.mxu1 %v19530_v27  ;;  %18429 = vmatmul.mubr.bf16.gmra.mxu0 %v10843_v42  ;;  %v11330_v27 = vshll.u32 %v19556_v19, 16  ;;  %v11855_v19 = vrot.slane %v22879_v18, 1 }
 0x96a   : > { %18477 = vmatpush3.bf16.msra.mxu0 %v19533_v50  ;;  %18446 = vmatprep.subr.bf16.mxu1 %v19534_v20  ;;  %v11328_v50 = vor.u32 %v11326_v48, %v11324_v51  ;;  %v11621_v51 = vrot.slane %v11619_v45, 1  ;;  %v19573_v48 = vld [vmem:[%s19813_s8 + $0x230] sm:$0xff]  }
 0x96b   : > { %18478 = vmatprep.subr.bf16.mxu0 %v19535_v30  ;;  %18448 = vmatprep.mubr.bf16.mxu1 %v15614_v3  ;;  %v11832_v3 = vld [vmem:[#allocation2 + $0x58] sm:$0xe]  ;;  %v11858_v57 = vsel %vm9278_vm11, %v11855_v19, %v11857_v59 }
 0x96c   : > { %18480 = vmatprep.mubr.bf16.mxu0 %v11293_v31  ;;  %v11600_v31 = vrot.slane %v11598_v53, 1  ;;  %v22881_v58 = vcombine.low %v11832_v3, %v11520_v10  ;;  %v11623_v10 = vshrl.u32 %v22885_v63, 16 }
 0x96d   : > { %18447 = vmatpush3.bf16.msra.mxu1 %v19534_v20  ;;  %v11332_v20 = vrot.slane %v11330_v27, 1 }
 0x96e   : > { %18479 = vmatpush3.bf16.msra.mxu0 %v19535_v30  ;;  %18496 = vmatprep.subr.bf16.mxu1 %v19537_v35  ;;  %v11601_v8 = vor.u32 %v11600_v31, %v11596_v6  ;;  %v11852_v33 = vrot.slane %v22881_v58, 1  ;;  %v11625_v40 = vor.u32 %v11623_v10, %v11621_v51  ;;  %v19583_v31 = vld [vmem:[#allocation2 + $0x98] ss:$0 sps:$4 sm:$0x11]  }
 0x96f   : > { %18528 = vmatprep.subr.bf16.mxu0 %v19541_v1  ;;  %v11336_v42 = vor.u32 %v11334_v60, %v11332_v20  ;;  %v11333_v30 = vsel %vm8705_vm10, %v11328_v50, %v11332_v20  ;;  %v22930_v60 = vld [vmem:[#allocation2 + $0x88] sm:$0xff]  }
 0x970   : > { %18449 = vmatmul.mubr.bf16.vlgmr.msra.gmra.mxu1 %v15615_v7  ;;  %v11348_v7 = vrot.slane %v11346_v52, 1  ;;  %v11854_v29 = vsel %vm9278_vm11, %v11852_v33, %v11853_v2  ;;  %v11643_v53 = vshll.u32 %v22930_v60, 16 }
 0x971   : > { %18497 = vmatpush3.bf16.msra.mxu1 %v19537_v35  ;;  %18481 = vmatmul.mubr.bf16.vlgmr.msra.gmra.mxu0 %v11301_v25  ;;  %v19559_v35 = vld [vmem:[%s19813_s8 + $0x1d0] sm:$0xff]   ;;  %v11341_v0 = vsel %vm8705_vm10, %v11336_v42, %v11340_v12  ;;  %v11607_v25 = vshrl.u32 %v22871_v22, 16 }
 0x972   : > { %18529 = vmatpush3.bf16.msra.mxu0 %v19541_v1  ;;  %18498 = vmatprep.subr.bf16.mxu1 %v19542_v41  ;;  %v11344_v1 = vor.u32 %v11342_v38, %v11340_v12  ;;  %v11639_v38 = vshrl.u32 %v22914_v5, 16  ;;  %v19577_v12 = vld [vmem:[%s19813_s8 + $0x220] sm:$0xff]   ;;  %v11645_v6 = vrot.slane %v11643_v53, 1 }
 0x973   : > { %18530 = vmatprep.subr.bf16.mxu0 %v19543_v34  ;;  %18452 = vmatprep.mubr.bf16.mxu1 %v15616_v24  ;;  %v11615_v24 = vshrl.u32 %v22879_v18, 16 }
 0x974   : > { %18484 = vmatprep.mubr.bf16.mxu0 %v11309_v37  ;;  %v11609_v37 = vor.u32 %v11607_v25, %v11605_v47 }
 0x975   : > { %18499 = vmatpush3.bf16.msra.mxu1 %v19542_v41  ;;  %v11611_v41 = vshll.u32 %v22879_v18, 16 }
 0x976   : > { %18531 = vmatpush3.bf16.msra.mxu0 %v19543_v34  ;;  %18500 = vmatprep.subr.bf16.mxu1 %v19546_v4  ;;  %v11349_v34 = vsel %vm8705_vm10, %v11344_v1, %v11348_v7  ;;  %v12059_v1 = vshrl.u32 %v22881_v58, 16 }
 0x977   : > { %18532 = vmatprep.subr.bf16.mxu0 %v19549_v55  ;;  %v11613_v43 = vrot.slane %v11611_v41, 1 }
 0x978   : > { %18453 = vmatmul.mubr.bf16.gmra.mxu1 %v15617_v16 }
 0x979   : > { %18501 = vmatpush3.bf16.msra.mxu1 %v19546_v4  ;;  %18485 = vmatmul.mubr.bf16.gmra.mxu0 %v11317_v62  ;;  %v11606_v4 = vsel %vm8705_vm10, %v11601_v8, %v11605_v47  ;;  %v11617_v16 = vor.u32 %v11615_v24, %v11613_v43  ;;  %v11614_v14 = vsel %vm8705_vm10, %v11609_v37, %v11613_v43  ;;  %v11627_v62 = vshll.u32 %v22906_v11, 16 }
 0x97a   : > { %18533 = vmatpush3.bf16.msra.mxu0 %v19549_v55  ;;  %18502 = vmatprep.subr.bf16.mxu1 %v19550_v56  ;;  %v19571_v55 = vld [vmem:[%s19813_s8 + $0x238] sm:$0xff]   ;;  %v12067_v43 = vrot.slane %v11603_v46, 2  ;;  %v12071_v46 = vrot.slane %v11611_v41, 2 }
 0x97b   : > { %18534 = vmatprep.subr.bf16.mxu0 %v19551_v32  ;;  %18456 = vmatprep.mubr.bf16.mxu1 %v15618_v49  ;;  %v11622_v27 = vsel %vm8705_vm10, %v11617_v16, %v11621_v51  ;;  %v11635_v49 = vshll.u32 %v22914_v5, 16  ;;  %v19584_v16 = vld [vmem:[%s19813_s8 + $0x208] sm:$0xff]   ;;  %v11867_v51 = vrot.slane %v19583_v31, 1 }
 0x97c   : > { %18488 = vmatprep.mubr.bf16.mxu0 %v11325_v54  ;;  %v11629_v54 = vrot.slane %v11627_v62, 1 }
 0x97d   : > { %18503 = vmatpush3.bf16.msra.mxu1 %v19550_v56  ;;  %v11856_v56 = vsel %vm9278_vm11, %v11853_v2, %v11855_v19  ;;  %v11637_v20 = vrot.slane %v11635_v49, 1  ;;  %v11659_v2 = vshll.u32 %v19583_v31, 16 }
 0x97e   : > { %18535 = vmatpush3.bf16.msra.mxu0 %v19551_v32  ;;  %18504 = vmatprep.subr.bf16.mxu1 %v19554_v36  ;;  %v11631_v32 = vshrl.u32 %v22906_v11, 16 }
 0x97f   : > { %18536 = vmatprep.subr.bf16.mxu0 %v19557_v23  ;;  %v11661_v19 = vrot.slane %v11659_v2, 1 }
 0x980   : > { %18457 = vmatmul.mubr.bf16.gmra.mxu1 %v15619_v44  ;;  %v11633_v50 = vor.u32 %v11631_v32, %v11629_v54  ;;  %v11861_v44 = vrot.slane %v22914_v5, 1 }
 0x981   : > { %18505 = vmatpush3.bf16.msra.mxu1 %v19554_v36  ;;  %18489 = vmatmul.mubr.bf16.gmra.mxu0 %v11333_v30  ;;  %v11859_v36 = vrot.slane %v22906_v11, 1  ;;  %v11647_v30 = vshrl.u32 %v22930_v60, 16  ;;  %v12087_v11 = vrot.slane %v11643_v53, 2 }
 0x982   : > { %18537 = vmatpush3.bf16.msra.mxu0 %v19557_v23  ;;  %18506 = vmatprep.subr.bf16.mxu1 %v19558_v28  ;;  %v22938_v23 = vld [vmem:[#allocation2 + $0x90] sm:$0xff]   ;;  %v11638_v52 = vsel %vm8705_vm10, %v11633_v50, %v11637_v20 }
 0x983   : > { %18538 = vmatprep.subr.bf16.mxu0 %v19559_v35  ;;  %18460 = vmatprep.mubr.bf16.mxu1 %v15620_v39  ;;  %v11860_v42 = vsel %vm9278_vm11, %v11857_v59, %v11859_v36  ;;  %v11651_v3 = vshll.u32 %v22938_v23, 16  ;;  %v11641_v39 = vor.u32 %v11639_v38, %v11637_v20  ;;  %v11649_v7 = vor.u32 %v11647_v30, %v11645_v6 }
 0x984   : > { %18492 = vmatprep.mubr.bf16.mxu0 %v11341_v0  ;;  %v19580_v0 = vld [vmem:[%s19813_s8 + $0x218] sm:$0xff]   ;;  %v11865_v8 = vrot.slane %v22938_v23, 1  ;;  %v11655_v33 = vshrl.u32 %v22938_v23, 16 }
 0x985   : > { %18507 = vmatpush3.bf16.msra.mxu1 %v19558_v28  ;;  %v11630_v28 = vsel %vm8705_vm10, %v11625_v40, %v11629_v54  ;;  %v11646_v47 = vsel %vm8705_vm10, %v11641_v39, %v11645_v6  ;;  %v12078_v54 = vrot.slane %v11631_v32, 1  ;;  %v12086_v32 = vrot.slane %v11647_v30, 1 }
 0x986   : > { %18539 = vmatpush3.bf16.msra.mxu0 %v19559_v35  ;;  %18508 = vmatprep.subr.bf16.mxu1 %v19562_v21  ;;  %v11862_v35 = vsel %vm9278_vm11, %v11859_v36, %v11861_v44  ;;  %v12091_v5 = vrot.slane %v11651_v3, 2 }
 0x987   : > { %18540 = vmatprep.subr.bf16.mxu0 %v19565_v13 }
 0x988   : > { %18461 = vmatmul.mubr.bf16.gmra.mxu1 %v15621_v26  ;;  %v12062_v26 = vshll.u32 %v22881_v58, 16  ;;  %v12066_v58 = vrot.slane %v11607_v25, 1  ;;  %v12070_v25 = vrot.slane %v11615_v24, 1 }
 0x989   : > { %18509 = vmatpush3.bf16.msra.mxu1 %v19562_v21  ;;  %18493 = vmatmul.mubr.bf16.gmra.mxu0 %v11349_v34  ;;  %v11863_v21 = vrot.slane %v22930_v60, 1 }
 0x98a   : > { %18541 = vmatpush3.bf16.msra.mxu0 %v19565_v13  ;;  %18510 = vmatprep.subr.bf16.mxu1 %v19566_v15  ;;  %v11653_v13 = vrot.slane %v11651_v3, 1  ;;  %v12064_v37 = vrot.slane %v12062_v26, 2  ;;  %v12072_v24 = vor.u32 %v12071_v46, %v12070_v25 }
 0x98b   : > { %18542 = vmatprep.subr.bf16.mxu0 %v19567_v9  ;;  %18512 = vmatprep.mubr.bf16.mxu1 %v11606_v4  ;;  %v11864_v34 = vsel %vm9278_vm11, %v11861_v44, %v11863_v21 }
 0x98c   : > { %18544 = vmatprep.mubr.bf16.mxu0 %v11854_v29  ;;  %v11654_v4 = vsel %vm8705_vm10, %v11649_v7, %v11653_v13  ;;  %v11866_v29 = vsel %vm9278_vm11, %v11863_v21, %v11865_v8 }
 0x98d   : > { %18511 = vmatpush3.bf16.msra.mxu1 %v19566_v15  ;;  %v19581_v15 = vld [vmem:[%s19813_s8 + $0x210] sm:$0xff]  }
 0x98e   : > { %18543 = vmatpush3.bf16.msra.mxu0 %v19567_v9  ;;  %18560 = vmatprep.subr.bf16.mxu1 %v19571_v55  ;;  %v12061_v9 = vrot.slane %v12059_v1, 1 }
 0x990   : > { %18513 = vmatmul.mubr.bf16.vlgmr.msra.gmra.mxu1 %v11614_v14  ;;  %v12065_v59 = vor.u32 %v12064_v37, %v12061_v9  ;;  %v12068_v14 = vor.u32 %v12067_v43, %v12066_v58 }
 0x991   : > { %18561 = vmatpush3.bf16.msra.mxu1 %v19571_v55  ;;  %18545 = vmatmul.mubr.bf16.vlgmr.msra.gmra.mxu0 %v11856_v56  ;;  %v11657_v55 = vor.u32 %v11655_v33, %v11653_v13  ;;  %v11868_v56 = vsel %vm9278_vm11, %v11865_v8, %v11867_v51 }
 0x992   : > { %18562 = vmatprep.subr.bf16.mxu1 %v19573_v48  ;;  %18516 = vmatprep.mubr.bf16.mxu1 %v11622_v27  ;;  %v12074_v27 = vrot.slane %v11623_v10, 1  ;;  %v12069_v40 = vsel %vm9486_vm12, %v12065_v59, %v12068_v14  ;;  %v12073_v41 = vsel %vm9486_vm12, %v12068_v14, %v12072_v24  ;;  %v12079_v10 = vrot.slane %v11627_v62, 2  ;;  %v19586_v62 = vld [vmem:[#allocation2 + $0x98] ss:$0 sps:$4 sm:$0x33]  }
 0x993   : > { %18548 = vmatprep.mubr.bf16.mxu0 %v11858_v57  ;;  %v11662_v22 = vsel %vm8705_vm10, %v11657_v55, %v11661_v19  ;;  %v12075_v57 = vrot.slane %v11619_v45, 2  ;;  %v12082_v45 = vrot.slane %v11639_v38, 1  ;;  %v12095_v38 = vshrl.u32 %v19586_v62, 16 }
 0x994   : > { %v12080_v36 = vor.u32 %v12079_v10, %v12078_v54 }
 0x995   : > { %18563 = vmatpush3.bf16.msra.mxu1 %v19573_v48  ;;  %v19585_v48 = vld [vmem:[%s19813_s8 + $0x200] sm:$0xff]   ;;  %v12076_v18 = vor.u32 %v12075_v57, %v12074_v27 }
 0x996   : > { %18564 = vmatprep.subr.bf16.mxu1 %v19576_v61 }
 0x997   : > { %v12077_v63 = vsel %vm9486_vm12, %v12072_v24, %v12076_v18  ;;  %v12081_v20 = vsel %vm9486_vm12, %v12076_v18, %v12080_v36 }
 0x998   : > { %18517 = vmatmul.mubr.bf16.gmra.mxu1 %v11630_v28  ;;  %v12090_v28 = vrot.slane %v11655_v33, 1 }
 0x999   : > { %18565 = vmatpush3.bf16.msra.mxu1 %v19576_v61  ;;  %18549 = vmatmul.mubr.bf16.gmra.mxu0 %v11860_v42  ;;  %v12083_v61 = vrot.slane %v11635_v49, 2  ;;  %v12088_v49 = vor.u32 %v12087_v11, %v12086_v32  ;;  %v12098_v42 = vshll.u32 %v19586_v62, 16 }
 0x99a   : > { %18566 = vmatprep.subr.bf16.mxu1 %v19577_v12  ;;  %18520 = vmatprep.mubr.bf16.mxu1 %v11638_v52 }
 0x99b   : > { %18552 = vmatprep.mubr.bf16.mxu0 %v11862_v35  ;;  %v12084_v50 = vor.u32 %v12083_v61, %v12082_v45  ;;  %v12097_v35 = vrot.slane %v12095_v38, 1  ;;  %v12100_v30 = vrot.slane %v12098_v42, 2 }
 0x99d   : > { %18567 = vmatpush3.bf16.msra.mxu1 %v19577_v12  ;;  %v12085_v44 = vsel %vm9486_vm12, %v12080_v36, %v12084_v50  ;;  %v12092_v12 = vor.u32 %v12091_v5, %v12090_v28  ;;  %v12089_v52 = vsel %vm9486_vm12, %v12084_v50, %v12088_v49  ;;  %v12101_v53 = vor.u32 %v12100_v30, %v12097_v35 }
 0x99e   : > { %18568 = vmatprep.subr.bf16.mxu1 %v19580_v0 }
 0x99f   : > { %v12093_v60 = vsel %vm9486_vm12, %v12088_v49, %v12092_v12  ;;  %v12102_v39 = vsel %vm9486_vm12, %v12092_v12, %v12101_v53 }
 0x9a0   : > { %18521 = vmatmul.mubr.bf16.gmra.mxu1 %v11646_v47 }
 0x9a1   : > { %18569 = vmatpush3.bf16.msra.mxu1 %v19580_v0  ;;  %18553 = vmatmul.mubr.bf16.gmra.mxu0 %v11864_v34 }
 0x9a2   : > { %18570 = vmatprep.subr.bf16.mxu1 %v19581_v15  ;;  %18524 = vmatprep.mubr.bf16.mxu1 %v11654_v4 }
 0x9a3   : > { %18556 = vmatprep.mubr.bf16.mxu0 %v11866_v29 }
 0x9a5   : > { %18571 = vmatpush3.bf16.msra.mxu1 %v19581_v15 }
 0x9a6   : > { %18572 = vmatprep.subr.bf16.mxu1 %v19584_v16 }
 0x9a8   : > { %18525 = vmatmul.mubr.bf16.gmra.mxu1 %v11662_v22 }
 0x9a9   : > { %18573 = vmatpush3.bf16.msra.mxu1 %v19584_v16  ;;  %18557 = vmatmul.mubr.bf16.gmra.mxu0 %v11868_v56 }
 0x9aa   : > { %18574 = vmatprep.subr.bf16.mxu1 %v19585_v48  ;;  %18576 = vmatprep.mubr.bf16.mxu1 %v12069_v40 }
 0x9ad   : > { %18575 = vmatpush3.bf16.msra.mxu1 %v19585_v48 }
 0x9b0   : > { %18577 = vmatmul.mubr.bf16.vlgmr.msra.gmra.mxu1 %v12073_v41 }
 0x9b1   : > { %18580 = vmatprep.mubr.bf16.mxu1 %v12077_v63 }
 0x9b8   : > { %18581 = vmatmul.mubr.bf16.gmra.mxu1 %v12081_v20 }
 0x9b9   : > { %18584 = vmatprep.mubr.bf16.mxu1 %v12085_v44 }
 0x9c0   : > { %18585 = vmatmul.mubr.bf16.gmra.mxu1 %v12089_v52 }
 0x9c1   : > { %18588 = vmatprep.mubr.bf16.mxu1 %v12093_v60 }
 0x9c8   : > { %18589 = vmatmul.mubr.bf16.gmra.mxu1 %v12102_v39 }
 0x9f0   : > { %v18322_v23 = vpop.f32.mrf.mxu1 }
 0x9f1   : > { %v18354_v3 = vpop.f32.mrf.mxu0 }
 0x9f2   : > { %v10400_v6 = vadd.f32 %v18354_v3, %v18322_v23  ;;  %v10155_v31 = vpop.f32.mrf.mxu1 }
 0x9f3   : > { %v10391_v0 = vpop.f32.mrf.mxu0 }
 0x9f4   : > { %v10392_v21 = vadd.f32 %v10391_v0, %v10155_v31  ;;  %v18323_v1 = vpop.f32.mrf.mxu1 }
 0x9f5   : > { %v18355_v7 = vpop.f32.mrf.mxu0 }
 0x9f6   : > { %v10403_v13 = vadd.f32 %v18355_v7, %v18323_v1  ;;  %v10158_v26 = vpop.f32.mrf.mxu1 }
 0x9f7   : > { %v10394_v8 = vpop.f32.mrf.mxu0 }
 0x9f8   : > { %v10395_v47 = vadd.f32 %v10394_v8, %v10158_v26  ;;  %v18326_v33 = vpop.f32.mrf.mxu1 }
 0x9f9   : > { %v18358_v2 = vpop.f32.mrf.mxu0 }
 0x9fa   : > { %v10416_v34 = vadd.f32 %v18358_v2, %v18326_v33  ;;  %v10171_v15 = vpop.f32.mrf.mxu1 }
 0x9fb   : > { %v10407_v9 = vpop.f32.mrf.mxu0 }
 0x9fc   : > { %v10408_v4 = vadd.f32 %v10407_v9, %v10171_v15  ;;  %v18327_v37 = vpop.f32.mrf.mxu1 }
 0x9fd   : > { %v18359_v58 = vpop.f32.mrf.mxu0 }
 0x9fe   : > { %v10419_v43 = vadd.f32 %v18359_v58, %v18327_v37  ;;  %v10174_v29 = vpop.f32.mrf.mxu1 }
 0x9ff   : > { %v10410_v55 = vpop.f32.mrf.mxu0 }
 0xa00   : > { %v10411_v19 = vadd.f32 %v10410_v55, %v10174_v29  ;;  %v18330_v16 = vpop.f32.mrf.mxu1 }
 0xa01   : > { %v18362_v51 = vpop.f32.mrf.mxu0 }
 0xa02   : > { %v10432_v59 = vadd.f32 %v18362_v51, %v18330_v16  ;;  %v10187_v14 = vpop.f32.mrf.mxu1 }
 0xa03   : > { %v10423_v25 = vpop.f32.mrf.mxu0 }
 0xa04   : > { %v10424_v22 = vadd.f32 %v10423_v25, %v10187_v14  ;;  %v18331_v46 = vpop.f32.mrf.mxu1 }
 0xa05   : > { %v18363_v56 = vpop.f32.mrf.mxu0 }
 0xa06   : > { %v10435_v48 = vadd.f32 %v18363_v56, %v18331_v46  ;;  %v10190_v27 = vpop.f32.mrf.mxu1 }
 0xa07   : > { %v10426_v57 = vpop.f32.mrf.mxu0 }
 0xa08   : > { %v10427_v40 = vadd.f32 %v10426_v57, %v10190_v27  ;;  %v18334_v24 = vpop.f32.mrf.mxu1 }
 0xa09   : > { %v18366_v18 = vpop.f32.mrf.mxu0 }
 0xa0a   : > { %v10448_v41 = vadd.f32 %v18366_v18, %v18334_v24  ;;  %v10203_v54 = vpop.f32.mrf.mxu1 }
 0xa0b   : > { %v10439_v10 = vpop.f32.mrf.mxu0 }
 0xa0c   : > { %v10440_v63 = vadd.f32 %v10439_v10, %v10203_v54  ;;  %v18335_v45 = vpop.f32.mrf.mxu1 }
 0xa0d   : > { %v18367_v61 = vpop.f32.mrf.mxu0 }
 0xa0e   : > { %v10451_v36 = vadd.f32 %v18367_v61, %v18335_v45  ;;  %v10206_v50 = vpop.f32.mrf.mxu1 }
 0xa0f   : > { %v10442_v20 = vpop.f32.mrf.mxu0 }
 0xa10   : > { %v10443_v32 = vadd.f32 %v10442_v20, %v10206_v50  ;;  %v18386_v11 = vpop.f32.mrf.mxu1 }
 0xa11   : > { %v10674_v62 = vadd.f32 %v18386_v11, %v10400_v6  ;;  %v18418_v44 = vpop.f32.mrf.mxu0 }
 0xa12   : > { %v10609_v28 = vpop.f32.mrf.mxu1 }
 0xa13   : > { %v10672_v5 = vadd.f32 %v10609_v28, %v10392_v21  ;;  %v10999_v49 = vadd.f32 %v18418_v44, %v10674_v62  ;;  %v10934_v38 = vpop.f32.mrf.mxu0 }
 0xa14   : > { %v18387_v42 = vpop.f32.mrf.mxu1 }
 0xa15   : > { %v10675_v12 = vadd.f32 %v18387_v42, %v10403_v13  ;;  %v10997_v52 = vadd.f32 %v10934_v38, %v10672_v5  ;;  %v18419_v35 = vpop.f32.mrf.mxu0 }
 0xa16   : > { %v10612_v30 = vpop.f32.mrf.mxu1 }
 0xa17   : > { %v10673_v60 = vadd.f32 %v10612_v30, %v10395_v47  ;;  %v11000_v53 = vadd.f32 %v18419_v35, %v10675_v12  ;;  %v10937_v39 = vpop.f32.mrf.mxu0 }
 0xa18   : > { %v18390_v23 = vpop.f32.mrf.mxu1 }
 0xa19   : > { %v10678_v3 = vadd.f32 %v18390_v23, %v10416_v34  ;;  %v10998_v31 = vadd.f32 %v10937_v39, %v10673_v60  ;;  %v18422_v0 = vpop.f32.mrf.mxu0 }
 0xa1a   : > { %v10625_v1 = vpop.f32.mrf.mxu1 }
 0xa1b   : > { %v10676_v7 = vadd.f32 %v10625_v1, %v10408_v4  ;;  %v11003_v6 = vadd.f32 %v18422_v0, %v10678_v3  ;;  %v10950_v26 = vpop.f32.mrf.mxu0 }
 0xa1c   : > { %v18391_v8 = vpop.f32.mrf.mxu1 }
 0xa1d   : > { %v10679_v21 = vadd.f32 %v18391_v8, %v10419_v43  ;;  %v11001_v33 = vadd.f32 %v10950_v26, %v10676_v7  ;;  %v18423_v2 = vpop.f32.mrf.mxu0 }
 0xa1e   : > { %v10628_v15 = vpop.f32.mrf.mxu1 }
 0xa1f   : > { %v10677_v13 = vadd.f32 %v10628_v15, %v10411_v19  ;;  %v11004_v9 = vadd.f32 %v18423_v2, %v10679_v21  ;;  %v10953_v37 = vpop.f32.mrf.mxu0 }
 0xa20   : > { %v18394_v58 = vpop.f32.mrf.mxu1 }
 0xa21   : > { %v10682_v47 = vadd.f32 %v18394_v58, %v10432_v59  ;;  %v11002_v29 = vadd.f32 %v10953_v37, %v10677_v13  ;;  %v18426_v55 = vpop.f32.mrf.mxu0 }
 0xa22   : > { %v10641_v16 = vpop.f32.mrf.mxu1 }
 0xa23   : > { %v10680_v34 = vadd.f32 %v10641_v16, %v10424_v22  ;;  %v11007_v51 = vadd.f32 %v18426_v55, %v10682_v47  ;;  %v10966_v14 = vpop.f32.mrf.mxu0 }
 0xa24   : > { %v18395_v25 = vpop.f32.mrf.mxu1 }
 0xa25   : > { %v10683_v4 = vadd.f32 %v18395_v25, %v10435_v48  ;;  %v11005_v46 = vadd.f32 %v10966_v14, %v10680_v34  ;;  %v18427_v56 = vpop.f32.mrf.mxu0 }
 0xa26   : > { %v10644_v27 = vpop.f32.mrf.mxu1 }
 0xa27   : > { %v10681_v43 = vadd.f32 %v10644_v27, %v10427_v40  ;;  %v11008_v57 = vadd.f32 %v18427_v56, %v10683_v4  ;;  %v10969_v24 = vpop.f32.mrf.mxu0 }
 0xa28   : > { %v18398_v18 = vpop.f32.mrf.mxu1 }
 0xa29   : > { %v23007_v19 = vadd.f32 %v18398_v18, %v10448_v41  ;;  %v11006_v54 = vadd.f32 %v10969_v24, %v10681_v43  ;;  %v23009_v10 = vpop.f32.mrf.mxu0 }
 0xa2a   : > { %v10657_v59 = vpop.f32.mrf.mxu1 }
 0xa2b   : > { %v23011_v45 = vadd.f32 %v10657_v59, %v10440_v63  ;;  %v23013_v22 = vpop.f32.mrf.mxu0 }
 0xa2c   : > { %v18399_v61 = vpop.f32.mrf.mxu1 }
 0xa2d   : > { %v23015_v50 = vadd.f32 %v18399_v61, %v10451_v36  ;;  %v23017_v48 = vpop.f32.mrf.mxu0 }
 0xa2e   : > { %v10660_v20 = vpop.f32.mrf.mxu1 }
 0xa2f   : > { %v23019_v40 = vadd.f32 %v10660_v20, %v10443_v32  ;;  %v23021_v11 = vpop.f32.mrf.mxu0 }
 0xa30   : > { %23953 = vst [vmem:[#allocation17_spill] sm:$0xff] %v23021_v11  ;;  %v18450_v41 = vpop.f32.mrf.mxu1 }
 0xa31   : > { %23952 = vst [vmem:[#allocation16_spill] sm:$0xff] %v23019_v40  ;;  %v23023_v62 = vadd.f32 %v18450_v41, %v10999_v49  ;;  %v18482_v44 = vpop.f32.mrf.mxu0 }
 0xa32   : > { %v11127_v28 = vpop.f32.mrf.mxu1 }
 0xa33   : > { %v23025_v5 = vadd.f32 %v11127_v28, %v10997_v52  ;;  %v11440_v63 = vpop.f32.mrf.mxu0 }
 0xa34   : > { %v18451_v38 = vpop.f32.mrf.mxu1 }
 0xa35   : > { %v23027_v42 = vadd.f32 %v18451_v38, %v11000_v53  ;;  %v18483_v36 = vpop.f32.mrf.mxu0 }
 0xa36   : > { %v11130_v12 = vpop.f32.mrf.mxu1 }
 0xa37   : > { %v23029_v35 = vadd.f32 %v11130_v12, %v10998_v31  ;;  %v23031_v30 = vpop.f32.mrf.mxu0 }
 0xa38   : > { %v18454_v32 = vpop.f32.mrf.mxu1 }
 0xa39   : > { %v23033_v60 = vadd.f32 %v18454_v32, %v11003_v6  ;;  %v23035_v39 = vpop.f32.mrf.mxu0 }
 0xa3a   : > { %v11143_v49 = vpop.f32.mrf.mxu1 }
 0xa3b   : > { %v23037_v23 = vadd.f32 %v11143_v49, %v11001_v33  ;;  %v23039_v52 = vpop.f32.mrf.mxu0 }
 0xa3c   : > { %v18455_v3 = vpop.f32.mrf.mxu1 }
 0xa3d   : > { %v23041_v0 = vadd.f32 %v18455_v3, %v11004_v9  ;;  %v23043_v53 = vpop.f32.mrf.mxu0 }
 0xa3e   : > { %v11146_v1 = vpop.f32.mrf.mxu1 }
 0xa3f   : > { %v23045_v31 = vadd.f32 %v11146_v1, %v11002_v29  ;;  %v23047_v7 = vpop.f32.mrf.mxu0 }
 0xa40   : > { %v18458_v26 = vpop.f32.mrf.mxu1 }
 0xa41   : > { %v23049_v6 = vadd.f32 %v18458_v26, %v11007_v51  ;;  %v23051_v8 = vpop.f32.mrf.mxu0 }
 0xa42   : > { %v11159_v21 = vpop.f32.mrf.mxu1 }
 0xa43   : > { %v23053_v33 = vadd.f32 %v11159_v21, %v11005_v46  ;;  %v23055_v2 = vpop.f32.mrf.mxu0  ;;  %v11505_v21 = vadd.f32 %v18482_v44, %v23023_v62  ;;  %v11509_v62 = vadd.f32 %v23035_v39, %v23033_v60 }
 0xa44   : > { %v18459_v15 = vpop.f32.mrf.mxu1 }
 0xa45   : > { %v23057_v13 = vadd.f32 %v18459_v15, %v11008_v57  ;;  %v23059_v9 = vpop.f32.mrf.mxu0 }
 0xa46   : > { %v11162_v37 = vpop.f32.mrf.mxu1 }
 0xa47   : > { %v23061_v58 = vadd.f32 %v11162_v37, %v11006_v54  ;;  %v23063_v47 = vpop.f32.mrf.mxu0 }
 0xa48   : > { %v23065_v29 = vpop.f32.mrf.mxu1 }
 0xa49   : > { %v23067_v55 = vpop.f32.mrf.mxu0 }
 0xa4a   : > { %23954 = vst [vmem:[#allocation18_spill] sm:$0xff] %v23067_v55  ;;  %v23069_v16 = vpop.f32.mrf.mxu1 }
 0xa4b   : > { %v23071_v34 = vpop.f32.mrf.mxu0 }
 0xa4c   : > { %23955 = vst [vmem:[#allocation20_spill] sm:$0xff] %v23071_v34  ;;  %v23073_v51 = vpop.f32.mrf.mxu1  ;;  %v11506_v34 = vadd.f32 %v18483_v36, %v23027_v42 }
 0xa4d   : > { %23956 = vst [vmem:[#allocation24_spill] sm:$0xff] %v23073_v51  ;;  %v23075_v14 = vpop.f32.mrf.mxu0 }
 0xa4e   : > { %23957 = vst [vmem:[#allocation19_spill] sm:$0xff] %v23075_v14  ;;  %v23077_v25 = vpop.f32.mrf.mxu1 }
 0xa4f   : > { %23958 = vst [vmem:[#allocation22_spill] sm:$0xff] %v23077_v25  ;;  %v23079_v4 = vpop.f32.mrf.mxu0 }
 0xa50   : > { %23959 = vst [vmem:[#allocation25_spill] sm:$0xff] %v23079_v4  ;;  %v18514_v46 = vpop.f32.mrf.mxu1  ;;  %v11503_v4 = vadd.f32 %v11440_v63, %v23025_v5 }
 0xa51   : > { %v18546_v56 = vpop.f32.mrf.mxu0  ;;  %v11818_v14 = vadd.f32 %v18514_v46, %v11505_v21  ;;  %v11507_v46 = vadd.f32 %v23039_v52, %v23037_v23  ;;  %v11508_v52 = vadd.f32 %v23047_v7, %v23045_v31 }
 0xa52   : > { %v11753_v27 = vpop.f32.mrf.mxu1 }
 0xa53   : > { %v11959_v43 = vpop.f32.mrf.mxu0  ;;  %v11816_v51 = vadd.f32 %v11753_v27, %v11503_v4 }
 0xa54   : > { %v18515_v57 = vpop.f32.mrf.mxu1 }
 0xa55   : > { %v18547_v18 = vpop.f32.mrf.mxu0  ;;  %v11819_v40 = vadd.f32 %v18515_v57, %v11506_v34 }
 0xa56   : > { %v11756_v24 = vpop.f32.mrf.mxu1 }
 0xa57   : > { %v11962_v59 = vpop.f32.mrf.mxu0  ;;  %v12025_v27 = vadd.f32 %v18547_v18, %v11819_v40  ;;  %v11513_v18 = vadd.f32 %v23051_v8, %v23049_v6 }
 0xa58   : > { %v18518_v54 = vpop.f32.mrf.mxu1 }
 0xa59   : > { %v18550_v41 = vpop.f32.mrf.mxu0  ;;  %v11822_v42 = vadd.f32 %v18518_v54, %v11509_v62 }
 0xa5a   : > { %v11769_v61 = vpop.f32.mrf.mxu1 }
 0xa5b   : > { %v11975_v12 = vpop.f32.mrf.mxu0  ;;  %v11820_v34 = vadd.f32 %v11769_v61, %v11507_v46  ;;  %v12028_v40 = vadd.f32 %v18550_v41, %v11822_v42  ;;  %v11511_v41 = vadd.f32 %v23055_v2, %v23053_v33  ;;  %v11012_v46 = vadd.f32 %v23017_v48, %v23015_v50  ;;  %v23965_v50 = vld [vmem:[#allocation18_spill] sm:$0xff] }
 0xa5c   : > { %v18519_v20 = vpop.f32.mrf.mxu1 }
 0xa5d   : > { %v18551_v3 = vpop.f32.mrf.mxu0  ;;  %v12026_v54 = vadd.f32 %v11975_v12, %v11820_v34  ;;  %v11009_v12 = vadd.f32 %v23013_v22, %v23011_v45  ;;  %v11512_v45 = vadd.f32 %v23063_v47, %v23061_v58  ;;  %v23966_v34 = vld [vmem:[#allocation24_spill] sm:$0xff] }
 0xa5e   : > { %v11772_v28 = vpop.f32.mrf.mxu1  ;;  %v11205_v58 = vadd.f32 %v23966_v34, %v11012_v46 }
 0xa5f   : > { %v11978_v15 = vpop.f32.mrf.mxu0  ;;  %v11821_v61 = vadd.f32 %v11772_v28, %v11508_v52  ;;  %v11202_v22 = vadd.f32 %v23069_v16, %v11009_v12  ;;  %v23968_v52 = vld [vmem:[#allocation20_spill] sm:$0xff] }
 0xa60   : > { %v18522_v38 = vpop.f32.mrf.mxu1 }
 0xa61   : > { %v18554_v55 = vpop.f32.mrf.mxu0  ;;  %v12027_v2 = vadd.f32 %v11978_v15, %v11821_v61 }
 0xa62   : > { %v23081_v32 = vpop.f32.mrf.mxu1 }
 0xa63   : > { %v11991_v36 = vpop.f32.mrf.mxu0 }
 0xa64   : > { %v23083_v49 = vpop.f32.mrf.mxu1 }
 0xa66   : > { %v23085_v1 = vpop.f32.mrf.mxu1 }
 0xa67   : > { %23960 = vst [vmem:[#allocation21_spill] sm:$0xff] %v23085_v1  ;;  %v11504_v1 = vadd.f32 %v23031_v30, %v23029_v35  ;;  %v11510_v30 = vadd.f32 %v23043_v53, %v23041_v0 }
 0xa68   : > { %v23087_v26 = vpop.f32.mrf.mxu1 }
 0xa69   : > { %23961 = vst [vmem:[#allocation26_spill] sm:$0xff] %v23087_v26  ;;  %v12024_v26 = vadd.f32 %v18546_v56, %v11818_v14  ;;  %v11817_v5 = vadd.f32 %v11756_v24, %v11504_v1  ;;  %v18555_v56 = vpop.f32.mrf.mxu0  ;;  %v11823_v57 = vadd.f32 %v18519_v20, %v11510_v30  ;;  %v11011_v20 = vadd.f32 %v23009_v10, %v23007_v19 }
 0xa6a   : > { %v23090_v37 = vpop.f32.mrf.mxu1  ;;  %v11824_v10 = vadd.f32 %v23081_v32, %v11511_v41  ;;  %v23971_v41 = vld [vmem:[#allocation19_spill] sm:$0xff] }
 0xa6b   : > { %23962 = vst [vmem:[#allocation23_spill] sm:$0xff] %v23090_v37  ;;  %v12022_v37 = vadd.f32 %v11959_v43, %v11816_v51  ;;  %v12023_v39 = vadd.f32 %v11962_v59, %v11817_v5  ;;  %v11514_v5 = vadd.f32 %v23059_v9, %v23057_v13  ;;  %v11204_v19 = vadd.f32 %v23065_v29, %v11011_v20 }
 0xa6c   : > { %v23093_v25 = vpop.f32.mrf.mxu1  ;;  %v12030_v47 = vadd.f32 %v11991_v36, %v11824_v10 }
 0xa6d   : > { %v11827_v32 = vadd.f32 %v23083_v49, %v11514_v5  ;;  %v11517_v48 = vadd.f32 %v23965_v50, %v11204_v19 }
 0xa6e   : > { %v23096_v11 = vpop.f32.mrf.mxu1 }
 0xa6f   : > { %v12033_v61 = vadd.f32 %v18555_v56, %v11827_v32 }
 0xa70   : > { %v18578_v44 = vpop.f32.mrf.mxu1 }
 0xa71   : > { %v12258_v63 = vadd.f32 %v18578_v44, %v12024_v26  ;;  %v11826_v26 = vadd.f32 %v18522_v38, %v11513_v18  ;;  %v12029_v44 = vadd.f32 %v18551_v3, %v11823_v57 }
 0xa72   : > { %v12193_v4 = vpop.f32.mrf.mxu1 }
 0xa73   : > { %v23105_v21 = vadd.f32 %v12258_v63, %v22362_v17  ;;  %v12256_v35 = vadd.f32 %v12193_v4, %v12022_v37  ;;  %v11994_v37 = vpop.f32.mrf.mxu0  ;;  %v12032_v13 = vadd.f32 %v18554_v55, %v11826_v26  ;;  %v23967_v55 = vld [vmem:[#allocation21_spill] sm:$0xff]  ;;  %v11518_v26 = vadd.f32 %v23971_v41, %v11205_v58 }
 0xa74   : > { %v18579_v60 = vpop.f32.mrf.mxu1 }
 0xa75   : > { %v12290_v51 = vmax.f32 %v23105_v21, 0.0  ;;  %v23111_v14 = vadd.f32 %v12256_v35, %v22362_v17  ;;  %v12259_v23 = vadd.f32 %v18579_v60, %v12025_v27  ;;  %v18558_v9 = vpop.f32.mrf.mxu0  ;;  %v23963_v27 = vld [vmem:[#allocation16_spill] sm:$0xff]  ;;  %v23964_v35 = vld [vmem:[#allocation17_spill] sm:$0xff]  ;;  %v11825_v60 = vadd.f32 %v23967_v55, %v11512_v45 }
 0xa76   : > { %v12196_v43 = vpop.f32.mrf.mxu1  ;;  %v11010_v30 = vadd.f32 %v23964_v35, %v23963_v27  ;;  %v11831_v45 = vadd.f32 %v23093_v25, %v11518_v26 }
 0xa77   : > { %v12288_v24 = vmax.f32 %v23111_v14, 0.0  ;;  %v23117_v0 = vadd.f32 %v12259_v23, %v22362_v17  ;;  %v12257_v53 = vadd.f32 %v12196_v43, %v12023_v39  ;;  %v23969_v43 = vld [vmem:[#allocation22_spill] sm:$0xff]  ;;  %v12031_v12 = vadd.f32 %v11994_v37, %v11825_v60 }
 0xa78   : > { %v18582_v59 = vpop.f32.mrf.mxu1  ;;  %v11203_v57 = vadd.f32 %v23969_v43, %v11010_v30 }
 0xa79   : > { %v12291_v1 = vmax.f32 %v23117_v0, 0.0  ;;  %v23123_v31 = vadd.f32 %v12257_v53, %v22362_v17  ;;  %v12262_v7 = vadd.f32 %v18582_v59, %v12028_v40  ;;  %v11515_v40 = vadd.f32 %v23968_v52, %v11202_v22  ;;  %v23970_v53 = vld [vmem:[#allocation26_spill] sm:$0xff] }
 0xa7a   : > { %v12209_v62 = vpop.f32.mrf.mxu1  ;;  %v11830_v18 = vadd.f32 %v23970_v53, %v11517_v48 }
 0xa7b   : > { %v12289_v6 = vmax.f32 %v23123_v31, 0.0  ;;  %v23131_v8 = vadd.f32 %v12262_v7, %v22362_v17  ;;  %v12260_v28 = vadd.f32 %v12209_v62, %v12026_v54  ;;  %v12007_v54 = vpop.f32.mrf.mxu0  ;;  %v23972_v62 = vld [vmem:[#allocation23_spill] sm:$0xff] }
 0xa7c   : > { %v18583_v33 = vpop.f32.mrf.mxu1 }
 0xa7d   : > { %v12294_v38 = vmax.f32 %v23131_v8, 0.0  ;;  %v23141_v3 = vadd.f32 %v12260_v28, %v22362_v17  ;;  %v12263_v63 = vadd.f32 %v18583_v33, %v12029_v44  ;;  %v11828_v44 = vadd.f32 %v23972_v62, %v11515_v40  ;;  %v23973_v33 = vld [vmem:[#allocation25_spill] sm:$0xff] }
 0xa7e   : > { %v12212_v29 = vpop.f32.mrf.mxu1  ;;  %v11516_v56 = vadd.f32 %v23973_v33, %v11203_v57 }
 0xa7f   : > { %v12292_v15 = vmax.f32 %v23141_v3, 0.0  ;;  %v23151_v42 = vadd.f32 %v12263_v63, %v22362_v17  ;;  %v12261_v4 = vadd.f32 %v12212_v29, %v12027_v2  ;;  %v12036_v2 = vadd.f32 %v18558_v9, %v11830_v18  ;;  %v18559_v63 = vpop.f32.mrf.mxu0 }
 0xa80   : > { %v18586_v16 = vpop.f32.mrf.mxu1  ;;  %v12034_v37 = vadd.f32 %v12007_v54, %v11828_v44  ;;  %v12037_v48 = vadd.f32 %v18559_v63, %v11831_v45 }
 0xa81   : > { %v12295_v39 = vmax.f32 %v23151_v42, 0.0  ;;  %v23160_v49 = vadd.f32 %v12261_v4, %v22362_v17  ;;  %v12266_v23 = vadd.f32 %v18586_v16, %v12032_v13  ;;  %v11829_v4 = vadd.f32 %v23096_v11, %v11516_v56  ;;  %v12010_v30 = vpop.f32.mrf.mxu0 }
 0xa82   : > { %v12225_v59 = vpop.f32.mrf.mxu1 }
 0xa83   : > { %v12293_v36 = vmax.f32 %v23160_v49, 0.0  ;;  %v23167_v7 = vadd.f32 %v12266_v23, %v22362_v17  ;;  %v12264_v20 = vadd.f32 %v12225_v59, %v12030_v47  ;;  %v12035_v16 = vadd.f32 %v12010_v30, %v11829_v4 }
 0xa84   : > { %v18587_v28 = vpop.f32.mrf.mxu1 }
 0xa85   : > { %v12298_v5 = vmax.f32 %v23167_v7, 0.0  ;;  %v23173_v19 = vadd.f32 %v12264_v20, %v22362_v17  ;;  %v12267_v10 = vadd.f32 %v18587_v28, %v12033_v61 }
 0xa86   : > { %v12228_v46 = vpop.f32.mrf.mxu1 }
 0xa87   : > { %v12296_v22 = vmax.f32 %v23173_v19, 0.0  ;;  %v23179_v13 = vadd.f32 %v12267_v10, %v22362_v17  ;;  %v12265_v29 = vadd.f32 %v12228_v46, %v12031_v12 }
 0xa88   : > { %v18590_v32 = vpop.f32.mrf.mxu1 }
 0xa89   : > { %v12299_v27 = vmax.f32 %v23179_v13, 0.0  ;;  %v23184_v35 = vadd.f32 %v12265_v29, %v22362_v17  ;;  %v12270_v9 = vadd.f32 %v18590_v32, %v12036_v2 }
 0xa8a   : > { %v12241_v50 = vpop.f32.mrf.mxu1 }
 0xa8b   : > { %v12297_v25 = vmax.f32 %v23184_v35, 0.0  ;;  %v23188_v34 = vadd.f32 %v12270_v9, %v22362_v17  ;;  %v12268_v58 = vadd.f32 %v12241_v50, %v12034_v37 }
 0xa8c   : > { %v18591_v47 = vpop.f32.mrf.mxu1 }
 0xa8d   : > { %v12302_v55 = vmax.f32 %v23188_v34, 0.0  ;;  %v23192_v11 = vadd.f32 %v12268_v58, %v22362_v17  ;;  %v12271_v60 = vadd.f32 %v18591_v47, %v12037_v48 }
 0xa8e   : > { %v12244_v23 = vpop.f32.mrf.mxu1 }
 0xa8f   : > { %v12300_v52 = vmax.f32 %v23192_v11, 0.0  ;;  %v23196_v40 = vadd.f32 %v12271_v60, %v22362_v17  ;;  %v12269_v43 = vadd.f32 %v12244_v23, %v12035_v16  ;;  %12306 = sbr.rel (%p15480_p0) target bundleno = 2716 (0xa9c), region = 84 }
 0xa91   : > { %v12303_v57 = vmax.f32 %v23196_v40, 0.0  ;;  %v23200_v53 = vadd.f32 %v12269_v43, %v22362_v17 }
 0xa93   : > { %v12301_v18 = vmax.f32 %v23200_v53, 0.0 }
 0xa94   : > { %12307 = vst [vmem:[%s19818_s11 + $0x80] sm:$0xff] %v12288_v24  ;;  %12308 = vst [vmem:[%s19818_s11 + $0x88] sm:$0xff] %v12289_v6 }
 0xa95   : > { %12309 = vst [vmem:[%s19818_s11 + $0x90] sm:$0xff] %v12290_v51  ;;  %12310 = vst [vmem:[%s19818_s11 + $0x98] sm:$0xff] %v12291_v1 }
 0xa96   : > { %12311 = vst [vmem:[%s19818_s11 + $0xa0] sm:$0xff] %v12292_v15  ;;  %12312 = vst [vmem:[%s19818_s11 + $0xa8] sm:$0xff] %v12293_v36 }
 0xa97   : > { %12313 = vst [vmem:[%s19818_s11 + $0xb0] sm:$0xff] %v12294_v38  ;;  %12314 = vst [vmem:[%s19818_s11 + $0xb8] sm:$0xff] %v12295_v39 }
 0xa98   : > { %12315 = vst [vmem:[%s19818_s11 + $0xc0] sm:$0xff] %v12296_v22  ;;  %12316 = vst [vmem:[%s19818_s11 + $0xc8] sm:$0xff] %v12297_v25 }
 0xa99   : > { %12317 = vst [vmem:[%s19818_s11 + $0xd0] sm:$0xff] %v12298_v5  ;;  %12318 = vst [vmem:[%s19818_s11 + $0xd8] sm:$0xff] %v12299_v27 }
 0xa9a   : > { %12319 = vst [vmem:[%s19818_s11 + $0xe0] sm:$0xff] %v12300_v52  ;;  %12320 = vst [vmem:[%s19818_s11 + $0xe8] sm:$0xff] %v12301_v18 }
 0xa9b   : > { %12321 = vst [vmem:[%s19818_s11 + $0xf0] sm:$0xff] %v12302_v55  ;;  %12322 = vst [vmem:[%s19818_s11 + $0xf8] sm:$0xff] %v12303_v57 }
 0xa9c PF: > { %12325 = sbr.rel (%p15481_p1) target bundleno = 2880 (0xb40), region = 88 }
 0xaa1   : > { %v12328_v54 = vld [vmem:[%s23877_s3 + $0x90] sm:$0xff]  ;;  %v12326_v59 = vld [vmem:[%s23877_s3 + $0x80] sm:$0xff]  ;;  %v19735_v61 = vmov 0   ;;  %v12329_v20 = vld [vmem:[%s23877_s3 + $0x98] sm:$0xff] }
 0xaa2   : > { %19588 = vset.pattern.permute.xlu1 %v19735_v61  ;;  %19587 = vset.pattern.permute.xlu0 %v19735_v61  ;;  %v12327_v41 = vld [vmem:[%s23877_s3 + $0x88] sm:$0xff]  ;;  %v12330_v62 = vld [vmem:[%s23877_s3 + $0xa0] sm:$0xff]  ;;  %v12333_v44 = vld [vmem:[%s23877_s3 + $0xb8] sm:$0xff] }
 0xaa3   : > { %12354 = vperm.xlu1 %19588, %v12328_v54   ;;  %12344 = vperm.xlu0 %19587, %v12326_v59   ;;  %v12331_v26 = vld [vmem:[%s23877_s3 + $0xa8] sm:$0xff]  ;;  %v12332_v28 = vld [vmem:[%s23877_s3 + $0xb0] sm:$0xff]  ;;  %v12334_v10 = vld [vmem:[%s23877_s3 + $0xc0] sm:$0xff] }
 0xaa4   : > { %v12335_v12 = vld [vmem:[%s23877_s3 + $0xc8] sm:$0xff]  ;;  %v12337_v33 = vld [vmem:[%s23877_s3 + $0xd8] sm:$0xff]  ;;  %v12336_v56 = vld [vmem:[%s23877_s3 + $0xd0] sm:$0xff] }
 0xaa5   : > { %v12339_v2 = vld [vmem:[%s23877_s3 + $0xe8] sm:$0xff]  ;;  %v12338_v63 = vld [vmem:[%s23877_s3 + $0xe0] sm:$0xff]  ;;  %v12341_v46 = vld [vmem:[%s23877_s3 + $0xf8] sm:$0xff] }
 0xaa6   : > { %v12340_v45 = vld [vmem:[%s23877_s3 + $0xf0] sm:$0xff] }
 0xaa7   : > { %12359 = vperm.xlu1 %19588, %v12329_v20   ;;  %12349 = vperm.xlu0 %19587, %v12327_v41  }
 0xaab   : > { %12369 = vperm.xlu1 %19588, %v12331_v26   ;;  %12364 = vperm.xlu0 %19587, %v12330_v62  }
 0xaaf   : > { %12379 = vperm.xlu1 %19588, %v12333_v44   ;;  %12374 = vperm.xlu0 %19587, %v12332_v28  }
 0xab3   : > { %12389 = vperm.xlu1 %19588, %v12335_v12   ;;  %12384 = vperm.xlu0 %19587, %v12334_v10  }
 0xab7   : > { %12399 = vperm.xlu1 %19588, %v12337_v33   ;;  %12394 = vperm.xlu0 %19587, %v12336_v56  }
 0xabb   : > { %12409 = vperm.xlu1 %19588, %v12339_v2   ;;  %12404 = vperm.xlu0 %19587, %v12338_v63  }
 0xabf   : > { %12419 = vperm.xlu1 %19588, %v12341_v46   ;;  %12414 = vperm.xlu0 %19587, %v12340_v45  }
 0xb1e   : > { %v12355_v29 = vpop.permute.xlu1 %12354  ;;  %v12345_v37 = vpop.permute.xlu0 %12344 }
 0xb1f   : > { %v12422_v32 = vmul.f32 %v12345_v37, %v12288_v24  ;;  %v12424_v50 = vmul.f32 %v12355_v29, %v12290_v51 }
 0xb21   : > { %v16059_v4 = vpack.c.bf16 %v12422_v32, %v12422_v32 }
 0xb22   : > { %v12360_v9 = vpop.permute.xlu1 %12359  ;;  %v12350_v30 = vpop.permute.xlu0 %12349 }
 0xb23   : > { %12503 = vst [vmem:[#allocation2 + $0x114] sm:$0xf] %v16059_v4  ;;  %v12423_v48 = vmul.f32 %v12350_v30, %v12289_v6  ;;  %v12425_v60 = vmul.f32 %v12360_v9, %v12291_v1 }
 0xb25   : > { %v16222_v58 = vpack.c.bf16 %v12424_v50, %v12423_v48 }
 0xb26   : > { %v12370_v47 = vpop.permute.xlu1 %12369  ;;  %v12365_v16 = vpop.permute.xlu0 %12364 }
 0xb27   : > { %16296 = vst [vmem:[#allocation2 + $0x118] sm:$0xff] %v16222_v58   ;;  %v12426_v14 = vmul.f32 %v12365_v16, %v12292_v15  ;;  %v12427_v21 = vmul.f32 %v12370_v47, %v12293_v36 }
 0xb29   : > { %v16227_v24 = vpack.c.bf16 %v12426_v14, %v12425_v60 }
 0xb2a   : > { %v12380_v23 = vpop.permute.xlu1 %12379  ;;  %v12375_v43 = vpop.permute.xlu0 %12374 }
 0xb2b   : > { %16297 = vst [vmem:[#allocation2 + $0x120] sm:$0xff] %v16227_v24   ;;  %v12428_v51 = vmul.f32 %v12375_v43, %v12294_v38  ;;  %v12429_v0 = vmul.f32 %v12380_v23, %v12295_v39 }
 0xb2d   : > { %v16232_v31 = vpack.c.bf16 %v12428_v51, %v12427_v21 }
 0xb2e   : > { %v12390_v6 = vpop.permute.xlu1 %12389  ;;  %v12385_v54 = vpop.permute.xlu0 %12384 }
 0xb2f   : > { %16298 = vst [vmem:[#allocation2 + $0x128] sm:$0xff] %v16232_v31   ;;  %v12430_v1 = vmul.f32 %v12385_v54, %v12296_v22  ;;  %v12431_v49 = vmul.f32 %v12390_v6, %v12297_v25 }
 0xb31   : > { %v16237_v3 = vpack.c.bf16 %v12430_v1, %v12429_v0 }
 0xb32   : > { %v12400_v15 = vpop.permute.xlu1 %12399  ;;  %v12395_v59 = vpop.permute.xlu0 %12394 }
 0xb33   : > { %16299 = vst [vmem:[#allocation2 + $0x130] sm:$0xff] %v16237_v3   ;;  %v12432_v8 = vmul.f32 %v12395_v59, %v12298_v5  ;;  %v12433_v42 = vmul.f32 %v12400_v15, %v12299_v27 }
 0xb35   : > { %v16242_v38 = vpack.c.bf16 %v12432_v8, %v12431_v49 }
 0xb36   : > { %v12410_v36 = vpop.permute.xlu1 %12409  ;;  %v12405_v61 = vpop.permute.xlu0 %12404 }
 0xb37   : > { %16300 = vst [vmem:[#allocation2 + $0x138] sm:$0xff] %v16242_v38   ;;  %v12434_v39 = vmul.f32 %v12405_v61, %v12300_v52  ;;  %v12435_v35 = vmul.f32 %v12410_v36, %v12301_v18 }
 0xb39   : > { %v16247_v19 = vpack.c.bf16 %v12434_v39, %v12433_v42 }
 0xb3a   : > { %v12420_v22 = vpop.permute.xlu1 %12419  ;;  %v12415_v20 = vpop.permute.xlu0 %12414 }
 0xb3b   : > { %16301 = vst [vmem:[#allocation2 + $0x140] sm:$0xff] %v16247_v19   ;;  %v12437_v7 = vmul.f32 %v12420_v22, %v12303_v57  ;;  %v12436_v5 = vmul.f32 %v12415_v20, %v12302_v55 }
 0xb3d   : > { %v16074_v25 = vpack.c.bf16 %v12437_v7, %v12437_v7  ;;  %v16252_v13 = vpack.c.bf16 %v12436_v5, %v12435_v35 }
 0xb3f   : > { %12518 = vst [vmem:[#allocation2 + $0x150] sm:$0xf] %v16074_v25  ;;  %16302 = vst [vmem:[#allocation2 + $0x148] sm:$0xff] %v16252_v13  }
 0xb40 PF: > { %v19589_v27 = vld [vmem:[%s19813_s8 + $0x78] sm:$0xff]   ;;  %v19736_v11 = vmov 0.0   ;;  %v19591_v34 = vld [vmem:[%s19813_s8 + $0x70] sm:$0xff]   ;;  %vm19737_vm13 = vmmov 0   ;;  %v19593_v40 = vld [vmem:[%s19813_s8 + $0x68] sm:$0xff]  }
 0xb41   : > { %18592 = vmatprep.subr.bf16.mxu0 %v19736_v11  ;;  %18628 = vmatprep.subr.bf16.mxu1 %v19736_v11  ;;  %v19590_v52 = vld [vmem:[%s19813_s8 + $0x38] sm:$0xff]   ;;  %v19592_v55 = vld [vmem:[%s19813_s8 + $0x30] sm:$0xff]   ;;  %v19594_v57 = vld [vmem:[%s19813_s8 + $0x28] sm:$0xff]  }
 0xb42   : > { %18593 = vmatpush3.bf16.msra.mxu0 %v19589_v27  ;;  %18608 = vmatprep.mubr.msk.bf16.mxu0 %vm19737_vm13, %v19736_v11  ;;  %v19595_v53 = vld [vmem:[%s19813_s8 + $0x60] sm:$0xff]   ;;  %v19597_v41 = vld [vmem:[%s19813_s8 + $0x58] sm:$0xff]   ;;  %v12520_v62 = vld [vmem:[#allocation2 + $0x88] sm:$0xf] }
 0xb43   : > { %18629 = vmatpush3.bf16.msra.mxu1 %v19590_v52  ;;  %18594 = vmatprep.subr.bf16.mxu0 %v19736_v11  ;;  %v19596_v18 = vld [vmem:[%s19813_s8 + $0x20] sm:$0xff]   ;;  %v19598_v26 = vld [vmem:[%s19813_s8 + $0x18] sm:$0xff]   ;;  %v19599_v44 = vld [vmem:[%s19813_s8 + $0x50] sm:$0xff]  }
 0xb44   : > { %18630 = vmatprep.subr.bf16.mxu1 %v19736_v11  ;;  %18644 = vmatprep.mubr.msk.bf16.mxu1 %vm19737_vm13, %v19736_v11  ;;  %v23360_v28 = vld [vmem:[#allocation2 + $0x8c] sm:$0xff]   ;;  %v12519_v12 = vld [vmem:[#allocation2 + $0x84] sm:$0xc]  ;;  %v23375_v30 = vld [vmem:[#allocation2 + $0x94] sm:$0xff]  }
 0xb45   : > { %v12545_v10 = vld [vmem:[#allocation2 + $0x84] sm:$0x8]  ;;  %v15793_v33 = vcombine.low %v12519_v12, %v12520_v62  ;;  %v19600_v56 = vld [vmem:[%s19813_s8 + $0x10] sm:$0xff]   ;;  %v12733_v2 = vshrl.u32 %v23360_v28, 16  ;;  %v12736_v63 = vshll.u32 %v23360_v28, 16  ;;  %v19601_v29 = vld [vmem:[%s19813_s8 + $0x48] sm:$0xff]  }
 0xb46   : > { %18595 = vmatpush3.bf16.msra.mxu0 %v19591_v34  ;;  %v23368_v37 = vcombine.low %v12545_v10, %v12520_v62  ;;  %v19602_v32 = vld [vmem:[%s19813_s8 + $0x8] sm:$0xff]   ;;  %v19603_v58 = vld [vmem:[%s19813_s8 + $0x40] sm:$0xff]   ;;  %v12588_v16 = vrot.slane %v23360_v28, 3  ;;  %v12742_v23 = vshrl.u32 %v23375_v30, 16  ;;  %v12745_v43 = vshll.u32 %v23375_v30, 16  ;;  %v19608_v21 = vld [vmem:[%s19813_s8 + $0xb8] sm:$0xff]  }
 0xb47   : > { %18631 = vmatpush3.bf16.msra.mxu1 %v19592_v55  ;;  %18596 = vmatprep.subr.bf16.mxu0 %v19736_v11  ;;  %v12725_v46 = vshrl.u32 %v15793_v33, 16  ;;  %v12728_v45 = vshll.u32 %v15793_v33, 16  ;;  %v12735_v4 = vrot.slane %v12733_v2, 2  ;;  %v12738_v9 = vrot.slane %v12736_v63, 3  ;;  %v19604_v60 = vld [vmem:[%s19813_s8] sm:$0xff]   ;;  %v19611_v1 = vld [vmem:[%s19813_s8 + $0xf8] sm:$0xff]  }
 0xb48   : > { %18632 = vmatprep.subr.bf16.mxu1 %v19736_v11  ;;  %v12587_v47 = vrot.slane %v23368_v37, 3  ;;  %v23389_v31 = vld [vmem:[#allocation2 + $0x9c] sm:$0xff]   ;;  %v12744_v54 = vrot.slane %v12742_v23, 2  ;;  %v12747_v0 = vrot.slane %v12745_v43, 3  ;;  %v19609_v3 = vld [vmem:[%s19813_s8 + $0xb0] sm:$0xff]   ;;  %v12590_v15 = vrot.slane %v23375_v30, 3 }
 0xb49   : > { %v12727_v50 = vrot.slane %v12725_v46, 2  ;;  %v12730_v48 = vrot.slane %v12728_v45, 3  ;;  %v12739_v24 = vor.u32 %v12738_v9, %v12735_v4  ;;  %v19613_v59 = vld [vmem:[%s19813_s8 + $0xf0] sm:$0xff]   ;;  %v12751_v49 = vshrl.u32 %v23389_v31, 16  ;;  %v23409_v36 = vld [vmem:[#allocation2 + $0xa4] sm:$0xf] }
 0xb4a   : > { %18597 = vmatpush3.bf16.msra.mxu0 %v19593_v40  ;;  %v12589_v51 = vsel %vm7464_vm7, %v12587_v47, %v12588_v16  ;;  %v12754_v8 = vshll.u32 %v23389_v31, 16  ;;  %v12748_v38 = vor.u32 %v12747_v0, %v12744_v54  ;;  %v12528_v61 = vld [vmem:[#allocation2 + $0xa8] sm:$0x1]  ;;  %v12591_v42 = vsel %vm7464_vm7, %v12588_v16, %v12590_v15  ;;  %v19615_v25 = vld [vmem:[%s19813_s8 + $0xa0] sm:$0xff]   ;;  %v19617_v40 = vld [vmem:[%s19813_s8 + $0x98] sm:$0xff]  }
 0xb4b   : > { %18633 = vmatpush3.bf16.msra.mxu1 %v19594_v57  ;;  %18598 = vmatprep.subr.bf16.mxu0 %v19736_v11  ;;  %v12731_v14 = vor.u32 %v12730_v48, %v12727_v50  ;;  %v19612_v39 = vld [vmem:[%s19813_s8 + $0xa8] sm:$0xff]   ;;  %v12753_v22 = vrot.slane %v12751_v49, 2  ;;  %v23421_v35 = vcombine.low %v23409_v36, %v12528_v61  ;;  %v12592_v5 = vrot.slane %v23389_v31, 3  ;;  %v19618_v34 = vld [vmem:[%s19813_s8 + $0xe0] sm:$0xff]   ;;  %v23443_v12 = vld [vmem:[#allocation2 + $0x90] sm:$0xf] }
 0xb4c   : > { %18634 = vmatprep.subr.bf16.mxu1 %v19736_v11  ;;  %v12749_v19 = vsel %vm7638_vm8, %v12739_v24, %v12748_v38  ;;  %v12756_v20 = vrot.slane %v12754_v8, 3  ;;  %v19616_v7 = vld [vmem:[%s19813_s8 + $0xe8] sm:$0xff]   ;;  %v23445_v10 = vld [vmem:[#allocation2 + $0x94] sm:$0xf]  ;;  %v23448_v33 = vld [vmem:[#allocation2 + $0x98] sm:$0xf] }
 0xb4d   : > { %v12740_v6 = vsel %vm7638_vm8, %v12731_v14, %v12739_v24  ;;  %v12760_v27 = vshrl.u32 %v23421_v35, 16  ;;  %v12763_v52 = vshll.u32 %v23421_v35, 16  ;;  %v12593_v55 = vsel %vm7464_vm7, %v12590_v15, %v12592_v5  ;;  %v13076_v62 = vld [vmem:[#allocation2 + $0x8c] sm:$0x8]  ;;  %v19622_v46 = vld [vmem:[%s19813_s8 + $0xd0] sm:$0xff]  }
 0xb4e   : > { %18599 = vmatpush3.bf16.msra.mxu0 %v19595_v53  ;;  %v12757_v13 = vor.u32 %v12756_v20, %v12753_v22  ;;  %v12594_v57 = vrot.slane %v23421_v35, 3  ;;  %v19620_v53 = vld [vmem:[%s19813_s8 + $0xd8] sm:$0xff]   ;;  %v15843_v45 = vcombine.low %v13076_v62, %v23443_v12  ;;  %v19623_v9 = vld [vmem:[%s19813_s8 + $0x88] sm:$0xff]   ;;  %v12914_v48 = vshrl.u32 %v23368_v37, 16 }
 0xb4f   : > { %18635 = vmatpush3.bf16.msra.mxu1 %v19596_v18  ;;  %18600 = vmatprep.subr.bf16.mxu0 %v19736_v11  ;;  %v19624_v50 = vld [vmem:[%s19813_s8 + $0xc8] sm:$0xff]   ;;  %v12921_v54 = vrot.slane %v12733_v2, 3 }
 0xb50   : > { %18636 = vmatprep.subr.bf16.mxu1 %v19736_v11  ;;  %v12758_v18 = vsel %vm7638_vm8, %v12748_v38, %v12757_v13  ;;  %v13128_v47 = vshrl.u32 %v15843_v45, 16  ;;  %v13131_v16 = vshll.u32 %v15843_v45, 16 }
 0xb52   : > { %18601 = vmatpush3.bf16.msra.mxu0 %v19597_v41  ;;  %v12762_v41 = vrot.slane %v12760_v27, 2  ;;  %v13130_v15 = vrot.slane %v13128_v47, 3 }
 0xb53   : > { %18637 = vmatpush3.bf16.msra.mxu1 %v19598_v26  ;;  %18602 = vmatprep.subr.bf16.mxu0 %v19736_v11  ;;  %v12765_v26 = vrot.slane %v12763_v52, 3 }
 0xb54   : > { %18638 = vmatprep.subr.bf16.mxu1 %v19736_v11 }
 0xb56   : > { %18603 = vmatpush3.bf16.msra.mxu0 %v19599_v44  ;;  %v19621_v44 = vld [vmem:[%s19813_s8 + $0x90] sm:$0xff]  }
 0xb57   : > { %18639 = vmatpush3.bf16.msra.mxu1 %v19600_v56  ;;  %18604 = vmatprep.subr.bf16.mxu0 %v19736_v11  ;;  %v12766_v56 = vor.u32 %v12765_v26, %v12762_v41  ;;  %v19635_v41 = vld [vmem:[%s19813_s8 + $0x170] sm:$0xff]   ;;  %v12893_v26 = vld [vmem:[#allocation2 + $0xa8] sm:$0x3] }
 0xb58   : > { %18640 = vmatprep.subr.bf16.mxu1 %v19736_v11  ;;  %v15818_v45 = vcombine.low %v23409_v36, %v12893_v26 }
 0xb59   : > { %v12767_v4 = vsel %vm7638_vm8, %v12757_v13, %v12766_v56  ;;  %v12926_v13 = vrot.slane %v12745_v43, 4  ;;  %v23515_v43 = vld [vmem:[#allocation2 + $0xb0] sm:$0x3] }
 0xb5a   : > { %18605 = vmatpush3.bf16.msra.mxu0 %v19601_v29  ;;  %v15844_v29 = vcombine.low %v23445_v10, %v23448_v33 }
 0xb5b   : > { %18641 = vmatpush3.bf16.msra.mxu1 %v19602_v32  ;;  %18606 = vmatprep.subr.bf16.mxu0 %v19736_v11  ;;  %v12595_v32 = vsel %vm7464_vm7, %v12592_v5, %v12594_v57  ;;  %v19629_v5 = vld [vmem:[%s19813_s8 + $0x138] sm:$0xff]  }
 0xb5c   : > { %18642 = vmatprep.subr.bf16.mxu1 %v19736_v11  ;;  %v13136_v14 = vshrl.u32 %v15844_v29, 16  ;;  %v13139_v24 = vshll.u32 %v15844_v29, 16 }
 0xb5e   : > { %18607 = vmatpush3.bf16.msra.mxu0 %v19603_v58  ;;  %v12917_v58 = vshll.u32 %v23368_v37, 16  ;;  %v19626_v37 = vld [vmem:[%s19813_s8 + $0xc0] sm:$0xff]   ;;  %v13138_v38 = vrot.slane %v13136_v14, 3  ;;  %v13141_v61 = vrot.slane %v13139_v24, 4  ;;  %v19639_v14 = vld [vmem:[%s19813_s8 + $0x118] sm:$0xff]  }
 0xb5f   : > { %18643 = vmatpush3.bf16.msra.mxu1 %v19604_v60  ;;  %18664 = vmatprep.subr.bf16.mxu0 %v19736_v11  ;;  %v19625_v60 = vld [vmem:[%s19813_s8 + $0x80] sm:$0xff]  }
 0xb60   : > { %18700 = vmatprep.subr.bf16.mxu1 %v19736_v11  ;;  %v13142_v20 = vor.u32 %v13141_v61, %v13138_v38  ;;  %v19645_v38 = vld [vmem:[%s19813_s8 + $0x150] sm:$0xff]  }
 0xb61   : > { %18609 = vmatmul.mubr.bf16.vlgmr.msra.gmra.mxu0 %v12589_v51  ;;  %v23473_v51 = vld [vmem:[#allocation2 + $0xa0] sm:$0xf] }
 0xb62   : > { %18645 = vmatmul.mubr.bf16.vlgmr.msra.gmra.mxu1 %v12740_v6  ;;  %18665 = vmatpush3.bf16.msra.mxu0 %v19608_v21  ;;  %v23471_v21 = vld [vmem:[#allocation2 + $0x9c] sm:$0xf]  ;;  %v12916_v6 = vrot.slane %v12914_v48, 3  ;;  %v19637_v48 = vld [vmem:[%s19813_s8 + $0x120] sm:$0xff]  }
 0xb63   : > { %18666 = vmatprep.subr.bf16.mxu0 %v19736_v11  ;;  %18612 = vmatprep.mubr.msk.bf16.mxu0 %vm19737_vm13, %v19736_v11  ;;  %v15845_v0 = vcombine.low %v23471_v21, %v23473_v51 }
 0xb64   : > { %18648 = vmatprep.mubr.msk.bf16.mxu1 %vm19737_vm13, %v19736_v11  ;;  %18701 = vmatpush3.bf16.msra.mxu1 %v19611_v1  ;;  %v12919_v1 = vrot.slane %v12917_v58, 4 }
 0xb65   : > { %18702 = vmatprep.subr.bf16.mxu1 %v19736_v11 }
 0xb66   : > { %18667 = vmatpush3.bf16.msra.mxu0 %v19609_v3  ;;  %v12922_v3 = vrot.slane %v12736_v63, 4  ;;  %v12920_v28 = vor.u32 %v12919_v1, %v12916_v6  ;;  %v23490_v63 = vld [vmem:[#allocation2 + $0xa4] sm:$0xf]  ;;  %v19643_v1 = vld [vmem:[%s19813_s8 + $0x158] sm:$0xff]  }
 0xb67   : > { %18668 = vmatprep.subr.bf16.mxu0 %v19736_v11 }
 0xb68   : > { %18703 = vmatpush3.bf16.msra.mxu1 %v19613_v59  ;;  %v13133_v59 = vrot.slane %v13131_v16, 4  ;;  %v12923_v2 = vor.u32 %v12922_v3, %v12921_v54  ;;  %v19640_v16 = vld [vmem:[%s19813_s8 + $0x160] sm:$0xff]  }
 0xb69   : > { %18613 = vmatmul.mubr.bf16.gmra.mxu0 %v12591_v42  ;;  %18704 = vmatprep.subr.bf16.mxu1 %v19736_v11  ;;  %v13145_v42 = vshrl.u32 %v15845_v0, 16 }
 0xb6a   : > { %18649 = vmatmul.mubr.bf16.gmra.mxu1 %v12749_v19  ;;  %18669 = vmatpush3.bf16.msra.mxu0 %v19612_v39  ;;  %v13148_v39 = vshll.u32 %v15845_v0, 16  ;;  %v23492_v19 = vld [vmem:[#allocation2 + $0xa8] sm:$0xf]  ;;  %v13134_v22 = vor.u32 %v13133_v59, %v13130_v15  ;;  %v19644_v15 = vld [vmem:[%s19813_s8 + $0x110] sm:$0xff]  }
 0xb6b   : > { %18616 = vmatprep.mubr.msk.bf16.mxu0 %vm19737_vm13, %v19736_v11  ;;  %18652 = vmatprep.mubr.msk.bf16.mxu1 %vm19737_vm13, %v19736_v11  ;;  %v15846_v35 = vcombine.low %v23490_v63, %v23492_v19  ;;  %v13147_v52 = vrot.slane %v13145_v42, 3 }
 0xb6c   : > { %18670 = vmatprep.subr.bf16.mxu0 %v19736_v11  ;;  %18705 = vmatpush3.bf16.msra.mxu1 %v19616_v7  ;;  %v12924_v7 = vsel %vm7893_vm9, %v12920_v28, %v12923_v2  ;;  %v13143_v27 = vsel %vm7893_vm9, %v13134_v22, %v13142_v20  ;;  %v15872_v28 = vcombine.low %v23443_v12, %v23445_v10  ;;  %v19649_v12 = vld [vmem:[%s19813_s8 + $0x140] sm:$0xff]  }
 0xb6d   : > { %18706 = vmatprep.subr.bf16.mxu1 %v19736_v11  ;;  %v15873_v22 = vcombine.low %v23448_v33, %v23471_v21 }
 0xb6e   : > { %18671 = vmatpush3.bf16.msra.mxu0 %v19615_v25  ;;  %v12925_v25 = vrot.slane %v12742_v23, 3  ;;  %v23511_v23 = vld [vmem:[#allocation2 + $0xac] sm:$0xf]  ;;  %v13481_v10 = vshrl.u32 %v15872_v28, 16 }
 0xb6f   : > { %18672 = vmatprep.subr.bf16.mxu0 %v19736_v11 }
 0xb70   : > { %18707 = vmatpush3.bf16.msra.mxu1 %v19618_v34  ;;  %v13150_v34 = vrot.slane %v13148_v39, 4  ;;  %v19646_v39 = vld [vmem:[%s19813_s8 + $0x108] sm:$0xff]  }
 0xb71   : > { %18617 = vmatmul.mubr.bf16.gmra.mxu0 %v12593_v55  ;;  %18708 = vmatprep.subr.bf16.mxu1 %v19736_v11  ;;  %v19630_v55 = vld [vmem:[%s19813_s8 + $0x130] sm:$0xff]  }
 0xb72   : > { %18653 = vmatmul.mubr.bf16.gmra.mxu1 %v12758_v18  ;;  %18673 = vmatpush3.bf16.msra.mxu0 %v19617_v40  ;;  %v19633_v40 = vld [vmem:[%s19813_s8 + $0x178] sm:$0xff]   ;;  %v12927_v18 = vor.u32 %v12926_v13, %v12925_v25  ;;  %v13151_v30 = vor.u32 %v13150_v34, %v13147_v52  ;;  %v15874_v25 = vcombine.low %v23473_v51, %v23490_v63  ;;  %v13492_v52 = vshrl.u32 %v15873_v22, 16 }
 0xb73   : > { %18620 = vmatprep.mubr.msk.bf16.mxu0 %vm19737_vm13, %v19736_v11  ;;  %18656 = vmatprep.mubr.msk.bf16.mxu1 %vm19737_vm13, %v19736_v11  ;;  %v19651_v13 = vld [vmem:[%s19813_s8 + $0x1b8] sm:$0xff]   ;;  %v15875_v63 = vcombine.low %v23492_v19, %v23511_v23  ;;  %v19658_v19 = vld [vmem:[%s19813_s8 + $0x1a0] sm:$0xff]  }
 0xb74   : > { %18674 = vmatprep.subr.bf16.mxu0 %v19736_v11  ;;  %18709 = vmatpush3.bf16.msra.mxu1 %v19620_v53  ;;  %v13157_v53 = vshll.u32 %v15846_v35, 16  ;;  %v12928_v62 = vsel %vm7893_vm9, %v12923_v2, %v12927_v18  ;;  %v13152_v29 = vsel %vm7893_vm9, %v13142_v20, %v13151_v30  ;;  %v19647_v2 = vld [vmem:[%s19813_s8 + $0x148] sm:$0xff]   ;;  %v19648_v20 = vld [vmem:[%s19813_s8 + $0x100] sm:$0xff]   ;;  %v13496_v34 = vshll.u32 %v15874_v25, 16 }
 0xb75   : > { %18710 = vmatprep.subr.bf16.mxu1 %v19736_v11  ;;  %v13500_v26 = vshrl.u32 %v15874_v25, 16 }
 0xb76   : > { %18675 = vmatpush3.bf16.msra.mxu0 %v19621_v44  ;;  %v19634_v44 = vld [vmem:[%s19813_s8 + $0x128] sm:$0xff]   ;;  %v13498_v51 = vrot.slane %v13496_v34, 1 }
 0xb77   : > { %18676 = vmatprep.subr.bf16.mxu0 %v19736_v11 }
 0xb78   : > { %18711 = vmatpush3.bf16.msra.mxu1 %v19622_v46  ;;  %v12930_v46 = vrot.slane %v12754_v8, 4  ;;  %v12937_v8 = vshll.u32 %v15818_v45, 16 }
 0xb79   : > { %18621 = vmatmul.mubr.bf16.gmra.mxu0 %v12595_v32  ;;  %18712 = vmatprep.subr.bf16.mxu1 %v19736_v11 }
 0xb7a   : > { %18657 = vmatmul.mubr.bf16.gmra.mxu1 %v12767_v4  ;;  %18624 = vmatprep.mubr.msk.bf16.mxu0 %vm19737_vm13, %v19736_v11  ;;  %v13159_v4 = vrot.slane %v13157_v53, 4  ;;  %v19656_v53 = vld [vmem:[%s19813_s8 + $0x1f0] sm:$0xff]  }
 0xb7b   : > { %18660 = vmatprep.mubr.msk.bf16.mxu1 %vm19737_vm13, %v19736_v11  ;;  %18677 = vmatpush3.bf16.msra.mxu0 %v19623_v9  ;;  %v15847_v9 = vcombine.low %v23511_v23, %v23515_v43  ;;  %v13502_v23 = vor.u32 %v13500_v26, %v13498_v51 }
 0xb7c   : > { %18713 = vmatpush3.bf16.msra.mxu1 %v19624_v50  ;;  %18678 = vmatprep.subr.bf16.mxu0 %v19736_v11  ;;  %v19638_v50 = vld [vmem:[%s19813_s8 + $0x168] sm:$0xff]  }
 0xb7d   : > { %18714 = vmatprep.subr.bf16.mxu1 %v19736_v11  ;;  %v13163_v58 = vshrl.u32 %v15847_v9, 16  ;;  %v13166_v47 = vshll.u32 %v15847_v9, 16  ;;  %v19663_v9 = vld [vmem:[%s19813_s8 + $0x1d8] sm:$0xff]  }
 0xb7f   : > { %18679 = vmatpush3.bf16.msra.mxu0 %v19625_v60  ;;  %v13165_v54 = vrot.slane %v13163_v58, 3  ;;  %v13168_v0 = vrot.slane %v13166_v47, 4 }
 0xb80   : > { %18715 = vmatpush3.bf16.msra.mxu1 %v19626_v37  ;;  %18736 = vmatprep.subr.bf16.mxu0 %v19736_v11  ;;  %v12939_v37 = vrot.slane %v12937_v8, 4  ;;  %v13654_v8 = vld [vmem:[#allocation2 + $0x9c] sm:$0xf] }
 0xb81   : > { %18625 = vmatmul.mubr.bf16.gmra.mxu0 %v12594_v57  ;;  %18772 = vmatprep.subr.bf16.mxu1 %v19736_v11  ;;  %v13154_v57 = vshrl.u32 %v15846_v35, 16  ;;  %v13169_v59 = vor.u32 %v13168_v0, %v13165_v54  ;;  %v13483_v35 = vshll.u32 %v15872_v28, 16  ;;  %v19670_v54 = vld [vmem:[%s19813_s8 + $0x1c0] sm:$0xff]   ;;  %v13874_v0 = vld [vmem:[#allocation2 + $0x98] sm:$0xe] }
 0xb82   : > { %18661 = vmatmul.mubr.bf16.gmra.mxu1 %v12766_v56  ;;  %18680 = vmatprep.mubr.msk.bf16.mxu0 %vm19737_vm13, %v19736_v11  ;;  %v12929_v56 = vrot.slane %v12751_v49, 3  ;;  %v12934_v49 = vshrl.u32 %v15818_v45, 16  ;;  %v19660_v45 = vld [vmem:[%s19813_s8 + $0x198] sm:$0xff]  }
 0xb83   : > { %18716 = vmatprep.mubr.msk.bf16.mxu1 %vm19737_vm13, %v19736_v11  ;;  %v13156_v32 = vrot.slane %v13154_v57, 3 }
 0xb84   : > { %v12931_v31 = vor.u32 %v12930_v46, %v12929_v56  ;;  %v12936_v24 = vrot.slane %v12934_v49, 3  ;;  %v19662_v56 = vld [vmem:[#allocation2 + $0xb0] ss:$0 sps:$4 sm:$0x77]   ;;  %v19661_v46 = vld [vmem:[%s19813_s8 + $0x1e0] sm:$0xff]  }
 0xb85   : > { %v13160_v36 = vor.u32 %v13159_v4, %v13156_v32  ;;  %v13508_v32 = vshrl.u32 %v15875_v63, 16  ;;  %v13512_v4 = vshll.u32 %v19662_v56, 16  ;;  %v13653_v49 = vld [vmem:[#allocation2 + $0x98] sm:$0xf] }
 0xb86   : > { %v12932_v60 = vsel %vm7893_vm9, %v12927_v18, %v12931_v31  ;;  %v12940_v3 = vor.u32 %v12939_v37, %v12936_v24  ;;  %v19655_v18 = vld [vmem:[%s19813_s8 + $0x1a8] sm:$0xff]   ;;  %v15926_v58 = vcombine.low %v13653_v49, %v13654_v8  ;;  %v23625_v24 = vld [vmem:[#allocation2 + $0xa0] sm:$0xff]  }
 0xb87   : > { %v13161_v6 = vsel %vm7893_vm9, %v13151_v30, %v13160_v36  ;;  %v13170_v42 = vsel %vm7893_vm9, %v13160_v36, %v13169_v59  ;;  %v13504_v30 = vshll.u32 %v15875_v63, 16  ;;  %v19665_v36 = vld [vmem:[%s19813_s8 + $0x1d0] sm:$0xff]  }
 0xb88   : > { %v12941_v61 = vsel %vm7893_vm9, %v12931_v31, %v12940_v3  ;;  %v13514_v31 = vrot.slane %v13512_v4, 1  ;;  %v13704_v37 = vshll.u32 %v15926_v58, 16 }
 0xb89   : > { %18681 = vmatmul.mubr.bf16.vlgmr.msra.gmra.mxu0 %v12924_v7  ;;  %v13485_v7 = vrot.slane %v13483_v35, 1  ;;  %v13713_v35 = vshrl.u32 %v23625_v24, 16 }
 0xb8a   : > { %18717 = vmatmul.mubr.bf16.vlgmr.msra.gmra.mxu1 %v13143_v27  ;;  %18737 = vmatpush3.bf16.msra.mxu0 %v19629_v5  ;;  %v13488_v5 = vshll.u32 %v15873_v22, 16 }
 0xb8b   : > { %18738 = vmatprep.subr.bf16.mxu0 %v19736_v11  ;;  %18684 = vmatprep.mubr.msk.bf16.mxu0 %vm19737_vm13, %v19736_v11  ;;  %v13486_v33 = vor.u32 %v13485_v7, %v13481_v10  ;;  %v19675_v7 = vld [vmem:[%s19813_s8 + $0x230] sm:$0xff]  }
 0xb8c   : > { %18720 = vmatprep.mubr.msk.bf16.mxu1 %vm19737_vm13, %v19736_v11  ;;  %18773 = vmatpush3.bf16.msra.mxu1 %v19633_v40  ;;  %v13490_v21 = vrot.slane %v13488_v5, 1  ;;  %v19652_v40 = vld [vmem:[%s19813_s8 + $0x1b0] sm:$0xff]  }
 0xb8d   : > { %18774 = vmatprep.subr.bf16.mxu1 %v19736_v11 }
 0xb8e   : > { %18739 = vmatpush3.bf16.msra.mxu0 %v19630_v55  ;;  %v13491_v27 = vsel %vm8705_vm10, %v13486_v33, %v13490_v21  ;;  %v19654_v55 = vld [vmem:[%s19813_s8 + $0x1f8] sm:$0xff]   ;;  %v13494_v57 = vor.u32 %v13492_v52, %v13490_v21  ;;  %v23660_v21 = vld [vmem:[#allocation2 + $0xb0] sm:$0xff]  }
 0xb8f   : > { %18740 = vmatprep.subr.bf16.mxu0 %v19736_v11  ;;  %v13725_v34 = vshll.u32 %v23660_v21, 16  ;;  %v13729_v26 = vshrl.u32 %v23660_v21, 16 }
 0xb90   : > { %18775 = vmatpush3.bf16.msra.mxu1 %v19635_v41  ;;  %v13499_v41 = vsel %vm8705_vm10, %v13494_v57, %v13498_v51  ;;  %v19679_v51 = vld [vmem:[%s19813_s8 + $0x220] sm:$0xff]  }
 0xb91   : > { %18685 = vmatmul.mubr.bf16.gmra.mxu0 %v12928_v62  ;;  %18776 = vmatprep.subr.bf16.mxu1 %v19736_v11  ;;  %v19659_v62 = vld [vmem:[%s19813_s8 + $0x1e8] sm:$0xff]   ;;  %v13727_v57 = vrot.slane %v13725_v34, 1 }
 0xb92   : > { %18721 = vmatmul.mubr.bf16.gmra.mxu1 %v13152_v29  ;;  %18741 = vmatpush3.bf16.msra.mxu0 %v19634_v44  ;;  %v13506_v44 = vrot.slane %v13504_v30, 1 }
 0xb93   : > { %18688 = vmatprep.mubr.msk.bf16.mxu0 %vm19737_vm13, %v19736_v11  ;;  %18724 = vmatprep.mubr.msk.bf16.mxu1 %vm19737_vm13, %v19736_v11 }
 0xb94   : > { %18742 = vmatprep.subr.bf16.mxu0 %v19736_v11  ;;  %18777 = vmatpush3.bf16.msra.mxu1 %v19638_v50  ;;  %v13507_v29 = vsel %vm8705_vm10, %v13502_v23, %v13506_v44  ;;  %v19664_v50 = vld [vmem:[%s19813_s8 + $0x190] sm:$0xff]  }
 0xb95   : > { %18778 = vmatprep.subr.bf16.mxu1 %v19736_v11 }
 0xb96   : > { %18743 = vmatpush3.bf16.msra.mxu0 %v19637_v48  ;;  %v13510_v48 = vor.u32 %v13508_v32, %v13506_v44  ;;  %v19682_v44 = vld [vmem:[%s19813_s8 + $0x210] sm:$0xff]   ;;  %v19685_v32 = vld [vmem:[#allocation2 + $0xb8] ss:$0 sps:$4 sm:$0xff]  }
 0xb97   : > { %18744 = vmatprep.subr.bf16.mxu0 %v19736_v11  ;;  %v14081_v49 = vshll.u32 %v19685_v32, 16 }
 0xb98   : > { %18779 = vmatpush3.bf16.msra.mxu1 %v19640_v16  ;;  %v13515_v47 = vsel %vm8705_vm10, %v13510_v48, %v13514_v31  ;;  %v19666_v16 = vld [vmem:[%s19813_s8 + $0x188] sm:$0xff]   ;;  %v19684_v48 = vld [vmem:[%s19813_s8 + $0x200] sm:$0xff]  }
 0xb99   : > { %18689 = vmatmul.mubr.bf16.gmra.mxu0 %v12932_v60  ;;  %18780 = vmatprep.subr.bf16.mxu1 %v19736_v11  ;;  %v19668_v60 = vld [vmem:[%s19813_s8 + $0x1c8] sm:$0xff]  }
 0xb9a   : > { %18725 = vmatmul.mubr.bf16.gmra.mxu1 %v13161_v6  ;;  %18745 = vmatpush3.bf16.msra.mxu0 %v19639_v14  ;;  %v13516_v14 = vshrl.u32 %v19662_v56, 16  ;;  %v19669_v6 = vld [vmem:[%s19813_s8 + $0x180] sm:$0xff]  }
 0xb9b   : > { %18692 = vmatprep.mubr.msk.bf16.mxu0 %vm19737_vm13, %v19736_v11  ;;  %18728 = vmatprep.mubr.msk.bf16.mxu1 %vm19737_vm13, %v19736_v11 }
 0xb9c   : > { %18746 = vmatprep.subr.bf16.mxu0 %v19736_v11  ;;  %18781 = vmatpush3.bf16.msra.mxu1 %v19643_v1  ;;  %v15876_v1 = vcombine.low %v23515_v43, %v23515_v43 }
 0xb9d   : > { %18782 = vmatprep.subr.bf16.mxu1 %v19736_v11 }
 0xb9e   : > { %18747 = vmatpush3.bf16.msra.mxu0 %v19644_v15  ;;  %v13702_v15 = vshrl.u32 %v15926_v58, 16 }
 0xb9f   : > { %18748 = vmatprep.subr.bf16.mxu0 %v19736_v11 }
 0xba0   : > { %18783 = vmatpush3.bf16.msra.mxu1 %v19645_v38  ;;  %v13709_v38 = vshll.u32 %v23625_v24, 16 }
 0xba1   : > { %18693 = vmatmul.mubr.bf16.gmra.mxu0 %v12941_v61  ;;  %18784 = vmatprep.subr.bf16.mxu1 %v19736_v11  ;;  %v23636_v61 = vcombine.low %v13874_v0, %v13654_v8 }
 0xba2   : > { %18729 = vmatmul.mubr.bf16.gmra.mxu1 %v13170_v42  ;;  %18696 = vmatprep.mubr.msk.bf16.mxu0 %vm19737_vm13, %v19736_v11  ;;  %v13711_v42 = vrot.slane %v13709_v38, 1 }
 0xba3   : > { %18732 = vmatprep.mubr.msk.bf16.mxu1 %vm19737_vm13, %v19736_v11  ;;  %18749 = vmatpush3.bf16.msra.mxu0 %v19646_v39  ;;  %v23644_v39 = vld [vmem:[#allocation2 + $0xa8] sm:$0xff]  }
 0xba4   : > { %18785 = vmatpush3.bf16.msra.mxu1 %v19647_v2  ;;  %18750 = vmatprep.subr.bf16.mxu0 %v19736_v11  ;;  %v13895_v2 = vrot.slane %v23625_v24, 1  ;;  %v13715_v5 = vor.u32 %v13713_v35, %v13711_v42  ;;  %v13721_v52 = vshrl.u32 %v23644_v39, 16 }
 0xba5   : > { %18786 = vmatprep.subr.bf16.mxu1 %v19736_v11 }
 0xba7   : > { %18751 = vmatpush3.bf16.msra.mxu0 %v19648_v20  ;;  %v19674_v20 = vld [vmem:[%s19813_s8 + $0x238] sm:$0xff]  }
 0xba8   : > { %18787 = vmatpush3.bf16.msra.mxu1 %v19649_v12  ;;  %18808 = vmatprep.subr.bf16.mxu0 %v19736_v11  ;;  %v13717_v12 = vshll.u32 %v23644_v39, 16 }
 0xba9   : > { %18697 = vmatmul.mubr.bf16.gmra.mxu0 %v12940_v3  ;;  %18844 = vmatprep.subr.bf16.mxu1 %v19736_v11  ;;  %v13518_v3 = vor.u32 %v13516_v14, %v13514_v31  ;;  %v14078_v31 = vshrl.u32 %v19685_v32, 16  ;;  %v14073_v14 = vrot.slane %v13729_v26, 1 }
 0xbaa   : > { %18733 = vmatmul.mubr.bf16.gmra.mxu1 %v13169_v59  ;;  %18752 = vmatprep.mubr.msk.bf16.mxu0 %vm19737_vm13, %v19736_v11  ;;  %v13706_v59 = vrot.slane %v13704_v37, 1  ;;  %v13719_v33 = vrot.slane %v13717_v12, 1 }
 0xbab   : > { %18788 = vmatprep.mubr.msk.bf16.mxu1 %vm19737_vm13, %v19736_v11  ;;  %v14080_v37 = vrot.slane %v14078_v31, 1 }
 0xbac   : > { %v13707_v43 = vor.u32 %v13706_v59, %v13702_v15  ;;  %v14069_v15 = vrot.slane %v13721_v52, 1  ;;  %v14070_v59 = vrot.slane %v13717_v12, 2 }
 0xbb1   : > { %18753 = vmatmul.mubr.bf16.vlgmr.msra.gmra.mxu0 %v15872_v28  ;;  %v13894_v28 = vrot.slane %v23636_v61, 1 }
 0xbb2   : > { %18789 = vmatmul.mubr.bf16.vlgmr.msra.gmra.mxu1 %v13491_v27  ;;  %18809 = vmatpush3.bf16.msra.mxu0 %v19651_v13  ;;  %v13720_v13 = vsel %vm8705_vm10, %v13715_v5, %v13719_v33  ;;  %v19677_v27 = vld [vmem:[%s19813_s8 + $0x228] sm:$0xff]  }
 0xbb3   : > { %18810 = vmatprep.subr.bf16.mxu0 %v19736_v11  ;;  %18756 = vmatprep.mubr.msk.bf16.mxu0 %vm19737_vm13, %v19736_v11  ;;  %v13896_v10 = vsel %vm9278_vm11, %v13894_v28, %v13895_v2 }
 0xbb4   : > { %18792 = vmatprep.mubr.msk.bf16.mxu1 %vm19737_vm13, %v19736_v11  ;;  %18845 = vmatpush3.bf16.msra.mxu1 %v19654_v55 }
 0xbb5   : > { %18846 = vmatprep.subr.bf16.mxu1 %v19736_v11 }
 0xbb6   : > { %18811 = vmatpush3.bf16.msra.mxu0 %v19652_v40  ;;  %v13723_v40 = vor.u32 %v13721_v52, %v13719_v33 }
 0xbb7   : > { %18812 = vmatprep.subr.bf16.mxu0 %v19736_v11 }
 0xbb8   : > { %18847 = vmatpush3.bf16.msra.mxu1 %v19656_v53  ;;  %v13899_v53 = vrot.slane %v23660_v21, 1 }
 0xbb9   : > { %18757 = vmatmul.mubr.bf16.gmra.mxu0 %v15873_v22  ;;  %18848 = vmatprep.subr.bf16.mxu1 %v19736_v11  ;;  %v13712_v22 = vsel %vm8705_vm10, %v13707_v43, %v13711_v42 }
 0xbba   : > { %18793 = vmatmul.mubr.bf16.gmra.mxu1 %v13499_v41  ;;  %18813 = vmatpush3.bf16.msra.mxu0 %v19655_v18  ;;  %v13728_v18 = vsel %vm8705_vm10, %v13723_v40, %v13727_v57  ;;  %v19680_v41 = vld [vmem:[%s19813_s8 + $0x218] sm:$0xff]  }
 0xbbb   : > { %18760 = vmatprep.mubr.msk.bf16.mxu0 %vm19737_vm13, %v19736_v11  ;;  %18796 = vmatprep.mubr.msk.bf16.mxu1 %vm19737_vm13, %v19736_v11 }
 0xbbc   : > { %18814 = vmatprep.subr.bf16.mxu0 %v19736_v11  ;;  %18849 = vmatpush3.bf16.msra.mxu1 %v19659_v62 }
 0xbbd   : > { %18850 = vmatprep.subr.bf16.mxu1 %v19736_v11 }
 0xbbe   : > { %18815 = vmatpush3.bf16.msra.mxu0 %v19658_v19  ;;  %v13731_v19 = vor.u32 %v13729_v26, %v13727_v57 }
 0xbbf   : > { %18816 = vmatprep.subr.bf16.mxu0 %v19736_v11 }
 0xbc0   : > { %18851 = vmatpush3.bf16.msra.mxu1 %v19661_v46 }
 0xbc1   : > { %18761 = vmatmul.mubr.bf16.gmra.mxu0 %v15874_v25  ;;  %18852 = vmatprep.subr.bf16.mxu1 %v19736_v11  ;;  %v13897_v25 = vrot.slane %v23644_v39, 1 }
 0xbc2   : > { %18797 = vmatmul.mubr.bf16.gmra.mxu1 %v13507_v29  ;;  %18817 = vmatpush3.bf16.msra.mxu0 %v19660_v45  ;;  %v19683_v29 = vld [vmem:[%s19813_s8 + $0x208] sm:$0xff]  }
 0xbc3   : > { %18764 = vmatprep.mubr.msk.bf16.mxu0 %vm19737_vm13, %v19736_v11  ;;  %18800 = vmatprep.mubr.msk.bf16.mxu1 %vm19737_vm13, %v19736_v11  ;;  %v13898_v55 = vsel %vm9278_vm11, %v13895_v2, %v13897_v25  ;;  %v13900_v62 = vsel %vm9278_vm11, %v13897_v25, %v13899_v53 }
 0xbc4   : > { %18818 = vmatprep.subr.bf16.mxu0 %v19736_v11  ;;  %18853 = vmatpush3.bf16.msra.mxu1 %v19663_v9  ;;  %v14058_v9 = vshrl.u32 %v23636_v61, 16 }
 0xbc5   : > { %18854 = vmatprep.subr.bf16.mxu1 %v19736_v11 }
 0xbc6   : > { %18819 = vmatpush3.bf16.msra.mxu0 %v19664_v50  ;;  %v14061_v50 = vshll.u32 %v23636_v61, 16  ;;  %v14060_v58 = vrot.slane %v14058_v9, 1  ;;  %v14071_v61 = vor.u32 %v14070_v59, %v14069_v15 }
 0xbc7   : > { %18820 = vmatprep.subr.bf16.mxu0 %v19736_v11 }
 0xbc8   : > { %18855 = vmatpush3.bf16.msra.mxu1 %v19665_v36  ;;  %v14065_v36 = vrot.slane %v13713_v35, 1 }
 0xbc9   : > { %18765 = vmatmul.mubr.bf16.gmra.mxu0 %v15875_v63  ;;  %18856 = vmatprep.subr.bf16.mxu1 %v19736_v11  ;;  %v19681_v63 = vld [vmem:[#allocation2 + $0xb8] ss:$0 sps:$4 sm:$0x77]  }
 0xbca   : > { %18801 = vmatmul.mubr.bf16.gmra.mxu1 %v13515_v47  ;;  %18768 = vmatprep.mubr.msk.bf16.mxu0 %vm19737_vm13, %v19736_v11  ;;  %v13733_v30 = vshll.u32 %v19681_v63, 16  ;;  %v13901_v56 = vrot.slane %v19681_v63, 1  ;;  %v13737_v4 = vshrl.u32 %v19681_v63, 16  ;;  %v14063_v47 = vrot.slane %v14061_v50, 2 }
 0xbcb   : > { %18804 = vmatprep.mubr.msk.bf16.mxu1 %vm19737_vm13, %v19736_v11  ;;  %18821 = vmatpush3.bf16.msra.mxu0 %v19666_v16  ;;  %v14066_v16 = vrot.slane %v13709_v38, 2 }
 0xbcc   : > { %18857 = vmatpush3.bf16.msra.mxu1 %v19668_v60  ;;  %18822 = vmatprep.subr.bf16.mxu0 %v19736_v11  ;;  %v13735_v23 = vrot.slane %v13733_v30, 1  ;;  %v13902_v45 = vsel %vm9278_vm11, %v13899_v53, %v13901_v56  ;;  %v14074_v60 = vrot.slane %v13725_v34, 2 }
 0xbcd   : > { %18858 = vmatprep.subr.bf16.mxu1 %v19736_v11  ;;  %v14067_v0 = vor.u32 %v14066_v16, %v14065_v36 }
 0xbce   : > { %v13736_v46 = vsel %vm8705_vm10, %v13731_v19, %v13735_v23  ;;  %v13739_v8 = vor.u32 %v13737_v4, %v13735_v23  ;;  %v14075_v24 = vor.u32 %v14074_v60, %v14073_v14 }
 0xbcf   : > { %18823 = vmatpush3.bf16.msra.mxu0 %v19669_v6  ;;  %v14083_v6 = vrot.slane %v14081_v49, 2  ;;  %v14072_v43 = vsel %vm9486_vm12, %v14067_v0, %v14071_v61 }
 0xbd0   : > { %18859 = vmatpush3.bf16.msra.mxu1 %v19670_v54  ;;  %18880 = vmatprep.subr.bf16.mxu0 %v19736_v11  ;;  %v14064_v54 = vor.u32 %v14063_v47, %v14060_v58  ;;  %v14076_v42 = vsel %vm9486_vm12, %v14071_v61, %v14075_v24 }
 0xbd1   : > { %18769 = vmatmul.mubr.bf16.gmra.mxu0 %v15876_v1  ;;  %18932 = vmatprep.subr.bf16.mxu1 %v19736_v11  ;;  %v14084_v1 = vor.u32 %v14083_v6, %v14080_v37 }
 0xbd2   : > { %18805 = vmatmul.mubr.bf16.gmra.mxu1 %v13518_v3  ;;  %18824 = vmatprep.mubr.msk.bf16.mxu0 %vm19737_vm13, %v19736_v11  ;;  %v14068_v3 = vsel %vm9486_vm12, %v14064_v54, %v14067_v0 }
 0xbd3   : > { %18860 = vmatprep.mubr.msk.bf16.mxu1 %vm19737_vm13, %v19736_v11  ;;  %v14085_v38 = vsel %vm9486_vm12, %v14075_v24, %v14084_v1 }
 0xbd9   : > { %18825 = vmatmul.mubr.bf16.vlgmr.msra.gmra.mxu0 %v13712_v22 }
 0xbda   : > { %18861 = vmatmul.mubr.bf16.vlgmr.msra.gmra.mxu1 %v13896_v10  ;;  %18881 = vmatpush3.bf16.msra.mxu0 %v19674_v20 }
 0xbdb   : > { %18882 = vmatprep.subr.bf16.mxu0 %v19736_v11  ;;  %18828 = vmatprep.mubr.msk.bf16.mxu0 %vm19737_vm13, %v19736_v11 }
 0xbdc   : > { %18864 = vmatprep.mubr.msk.bf16.mxu1 %vm19737_vm13, %v19736_v11  ;;  %18940 = vmatpush3.bf16.msra.mxu1 %v19674_v20 }
 0xbdd   : > { %18933 = vmatprep.subr.bf16.mxu1 %v19736_v11 }
 0xbde   : > { %18883 = vmatpush3.bf16.msra.mxu0 %v19675_v7 }
 0xbdf   : > { %18884 = vmatprep.subr.bf16.mxu0 %v19736_v11 }
 0xbe0   : > { %18941 = vmatpush3.bf16.msra.mxu1 %v19675_v7 }
 0xbe1   : > { %18829 = vmatmul.mubr.bf16.gmra.mxu0 %v13720_v13  ;;  %18934 = vmatprep.subr.bf16.mxu1 %v19736_v11 }
 0xbe2   : > { %18865 = vmatmul.mubr.bf16.gmra.mxu1 %v13898_v55  ;;  %18885 = vmatpush3.bf16.msra.mxu0 %v19677_v27 }
 0xbe3   : > { %18832 = vmatprep.mubr.msk.bf16.mxu0 %vm19737_vm13, %v19736_v11  ;;  %18868 = vmatprep.mubr.msk.bf16.mxu1 %vm19737_vm13, %v19736_v11 }
 0xbe4   : > { %18886 = vmatprep.subr.bf16.mxu0 %v19736_v11  ;;  %18942 = vmatpush3.bf16.msra.mxu1 %v19677_v27 }
 0xbe5   : > { %18935 = vmatprep.subr.bf16.mxu1 %v19736_v11 }
 0xbe6   : > { %18887 = vmatpush3.bf16.msra.mxu0 %v19679_v51 }
 0xbe7   : > { %18888 = vmatprep.subr.bf16.mxu0 %v19736_v11 }
 0xbe8   : > { %18943 = vmatpush3.bf16.msra.mxu1 %v19679_v51 }
 0xbe9   : > { %18833 = vmatmul.mubr.bf16.gmra.mxu0 %v13728_v18  ;;  %18936 = vmatprep.subr.bf16.mxu1 %v19736_v11 }
 0xbea   : > { %18869 = vmatmul.mubr.bf16.gmra.mxu1 %v13900_v62  ;;  %18889 = vmatpush3.bf16.msra.mxu0 %v19680_v41 }
 0xbeb   : > { %18836 = vmatprep.mubr.msk.bf16.mxu0 %vm19737_vm13, %v19736_v11  ;;  %18872 = vmatprep.mubr.msk.bf16.mxu1 %vm19737_vm13, %v19736_v11 }
 0xbec   : > { %18944 = vmatpush3.bf16.msra.mxu1 %v19680_v41  ;;  %18890 = vmatprep.subr.bf16.mxu0 %v19736_v11 }
 0xbed   : > { %18937 = vmatprep.subr.bf16.mxu1 %v19736_v11 }
 0xbee   : > { %18891 = vmatpush3.bf16.msra.mxu0 %v19682_v44 }
 0xbef   : > { %18892 = vmatprep.subr.bf16.mxu0 %v19736_v11 }
 0xbf0   : > { %18945 = vmatpush3.bf16.msra.mxu1 %v19682_v44 }
 0xbf1   : > { %18837 = vmatmul.mubr.bf16.gmra.mxu0 %v13736_v46  ;;  %18938 = vmatprep.subr.bf16.mxu1 %v19736_v11 }
 0xbf2   : > { %18873 = vmatmul.mubr.bf16.gmra.mxu1 %v13902_v45  ;;  %18840 = vmatprep.mubr.msk.bf16.mxu0 %vm19737_vm13, %v19736_v11 }
 0xbf3   : > { %18876 = vmatprep.mubr.msk.bf16.mxu1 %vm19737_vm13, %v19736_v11  ;;  %18893 = vmatpush3.bf16.msra.mxu0 %v19683_v29 }
 0xbf4   : > { %18946 = vmatpush3.bf16.msra.mxu1 %v19683_v29  ;;  %18894 = vmatprep.subr.bf16.mxu0 %v19736_v11 }
 0xbf5   : > { %18939 = vmatprep.subr.bf16.mxu1 %v19736_v11 }
 0xbf7   : > { %18895 = vmatpush3.bf16.msra.mxu0 %v19684_v48 }
 0xbf8   : > { %18947 = vmatpush3.bf16.msra.mxu1 %v19684_v48 }
 0xbf9   : > { %18841 = vmatmul.mubr.bf16.gmra.mxu0 %v13739_v8 }
 0xbfa   : > { %18877 = vmatmul.mubr.bf16.gmra.mxu1 %v13901_v56  ;;  %18896 = vmatprep.mubr.msk.bf16.mxu0 %vm19737_vm13, %v19736_v11 }
 0xbfb   : > { %18908 = vmatprep.mubr.msk.bf16.mxu1 %vm19737_vm13, %v19736_v11 }
 0xc01   : > { %18897 = vmatmul.mubr.bf16.vlgmr.msra.gmra.mxu0 %v14068_v3 }
 0xc02   : > { %18909 = vmatmul.mubr.bf16.vlgmr.msra.gmra.mxu1 %v14085_v38  ;;  %18900 = vmatprep.mubr.msk.bf16.mxu0 %vm19737_vm13, %v19736_v11 }
 0xc03   : > { %18912 = vmatprep.mubr.msk.bf16.mxu1 %vm19737_vm13, %v19736_v11 }
 0xc09   : > { %18901 = vmatmul.mubr.bf16.gmra.mxu0 %v14072_v43 }
 0xc0a   : > { %18913 = vmatmul.mubr.bf16.gmra.mxu1 %v14084_v1  ;;  %18904 = vmatprep.mubr.msk.bf16.mxu0 %vm19737_vm13, %v19736_v11 }
 0xc11   : > { %18905 = vmatmul.mubr.bf16.gmra.mxu0 %v14076_v42 }
 0xc21   : > { %v12683_v39 = vpop.f32.mrf.mxu0 }
 0xc22   : > { %v12855_v28 = vpop.f32.mrf.mxu1 }
 0xc23   : > { %v12856_v2 = vadd.f32 %v12855_v28, %v12683_v39  ;;  %v18610_v22 = vpop.f32.mrf.mxu0 }
 0xc24   : > { %v18646_v20 = vpop.f32.mrf.mxu1 }
 0xc25   : > { %v12686_v35 = vpop.f32.mrf.mxu0 }
 0xc26   : > { %v12858_v12 = vpop.f32.mrf.mxu1 }
 0xc27   : > { %v12859_v10 = vadd.f32 %v12858_v12, %v12686_v35  ;;  %v18611_v7 = vpop.f32.mrf.mxu0 }
 0xc28   : > { %v18647_v5 = vpop.f32.mrf.mxu1 }
 0xc29   : > { %v12691_v33 = vpop.f32.mrf.mxu0 }
 0xc2a   : > { %v12863_v21 = vpop.f32.mrf.mxu1 }
 0xc2b   : > { %v12864_v25 = vadd.f32 %v12863_v21, %v12691_v33  ;;  %v18614_v13 = vpop.f32.mrf.mxu0 }
 0xc2c   : > { %v18650_v27 = vpop.f32.mrf.mxu1 }
 0xc2d   : > { %v12694_v52 = vpop.f32.mrf.mxu0 }
 0xc2e   : > { %v12866_v11 = vpop.f32.mrf.mxu1 }
 0xc2f   : > { %v12867_v34 = vadd.f32 %v12866_v11, %v12694_v52  ;;  %v18615_v55 = vpop.f32.mrf.mxu0 }
 0xc30   : > { %v18651_v40 = vpop.f32.mrf.mxu1 }
 0xc31   : > { %v12699_v57 = vpop.f32.mrf.mxu0 }
 0xc32   : > { %v12871_v51 = vpop.f32.mrf.mxu1 }
 0xc33   : > { %v12872_v63 = vadd.f32 %v12871_v51, %v12699_v57  ;;  %v18618_v53 = vpop.f32.mrf.mxu0 }
 0xc34   : > { %v18654_v18 = vpop.f32.mrf.mxu1 }
 0xc35   : > { %v12702_v41 = vpop.f32.mrf.mxu0 }
 0xc36   : > { %v12874_v26 = vpop.f32.mrf.mxu1 }
 0xc37   : > { %v12875_v30 = vadd.f32 %v12874_v26, %v12702_v41  ;;  %v18619_v62 = vpop.f32.mrf.mxu0 }
 0xc38   : > { %v18655_v19 = vpop.f32.mrf.mxu1 }
 0xc39   : > { %v12707_v23 = vpop.f32.mrf.mxu0 }
 0xc3a   : > { %v12879_v44 = vpop.f32.mrf.mxu1 }
 0xc3b   : > { %v12880_v56 = vadd.f32 %v12879_v44, %v12707_v23  ;;  %v18622_v46 = vpop.f32.mrf.mxu0 }
 0xc3c   : > { %v18658_v45 = vpop.f32.mrf.mxu1 }
 0xc3d   : > { %v12710_v29 = vpop.f32.mrf.mxu0 }
 0xc3e   : > { %v12882_v32 = vpop.f32.mrf.mxu1 }
 0xc3f   : > { %v12883_v4 = vadd.f32 %v12882_v32, %v12710_v29  ;;  %v18623_v9 = vpop.f32.mrf.mxu0 }
 0xc40   : > { %v18659_v50 = vpop.f32.mrf.mxu1 }
 0xc41   : > { %v12715_v48 = vpop.f32.mrf.mxu0 }
 0xc42   : > { %v12887_v31 = vpop.f32.mrf.mxu1 }
 0xc43   : > { %v12888_v49 = vadd.f32 %v12887_v31, %v12715_v48  ;;  %v18626_v8 = vpop.f32.mrf.mxu0 }
 0xc44   : > { %v18662_v36 = vpop.f32.mrf.mxu1 }
 0xc45   : > { %v12718_v58 = vpop.f32.mrf.mxu0 }
 0xc46   : > { %v12890_v47 = vpop.f32.mrf.mxu1 }
 0xc47   : > { %v18627_v16 = vpop.f32.mrf.mxu0 }
 0xc48   : > { %v18663_v60 = vpop.f32.mrf.mxu1 }
 0xc49   : > { %v13029_v14 = vpop.f32.mrf.mxu0 }
 0xc4a   : > { %v13067_v37 = vadd.f32 %v13029_v14, %v12856_v2  ;;  %v13258_v6 = vpop.f32.mrf.mxu1 }
 0xc4b   : > { %v18682_v54 = vpop.f32.mrf.mxu0 }
 0xc4c   : > { %v13296_v0 = vadd.f32 %v13258_v6, %v13067_v37  ;;  %v18718_v24 = vpop.f32.mrf.mxu1 }
 0xc4d   : > { %v13032_v1 = vpop.f32.mrf.mxu0 }
 0xc4e   : > { %v13068_v3 = vadd.f32 %v13032_v1, %v12859_v10  ;;  %v13261_v15 = vpop.f32.mrf.mxu1 }
 0xc4f   : > { %v18683_v59 = vpop.f32.mrf.mxu0 }
 0xc50   : > { %v13297_v38 = vadd.f32 %v13261_v15, %v13068_v3  ;;  %v18719_v61 = vpop.f32.mrf.mxu1 }
 0xc51   : > { %v13037_v43 = vpop.f32.mrf.mxu0 }
 0xc52   : > { %v13069_v42 = vadd.f32 %v13037_v43, %v12864_v25  ;;  %v13266_v39 = vpop.f32.mrf.mxu1 }
 0xc53   : > { %v18686_v28 = vpop.f32.mrf.mxu0 }
 0xc54   : > { %v13298_v22 = vadd.f32 %v13266_v39, %v13069_v42  ;;  %v18722_v20 = vpop.f32.mrf.mxu1 }
 0xc55   : > { %v13040_v35 = vpop.f32.mrf.mxu0 }
 0xc56   : > { %v13070_v12 = vadd.f32 %v13040_v35, %v12867_v34  ;;  %v13269_v7 = vpop.f32.mrf.mxu1 }
 0xc57   : > { %v18687_v2 = vpop.f32.mrf.mxu0 }
 0xc58   : > { %v13299_v5 = vadd.f32 %v13269_v7, %v13070_v12  ;;  %v18723_v33 = vpop.f32.mrf.mxu1 }
 0xc59   : > { %v13045_v21 = vpop.f32.mrf.mxu0 }
 0xc5a   : > { %v13071_v13 = vadd.f32 %v13045_v21, %v12872_v63  ;;  %v13274_v27 = vpop.f32.mrf.mxu1 }
 0xc5b   : > { %v18690_v10 = vpop.f32.mrf.mxu0 }
 0xc5c   : > { %v13300_v52 = vadd.f32 %v13274_v27, %v13071_v13  ;;  %v18726_v11 = vpop.f32.mrf.mxu1 }
 0xc5d   : > { %v13048_v55 = vpop.f32.mrf.mxu0 }
 0xc5e   : > { %v13072_v40 = vadd.f32 %v13048_v55, %v12875_v30  ;;  %v13277_v57 = vpop.f32.mrf.mxu1 }
 0xc5f   : > { %v18691_v25 = vpop.f32.mrf.mxu0 }
 0xc60   : > { %v13301_v51 = vadd.f32 %v13277_v57, %v13072_v40  ;;  %v18727_v53 = vpop.f32.mrf.mxu1 }
 0xc61   : > { %v13053_v18 = vpop.f32.mrf.mxu0 }
 0xc62   : > { %v13073_v41 = vadd.f32 %v13053_v18, %v12880_v56  ;;  %v13282_v26 = vpop.f32.mrf.mxu1 }
 0xc63   : > { %v18694_v34 = vpop.f32.mrf.mxu0 }
 0xc64   : > { %v13302_v62 = vadd.f32 %v13282_v26, %v13073_v41  ;;  %v18730_v19 = vpop.f32.mrf.mxu1 }
 0xc65   : > { %v13056_v23 = vpop.f32.mrf.mxu0 }
 0xc66   : > { %v13074_v44 = vadd.f32 %v13056_v23, %v12883_v4  ;;  %v13285_v46 = vpop.f32.mrf.mxu1 }
 0xc67   : > { %v18695_v63 = vpop.f32.mrf.mxu0 }
 0xc68   : > { %v13303_v45 = vadd.f32 %v13285_v46, %v13074_v44  ;;  %v18731_v29 = vpop.f32.mrf.mxu1 }
 0xc69   : > { %v13061_v32 = vpop.f32.mrf.mxu0 }
 0xc6a   : > { %v13075_v9 = vadd.f32 %v13061_v32, %v12888_v49  ;;  %v13290_v50 = vpop.f32.mrf.mxu1 }
 0xc6b   : > { %v18698_v30 = vpop.f32.mrf.mxu0 }
 0xc6c   : > { %v23739_v48 = vadd.f32 %v13290_v50, %v13075_v9  ;;  %v18734_v31 = vpop.f32.mrf.mxu1 }
 0xc6d   : > { %v13064_v8 = vpop.f32.mrf.mxu0 }
 0xc6e   : > { %v13293_v36 = vpop.f32.mrf.mxu1 }
 0xc6f   : > { %v18699_v56 = vpop.f32.mrf.mxu0 }
 0xc70   : > { %v18735_v58 = vpop.f32.mrf.mxu1 }
 0xc71   : > { %v13413_v47 = vpop.f32.mrf.mxu0 }
 0xc72   : > { %v13451_v16 = vadd.f32 %v13413_v47, %v13296_v0  ;;  %v13606_v60 = vpop.f32.mrf.mxu1 }
 0xc73   : > { %v18754_v14 = vpop.f32.mrf.mxu0 }
 0xc74   : > { %v23741_v4 = vadd.f32 %v13606_v60, %v13451_v16  ;;  %v18790_v37 = vpop.f32.mrf.mxu1 }
 0xc75   : > { %v13416_v6 = vpop.f32.mrf.mxu0 }
 0xc76   : > { %v13452_v54 = vadd.f32 %v13416_v6, %v13297_v38  ;;  %v13609_v24 = vpop.f32.mrf.mxu1 }
 0xc77   : > { %v18755_v49 = vpop.f32.mrf.mxu0 }
 0xc78   : > { %v23743_v1 = vadd.f32 %v13609_v24, %v13452_v54  ;;  %v18791_v3 = vpop.f32.mrf.mxu1 }
 0xc79   : > { %v13421_v15 = vpop.f32.mrf.mxu0 }
 0xc7a   : > { %v13453_v59 = vadd.f32 %v13421_v15, %v13298_v22  ;;  %v13614_v61 = vpop.f32.mrf.mxu1 }
 0xc7b   : > { %v18758_v43 = vpop.f32.mrf.mxu0 }
 0xc7c   : > { %v23745_v42 = vadd.f32 %v13614_v61, %v13453_v59  ;;  %v18794_v39 = vpop.f32.mrf.mxu1 }
 0xc7d   : > { %v13424_v0 = vpop.f32.mrf.mxu0 }
 0xc7e   : > { %v13454_v28 = vadd.f32 %v13424_v0, %v13299_v5  ;;  %v13617_v20 = vpop.f32.mrf.mxu1 }
 0xc7f   : > { %v18759_v35 = vpop.f32.mrf.mxu0 }
 0xc80   : > { %v23747_v12 = vadd.f32 %v13617_v20, %v13454_v28  ;;  %v18795_v7 = vpop.f32.mrf.mxu1 }
 0xc81   : > { %v13429_v38 = vpop.f32.mrf.mxu0 }
 0xc82   : > { %v13455_v2 = vadd.f32 %v13429_v38, %v13300_v52  ;;  %v13622_v33 = vpop.f32.mrf.mxu1 }
 0xc83   : > { %v18762_v21 = vpop.f32.mrf.mxu0 }
 0xc84   : > { %v23749_v13 = vadd.f32 %v13622_v33, %v13455_v2  ;;  %v18798_v27 = vpop.f32.mrf.mxu1 }
 0xc85   : > { %v13432_v22 = vpop.f32.mrf.mxu0 }
 0xc86   : > { %v13456_v10 = vadd.f32 %v13432_v22, %v13301_v51  ;;  %v13625_v11 = vpop.f32.mrf.mxu1 }
 0xc87   : > { %v18763_v55 = vpop.f32.mrf.mxu0 }
 0xc88   : > { %v23751_v40 = vadd.f32 %v13625_v11, %v13456_v10  ;;  %v18799_v57 = vpop.f32.mrf.mxu1 }
 0xc89   : > { %v13437_v5 = vpop.f32.mrf.mxu0 }
 0xc8a   : > { %v13457_v25 = vadd.f32 %v13437_v5, %v13302_v62  ;;  %v13630_v53 = vpop.f32.mrf.mxu1 }
 0xc8b   : > { %v18766_v18 = vpop.f32.mrf.mxu0 }
 0xc8c   : > { %v13650_v41 = vadd.f32 %v13630_v53, %v13457_v25  ;;  %v18802_v26 = vpop.f32.mrf.mxu1 }
 0xc8d   : > { %v13440_v34 = vpop.f32.mrf.mxu0 }
 0xc8e   : > { %v13458_v52 = vadd.f32 %v13440_v34, %v13303_v45  ;;  %v13633_v19 = vpop.f32.mrf.mxu1 }
 0xc8f   : > { %v18767_v23 = vpop.f32.mrf.mxu0 }
 0xc90   : > { %v13651_v44 = vadd.f32 %v13633_v19, %v13458_v52  ;;  %v18803_v46 = vpop.f32.mrf.mxu1 }
 0xc91   : > { %v13445_v63 = vpop.f32.mrf.mxu0 }
 0xc92   : > { %v13638_v29 = vpop.f32.mrf.mxu1  ;;  %v13459_v26 = vadd.f32 %v13445_v63, %v23739_v48 }
 0xc93   : > { %v18770_v51 = vpop.f32.mrf.mxu0 }
 0xc94   : > { %v18806_v32 = vpop.f32.mrf.mxu1 }
 0xc95   : > { %v13448_v9 = vpop.f32.mrf.mxu0 }
 0xc96   : > { %v13641_v50 = vpop.f32.mrf.mxu1 }
 0xc97   : > { %v18771_v30 = vpop.f32.mrf.mxu0 }
 0xc98   : > { %v18807_v31 = vpop.f32.mrf.mxu1  ;;  %v13652_v30 = vadd.f32 %v13638_v29, %v13459_v26 }
 0xc99   : > { %v13827_v8 = vpop.f32.mrf.mxu0 }
 0xc9a   : > { %v13990_v62 = vpop.f32.mrf.mxu1  ;;  %v13865_v57 = vadd.f32 %v13827_v8, %v23741_v4 }
 0xc9b   : > { %v18826_v36 = vpop.f32.mrf.mxu0 }
 0xc9c   : > { %v18862_v56 = vpop.f32.mrf.mxu1  ;;  %v14028_v52 = vadd.f32 %v13990_v62, %v13865_v57 }
 0xc9d   : > { %v13830_v58 = vpop.f32.mrf.mxu0 }
 0xc9e   : > { %v13993_v47 = vpop.f32.mrf.mxu1  ;;  %v13866_v19 = vadd.f32 %v13830_v58, %v23743_v1 }
 0xc9f   : > { %v18827_v16 = vpop.f32.mrf.mxu0 }
 0xca0   : > { %v18863_v45 = vpop.f32.mrf.mxu1  ;;  %v14029_v4 = vadd.f32 %v13993_v47, %v13866_v19 }
 0xca1   : > { %v13835_v60 = vpop.f32.mrf.mxu0 }
 0xca2   : > { %v13998_v14 = vpop.f32.mrf.mxu1 }
 0xca3   : > { %v18830_v37 = vpop.f32.mrf.mxu0 }
 0xca4   : > { %v18866_v6 = vpop.f32.mrf.mxu1 }
 0xca5   : > { %v13838_v54 = vpop.f32.mrf.mxu0 }
 0xca6   : > { %v23753_v24 = vpop.f32.mrf.mxu1 }
 0xca7   : > { %v18831_v49 = vpop.f32.mrf.mxu0 }
 0xca8   : > { %v18867_v3 = vpop.f32.mrf.mxu1 }
 0xca9   : > { %v23755_v15 = vpop.f32.mrf.mxu0 }
 0xcaa   : > { %v23757_v59 = vpop.f32.mrf.mxu1 }
 0xcab   : > { %v18834_v61 = vpop.f32.mrf.mxu0 }
 0xcac   : > { %v18870_v43 = vpop.f32.mrf.mxu1 }
 0xcad   : > { %v23759_v39 = vpop.f32.mrf.mxu0 }
 0xcae   : > { %v23761_v0 = vpop.f32.mrf.mxu1 }
 0xcaf   : > { %v18835_v28 = vpop.f32.mrf.mxu0 }
 0xcb0   : > { %v18871_v20 = vpop.f32.mrf.mxu1 }
 0xcb1   : > { %v13851_v35 = vpop.f32.mrf.mxu0 }
 0xcb2   : > { %v14014_v7 = vpop.f32.mrf.mxu1  ;;  %v13871_v25 = vadd.f32 %v13851_v35, %v13650_v41  ;;  %v13867_v41 = vadd.f32 %v13835_v60, %v23745_v42  ;;  %v13868_v42 = vadd.f32 %v13838_v54, %v23747_v12  ;;  %v13869_v12 = vadd.f32 %v23755_v15, %v23749_v13 }
 0xcb3   : > { %v18838_v38 = vpop.f32.mrf.mxu0 }
 0xcb4   : > { %v18874_v2 = vpop.f32.mrf.mxu1  ;;  %v14034_v46 = vadd.f32 %v14014_v7, %v13871_v25  ;;  %v14030_v37 = vadd.f32 %v13998_v14, %v13867_v41  ;;  %v14031_v14 = vadd.f32 %v23753_v24, %v13868_v42  ;;  %v14032_v57 = vadd.f32 %v23757_v59, %v13869_v12 }
 0xcb5   : > { %v13854_v33 = vpop.f32.mrf.mxu0  ;;  %v13870_v24 = vadd.f32 %v23759_v39, %v23751_v40 }
 0xcb6   : > { %v14017_v21 = vpop.f32.mrf.mxu1  ;;  %v13872_v51 = vadd.f32 %v13854_v33, %v13651_v44 }
 0xcb7   : > { %v18839_v27 = vpop.f32.mrf.mxu0  ;;  %v14033_v26 = vadd.f32 %v23761_v0, %v13870_v24 }
 0xcb8   : > { %v18875_v22 = vpop.f32.mrf.mxu1  ;;  %v14035_v63 = vadd.f32 %v14017_v21, %v13872_v51 }
 0xcb9   : > { %v13859_v10 = vpop.f32.mrf.mxu0 }
 0xcba   : > { %v14022_v11 = vpop.f32.mrf.mxu1  ;;  %v13873_v62 = vadd.f32 %v13859_v10, %v13652_v30 }
 0xcbb   : > { %v18842_v55 = vpop.f32.mrf.mxu0 }
 0xcbc   : > { %v18878_v5 = vpop.f32.mrf.mxu1  ;;  %v14036_v49 = vadd.f32 %v14022_v11, %v13873_v62 }
 0xcbd   : > { %v13862_v53 = vpop.f32.mrf.mxu0 }
 0xcbe   : > { %v14025_v18 = vpop.f32.mrf.mxu1 }
 0xcbf   : > { %v18843_v34 = vpop.f32.mrf.mxu0 }
 0xcc0   : > { %v18879_v23 = vpop.f32.mrf.mxu1 }
 0xcc1   : > { %v14173_v32 = vpop.f32.mrf.mxu0 }
 0xcc2   : > { %v14211_v9 = vadd.f32 %v14173_v32, %v14028_v52  ;;  %v14197_v50 = vpop.f32.mrf.mxu1 }
 0xcc3   : > { %v14217_v31 = vadd.f32 %v14197_v50, %v14034_v46  ;;  %v18898_v36 = vpop.f32.mrf.mxu0 }
 0xcc4   : > { %v23768_v8 = vadd.f32 %v14211_v9, %v22362_v17  ;;  %v18910_v48 = vpop.f32.mrf.mxu1 }
 0xcc5   : > { %v23771_v1 = vadd.f32 %v14217_v31, %v22362_v17  ;;  %v14176_v56 = vpop.f32.mrf.mxu0 }
 0xcc6   : > { %v14229_v44 = vmax.f32 %v23768_v8, 0.0  ;;  %v14212_v58 = vadd.f32 %v14176_v56, %v14029_v4  ;;  %v14200_v16 = vpop.f32.mrf.mxu1 }
 0xcc7   : > { %v14235_v29 = vmax.f32 %v23771_v1, 0.0  ;;  %v14218_v45 = vadd.f32 %v14200_v16, %v14035_v63  ;;  %v18899_v47 = vpop.f32.mrf.mxu0 }
 0xcc8   : > { %v23777_v60 = vadd.f32 %v14212_v58, %v22362_v17  ;;  %v18911_v6 = vpop.f32.mrf.mxu1 }
 0xcc9   : > { %v23780_v3 = vadd.f32 %v14218_v45, %v22362_v17  ;;  %v14181_v61 = vpop.f32.mrf.mxu0 }
 0xcca   : > { %v14230_v43 = vmax.f32 %v23777_v60, 0.0  ;;  %v14213_v28 = vadd.f32 %v14181_v61, %v14030_v37  ;;  %v14205_v20 = vpop.f32.mrf.mxu1 }
 0xccb   : > { %v14236_v35 = vmax.f32 %v23780_v3, 0.0  ;;  %v14219_v7 = vadd.f32 %v14205_v20, %v14036_v49  ;;  %v18902_v38 = vpop.f32.mrf.mxu0 }
 0xccc   : > { %v14222_v54 = vadd.f32 %v14213_v28, %v22362_v17  ;;  %v18914_v2 = vpop.f32.mrf.mxu1 }
 0xccd   : > { %v23789_v33 = vadd.f32 %v14219_v7, %v22362_v17  ;;  %v14184_v21 = vpop.f32.mrf.mxu0 }
 0xcce   : > { %v14231_v27 = vmax.f32 %v14222_v54, 0.0  ;;  %v14214_v22 = vadd.f32 %v14184_v21, %v14031_v14  ;;  %v14208_v10 = vpop.f32.mrf.mxu1 }
 0xccf   : > { %v14237_v11 = vmax.f32 %v23789_v33, 0.0  ;;  %v18903_v55 = vpop.f32.mrf.mxu0 }
 0xcd0   : > { %v14223_v13 = vadd.f32 %v14214_v22, %v22362_v17  ;;  %v18915_v15 = vpop.f32.mrf.mxu1 }
 0xcd1   : > { %v14189_v5 = vpop.f32.mrf.mxu0 }
 0xcd2   : > { %v14232_v25 = vmax.f32 %v14223_v13, 0.0  ;;  %v14215_v53 = vadd.f32 %v14189_v5, %v14032_v57 }
 0xcd3   : > { %v18906_v18 = vpop.f32.mrf.mxu0 }
 0xcd4   : > { %v14224_v34 = vadd.f32 %v14215_v53, %v22362_v17 }
 0xcd5   : > { %v14192_v52 = vpop.f32.mrf.mxu0 }
 0xcd6   : > { %v14233_v19 = vmax.f32 %v14224_v34, 0.0  ;;  %v14216_v23 = vadd.f32 %v14192_v52, %v14033_v26  ;;  %14240 = sbr.rel (%p15480_p0) target bundleno = 3296 (0xce0), region = 92 }
 0xcd7   : > { %v18907_v46 = vpop.f32.mrf.mxu0 }
 0xcd8   : > { %v14225_v59 = vadd.f32 %v14216_v23, %v22362_v17 }
 0xcda   : > { %v14234_v51 = vmax.f32 %v14225_v59, 0.0 }
 0xcdb   : > { %14241 = vst [vmem:[%s19818_s11 + $0x100] sm:$0xff] %v14229_v44  ;;  %14242 = vst [vmem:[%s19818_s11 + $0x108] sm:$0xff] %v14230_v43 }
 0xcdc   : > { %14243 = vst [vmem:[%s19818_s11 + $0x110] sm:$0xff] %v14231_v27  ;;  %14244 = vst [vmem:[%s19818_s11 + $0x118] sm:$0xff] %v14232_v25 }
 0xcdd   : > { %14245 = vst [vmem:[%s19818_s11 + $0x120] sm:$0xff] %v14233_v19  ;;  %14246 = vst [vmem:[%s19818_s11 + $0x128] sm:$0xff] %v14234_v51 }
 0xcde   : > { %14247 = vst [vmem:[%s19818_s11 + $0x130] sm:$0xff] %v14235_v29  ;;  %14248 = vst [vmem:[%s19818_s11 + $0x138] sm:$0xff] %v14236_v35 }
 0xcdf   : > { %14249 = vst [vmem:[%s19818_s11 + $0x140] sm:$0xf] %v14237_v11 }
 0xce0 PF: > { %14252 = sbr.rel (%p15481_p1) target bundleno = 3448 (0xd78), region = 96 }
 0xce5   : > { %v14255_v17 = vld [vmem:[%s23877_s3 + $0x110] sm:$0xff]  ;;  %v14253_v40 = vld [vmem:[%s23877_s3 + $0x100] sm:$0xff]  ;;  %v19738_v39 = vmov 0   ;;  %v14256_v0 = vld [vmem:[%s23877_s3 + $0x118] sm:$0xff] }
 0xce6   : > { %19687 = vset.pattern.permute.xlu1 %v19738_v39  ;;  %19686 = vset.pattern.permute.xlu0 %v19738_v39  ;;  %v14254_v32 = vld [vmem:[%s23877_s3 + $0x108] sm:$0xff]  ;;  %v14257_v50 = vld [vmem:[%s23877_s3 + $0x120] sm:$0xff]  ;;  %v14260_v30 = vld [vmem:[%s23877_s3 + $0x138] sm:$0xff] }
 0xce7   : > { %14274 = vperm.xlu1 %19687, %v14255_v17   ;;  %14264 = vperm.xlu0 %19686, %v14253_v40   ;;  %v14258_v9 = vld [vmem:[%s23877_s3 + $0x128] sm:$0xff]  ;;  %v14259_v31 = vld [vmem:[%s23877_s3 + $0x130] sm:$0xff]  ;;  %v14261_v36 = vld [vmem:[%s23877_s3 + $0x140] sm:$0xf] }
 0xceb   : > { %14279 = vperm.xlu1 %19687, %v14256_v0   ;;  %14269 = vperm.xlu0 %19686, %v14254_v32  }
 0xcef   : > { %14289 = vperm.xlu1 %19687, %v14258_v9   ;;  %14284 = vperm.xlu0 %19686, %v14257_v50  }
 0xcf3   : > { %14299 = vperm.xlu1 %19687, %v14260_v30   ;;  %14294 = vperm.xlu0 %19686, %v14259_v31  }
 0xcf7   : > { %14304 = vperm.xlu0 %19686, %v14261_v36  }
 0xd62   : > { %v14275_v4 = vpop.permute.xlu1 %14274  ;;  %v14265_v41 = vpop.permute.xlu0 %14264 }
 0xd63   : > { %v14307_v48 = vmul.f32 %v14265_v41, %v14229_v44  ;;  %v14309_v63 = vmul.f32 %v14275_v4, %v14231_v27 }
 0xd65   : > { %v16075_v62 = vpack.c.bf16 %v14307_v48, %v14307_v48 }
 0xd66   : > { %v14280_v56 = vpop.permute.xlu1 %14279  ;;  %v14270_v58 = vpop.permute.xlu0 %14269 }
 0xd67   : > { %14354 = vst [vmem:[#allocation2 + $0x154] sm:$0xf] %v16075_v62  ;;  %v14308_v16 = vmul.f32 %v14270_v58, %v14230_v43  ;;  %v14310_v42 = vmul.f32 %v14280_v56, %v14232_v25 }
 0xd69   : > { %v16257_v45 = vpack.c.bf16 %v14309_v63, %v14308_v16 }
 0xd6a   : > { %v14290_v47 = vpop.permute.xlu1 %14289  ;;  %v14285_v37 = vpop.permute.xlu0 %14284 }
 0xd6b   : > { %16303 = vst [vmem:[#allocation2 + $0x158] sm:$0xff] %v16257_v45   ;;  %v14311_v6 = vmul.f32 %v14285_v37, %v14233_v19  ;;  %v14312_v20 = vmul.f32 %v14290_v47, %v14234_v51 }
 0xd6d   : > { %v16262_v49 = vpack.c.bf16 %v14311_v6, %v14310_v42 }
 0xd6e   : > { %v14300_v61 = vpop.permute.xlu1 %14299  ;;  %v14295_v28 = vpop.permute.xlu0 %14294 }
 0xd6f   : > { %16304 = vst [vmem:[#allocation2 + $0x160] sm:$0xff] %v16262_v49   ;;  %v14314_v8 = vmul.f32 %v14300_v61, %v14236_v35  ;;  %v14313_v44 = vmul.f32 %v14295_v28, %v14235_v29 }
 0xd71   : > { %v16082_v7 = vpack.c.bf16 %v14314_v8, %v14314_v8  ;;  %v16267_v60 = vpack.c.bf16 %v14313_v44, %v14312_v20 }
 0xd72   : > { %v14305_v43 = vpop.permute.xlu0 %14304 }
 0xd73   : > { %14361 = vst [vmem:[#allocation2 + $0x170] sm:$0xf] %v16082_v7  ;;  %16305 = vst [vmem:[#allocation2 + $0x168] sm:$0xff] %v16267_v60   ;;  %v14315_v38 = vmul.f32 %v14305_v43, %v14237_v11 }
 0xd75   : > { %v16083_v14 = vpack.c.bf16 %v14315_v38, %v14315_v38 }
 0xd77   : > { %14362 = vst [vmem:[#allocation2 + $0x174] sm:$0x3] %v16083_v14 }
 0xd78 PF: > { %s14_s19 = sadd.s32 1, %s19726_s19   ;;  %s23974_s15 = smov %s19718_s17 }
 0xd79   : > { %p11_p2 = scmp.ge.s32.totalorder %s14_s19, 6   ;;  %s23975_s16 = smov %s19722_s18 }
 0xd7a   : > { %s23976_s17 = smov %s23979_s20  ;;  %s23977_s18 = smov %s23983_s21 }
 0xd7b   :  { %13 = sbr.rel (!%p11_p2) target bundleno = 3 (0x3), region = 153 }

</bundles_post_ra>
